<compile_context>
chip_gen: v6e
topology: v6e:2x2x1
jax: 0.10.0
libtpu: 0.0.40
codegen_flags: <defaults>
</compile_context>

<pallas_src>
import math
from functools import partial

import jax
import jax.numpy as jnp
from jax import lax
from jax.experimental import pallas as pl
from jax.experimental.pallas import tpu as pltpu

F32 = jnp.float32
BF16 = jnp.bfloat16


# ----------------------------------------------------------------------------
# Fused AttentionBlock kernel (one batch element per grid step)
# ----------------------------------------------------------------------------
def _attention_block_kernel(x_ref, gamma_ref, beta_ref, mgc_ref, mcg_ref,
                            wqkv_ref, bqkv_ref, wo_ref, bo_ref, o_ref,
                            oh_scratch, *, n_heads, dim_head, n_groups, eps):
    x = x_ref[0]                                   # (C, N) f32
    C, N = x.shape
    hd = n_heads * dim_head
    inv_cnt = 1.0 / float(N * (C // n_groups))

    # ---------------- GroupNorm (f32 statistics) ----------------
    mgc = mgc_ref[...]                             # (G, C) one-hot channel->group
    mcg = mcg_ref[...]                             # (C, G)
    gsum = jnp.dot(mgc, x, preferred_element_type=jnp.float32)        # (G, N)
    gsq = jnp.dot(mgc, x * x, preferred_element_type=jnp.float32)     # (G, N)
    mean_g = jnp.sum(gsum, axis=1, keepdims=True) * inv_cnt           # (G, 1)
    ex2_g = jnp.sum(gsq, axis=1, keepdims=True) * inv_cnt             # (G, 1)
    var_g = ex2_g - mean_g * mean_g               # biased variance (PyTorch GN)
    inv_g = lax.rsqrt(var_g + eps)                                     # (G, 1)

    # Broadcast group stats to per-channel (C,1) vectors with tiny masked sums
    # (no (C,G)@(G,N) matmuls, no (C,N) temporaries).
    mean_c = sum(mcg[:, g:g + 1] * mean_g[g:g + 1, :] for g in range(n_groups))
    inv_c = sum(mcg[:, g:g + 1] * inv_g[g:g + 1, :] for g in range(n_groups))
    scale_c = inv_c * gamma_ref[...]                                   # (C, 1)
    shift_c = beta_ref[...] - mean_c * scale_c                         # (C, 1)
    h = x * scale_c + shift_c                      # (C, N): one mul + one add

    # ---------------- qkv projection (bf16 MXU, f32 accumulate) ----------------
    # NOTE: 1/sqrt(dim_head) is already folded into the Q rows of wqkv/bqkv.
    hb = h.astype(BF16)
    qkv = jnp.dot(wqkv_ref[...], hb,
                  preferred_element_type=jnp.float32) + bqkv_ref[...]  # (3*hd, N)

    # ---------------- per-head attention into a (hd, N) bf16 scratch ----------
    for hh in range(n_heads):
        q0 = hh * dim_head
        qh = qkv[q0:q0 + dim_head, :].astype(BF16)                     # (dh, N)
        kh = qkv[hd + q0:hd + q0 + dim_head, :].astype(BF16)           # (dh, N)
        vh = qkv[2 * hd + q0:2 * hd + q0 + dim_head, :].astype(BF16)   # (dh, N)

        # scores in (key, query) orientation: s[j, i] = sum_d k[d, j] * q[d, i]
        s = lax.dot_general(kh, qh, (((0,), (0,)), ((), ())),
                            preferred_element_type=jnp.float32)        # (N, N)
        m_row = jnp.max(s, axis=0, keepdims=True)                      # (1, N)
        e = jnp.exp(s - m_row)                                         # (N, N) f32
        denom = jnp.sum(e, axis=0, keepdims=True)                      # (1, N) f32

        # PV: plain (dh, N_keys) @ (N_keys, N_queries) matmul on bf16 e.
        oh = jnp.dot(vh, e.astype(BF16),
                     preferred_element_type=jnp.float32)               # (dh, N)
        # normalize the small head output instead of the (N, N) matrix
        oh = oh * pl.reciprocal(denom, approx=True)
        oh_scratch[q0:q0 + dim_head, :] = oh.astype(BF16)

    # ------------- fused output projection (single K = hd matmul) -------------
    proj = jnp.dot(wo_ref[...], oh_scratch[...],
                   preferred_element_type=jnp.float32)                 # (C, N)
    o_ref[0] = x + bo_ref[...] + proj


def attention_block(x_nchw, p, n_heads=4, dim_head=32, n_groups=8, eps=1e-5):
    """Pallas forward of AttentionBlock.  x_nchw: (B, C, H, W) f32."""
    B, C, H, W = x_nchw.shape
    assert C % n_groups == 0
    N = H * W
    dh = dim_head
    hd = n_heads * dh
    scale = dh ** (-0.5)

    # --- host-side weight re-layout (tiny, done once under jit) ---------------
    # torch to_qkv rows are [head0:(q,k,v), head1:(q,k,v), ...]; regroup to
    # row blocks [Q_heads | K_heads | V_heads] so the kernel slices sublanes.
    wqkv = p['qkv_w'].reshape(n_heads, 3, dh, C).transpose(1, 0, 2, 3).reshape(3 * hd, C)
    bqkv = p['qkv_b'].reshape(n_heads, 3, dh).transpose(1, 0, 2).reshape(3 * hd, 1)
    # fold the softmax scale into Q (rows [0:hd]) — removes the (N,N) scale pass
    wqkv = wqkv.at[:hd].multiply(scale)
    bqkv = bqkv.at[:hd].multiply(scale)
    wo = p['out_w']                               # (C, hd), used whole (fused proj)
    bo = p['out_b'].reshape(C, 1)
    gamma = p['norm_g'].reshape(C, 1)
    beta = p['norm_b'].reshape(C, 1)

    # one-hot channel<->group masks for the GroupNorm reductions / broadcast
    ch = jnp.arange(C, dtype=jnp.int32)
    grp = jnp.arange(n_groups, dtype=jnp.int32)
    mgc = (ch[None, :] // (C // n_groups) == grp[:, None]).astype(F32)   # (G, C)
    mcg = mgc.T                                                          # (C, G)

    xf = x_nchw.reshape(B, C, N).astype(F32)

    kern = partial(_attention_block_kernel, n_heads=n_heads, dim_head=dh,
                   n_groups=n_groups, eps=eps)
    out = pl.pallas_call(
        kern,
        out_shape=jax.ShapeDtypeStruct((B, C, N), F32),
        grid=(B,),
        in_specs=[
            pl.BlockSpec((1, C, N), lambda b: (b, 0, 0)),        # x
            pl.BlockSpec((C, 1), lambda b: (0, 0)),              # gamma
            pl.BlockSpec((C, 1), lambda b: (0, 0)),              # beta
            pl.BlockSpec((n_groups, C), lambda b: (0, 0)),       # mask (G, C)
            pl.BlockSpec((C, n_groups), lambda b: (0, 0)),       # mask (C, G)
            pl.BlockSpec((3 * hd, C), lambda b: (0, 0)),         # wqkv (bf16)
            pl.BlockSpec((3 * hd, 1), lambda b: (0, 0)),         # bqkv
            pl.BlockSpec((C, hd), lambda b: (0, 0)),             # wo (bf16, whole)
            pl.BlockSpec((C, 1), lambda b: (0, 0)),              # bo
        ],
        out_specs=pl.BlockSpec((1, C, N), lambda b: (b, 0, 0)),
        scratch_shapes=[pltpu.VMEM((hd, N), BF16)],              # concat'd head outs
        compiler_params=pltpu.CompilerParams(dimension_semantics=("parallel",)),
    )(xf, gamma, beta, mgc, mcg,
      wqkv.astype(BF16), bqkv.astype(F32),
      wo.astype(BF16), bo.astype(F32))
    return out.reshape(B, C, H, W)


# ----------------------------------------------------------------------------
# Pure-JAX reference mirroring the PyTorch module (f32 everywhere)
# ----------------------------------------------------------------------------
def attention_block_ref(x, p, n_heads=4, dim_head=32, n_groups=8, eps=1e-5):
    B, C, H, W = x.shape
    N = H * W
    xg = x.reshape(B, n_groups, (C // n_groups) * N)
    mean = jnp.mean(xg, axis=-1, keepdims=True)
    var = jnp.mean((xg - mean) ** 2, axis=-1, keepdims=True)
    hn = (xg - mean) / jnp.sqrt(var + eps)
    hn = hn.reshape(B, C, N) * p['norm_g'][None, :, None] + p['norm_b'][None, :, None]
    h = jnp.transpose(hn, (0, 2, 1))                                    # (B, N, C)
    qkv = h @ p['qkv_w'].T + p['qkv_b']                                 # (B, N, 3*hd)
    qkv = qkv.reshape(B, N, n_heads, 3 * dim_head)
    q = qkv[..., :dim_head]
    k = qkv[..., dim_head:2 * dim_head]
    v = qkv[..., 2 * dim_head:]
    attn = jnp.einsum('bihd,bjhd->bijh', q, k) * (dim_head ** (-0.5))
    attn = jax.nn.softmax(attn, axis=2)
    out = jnp.einsum('bijh,bjhd->bihd', attn, v)
    out = out.reshape(B, N, n_heads * dim_head)
    out = out @ p['out_w'].T + p['out_b']
    out = jnp.transpose(out, (0, 2, 1)).reshape(B, C, H, W)
    return out + x


# ----------------------------------------------------------------------------
# Deterministic synthetic parameters (PyTorch tensor layouts)
# ----------------------------------------------------------------------------
def make_params(key, in_dim, n_heads=4, dim_head=32):
    k1, k2, k3, k4, k5, k6 = jax.random.split(key, 6)
    hd = n_heads * dim_head
    return {
        'norm_g': 1.0 + 0.1 * jax.random.normal(k1, (in_dim,), F32),
        'norm_b': 0.1 * jax.random.normal(k2, (in_dim,), F32),
        'qkv_w': jax.random.normal(k3, (3 * hd, in_dim), F32) / math.sqrt(in_dim),
        'qkv_b': 0.02 * jax.random.normal(k4, (3 * hd,), F32),
        'out_w': jax.random.normal(k5, (in_dim, hd), F32) / math.sqrt(hd),
        'out_b': 0.02 * jax.random.normal(k6, (in_dim,), F32),
    }


# ----------------------------------------------------------------------------
if __name__ == "__main__":
    key = jax.random.PRNGKey(0)
    kp, kx = jax.random.split(key)

    # Small shapes consistent with the module: attention at 16x16 resolution.
    B, C, H, W = 2, 64, 16, 16
    n_heads, dim_head, n_groups = 4, 32, 8

    params = make_params(kp, C, n_heads, dim_head)
    x = jax.random.normal(kx, (B, C, H, W), F32)

    fwd = jax.jit(lambda xx: attention_block(xx, params, n_heads, dim_head, n_groups))
    out = fwd(x)
    jax.block_until_ready(out)

    ref = attention_block_ref(x, params, n_heads, dim_head, n_groups)
    err = float(jnp.max(jnp.abs(out - ref)))

    assert out.shape == (B, C, H, W), out.shape
    assert bool(jnp.all(jnp.isfinite(out)))
    # bf16 MXU operands with f32 accumulation: small tolerance vs. f32 reference.
    assert err < 0.15, f"max abs error vs reference too large: {err}"
    print("KERNEL_OK")
</pallas_src>

<mosaic_0001>
module attributes {stable_mosaic.version = 11 : i64} {
  func.func @_attention_block_kernel(%arg0: i32, %arg1: memref<1x64x256xf32, #tpu.memory_space<vmem>>, %arg2: memref<64x1xf32, #tpu.memory_space<vmem>>, %arg3: memref<64x1xf32, #tpu.memory_space<vmem>>, %arg4: memref<8x64xf32, #tpu.memory_space<vmem>>, %arg5: memref<64x8xf32, #tpu.memory_space<vmem>>, %arg6: memref<384x64xbf16, #tpu.memory_space<vmem>>, %arg7: memref<384x1xf32, #tpu.memory_space<vmem>>, %arg8: memref<64x128xbf16, #tpu.memory_space<vmem>>, %arg9: memref<64x1xf32, #tpu.memory_space<vmem>>, %arg10: memref<1x64x256xf32, #tpu.memory_space<vmem>>, %arg11: memref<128x256xbf16, #tpu.memory_space<vmem>>) attributes {dimension_semantics = [#tpu.dimension_semantics<parallel>], iteration_bounds = array<i64: 2>, scalar_prefetch = 0 : i64, scratch_operands = 1 : i64, tpu.core_type = #tpu.core_type<tc>, window_params = [{transform_indices = @transform_0, window_bounds = array<i64: 1, 64, 256>}, {pipeline_mode = #tpu.pipeline_mode<synchronous>, transform_indices = @transform_1, window_bounds = array<i64: 64, 1>}, {pipeline_mode = #tpu.pipeline_mode<synchronous>, transform_indices = @transform_2, window_bounds = array<i64: 64, 1>}, {pipeline_mode = #tpu.pipeline_mode<synchronous>, transform_indices = @transform_3, window_bounds = array<i64: 8, 64>}, {pipeline_mode = #tpu.pipeline_mode<synchronous>, transform_indices = @transform_4, window_bounds = array<i64: 64, 8>}, {pipeline_mode = #tpu.pipeline_mode<synchronous>, transform_indices = @transform_5, window_bounds = array<i64: 384, 64>}, {pipeline_mode = #tpu.pipeline_mode<synchronous>, transform_indices = @transform_6, window_bounds = array<i64: 384, 1>}, {pipeline_mode = #tpu.pipeline_mode<synchronous>, transform_indices = @transform_7, window_bounds = array<i64: 64, 128>}, {pipeline_mode = #tpu.pipeline_mode<synchronous>, transform_indices = @transform_8, window_bounds = array<i64: 64, 1>}, {transform_indices = @transform_9, window_bounds = array<i64: 1, 64, 256>}]} {
    %c0 = arith.constant 0 : index
    %c0_0 = arith.constant 0 : index
    %c0_1 = arith.constant 0 : index
    %0 = vector.load %arg1[%c0, %c0_0, %c0_1] : memref<1x64x256xf32, #tpu.memory_space<vmem>>, vector<1x64x256xf32>
    %1 = vector.shape_cast %0 : vector<1x64x256xf32> to vector<64x256xf32>
    %c0_2 = arith.constant 0 : index
    %c0_3 = arith.constant 0 : index
    %2 = vector.load %arg4[%c0_2, %c0_3] : memref<8x64xf32, #tpu.memory_space<vmem>>, vector<8x64xf32>
    %c0_4 = arith.constant 0 : index
    %c0_5 = arith.constant 0 : index
    %3 = vector.load %arg5[%c0_4, %c0_5] : memref<64x8xf32, #tpu.memory_space<vmem>>, vector<64x8xf32>
    %cst = arith.constant dense<0.000000e+00> : vector<8x256xf32>
    %4 = tpu.matmul %2, %1, %cst {dimension_numbers = #tpu.dot_dimension_numbers<[1], [0], [0], [1], [0, 0, 1, 1], [], []>} : vector<8x64xf32>, vector<64x256xf32>, vector<8x256xf32> -> vector<8x256xf32>
    %5 = arith.mulf %1, %1 : vector<64x256xf32>
    %cst_6 = arith.constant dense<0.000000e+00> : vector<8x256xf32>
    %6 = tpu.matmul %2, %5, %cst_6 {dimension_numbers = #tpu.dot_dimension_numbers<[1], [0], [0], [1], [0, 0, 1, 1], [], []>} : vector<8x64xf32>, vector<64x256xf32>, vector<8x256xf32> -> vector<8x256xf32>
    %cst_7 = arith.constant dense<0.000000e+00> : vector<8xf32>
    %7 = vector.multi_reduction <add>, %4, %cst_7 [1] : vector<8x256xf32> to vector<8xf32>
    %8 = vector.shape_cast %7 : vector<8xf32> to vector<8x1xf32>
    %cst_8 = arith.constant 4.8828125E-4 : f32
    %9 = vector.broadcast %cst_8 : f32 to vector<8x1xf32>
    %10 = arith.mulf %8, %9 : vector<8x1xf32>
    %cst_9 = arith.constant dense<0.000000e+00> : vector<8xf32>
    %11 = vector.multi_reduction <add>, %6, %cst_9 [1] : vector<8x256xf32> to vector<8xf32>
    %12 = vector.shape_cast %11 : vector<8xf32> to vector<8x1xf32>
    %cst_10 = arith.constant 4.8828125E-4 : f32
    %13 = vector.broadcast %cst_10 : f32 to vector<8x1xf32>
    %14 = arith.mulf %12, %13 : vector<8x1xf32>
    %15 = arith.mulf %10, %10 : vector<8x1xf32>
    %16 = arith.subf %14, %15 : vector<8x1xf32>
    %cst_11 = arith.constant 9.99999974E-6 : f32
    %17 = vector.broadcast %cst_11 : f32 to vector<8x1xf32>
    %18 = arith.addf %16, %17 : vector<8x1xf32>
    %19 = math.rsqrt %18 : vector<8x1xf32>
    %20 = vector.extract_strided_slice %3 {offsets = [0, 0], sizes = [64, 1], strides = [1, 1]} : vector<64x8xf32> to vector<64x1xf32>
    %21 = vector.extract_strided_slice %10 {offsets = [0, 0], sizes = [1, 1], strides = [1, 1]} : vector<8x1xf32> to vector<1x1xf32>
    %22 = vector.broadcast %21 : vector<1x1xf32> to vector<64x1xf32>
    %23 = arith.mulf %20, %22 : vector<64x1xf32>
    %cst_12 = arith.constant 0.000000e+00 : f32
    %24 = vector.broadcast %cst_12 : f32 to vector<64x1xf32>
    %25 = arith.addf %24, %23 : vector<64x1xf32>
    %26 = vector.extract_strided_slice %3 {offsets = [0, 1], sizes = [64, 1], strides = [1, 1]} : vector<64x8xf32> to vector<64x1xf32>
    %27 = vector.extract_strided_slice %10 {offsets = [1, 0], sizes = [1, 1], strides = [1, 1]} : vector<8x1xf32> to vector<1x1xf32>
    %28 = vector.broadcast %27 : vector<1x1xf32> to vector<64x1xf32>
    %29 = arith.mulf %26, %28 : vector<64x1xf32>
    %30 = arith.addf %25, %29 : vector<64x1xf32>
    %31 = vector.extract_strided_slice %3 {offsets = [0, 2], sizes = [64, 1], strides = [1, 1]} : vector<64x8xf32> to vector<64x1xf32>
    %32 = vector.extract_strided_slice %10 {offsets = [2, 0], sizes = [1, 1], strides = [1, 1]} : vector<8x1xf32> to vector<1x1xf32>
    %33 = vector.broadcast %32 : vector<1x1xf32> to vector<64x1xf32>
    %34 = arith.mulf %31, %33 : vector<64x1xf32>
    %35 = arith.addf %30, %34 : vector<64x1xf32>
    %36 = vector.extract_strided_slice %3 {offsets = [0, 3], sizes = [64, 1], strides = [1, 1]} : vector<64x8xf32> to vector<64x1xf32>
    %37 = vector.extract_strided_slice %10 {offsets = [3, 0], sizes = [1, 1], strides = [1, 1]} : vector<8x1xf32> to vector<1x1xf32>
    %38 = vector.broadcast %37 : vector<1x1xf32> to vector<64x1xf32>
    %39 = arith.mulf %36, %38 : vector<64x1xf32>
    %40 = arith.addf %35, %39 : vector<64x1xf32>
    %41 = vector.extract_strided_slice %3 {offsets = [0, 4], sizes = [64, 1], strides = [1, 1]} : vector<64x8xf32> to vector<64x1xf32>
    %42 = vector.extract_strided_slice %10 {offsets = [4, 0], sizes = [1, 1], strides = [1, 1]} : vector<8x1xf32> to vector<1x1xf32>
    %43 = vector.broadcast %42 : vector<1x1xf32> to vector<64x1xf32>
    %44 = arith.mulf %41, %43 : vector<64x1xf32>
    %45 = arith.addf %40, %44 : vector<64x1xf32>
    %46 = vector.extract_strided_slice %3 {offsets = [0, 5], sizes = [64, 1], strides = [1, 1]} : vector<64x8xf32> to vector<64x1xf32>
    %47 = vector.extract_strided_slice %10 {offsets = [5, 0], sizes = [1, 1], strides = [1, 1]} : vector<8x1xf32> to vector<1x1xf32>
    %48 = vector.broadcast %47 : vector<1x1xf32> to vector<64x1xf32>
    %49 = arith.mulf %46, %48 : vector<64x1xf32>
    %50 = arith.addf %45, %49 : vector<64x1xf32>
    %51 = vector.extract_strided_slice %3 {offsets = [0, 6], sizes = [64, 1], strides = [1, 1]} : vector<64x8xf32> to vector<64x1xf32>
    %52 = vector.extract_strided_slice %10 {offsets = [6, 0], sizes = [1, 1], strides = [1, 1]} : vector<8x1xf32> to vector<1x1xf32>
    %53 = vector.broadcast %52 : vector<1x1xf32> to vector<64x1xf32>
    %54 = arith.mulf %51, %53 : vector<64x1xf32>
    %55 = arith.addf %50, %54 : vector<64x1xf32>
    %56 = vector.extract_strided_slice %3 {offsets = [0, 7], sizes = [64, 1], strides = [1, 1]} : vector<64x8xf32> to vector<64x1xf32>
    %57 = vector.extract_strided_slice %10 {offsets = [7, 0], sizes = [1, 1], strides = [1, 1]} : vector<8x1xf32> to vector<1x1xf32>
    %58 = vector.broadcast %57 : vector<1x1xf32> to vector<64x1xf32>
    %59 = arith.mulf %56, %58 : vector<64x1xf32>
    %60 = arith.addf %55, %59 : vector<64x1xf32>
    %61 = vector.extract_strided_slice %3 {offsets = [0, 0], sizes = [64, 1], strides = [1, 1]} : vector<64x8xf32> to vector<64x1xf32>
    %62 = vector.extract_strided_slice %19 {offsets = [0, 0], sizes = [1, 1], strides = [1, 1]} : vector<8x1xf32> to vector<1x1xf32>
    %63 = vector.broadcast %62 : vector<1x1xf32> to vector<64x1xf32>
    %64 = arith.mulf %61, %63 : vector<64x1xf32>
    %cst_13 = arith.constant 0.000000e+00 : f32
    %65 = vector.broadcast %cst_13 : f32 to vector<64x1xf32>
    %66 = arith.addf %65, %64 : vector<64x1xf32>
    %67 = vector.extract_strided_slice %3 {offsets = [0, 1], sizes = [64, 1], strides = [1, 1]} : vector<64x8xf32> to vector<64x1xf32>
    %68 = vector.extract_strided_slice %19 {offsets = [1, 0], sizes = [1, 1], strides = [1, 1]} : vector<8x1xf32> to vector<1x1xf32>
    %69 = vector.broadcast %68 : vector<1x1xf32> to vector<64x1xf32>
    %70 = arith.mulf %67, %69 : vector<64x1xf32>
    %71 = arith.addf %66, %70 : vector<64x1xf32>
    %72 = vector.extract_strided_slice %3 {offsets = [0, 2], sizes = [64, 1], strides = [1, 1]} : vector<64x8xf32> to vector<64x1xf32>
    %73 = vector.extract_strided_slice %19 {offsets = [2, 0], sizes = [1, 1], strides = [1, 1]} : vector<8x1xf32> to vector<1x1xf32>
    %74 = vector.broadcast %73 : vector<1x1xf32> to vector<64x1xf32>
    %75 = arith.mulf %72, %74 : vector<64x1xf32>
    %76 = arith.addf %71, %75 : vector<64x1xf32>
    %77 = vector.extract_strided_slice %3 {offsets = [0, 3], sizes = [64, 1], strides = [1, 1]} : vector<64x8xf32> to vector<64x1xf32>
    %78 = vector.extract_strided_slice %19 {offsets = [3, 0], sizes = [1, 1], strides = [1, 1]} : vector<8x1xf32> to vector<1x1xf32>
    %79 = vector.broadcast %78 : vector<1x1xf32> to vector<64x1xf32>
    %80 = arith.mulf %77, %79 : vector<64x1xf32>
    %81 = arith.addf %76, %80 : vector<64x1xf32>
    %82 = vector.extract_strided_slice %3 {offsets = [0, 4], sizes = [64, 1], strides = [1, 1]} : vector<64x8xf32> to vector<64x1xf32>
    %83 = vector.extract_strided_slice %19 {offsets = [4, 0], sizes = [1, 1], strides = [1, 1]} : vector<8x1xf32> to vector<1x1xf32>
    %84 = vector.broadcast %83 : vector<1x1xf32> to vector<64x1xf32>
    %85 = arith.mulf %82, %84 : vector<64x1xf32>
    %86 = arith.addf %81, %85 : vector<64x1xf32>
    %87 = vector.extract_strided_slice %3 {offsets = [0, 5], sizes = [64, 1], strides = [1, 1]} : vector<64x8xf32> to vector<64x1xf32>
    %88 = vector.extract_strided_slice %19 {offsets = [5, 0], sizes = [1, 1], strides = [1, 1]} : vector<8x1xf32> to vector<1x1xf32>
    %89 = vector.broadcast %88 : vector<1x1xf32> to vector<64x1xf32>
    %90 = arith.mulf %87, %89 : vector<64x1xf32>
    %91 = arith.addf %86, %90 : vector<64x1xf32>
    %92 = vector.extract_strided_slice %3 {offsets = [0, 6], sizes = [64, 1], strides = [1, 1]} : vector<64x8xf32> to vector<64x1xf32>
    %93 = vector.extract_strided_slice %19 {offsets = [6, 0], sizes = [1, 1], strides = [1, 1]} : vector<8x1xf32> to vector<1x1xf32>
    %94 = vector.broadcast %93 : vector<1x1xf32> to vector<64x1xf32>
    %95 = arith.mulf %92, %94 : vector<64x1xf32>
    %96 = arith.addf %91, %95 : vector<64x1xf32>
    %97 = vector.extract_strided_slice %3 {offsets = [0, 7], sizes = [64, 1], strides = [1, 1]} : vector<64x8xf32> to vector<64x1xf32>
    %98 = vector.extract_strided_slice %19 {offsets = [7, 0], sizes = [1, 1], strides = [1, 1]} : vector<8x1xf32> to vector<1x1xf32>
    %99 = vector.broadcast %98 : vector<1x1xf32> to vector<64x1xf32>
    %100 = arith.mulf %97, %99 : vector<64x1xf32>
    %101 = arith.addf %96, %100 : vector<64x1xf32>
    %c0_14 = arith.constant 0 : index
    %c0_15 = arith.constant 0 : index
    %102 = vector.load %arg2[%c0_14, %c0_15] : memref<64x1xf32, #tpu.memory_space<vmem>>, vector<64x1xf32>
    %103 = arith.mulf %101, %102 : vector<64x1xf32>
    %c0_16 = arith.constant 0 : index
    %c0_17 = arith.constant 0 : index
    %104 = vector.load %arg3[%c0_16, %c0_17] : memref<64x1xf32, #tpu.memory_space<vmem>>, vector<64x1xf32>
    %105 = arith.mulf %60, %103 : vector<64x1xf32>
    %106 = arith.subf %104, %105 : vector<64x1xf32>
    %107 = vector.broadcast %103 : vector<64x1xf32> to vector<64x256xf32>
    %108 = arith.mulf %1, %107 : vector<64x256xf32>
    %109 = vector.broadcast %106 : vector<64x1xf32> to vector<64x256xf32>
    %110 = arith.addf %108, %109 : vector<64x256xf32>
    %111 = arith.truncf %110 : vector<64x256xf32> to vector<64x256xbf16>
    %c0_18 = arith.constant 0 : index
    %c0_19 = arith.constant 0 : index
    %112 = vector.load %arg6[%c0_18, %c0_19] : memref<384x64xbf16, #tpu.memory_space<vmem>>, vector<384x64xbf16>
    %cst_20 = arith.constant dense<0.000000e+00> : vector<384x256xf32>
    %113 = tpu.matmul %112, %111, %cst_20 {dimension_numbers = #tpu.dot_dimension_numbers<[1], [0], [0], [1], [0, 0, 1, 1], [], []>} : vector<384x64xbf16>, vector<64x256xbf16>, vector<384x256xf32> -> vector<384x256xf32>
    %c0_21 = arith.constant 0 : index
    %c0_22 = arith.constant 0 : index
    %114 = vector.load %arg7[%c0_21, %c0_22] : memref<384x1xf32, #tpu.memory_space<vmem>>, vector<384x1xf32>
    %115 = vector.broadcast %114 : vector<384x1xf32> to vector<384x256xf32>
    %116 = arith.addf %113, %115 : vector<384x256xf32>
    %117 = vector.extract_strided_slice %116 {offsets = [0, 0], sizes = [32, 256], strides = [1, 1]} : vector<384x256xf32> to vector<32x256xf32>
    %118 = arith.truncf %117 : vector<32x256xf32> to vector<32x256xbf16>
    %119 = vector.extract_strided_slice %116 {offsets = [128, 0], sizes = [32, 256], strides = [1, 1]} : vector<384x256xf32> to vector<32x256xf32>
    %120 = arith.truncf %119 : vector<32x256xf32> to vector<32x256xbf16>
    %121 = vector.extract_strided_slice %116 {offsets = [256, 0], sizes = [32, 256], strides = [1, 1]} : vector<384x256xf32> to vector<32x256xf32>
    %122 = arith.truncf %121 : vector<32x256xf32> to vector<32x256xbf16>
    %cst_23 = arith.constant dense<0.000000e+00> : vector<256x256xf32>
    %123 = tpu.matmul %120, %118, %cst_23 {dimension_numbers = #tpu.dot_dimension_numbers<[0], [0], [1], [1], [0, 1, 1, 1], [], []>} : vector<32x256xbf16>, vector<32x256xbf16>, vector<256x256xf32> -> vector<256x256xf32>
    %cst_24 = arith.constant dense<0xFF800000> : vector<256xf32>
    %124 = vector.multi_reduction <maximumf>, %123, %cst_24 [0] : vector<256x256xf32> to vector<256xf32>
    %125 = vector.shape_cast %124 : vector<256xf32> to vector<1x256xf32>
    %126 = vector.broadcast %125 : vector<1x256xf32> to vector<256x256xf32>
    %127 = arith.subf %123, %126 : vector<256x256xf32>
    %128 = math.exp %127 : vector<256x256xf32>
    %cst_25 = arith.constant dense<0.000000e+00> : vector<256xf32>
    %129 = vector.multi_reduction <add>, %128, %cst_25 [0] : vector<256x256xf32> to vector<256xf32>
    %130 = vector.shape_cast %129 : vector<256xf32> to vector<1x256xf32>
    %131 = arith.truncf %128 : vector<256x256xf32> to vector<256x256xbf16>
    %cst_26 = arith.constant dense<0.000000e+00> : vector<32x256xf32>
    %132 = tpu.matmul %122, %131, %cst_26 {dimension_numbers = #tpu.dot_dimension_numbers<[1], [0], [0], [1], [0, 0, 1, 1], [], []>} : vector<32x256xbf16>, vector<256x256xbf16>, vector<32x256xf32> -> vector<32x256xf32>
    %133 = tpu.reciprocal %130 {approx = true} : vector<1x256xf32> -> vector<1x256xf32>
    %134 = vector.broadcast %133 : vector<1x256xf32> to vector<32x256xf32>
    %135 = arith.mulf %132, %134 : vector<32x256xf32>
    %136 = arith.truncf %135 : vector<32x256xf32> to vector<32x256xbf16>
    %c0_27 = arith.constant 0 : index
    %c0_28 = arith.constant 0 : index
    %137 = vector.load %arg11[%c0_27, %c0_28] : memref<128x256xbf16, #tpu.memory_space<vmem>>, vector<32x256xbf16>
    tpu.vector_store %arg11[%c0_27, %c0_28], %136 {strides = array<i32>} : memref<128x256xbf16, #tpu.memory_space<vmem>>, vector<32x256xbf16>,
    %138 = vector.extract_strided_slice %116 {offsets = [32, 0], sizes = [32, 256], strides = [1, 1]} : vector<384x256xf32> to vector<32x256xf32>
    %139 = arith.truncf %138 : vector<32x256xf32> to vector<32x256xbf16>
    %140 = vector.extract_strided_slice %116 {offsets = [160, 0], sizes = [32, 256], strides = [1, 1]} : vector<384x256xf32> to vector<32x256xf32>
    %141 = arith.truncf %140 : vector<32x256xf32> to vector<32x256xbf16>
    %142 = vector.extract_strided_slice %116 {offsets = [288, 0], sizes = [32, 256], strides = [1, 1]} : vector<384x256xf32> to vector<32x256xf32>
    %143 = arith.truncf %142 : vector<32x256xf32> to vector<32x256xbf16>
    %cst_29 = arith.constant dense<0.000000e+00> : vector<256x256xf32>
    %144 = tpu.matmul %141, %139, %cst_29 {dimension_numbers = #tpu.dot_dimension_numbers<[0], [0], [1], [1], [0, 1, 1, 1], [], []>} : vector<32x256xbf16>, vector<32x256xbf16>, vector<256x256xf32> -> vector<256x256xf32>
    %cst_30 = arith.constant dense<0xFF800000> : vector<256xf32>
    %145 = vector.multi_reduction <maximumf>, %144, %cst_30 [0] : vector<256x256xf32> to vector<256xf32>
    %146 = vector.shape_cast %145 : vector<256xf32> to vector<1x256xf32>
    %147 = vector.broadcast %146 : vector<1x256xf32> to vector<256x256xf32>
    %148 = arith.subf %144, %147 : vector<256x256xf32>
    %149 = math.exp %148 : vector<256x256xf32>
    %cst_31 = arith.constant dense<0.000000e+00> : vector<256xf32>
    %150 = vector.multi_reduction <add>, %149, %cst_31 [0] : vector<256x256xf32> to vector<256xf32>
    %151 = vector.shape_cast %150 : vector<256xf32> to vector<1x256xf32>
    %152 = arith.truncf %149 : vector<256x256xf32> to vector<256x256xbf16>
    %cst_32 = arith.constant dense<0.000000e+00> : vector<32x256xf32>
    %153 = tpu.matmul %143, %152, %cst_32 {dimension_numbers = #tpu.dot_dimension_numbers<[1], [0], [0], [1], [0, 0, 1, 1], [], []>} : vector<32x256xbf16>, vector<256x256xbf16>, vector<32x256xf32> -> vector<32x256xf32>
    %154 = tpu.reciprocal %151 {approx = true} : vector<1x256xf32> -> vector<1x256xf32>
    %155 = vector.broadcast %154 : vector<1x256xf32> to vector<32x256xf32>
    %156 = arith.mulf %153, %155 : vector<32x256xf32>
    %157 = arith.truncf %156 : vector<32x256xf32> to vector<32x256xbf16>
    %c32 = arith.constant 32 : index
    %c0_33 = arith.constant 0 : index
    %158 = vector.load %arg11[%c32, %c0_33] : memref<128x256xbf16, #tpu.memory_space<vmem>>, vector<32x256xbf16>
    tpu.vector_store %arg11[%c32, %c0_33], %157 {strides = array<i32>} : memref<128x256xbf16, #tpu.memory_space<vmem>>, vector<32x256xbf16>,
    %159 = vector.extract_strided_slice %116 {offsets = [64, 0], sizes = [32, 256], strides = [1, 1]} : vector<384x256xf32> to vector<32x256xf32>
    %160 = arith.truncf %159 : vector<32x256xf32> to vector<32x256xbf16>
    %161 = vector.extract_strided_slice %116 {offsets = [192, 0], sizes = [32, 256], strides = [1, 1]} : vector<384x256xf32> to vector<32x256xf32>
    %162 = arith.truncf %161 : vector<32x256xf32> to vector<32x256xbf16>
    %163 = vector.extract_strided_slice %116 {offsets = [320, 0], sizes = [32, 256], strides = [1, 1]} : vector<384x256xf32> to vector<32x256xf32>
    %164 = arith.truncf %163 : vector<32x256xf32> to vector<32x256xbf16>
    %cst_34 = arith.constant dense<0.000000e+00> : vector<256x256xf32>
    %165 = tpu.matmul %162, %160, %cst_34 {dimension_numbers = #tpu.dot_dimension_numbers<[0], [0], [1], [1], [0, 1, 1, 1], [], []>} : vector<32x256xbf16>, vector<32x256xbf16>, vector<256x256xf32> -> vector<256x256xf32>
    %cst_35 = arith.constant dense<0xFF800000> : vector<256xf32>
    %166 = vector.multi_reduction <maximumf>, %165, %cst_35 [0] : vector<256x256xf32> to vector<256xf32>
    %167 = vector.shape_cast %166 : vector<256xf32> to vector<1x256xf32>
    %168 = vector.broadcast %167 : vector<1x256xf32> to vector<256x256xf32>
    %169 = arith.subf %165, %168 : vector<256x256xf32>
    %170 = math.exp %169 : vector<256x256xf32>
    %cst_36 = arith.constant dense<0.000000e+00> : vector<256xf32>
    %171 = vector.multi_reduction <add>, %170, %cst_36 [0] : vector<256x256xf32> to vector<256xf32>
    %172 = vector.shape_cast %171 : vector<256xf32> to vector<1x256xf32>
    %173 = arith.truncf %170 : vector<256x256xf32> to vector<256x256xbf16>
    %cst_37 = arith.constant dense<0.000000e+00> : vector<32x256xf32>
    %174 = tpu.matmul %164, %173, %cst_37 {dimension_numbers = #tpu.dot_dimension_numbers<[1], [0], [0], [1], [0, 0, 1, 1], [], []>} : vector<32x256xbf16>, vector<256x256xbf16>, vector<32x256xf32> -> vector<32x256xf32>
    %175 = tpu.reciprocal %172 {approx = true} : vector<1x256xf32> -> vector<1x256xf32>
    %176 = vector.broadcast %175 : vector<1x256xf32> to vector<32x256xf32>
    %177 = arith.mulf %174, %176 : vector<32x256xf32>
    %178 = arith.truncf %177 : vector<32x256xf32> to vector<32x256xbf16>
    %c64 = arith.constant 64 : index
    %c0_38 = arith.constant 0 : index
    %179 = vector.load %arg11[%c64, %c0_38] : memref<128x256xbf16, #tpu.memory_space<vmem>>, vector<32x256xbf16>
    tpu.vector_store %arg11[%c64, %c0_38], %178 {strides = array<i32>} : memref<128x256xbf16, #tpu.memory_space<vmem>>, vector<32x256xbf16>,
    %180 = vector.extract_strided_slice %116 {offsets = [96, 0], sizes = [32, 256], strides = [1, 1]} : vector<384x256xf32> to vector<32x256xf32>
    %181 = arith.truncf %180 : vector<32x256xf32> to vector<32x256xbf16>
    %182 = vector.extract_strided_slice %116 {offsets = [224, 0], sizes = [32, 256], strides = [1, 1]} : vector<384x256xf32> to vector<32x256xf32>
    %183 = arith.truncf %182 : vector<32x256xf32> to vector<32x256xbf16>
    %184 = vector.extract_strided_slice %116 {offsets = [352, 0], sizes = [32, 256], strides = [1, 1]} : vector<384x256xf32> to vector<32x256xf32>
    %185 = arith.truncf %184 : vector<32x256xf32> to vector<32x256xbf16>
    %cst_39 = arith.constant dense<0.000000e+00> : vector<256x256xf32>
    %186 = tpu.matmul %183, %181, %cst_39 {dimension_numbers = #tpu.dot_dimension_numbers<[0], [0], [1], [1], [0, 1, 1, 1], [], []>} : vector<32x256xbf16>, vector<32x256xbf16>, vector<256x256xf32> -> vector<256x256xf32>
    %cst_40 = arith.constant dense<0xFF800000> : vector<256xf32>
    %187 = vector.multi_reduction <maximumf>, %186, %cst_40 [0] : vector<256x256xf32> to vector<256xf32>
    %188 = vector.shape_cast %187 : vector<256xf32> to vector<1x256xf32>
    %189 = vector.broadcast %188 : vector<1x256xf32> to vector<256x256xf32>
    %190 = arith.subf %186, %189 : vector<256x256xf32>
    %191 = math.exp %190 : vector<256x256xf32>
    %cst_41 = arith.constant dense<0.000000e+00> : vector<256xf32>
    %192 = vector.multi_reduction <add>, %191, %cst_41 [0] : vector<256x256xf32> to vector<256xf32>
    %193 = vector.shape_cast %192 : vector<256xf32> to vector<1x256xf32>
    %194 = arith.truncf %191 : vector<256x256xf32> to vector<256x256xbf16>
    %cst_42 = arith.constant dense<0.000000e+00> : vector<32x256xf32>
    %195 = tpu.matmul %185, %194, %cst_42 {dimension_numbers = #tpu.dot_dimension_numbers<[1], [0], [0], [1], [0, 0, 1, 1], [], []>} : vector<32x256xbf16>, vector<256x256xbf16>, vector<32x256xf32> -> vector<32x256xf32>
    %196 = tpu.reciprocal %193 {approx = true} : vector<1x256xf32> -> vector<1x256xf32>
    %197 = vector.broadcast %196 : vector<1x256xf32> to vector<32x256xf32>
    %198 = arith.mulf %195, %197 : vector<32x256xf32>
    %199 = arith.truncf %198 : vector<32x256xf32> to vector<32x256xbf16>
    %c96 = arith.constant 96 : index
    %c0_43 = arith.constant 0 : index
    %200 = vector.load %arg11[%c96, %c0_43] : memref<128x256xbf16, #tpu.memory_space<vmem>>, vector<32x256xbf16>
    tpu.vector_store %arg11[%c96, %c0_43], %199 {strides = array<i32>} : memref<128x256xbf16, #tpu.memory_space<vmem>>, vector<32x256xbf16>,
    %c0_44 = arith.constant 0 : index
    %c0_45 = arith.constant 0 : index
    %201 = vector.load %arg8[%c0_44, %c0_45] : memref<64x128xbf16, #tpu.memory_space<vmem>>, vector<64x128xbf16>
    %c0_46 = arith.constant 0 : index
    %c0_47 = arith.constant 0 : index
    %202 = vector.load %arg11[%c0_46, %c0_47] : memref<128x256xbf16, #tpu.memory_space<vmem>>, vector<128x256xbf16>
    %cst_48 = arith.constant dense<0.000000e+00> : vector<64x256xf32>
    %203 = tpu.matmul %201, %202, %cst_48 {dimension_numbers = #tpu.dot_dimension_numbers<[1], [0], [0], [1], [0, 0, 1, 1], [], []>} : vector<64x128xbf16>, vector<128x256xbf16>, vector<64x256xf32> -> vector<64x256xf32>
    %c0_49 = arith.constant 0 : index
    %c0_50 = arith.constant 0 : index
    %204 = vector.load %arg9[%c0_49, %c0_50] : memref<64x1xf32, #tpu.memory_space<vmem>>, vector<64x1xf32>
    %205 = vector.broadcast %204 : vector<64x1xf32> to vector<64x256xf32>
    %206 = arith.addf %1, %205 : vector<64x256xf32>
    %207 = arith.addf %206, %203 : vector<64x256xf32>
    %c0_51 = arith.constant 0 : index
    %c0_52 = arith.constant 0 : index
    %c0_53 = arith.constant 0 : index
    %208 = vector.load %arg10[%c0_51, %c0_52, %c0_53] : memref<1x64x256xf32, #tpu.memory_space<vmem>>, vector<1x64x256xf32>
    %209 = vector.shape_cast %208 : vector<1x64x256xf32> to vector<64x256xf32>
    %210 = vector.shape_cast %207 : vector<64x256xf32> to vector<1x64x256xf32>
    tpu.vector_store %arg10[%c0_51, %c0_52, %c0_53], %210 {strides = array<i32>} : memref<1x64x256xf32, #tpu.memory_space<vmem>>, vector<1x64x256xf32>,
    return
  }
  func.func @transform_0(%arg0: i32) -> (i32, i32, i32) {
    %c0_i32 = arith.constant 0 : i32
    %c0_i32_0 = arith.constant 0 : i32
    %c0_i32_1 = arith.constant 0 : i32
    return %arg0, %c0_i32, %c0_i32_0 : i32, i32, i32
  }
  func.func @transform_1(%arg0: i32) -> (i32, i32) {
    %c0_i32 = arith.constant 0 : i32
    %c0_i32_0 = arith.constant 0 : i32
    %c0_i32_1 = arith.constant 0 : i32
    return %c0_i32, %c0_i32_0 : i32, i32
  }
  func.func @transform_2(%arg0: i32) -> (i32, i32) {
    %c0_i32 = arith.constant 0 : i32
    %c0_i32_0 = arith.constant 0 : i32
    %c0_i32_1 = arith.constant 0 : i32
    return %c0_i32, %c0_i32_0 : i32, i32
  }
  func.func @transform_3(%arg0: i32) -> (i32, i32) {
    %c0_i32 = arith.constant 0 : i32
    %c0_i32_0 = arith.constant 0 : i32
    %c0_i32_1 = arith.constant 0 : i32
    return %c0_i32, %c0_i32_0 : i32, i32
  }
  func.func @transform_4(%arg0: i32) -> (i32, i32) {
    %c0_i32 = arith.constant 0 : i32
    %c0_i32_0 = arith.constant 0 : i32
    %c0_i32_1 = arith.constant 0 : i32
    return %c0_i32, %c0_i32_0 : i32, i32
  }
  func.func @transform_5(%arg0: i32) -> (i32, i32) {
    %c0_i32 = arith.constant 0 : i32
    %c0_i32_0 = arith.constant 0 : i32
    %c0_i32_1 = arith.constant 0 : i32
    return %c0_i32, %c0_i32_0 : i32, i32
  }
  func.func @transform_6(%arg0: i32) -> (i32, i32) {
    %c0_i32 = arith.constant 0 : i32
    %c0_i32_0 = arith.constant 0 : i32
    %c0_i32_1 = arith.constant 0 : i32
    return %c0_i32, %c0_i32_0 : i32, i32
  }
  func.func @transform_7(%arg0: i32) -> (i32, i32) {
    %c0_i32 = arith.constant 0 : i32
    %c0_i32_0 = arith.constant 0 : i32
    %c0_i32_1 = arith.constant 0 : i32
    return %c0_i32, %c0_i32_0 : i32, i32
  }
  func.func @transform_8(%arg0: i32) -> (i32, i32) {
    %c0_i32 = arith.constant 0 : i32
    %c0_i32_0 = arith.constant 0 : i32
    %c0_i32_1 = arith.constant 0 : i32
    return %c0_i32, %c0_i32_0 : i32, i32
  }
  func.func @transform_9(%arg0: i32) -> (i32, i32, i32) {
    %c0_i32 = arith.constant 0 : i32
    %c0_i32_0 = arith.constant 0 : i32
    %c0_i32_1 = arith.constant 0 : i32
    return %arg0, %c0_i32, %c0_i32_0 : i32, i32, i32
  }
}

</mosaic_0001>

<bundles_post_ra>
// kernel: _lambda_.1
= control target key start
LH: loop header
LB: loop body
LE: loop exit
PB: predicated region body
PF: predicated region fallthrough
CT: control target
= control target key end

     0   :  { %s6478_s30 = smov 0   ;;  %s10685_s0 = inlined_call_operand.vmem [shape: f32[2,64,256], index: 0, kind: input, shape index: {}]   ;;  %s10686_s1 = inlined_call_operand.vmem [shape: f32[64,1], index: 1, kind: input, shape index: {}]   ;;  %s10687_s2 = inlined_call_operand.vmem [shape: f32[64,1], index: 2, kind: input, shape index: {}]   ;;  %s10688_s3 = inlined_call_operand.vmem [shape: f32[8,64], index: 3, kind: input, shape index: {}]   ;;  %s10689_s4 = inlined_call_operand.vmem [shape: f32[64,8], index: 4, kind: input, shape index: {}]   ;;  %s10690_s5 = inlined_call_operand.vmem [shape: bf16[384,64], index: 5, kind: input, shape index: {}]   ;;  %s10691_s6 = inlined_call_operand.vmem [shape: f32[384,1], index: 6, kind: input, shape index: {}]   ;;  %s10692_s7 = inlined_call_operand.vmem [shape: bf16[64,128], index: 7, kind: input, shape index: {}]   ;;  %s10693_s8 = inlined_call_operand.vmem [shape: f32[64,1], index: 8, kind: input, shape index: {}]   ;;  %s10694_s9 = inlined_call_operand.vmem [shape: f32[2,64,256], index: 9, kind: output, shape index: {}]  }
   0x1 LB: > { %s5607_s10 = sadd.s32 4294967295, %s6417_s30   ;;  %p5611_p0 = scmp.ge.s32.totalorder %s6417_s30, 1  ;;  %s6417_s30 = sphi %s6478_s30, %s19_s30  }
   0x2   : > { %p287_p1 = scmp.lt.s32.totalorder %s6417_s30, 3 }
   0x4   : > { %p288_p2 = pnand %p5611_p0, %p287_p1 }
   0x6   : > { %291 = sbr.rel (%p288_p2) target bundleno = 3602 (0xe12), region = 56 }
   0xb   : > { %p323_p3 = scmp.lt.s32.totalorder %s5607_s10, 1  ;;  %v6419_v0 = vmov 0.0   ;;  %vm359_vm0 = vcmask 523264   ;;  %v350_v30 = vld [vmem:[%s10688_s3] sm:$0xff]  ;;  %v533_v40 = vlaneseq  ;;  %v6524_v46 = vld [vmem:[%s10689_s4 + $0x38] sm:$0xff]  ;;  %v6529_v47 = vld [vmem:[%s10689_s4 + $0x30] sm:$0xff] }
   0xc   : > { %427 = vmatprep.mubr.f32.mxu0 %v6419_v0  ;;  %514 = vmatprep.mubr.f32.mxu1 %v6419_v0  ;;  %v6547_v56 = vld [vmem:[%s10689_s4 + $0x28] sm:$0xff]  ;;  %s6420_s23 = smov 127   ;;  %s6421_s24 = smov 126   ;;  %vm2306_vm1 = vcmask 261120  }
   0xd   : > { %s11463_s10 = smov (!%p323_p3, %s5607_s10), 1  ;;  %v6517_v41 = vshrl.u32 %v533_v40, 7  ;;  %s6422_s27 = smov 125  }
   0xe   : > { %s5768_s11 = sshll.u32 %s11463_s10, 7  ;;  %s6423_s19 = smov 124  }
   0xf   : > { %s6494_s14 = scalar_lea.vmem %s10685_s0, %s5768_s11  ;;  %v555_v42 = vsub.s32 1, %v6517_v41  ;;  %v607_v45 = vsub.s32 2, %v6517_v41  ;;  %v659_v51 = vsub.s32 3, %v6517_v41  ;;  %v711_v62 = vsub.s32 4, %v6517_v41  ;;  %s6424_s20 = smov 123  }
  0x10   : > { %v349_v1 = vld [vmem:[%s6494_s14 + $0x78] sm:$0xff]  ;;  %v348_v2 = vld [vmem:[%s6494_s14 + $0x70] sm:$0xff]  ;;  %v347_v3 = vld [vmem:[%s6494_s14 + $0x68] sm:$0xff]  ;;  %v867_v63 = vsub.s32 7, %v6517_v41  ;;  %s6425_s21 = smov 122   ;;  %s6426_s22 = smov 121  }
  0x11   : > { %379 = vmatprep.subr.mxu0 %v349_v1  ;;  %v346_v4 = vld [vmem:[%s6494_s14 + $0x60] sm:$0xff]  ;;  %v449_v5 = vmul.f32 %v349_v1, %v349_v1  ;;  %v448_v6 = vmul.f32 %v348_v2, %v348_v2  ;;  %v447_v7 = vmul.f32 %v347_v3, %v347_v3  ;;  %v345_v8 = vld [vmem:[%s6494_s14 + $0x58] sm:$0xff]  ;;  %v344_v10 = vld [vmem:[%s6494_s14 + $0x50] sm:$0xff] }
  0x12   : > { %380 = vmatpush1.msra.mxu0 %v348_v2  ;;  %v446_v9 = vmul.f32 %v346_v4, %v346_v4  ;;  %v445_v11 = vmul.f32 %v345_v8, %v345_v8  ;;  %v343_v12 = vld [vmem:[%s6494_s14 + $0x48] sm:$0xff]  ;;  %v342_v13 = vld [vmem:[%s6494_s14 + $0x40] sm:$0xff]  ;;  %v341_v14 = vld [vmem:[%s6494_s14 + $0x38] sm:$0xff]  ;;  %v444_v15 = vmul.f32 %v344_v10, %v344_v10  ;;  %v763_v2 = vsub.s32 5, %v6517_v41 }
  0x13   : > { %381 = vmatprep.subr.mxu0 %v347_v3  ;;  %466 = vmatprep.subr.mxu1 %v449_v5  ;;  %v340_v16 = vld [vmem:[%s6494_s14 + $0x30] sm:$0xff]  ;;  %v443_v17 = vmul.f32 %v343_v12, %v343_v12  ;;  %v339_v18 = vld [vmem:[%s6494_s14 + $0x28] sm:$0xff]  ;;  %v442_v19 = vmul.f32 %v342_v13, %v342_v13  ;;  %v338_v20 = vld [vmem:[%s6494_s14 + $0x20] sm:$0xff]  ;;  %v441_v21 = vmul.f32 %v341_v14, %v341_v14  ;;  %v815_v5 = vsub.s32 6, %v6517_v41 }
  0x14   : > { %382 = vmatpush1.msra.mxu0 %v346_v4  ;;  %467 = vmatpush1.msra.mxu1 %v448_v6  ;;  %v337_v22 = vld [vmem:[%s6494_s14 + $0x18] sm:$0xff]  ;;  %v440_v23 = vmul.f32 %v340_v16, %v340_v16  ;;  %v336_v24 = vld [vmem:[%s6494_s14 + $0x10] sm:$0xff]  ;;  %v439_v25 = vmul.f32 %v339_v18, %v339_v18  ;;  %v335_v26 = vld [vmem:[%s6494_s14 + $0x8] sm:$0xff]  ;;  %v438_v27 = vmul.f32 %v338_v20, %v338_v20 }
  0x15   : > { %383 = vmatprep.subr.mxu0 %v345_v8  ;;  %468 = vmatprep.subr.mxu1 %v447_v7  ;;  %v334_v28 = vld [vmem:[%s6494_s14] sm:$0xff]  ;;  %v437_v29 = vmul.f32 %v337_v22, %v337_v22  ;;  %v436_v31 = vmul.f32 %v336_v24, %v336_v24  ;;  %v435_v32 = vmul.f32 %v335_v26, %v335_v26  ;;  %v6581_v6 = vld [vmem:[%s10689_s4 + $0x18] sm:$0xff]  ;;  %v535_v8 = vsub.s32 0, %v6517_v41 }
  0x16   : > { %384 = vmatpush1.msra.mxu0 %v344_v10  ;;  %469 = vmatpush1.msra.mxu1 %v446_v9  ;;  %v434_v33 = vmul.f32 %v334_v28, %v334_v28  ;;  %v6571_v3 = vld [vmem:[%s10689_s4 + $0x20] sm:$0xff] }
  0x17   : > { %385 = vmatprep.subr.mxu0 %v343_v12  ;;  %470 = vmatprep.subr.mxu1 %v445_v11  ;;  %v6595_v12 = vld [vmem:[%s10689_s4 + $0x8] sm:$0xff] }
  0x18   : > { %386 = vmatpush1.msra.mxu0 %v342_v13  ;;  %471 = vmatpush1.msra.mxu1 %v444_v15  ;;  %v6600_v13 = vld [vmem:[%s10689_s4] sm:$0xff]  ;;  %v6607_v15 = vld [vmem:[%s10689_s4 + $0x10] sm:$0xff] }
  0x19   : > { %387 = vmatprep.subr.mxu0 %v341_v14  ;;  %472 = vmatprep.subr.mxu1 %v443_v17 }
  0x1a   : > { %388 = vmatpush1.msra.mxu0 %v340_v16  ;;  %473 = vmatpush1.msra.mxu1 %v442_v19 }
  0x1b   : > { %389 = vmatprep.subr.mxu0 %v339_v18  ;;  %474 = vmatprep.subr.mxu1 %v441_v21 }
  0x1c   : > { %390 = vmatpush1.msra.mxu0 %v338_v20  ;;  %475 = vmatpush1.msra.mxu1 %v440_v23 }
  0x1d   : > { %391 = vmatprep.subr.mxu0 %v337_v22  ;;  %476 = vmatprep.subr.mxu1 %v439_v25 }
  0x1e   : > { %392 = vmatpush1.msra.mxu0 %v336_v24  ;;  %477 = vmatpush1.msra.mxu1 %v438_v27 }
  0x1f   : > { %393 = vmatprep.subr.mxu0 %v335_v26  ;;  %478 = vmatprep.subr.mxu1 %v437_v29 }
  0x20   : > { %394 = vmatpush1.msra.mxu0 %v334_v28  ;;  %479 = vmatpush1.msra.mxu1 %v436_v31 }
  0x21   : > { %5616 = vmatmul.mubr.msk.f32.vlgmr.msra.gmra.mxu0 %vm359_vm0, %v350_v30  ;;  %480 = vmatprep.subr.mxu1 %v435_v32 }
  0x22   : > { %481 = vmatpush1.msra.mxu1 %v434_v33 }
  0x23   : > { %5617 = vmatmul.mubr.msk.f32.vlgmr.msra.gmra.mxu1 %vm359_vm0, %v350_v30 }
  0xe1   : > { %v429_v34 = vpop.f32.mrf.mxu0 }
  0xe3   : > { %v431_v35 = vpop.f32.mrf.mxu0  ;;  %v516_v36 = vpop.f32.mrf.mxu1 }
  0xe4   : > { %v521_v37 = vadd.f32 %v431_v35, %v429_v34 }
  0xe5   : > { %v518_v38 = vpop.f32.mrf.mxu1 }
  0xe6   : > { %522 = vadd.xlane.f32.xlu0 %v521_v37  ;;  %v525_v39 = vadd.f32 %v518_v38, %v516_v36 }
  0xea   : > { %526 = vadd.xlane.f32.xlu0 %v525_v39 }
 0x16f   : > { %v523_v43 = vpop.xlane.xlu0 %522 }
 0x170   : > { %v524_v44 = vmul.f32 0.00048828125, %v523_v43 }
 0x172   : > { %v6533_v48 = vrot.slane %v524_v44, %v555_v42  ;;  %v529_v49 = vmul.f32 %v524_v44, %v524_v44  ;;  %v6542_v55 = vrot.slane %v524_v44, %v607_v45  ;;  %v6557_v61 = vrot.slane %v524_v44, %v659_v51 }
 0x173   : > { %v527_v50 = vpop.xlane.xlu0 %526  ;;  %v6573_v4 = vrot.slane %v524_v44, %v711_v62  ;;  %v6583_v7 = vrot.slane %v524_v44, %v867_v63  ;;  %v6590_v11 = vrot.slane %v524_v44, %v763_v2  ;;  %v6609_v16 = vrot.slane %v524_v44, %v815_v5 }
 0x174   : > { %v528_v52 = vmul.f32 0.00048828125, %v527_v50  ;;  %v564_v53 = vmul.f32 %v6533_v48, %v6524_v46  ;;  %v563_v54 = vmul.f32 %v6533_v48, %v6529_v47  ;;  %v615_v59 = vmul.f32 %v6542_v55, %v6529_v47 }
 0x175   : > { %v562_v60 = vmul.f32 %v6533_v48, %v6547_v56  ;;  %v616_v0 = vmul.f32 %v6542_v55, %v6524_v46  ;;  %v668_v1 = vmul.f32 %v6557_v61, %v6524_v46  ;;  %v614_v9 = vmul.f32 %v6542_v55, %v6547_v56 }
 0x176   : > { %v530_v57 = vsub.f32 %v528_v52, %v529_v49  ;;  %587 = vrot.lane.b32.xlu1 %v564_v53, %s6420_s23  ;;  %585 = vrot.lane.b32.xlu0 %v563_v54, %s6420_s23  ;;  %v561_v10 = vmul.f32 %v6533_v48, %v6571_v3  ;;  %v720_v14 = vmul.f32 %v6573_v4, %v6524_v46 }
 0x177   : > { %v667_v17 = vmul.f32 %v6557_v61, %v6529_v47  ;;  %v613_v18 = vmul.f32 %v6542_v55, %v6571_v3  ;;  %v560_v19 = vmul.f32 %v6533_v48, %v6581_v6  ;;  %v719_v20 = vmul.f32 %v6573_v4, %v6529_v47 }
 0x178   : > { %v531_v58 = vadd.f32 1e-05, %v530_v57  ;;  %v536_v21 = vrot.slane %v524_v44, %v535_v8  ;;  %v6623_v22 = vmul.f32 %v6583_v7, %v6595_v12  ;;  %v6627_v23 = vmul.f32 %v6583_v7, %v6600_v13 }
 0x179   : > { %v666_v24 = vmul.f32 %v6557_v61, %v6547_v56  ;;  %v772_v25 = vmul.f32 %v6590_v11, %v6524_v46  ;;  %v559_v26 = vmul.f32 %v6533_v48, %v6607_v15  ;;  %v6637_v27 = vmul.f32 %v6542_v55, %v6581_v6 }
 0x17a   : > { %5849 = vrsqrt.f32 %v531_v58  ;;  %637 = vrot.lane.b32.xlu1 %v615_v59, %s6421_s24  ;;  %583 = vrot.lane.b32.xlu0 %v562_v60, %s6420_s23  ;;  %10861 = vst [vmem:[#allocation3_spill] sm:$0xff] %v6623_v22  ;;  %10862 = vst [vmem:[#allocation4_spill] sm:$0xff] %v6627_v23  ;;  %v6640_v28 = vmul.f32 %v536_v21, %v6524_v46  ;;  %v6643_v29 = vmul.f32 %v536_v21, %v6529_v47 }
 0x17b   : > { %v6646_v30 = vmul.f32 %v536_v21, %v6547_v56  ;;  %v6649_v31 = vmul.f32 %v536_v21, %v6571_v3  ;;  %v6654_v32 = vmul.f32 %v536_v21, %v6581_v6  ;;  %v6657_v33 = vmul.f32 %v536_v21, %v6607_v15 }
 0x17c   : > { %10863 = vst [vmem:[#allocation5_spill] sm:$0xff] %v6640_v28  ;;  %10864 = vst [vmem:[#allocation6_spill] sm:$0xff] %v6643_v29  ;;  %v6660_v34 = vmul.f32 %v536_v21, %v6595_v12  ;;  %v6664_v36 = vmul.f32 %v6557_v61, %v6571_v3  ;;  %v6668_v37 = vmul.f32 %v6573_v4, %v6547_v56 }
 0x17d   : > { %10865 = vst [vmem:[#allocation7_spill] sm:$0xff] %v6646_v30  ;;  %10866 = vst [vmem:[#allocation8_spill] sm:$0xff] %v6649_v31  ;;  %v6672_v38 = vmul.f32 %v6590_v11, %v6529_v47  ;;  %v6675_v39 = vmul.f32 %v536_v21, %v6600_v13 }
 0x17e   : > { %639 = vrot.lane.b32.xlu1 %v616_v0, %s6421_s24  ;;  %691 = vrot.lane.b32.xlu0 %v668_v1, %s6422_s27  ;;  %10867 = vst [vmem:[#allocation9_spill] sm:$0xff] %v6654_v32  ;;  %10868 = vst [vmem:[#allocation10_spill] sm:$0xff] %v6657_v33 }
 0x17f   : > { %10869 = vst [vmem:[#allocation11_spill] sm:$0xff] %v6660_v34  ;;  %10870 = vst [vmem:[#allocation12_spill] sm:$0xff] %v6675_v39 }
 0x182   : > { %635 = vrot.lane.b32.xlu0 %v614_v9, %s6421_s24  ;;  %581 = vrot.lane.b32.xlu1 %v561_v10, %s6420_s23 }
 0x186   : > { %743 = vrot.lane.b32.xlu0 %v720_v14, %s6423_s19  ;;  %689 = vrot.lane.b32.xlu1 %v667_v17, %s6422_s27 }
 0x187   : > { %v5850_v35 = vpop.eup %5849 }
 0x188   : > { %v940_v40 = vrot.slane %v5850_v35, %v555_v42  ;;  %v1044_v43 = vrot.slane %v5850_v35, %v659_v51  ;;  %v992_v44 = vrot.slane %v5850_v35, %v607_v45  ;;  %v6683_v49 = vrot.slane %v5850_v35, %v711_v62 }
 0x189   : > { %v6685_v50 = vrot.slane %v5850_v35, %v763_v2  ;;  %v6687_v52 = vrot.slane %v5850_v35, %v815_v5  ;;  %v6689_v53 = vrot.slane %v5850_v35, %v867_v63  ;;  %v6691_v54 = vrot.slane %v5850_v35, %v535_v8 }
 0x18a   : > { %633 = vrot.lane.b32.xlu1 %v613_v18, %s6421_s24  ;;  %579 = vrot.lane.b32.xlu0 %v560_v19, %s6420_s23  ;;  %v6696_v42 = vmul.f32 %v940_v40, %v6547_v56  ;;  %v6699_v41 = vmul.f32 %v1044_v43, %v6524_v46  ;;  %v6702_v45 = vmul.f32 %v940_v40, %v6529_v47 }
 0x18b   : > { %v6705_v51 = vmul.f32 %v992_v44, %v6547_v56  ;;  %v6708_v57 = vmul.f32 %v940_v40, %v6524_v46  ;;  %v6712_v58 = vmul.f32 %v6683_v49, %v6524_v46  ;;  %v6715_v59 = vmul.f32 %v992_v44, %v6529_v47 }
 0x18c   : > { %v6718_v60 = vmul.f32 %v940_v40, %v6581_v6  ;;  %v6721_v62 = vmul.f32 %v992_v44, %v6524_v46  ;;  %v6724_v63 = vmul.f32 %v1044_v43, %v6547_v56  ;;  %v6727_v0 = vmul.f32 %v940_v40, %v6571_v3 }
 0x18d   : > { %v6731_v1 = vmul.f32 %v6685_v50, %v6524_v46  ;;  %v6734_v2 = vmul.f32 %v1044_v43, %v6529_v47  ;;  %v6737_v5 = vmul.f32 %v992_v44, %v6581_v6  ;;  %v6740_v8 = vmul.f32 %v992_v44, %v6571_v3 }
 0x18e   : > { %741 = vrot.lane.b32.xlu1 %v719_v20, %s6423_s19  ;;  %687 = vrot.lane.b32.xlu0 %v666_v24, %s6422_s27  ;;  %v6746_v9 = vmul.f32 %v6683_v49, %v6547_v56  ;;  %v6750_v10 = vmul.f32 %v6683_v49, %v6529_v47  ;;  %v6754_v14 = vmul.f32 %v6687_v52, %v6524_v46 }
 0x18f   : > { %v6757_v17 = vmul.f32 %v940_v40, %v6607_v15  ;;  %v6760_v18 = vmul.f32 %v940_v40, %v6595_v12  ;;  %v6763_v19 = vmul.f32 %v1044_v43, %v6571_v3  ;;  %v6766_v20 = vmul.f32 %v1044_v43, %v6581_v6 }
 0x190   : > { %v6770_v21 = vmul.f32 %v6685_v50, %v6529_v47  ;;  %v6774_v24 = vmul.f32 %v6685_v50, %v6547_v56  ;;  %v6777_v35 = vmul.f32 %v992_v44, %v6607_v15  ;;  %v6781_v31 = vmul.f32 %v6689_v53, %v6524_v46 }
 0x191   : > { %v6785_v29 = vmul.f32 %v6683_v49, %v6571_v3  ;;  %v6788_v28 = vmul.f32 %v992_v44, %v6595_v12  ;;  %v6792_v23 = vmul.f32 %v6687_v52, %v6529_v47  ;;  %v6796_v22 = vmul.f32 %v6683_v49, %v6581_v6 }
 0x192   : > { %795 = vrot.lane.b32.xlu0 %v772_v25, %s6424_s20  ;;  %577 = vrot.lane.b32.xlu1 %v559_v26, %s6420_s23  ;;  %v6802_v39 = vmul.f32 %v6687_v52, %v6547_v56  ;;  %v6805_v33 = vmul.f32 %v940_v40, %v6600_v13  ;;  %v6808_v34 = vmul.f32 %v1044_v43, %v6595_v12 }
 0x193   : > { %v6811_v32 = vmul.f32 %v1044_v43, %v6607_v15  ;;  %v6815_v30 = vmul.f32 %v6685_v50, %v6581_v6  ;;  %v6819_v25 = vmul.f32 %v6685_v50, %v6571_v3  ;;  %v6823_v26 = vmul.f32 %v6689_v53, %v6547_v56 }
 0x194   : > { %10871 = vst [vmem:[#allocation13_spill] sm:$0xff] %v6808_v34  ;;  %v6827_v40 = vmul.f32 %v6689_v53, %v6529_v47  ;;  %v6831_v34 = vmul.f32 %v6683_v49, %v6595_v12 }
 0x195   : > { %10872 = vst [vmem:[#allocation14_spill] sm:$0xff] %v6811_v32  ;;  %10873 = vst [vmem:[#allocation15_spill] sm:$0xff] %v6815_v30  ;;  %v6834_v32 = vmul.f32 %v992_v44, %v6600_v13  ;;  %v6838_v30 = vmul.f32 %v6687_v52, %v6581_v6  ;;  %v6861_v44 = vmul.f32 %v6689_v53, %v6581_v6 }
 0x196   : > { %10874 = vst [vmem:[#allocation16_spill] sm:$0xff] %v6819_v25  ;;  %10875 = vst [vmem:[#allocation17_spill] sm:$0xff] %v6823_v26  ;;  %v6842_v25 = vmul.f32 %v6683_v49, %v6607_v15  ;;  %v6846_v26 = vmul.f32 %v6685_v50, %v6595_v12  ;;  %631 = vrot.lane.b32.xlu0 %v6637_v27, %s6421_s24  ;;  %685 = vrot.lane.b32.xlu1 %v6664_v36, %s6422_s27 }
 0x197   : > { %10876 = vst [vmem:[#allocation18_spill] sm:$0xff] %v6827_v40  ;;  %10877 = vst [vmem:[#allocation19_spill] sm:$0xff] %v6831_v34  ;;  %v6850_v40 = vmul.f32 %v6687_v52, %v6571_v3  ;;  %v6853_v34 = vmul.f32 %v1044_v43, %v6600_v13  ;;  %v6873_v43 = vmul.f32 %v6689_v53, %v6571_v3 }
 0x198   : > { %10878 = vst [vmem:[#allocation20_spill] sm:$0xff] %v6846_v26  ;;  %10880 = vst [vmem:[#allocation22_spill] sm:$0xff] %v6861_v44  ;;  %v6865_v26 = vmul.f32 %v6685_v50, %v6607_v15  ;;  %v6877_v27 = vmul.f32 %v6689_v53, %v6595_v12  ;;  %v6881_v36 = vmul.f32 %v6683_v49, %v6600_v13 }
 0x199   : > { %10879 = vst [vmem:[#allocation21_spill] sm:$0xff] %v6850_v40  ;;  %v6869_v40 = vmul.f32 %v6687_v52, %v6595_v12  ;;  %10883 = vst [vmem:[#allocation25_spill] sm:$0xff] %v6873_v43  ;;  %v6885_v44 = vmul.f32 %v6687_v52, %v6607_v15  ;;  %v6897_v43 = vmul.f32 %v6689_v53, %v6607_v15 }
 0x19a   : > { %10881 = vst [vmem:[#allocation23_spill] sm:$0xff] %v6865_v26  ;;  %10884 = vst [vmem:[#allocation26_spill] sm:$0xff] %v6881_v36  ;;  %v6889_v26 = vmul.f32 %v6685_v50, %v6600_v13  ;;  %v6901_v49 = vmul.f32 %v6687_v52, %v6600_v13  ;;  %v6905_v36 = vmul.f32 %v6691_v54, %v6529_v47  ;;  %739 = vrot.lane.b32.xlu0 %v6668_v37, %s6423_s19 }
 0x19b   : > { %10882 = vst [vmem:[#allocation24_spill] sm:$0xff] %v6869_v40  ;;  %v6893_v40 = vmul.f32 %v6691_v54, %v6547_v56  ;;  %v6909_v50 = vmul.f32 %v6689_v53, %v6600_v13  ;;  %793 = vrot.lane.b32.xlu1 %v6672_v38, %s6424_s20  ;;  %v6925_v52 = vmul.f32 %v6691_v54, %v6571_v3 }
 0x19c   : > { %10885 = vst [vmem:[#allocation27_spill] sm:$0xff] %v6889_v26  ;;  %10887 = vst [vmem:[#allocation29_spill] sm:$0xff] %v6905_v36  ;;  %v6913_v26 = vmul.f32 %v6691_v54, %v6524_v46  ;;  %v6929_v53 = vmul.f32 %v6691_v54, %v6607_v15  ;;  %v6933_v36 = vmul.f32 %v6691_v54, %v6595_v12 }
 0x19d   : > { %10886 = vst [vmem:[#allocation28_spill] sm:$0xff] %v6893_v40  ;;  %v6917_v40 = vmul.f32 %v6691_v54, %v6581_v6  ;;  %v824_v37 = vmul.f32 %v6609_v16, %v6524_v46  ;;  %v611_v38 = vmul.f32 %v6542_v55, %v6607_v15 }
 0x19e   : > { %10888 = vst [vmem:[#allocation30_spill] sm:$0xff] %v6913_v26  ;;  %10889 = vst [vmem:[#allocation31_spill] sm:$0xff] %v6929_v53  ;;  %v6937_v26 = vmul.f32 %v6691_v54, %v6600_v13  ;;  %v717_v53 = vmul.f32 %v6573_v4, %v6571_v3  ;;  %v823_v54 = vmul.f32 %v6609_v16, %v6529_v47 }
 0x19f   : > { %10890 = vst [vmem:[#allocation32_spill] sm:$0xff] %v6933_v36  ;;  %847 = vrot.lane.b32.xlu0 %v824_v37, %s6425_s21  ;;  %629 = vrot.lane.b32.xlu1 %v611_v38, %s6421_s24  ;;  %v558_v36 = vmul.f32 %v6533_v48, %v6595_v12  ;;  %v770_v37 = vmul.f32 %v6590_v11, %v6547_v56 }
 0x1a0   : > { %10891 = vst [vmem:[#allocation33_spill] sm:$0xff] %v6937_v26  ;;  %v664_v26 = vmul.f32 %v6557_v61, %v6581_v6  ;;  %v557_v38 = vmul.f32 %v6533_v48, %v6600_v13  ;;  %v769_v48 = vmul.f32 %v6590_v11, %v6571_v3 }
 0x1a3   : > { %737 = vrot.lane.b32.xlu1 %v717_v53, %s6423_s19  ;;  %575 = vrot.lane.b32.xlu0 %v558_v36, %s6420_s23  ;;  %v876_v36 = vmul.f32 %v6583_v7, %v6524_v46  ;;  %v663_v53 = vmul.f32 %v6557_v61, %v6607_v15  ;;  %v716_v46 = vmul.f32 %v6573_v4, %v6581_v6 }
 0x1a7   : > { %845 = vrot.lane.b32.xlu1 %v823_v54, %s6425_s21  ;;  %683 = vrot.lane.b32.xlu0 %v664_v26, %s6422_s27  ;;  %v610_v26 = vmul.f32 %v6542_v55, %v6595_v12  ;;  %v875_v54 = vmul.f32 %v6583_v7, %v6529_v47  ;;  %v715_v47 = vmul.f32 %v6573_v4, %v6607_v15 }
 0x1ab   : > { %791 = vrot.lane.b32.xlu0 %v770_v37, %s6424_s20  ;;  %573 = vrot.lane.b32.xlu1 %v557_v38, %s6420_s23  ;;  %v822_v37 = vmul.f32 %v6609_v16, %v6547_v56  ;;  %v609_v38 = vmul.f32 %v6542_v55, %v6600_v13  ;;  %v821_v55 = vmul.f32 %v6609_v16, %v6571_v3 }
 0x1af   : > { %899 = vrot.lane.b32.xlu0 %v876_v36, %s6426_s22  ;;  %681 = vrot.lane.b32.xlu1 %v663_v53, %s6422_s27  ;;  %v662_v36 = vmul.f32 %v6557_v61, %v6595_v12  ;;  %v768_v53 = vmul.f32 %v6590_v11, %v6581_v6 }
 0x1b3   : > { %627 = vrot.lane.b32.xlu0 %v610_v26, %s6421_s24  ;;  %789 = vrot.lane.b32.xlu1 %v769_v48, %s6424_s20  ;;  %v874_v26 = vmul.f32 %v6583_v7, %v6547_v56  ;;  %v661_v48 = vmul.f32 %v6557_v61, %v6600_v13  ;;  %v820_v56 = vmul.f32 %v6609_v16, %v6581_v6 }
 0x1b4   : > { %v873_v61 = vmul.f32 %v6583_v7, %v6571_v3  ;;  %v819_v3 = vmul.f32 %v6609_v16, %v6607_v15 }
 0x1b7   : > { %735 = vrot.lane.b32.xlu0 %v716_v46, %s6423_s19  ;;  %897 = vrot.lane.b32.xlu1 %v875_v54, %s6426_s22  ;;  %v714_v46 = vmul.f32 %v6573_v4, %v6595_v12  ;;  %v767_v54 = vmul.f32 %v6590_v11, %v6607_v15 }
 0x1bb   : > { %843 = vrot.lane.b32.xlu0 %v822_v37, %s6425_s21  ;;  %625 = vrot.lane.b32.xlu1 %v609_v38, %s6421_s24  ;;  %v766_v37 = vmul.f32 %v6590_v11, %v6595_v12  ;;  %v713_v38 = vmul.f32 %v6573_v4, %v6600_v13  ;;  %v765_v4 = vmul.f32 %v6590_v11, %v6600_v13 }
 0x1bf   : > { %679 = vrot.lane.b32.xlu0 %v662_v36, %s6422_s27  ;;  %733 = vrot.lane.b32.xlu1 %v715_v47, %s6423_s19  ;;  %v872_v36 = vmul.f32 %v6583_v7, %v6581_v6  ;;  %v818_v47 = vmul.f32 %v6609_v16, %v6595_v12  ;;  %v871_v6 = vmul.f32 %v6583_v7, %v6607_v15 }
 0x1c3   : > { %787 = vrot.lane.b32.xlu0 %v768_v53, %s6424_s20  ;;  %841 = vrot.lane.b32.xlu1 %v821_v55, %s6425_s21  ;;  %v817_v53 = vmul.f32 %v6609_v16, %v6600_v13 }
 0x1c7   : > { %895 = vrot.lane.b32.xlu0 %v874_v26, %s6426_s22  ;;  %677 = vrot.lane.b32.xlu1 %v661_v48, %s6422_s27  ;;  %v10896_v26 = vld [vmem:[#allocation11_spill] sm:$0xff] }
 0x1cb   : > { %731 = vrot.lane.b32.xlu0 %v714_v46, %s6423_s19  ;;  %785 = vrot.lane.b32.xlu1 %v767_v54, %s6424_s20 }
 0x1cf   : > { %839 = vrot.lane.b32.xlu0 %v820_v56, %s6425_s21  ;;  %893 = vrot.lane.b32.xlu1 %v873_v61, %s6426_s22  ;;  %v10897_v61 = vld [vmem:[#allocation15_spill] sm:$0xff] }
 0x1d3   : > { %783 = vrot.lane.b32.xlu0 %v766_v37, %s6424_s20  ;;  %729 = vrot.lane.b32.xlu1 %v713_v38, %s6423_s19  ;;  %v10898_v37 = vld [vmem:[#allocation16_spill] sm:$0xff] }
 0x1d7   : > { %891 = vrot.lane.b32.xlu0 %v872_v36, %s6426_s22  ;;  %837 = vrot.lane.b32.xlu1 %v819_v3, %s6425_s21 }
 0x1db   : > { %835 = vrot.lane.b32.xlu0 %v818_v47, %s6425_s21  ;;  %781 = vrot.lane.b32.xlu1 %v765_v4, %s6424_s20 }
 0x1df   : > { %889 = vrot.lane.b32.xlu1 %v871_v6, %s6426_s22  ;;  %967 = vrot.lane.b32.xlu0 %v6696_v42, %s6420_s23 }
 0x1e3   : > { %833 = vrot.lane.b32.xlu1 %v817_v53, %s6425_s21  ;;  %1075 = vrot.lane.b32.xlu0 %v6699_v41, %s6422_s27  ;;  %v10899_v53 = vld [vmem:[#allocation17_spill] sm:$0xff] }
 0x1e7   : > { %969 = vrot.lane.b32.xlu1 %v6702_v45, %s6420_s23  ;;  %1019 = vrot.lane.b32.xlu0 %v6705_v51, %s6421_s24 }
 0x1e8   : > { %v7049_v7 = vpop.permute.xlu1 %587  ;;  %v7051_v11 = vpop.permute.xlu0 %585 }
 0x1eb   : > { %971 = vrot.lane.b32.xlu1 %v6708_v57, %s6420_s23  ;;  %1127 = vrot.lane.b32.xlu0 %v6712_v58, %s6423_s19 }
 0x1ec   : > { %v7057_v12 = vpop.permute.xlu1 %637  ;;  %v584_v13 = vpop.permute.xlu0 %583 }
 0x1ef   : > { %1021 = vrot.lane.b32.xlu1 %v6715_v59, %s6421_s24  ;;  %963 = vrot.lane.b32.xlu0 %v6718_v60, %s6420_s23 }
 0x1f0   : > { %v7063_v15 = vpop.permute.xlu1 %639  ;;  %v7065_v16 = vpop.permute.xlu0 %691 }
 0x1f3   : > { %1023 = vrot.lane.b32.xlu1 %v6721_v62, %s6421_s24  ;;  %1071 = vrot.lane.b32.xlu0 %v6724_v63, %s6422_s27 }
 0x1f4   : > { %v7071_v42 = vpop.permute.xlu1 %581  ;;  %v636_v41 = vpop.permute.xlu0 %635 }
 0x1f7   : > { %965 = vrot.lane.b32.xlu1 %v6727_v0, %s6420_s23  ;;  %1179 = vrot.lane.b32.xlu0 %v6731_v1, %s6424_s20 }
 0x1f8   : > { %v7077_v45 = vpop.permute.xlu1 %689  ;;  %v7079_v51 = vpop.permute.xlu0 %743 }
 0x1fb   : > { %1073 = vrot.lane.b32.xlu1 %v6734_v2, %s6422_s27  ;;  %1015 = vrot.lane.b32.xlu0 %v6737_v5, %s6421_s24  ;;  %v10695_v2 = vmov 0  }
 0x1fc   : > { %v7085_v57 = vpop.permute.xlu1 %633  ;;  %v580_v58 = vpop.permute.xlu0 %579  ;;  %5820 = vset.pattern.permute.xlu0 %v10695_v2  ;;  %5819 = vset.pattern.permute.xlu1 %v10695_v2 }
 0x1fd   : > { %2021 = vmatprep.mubr.bf16.mxu0 %v10695_v2  ;;  %2387 = vmatprep.mubr.bf16.mxu1 %v10695_v2 }
 0x1ff   : > { %1017 = vrot.lane.b32.xlu1 %v6740_v8, %s6421_s24  ;;  %1123 = vrot.lane.b32.xlu0 %v6746_v9, %s6423_s19 }
 0x200   : > { %v7091_v59 = vpop.permute.xlu1 %741  ;;  %v688_v60 = vpop.permute.xlu0 %687 }
 0x203   : > { %1125 = vrot.lane.b32.xlu1 %v6750_v10, %s6423_s19  ;;  %1231 = vrot.lane.b32.xlu0 %v6754_v14, %s6425_s21 }
 0x204   : > { %v7097_v62 = vpop.permute.xlu1 %577  ;;  %v7099_v63 = vpop.permute.xlu0 %795 }
 0x207   : > { %961 = vrot.lane.b32.xlu1 %v6757_v17, %s6420_s23  ;;  %959 = vrot.lane.b32.xlu0 %v6760_v18, %s6420_s23 }
 0x208   : > { %v7105_v0 = vpop.permute.xlu1 %685  ;;  %v632_v1 = vpop.permute.xlu0 %631 }
 0x20b   : > { %1069 = vrot.lane.b32.xlu1 %v6763_v19, %s6422_s27  ;;  %1067 = vrot.lane.b32.xlu0 %v6766_v20, %s6422_s27 }
 0x20c   : > { %v740_v8 = vpop.permute.xlu0 %739 }
 0x20d   : > { %v7113_v5 = vpop.permute.xlu1 %793 }
 0x20f   : > { %1177 = vrot.lane.b32.xlu1 %v6770_v21, %s6424_s20  ;;  %1175 = vrot.lane.b32.xlu0 %v6774_v24, %s6424_s20  ;;  %v10893_v24 = vld [vmem:[#allocation14_spill] sm:$0xff] }
 0x211   : > { %v7121_v9 = vpop.permute.xlu1 %629  ;;  %v7123_v10 = vpop.permute.xlu0 %847 }
 0x213   : > { %1013 = vrot.lane.b32.xlu1 %v6777_v35, %s6421_s24  ;;  %1283 = vrot.lane.b32.xlu0 %v6781_v31, %s6426_s22 }
 0x215   : > { %v7129_v14 = vpop.permute.xlu1 %737  ;;  %v576_v17 = vpop.permute.xlu0 %575 }
 0x216   : > { %v598_v48 = vadd.f32 %v576_v17, %v10896_v26 }
 0x217   : > { %1121 = vrot.lane.b32.xlu1 %v6785_v29, %s6423_s19  ;;  %1011 = vrot.lane.b32.xlu0 %v6788_v28, %s6421_s24  ;;  %v10892_v28 = vld [vmem:[#allocation13_spill] sm:$0xff] }
 0x219   : > { %v7135_v18 = vpop.permute.xlu1 %845  ;;  %v684_v19 = vpop.permute.xlu0 %683 }
 0x21b   : > { %1229 = vrot.lane.b32.xlu1 %v6792_v23, %s6425_s21  ;;  %1119 = vrot.lane.b32.xlu0 %v6796_v22, %s6423_s19  ;;  %v10894_v23 = vld [vmem:[#allocation7_spill] sm:$0xff]  ;;  %v10895_v22 = vld [vmem:[#allocation9_spill] sm:$0xff] }
 0x21c   : > { %v602_v35 = vadd.f32 %v584_v13, %v10894_v23  ;;  %v600_v55 = vadd.f32 %v580_v58, %v10895_v22  ;;  %v10900_v13 = vld [vmem:[#allocation18_spill] sm:$0xff]  ;;  %v10903_v22 = vld [vmem:[#allocation21_spill] sm:$0xff] }
 0x21d   : > { %v574_v20 = vpop.permute.xlu1 %573  ;;  %v792_v31 = vpop.permute.xlu0 %791 }
 0x21e   : > { %v654_v54 = vadd.f32 %v636_v41, %v602_v35  ;;  %v10902_v35 = vld [vmem:[#allocation20_spill] sm:$0xff] }
 0x21f   : > { %1227 = vrot.lane.b32.xlu0 %v6802_v39, %s6425_s21  ;;  %957 = vrot.lane.b32.xlu1 %v6805_v33, %s6420_s23  ;;  %v652_v33 = vadd.f32 %v632_v1, %v600_v55 }
 0x220   : > { %v706_v38 = vadd.f32 %v688_v60, %v654_v54  ;;  %v10905_v54 = vld [vmem:[#allocation23_spill] sm:$0xff] }
 0x221   : > { %v682_v29 = vpop.permute.xlu1 %681  ;;  %v7145_v21 = vpop.permute.xlu0 %899  ;;  %v704_v36 = vadd.f32 %v684_v19, %v652_v33  ;;  %v10906_v33 = vld [vmem:[#allocation24_spill] sm:$0xff] }
 0x222   : > { %v758_v4 = vadd.f32 %v740_v8, %v706_v38 }
 0x223   : > { %1063 = vrot.lane.b32.xlu0 %v10892_v28, %s6422_s27  ;;  %1065 = vrot.lane.b32.xlu1 %v10893_v24, %s6422_s27  ;;  %v10901_v28 = vld [vmem:[#allocation19_spill] sm:$0xff] }
 0x224   : > { %v810_v41 = vadd.f32 %v792_v31, %v758_v4 }
 0x225   : > { %v7154_v46 = vpop.permute.xlu1 %789  ;;  %v628_v39 = vpop.permute.xlu0 %627 }
 0x226   : > { %v650_v56 = vadd.f32 %v628_v39, %v598_v48 }
 0x227   : > { %1171 = vrot.lane.b32.xlu0 %v10897_v61, %s6424_s20  ;;  %1173 = vrot.lane.b32.xlu1 %v10898_v37, %s6424_s20  ;;  %v10908_v37 = vld [vmem:[#allocation12_spill] sm:$0xff] }
 0x228   : > { %v597_v38 = vadd.f32 %v574_v20, %v10908_v37 }
 0x229   : > { %v7160_v3 = vpop.permute.xlu1 %897  ;;  %v736_v47 = vpop.permute.xlu0 %735 }
 0x22a   : > { %v756_v6 = vadd.f32 %v736_v47, %v704_v36 }
 0x22b   : > { %1279 = vrot.lane.b32.xlu0 %v10899_v53, %s6426_s22  ;;  %1281 = vrot.lane.b32.xlu1 %v10900_v13, %s6426_s22 }
 0x22d   : > { %v626_v58 = vpop.permute.xlu1 %625  ;;  %v844_v1 = vpop.permute.xlu0 %843 }
 0x22e   : > { %v862_v17 = vadd.f32 %v844_v1, %v810_v41  ;;  %v649_v4 = vadd.f32 %v626_v58, %v597_v38 }
 0x22f   : > { %1115 = vrot.lane.b32.xlu0 %v10901_v28, %s6423_s19  ;;  %1009 = vrot.lane.b32.xlu1 %v6834_v32, %s6421_s24  ;;  %v10911_v28 = vld [vmem:[#allocation3_spill] sm:$0xff] }
 0x231   : > { %v734_v60 = vpop.permute.xlu1 %733  ;;  %v680_v19 = vpop.permute.xlu0 %679 }
 0x232   : > { %v702_v8 = vadd.f32 %v680_v19, %v650_v56  ;;  %v10907_v56 = vld [vmem:[#allocation10_spill] sm:$0xff] }
 0x233   : > { %1223 = vrot.lane.b32.xlu0 %v6838_v30, %s6425_s21  ;;  %1117 = vrot.lane.b32.xlu1 %v6842_v25, %s6423_s19  ;;  %v10904_v30 = vld [vmem:[#allocation22_spill] sm:$0xff]  ;;  %v599_v61 = vadd.f32 %v7097_v62, %v10907_v56  ;;  %v10915_v56 = vld [vmem:[#allocation4_spill] sm:$0xff] }
 0x235   : > { %v7174_v24 = vpop.permute.xlu1 %841  ;;  %v788_v31 = vpop.permute.xlu0 %787  ;;  %v651_v47 = vadd.f32 %v7121_v9, %v599_v61 }
 0x236   : > { %v7176_v23 = vadd.f32 %v788_v31, %v756_v6  ;;  %v10909_v6 = vld [vmem:[#allocation25_spill] sm:$0xff] }
 0x237   : > { %1167 = vrot.lane.b32.xlu0 %v10902_v35, %s6424_s20  ;;  %1225 = vrot.lane.b32.xlu1 %v10903_v22, %s6425_s21  ;;  %v703_v53 = vadd.f32 %v682_v29, %v651_v47 }
 0x239   : > { %v678_v32 = vpop.permute.xlu1 %677  ;;  %v896_v55 = vpop.permute.xlu0 %895  ;;  %v755_v62 = vadd.f32 %v734_v60, %v703_v53  ;;  %v10912_v60 = vld [vmem:[#allocation27_spill] sm:$0xff] }
 0x23a   : > { %v7182_v26 = vadd.f32 %v896_v55, %v862_v17  ;;  %v701_v13 = vadd.f32 %v678_v32, %v649_v4  ;;  %v10910_v17 = vld [vmem:[#allocation26_spill] sm:$0xff] }
 0x23b   : > { %1061 = vrot.lane.b32.xlu1 %v6853_v34, %s6422_s27  ;;  %1275 = vrot.lane.b32.xlu0 %v10904_v30, %s6426_s22 }
 0x23d   : > { %v786_v25 = vpop.permute.xlu1 %785  ;;  %v732_v48 = vpop.permute.xlu0 %731 }
 0x23e   : > { %v7188_v39 = vadd.f32 %v732_v48, %v702_v8  ;;  %v807_v9 = vadd.f32 %v786_v25, %v755_v62 }
 0x23f   : > { %1169 = vrot.lane.b32.xlu1 %v10905_v54, %s6424_s20  ;;  %1219 = vrot.lane.b32.xlu0 %v10906_v33, %s6425_s21 }
 0x241   : > { %v7197_v36 = vpop.permute.xlu1 %893  ;;  %v7199_v34 = vpop.permute.xlu0 %839 }
 0x243   : > { %1277 = vrot.lane.b32.xlu1 %v10909_v6, %s6426_s22  ;;  %1271 = vrot.lane.b32.xlu0 %v6877_v27, %s6426_s22 }
 0x245   : > { %v730_v41 = vpop.permute.xlu1 %729  ;;  %v7206_v1 = vpop.permute.xlu0 %783 }
 0x246   : > { %v753_v20 = vadd.f32 %v730_v41, %v701_v13  ;;  %v10916_v41 = vld [vmem:[#allocation30_spill] sm:$0xff] }
 0x247   : > { %1113 = vrot.lane.b32.xlu1 %v10910_v17, %s6423_s19  ;;  %887 = vrot.lane.b32.xlu0 %v10911_v28, %s6426_s22 }
 0x249   : > { %v838_v58 = vpop.permute.xlu1 %837  ;;  %v7212_v19 = vpop.permute.xlu0 %891 }
 0x24a   : > { %v859_v8 = vadd.f32 %v838_v58, %v807_v9  ;;  %v10917_v58 = vld [vmem:[#allocation5_spill] sm:$0xff] }
 0x24b   : > { %1221 = vrot.lane.b32.xlu1 %v6885_v44, %s6425_s21 }
 0x24d   : > { %v782_v27 = vpop.permute.xlu1 %781  ;;  %v7216_v29 = vpop.permute.xlu0 %835 }
 0x24e   : > { %v805_v31 = vadd.f32 %v782_v27, %v753_v20 }
 0x24f   : > { %1165 = vrot.lane.b32.xlu1 %v10912_v60, %s6424_s20 }
 0x251   : > { %v890_v35 = vpop.permute.xlu1 %889  ;;  %v968_v22 = vpop.permute.xlu0 %967 }
 0x252   : > { %v7220_v32 = vadd.f32 %v890_v35, %v859_v8  ;;  %v604_v8 = vadd.f32 %v7049_v7, %v10917_v58  ;;  %v1308_v7 = vld [vmem:[%s10686_s1 + $0x38] sm:$0xff] }
 0x253   : > { %1273 = vrot.lane.b32.xlu1 %v6897_v43, %s6426_s22 }
 0x254   : > { %10913 = vst [vmem:[#allocation13_spill] sm:$0xff] %v7220_v32 }
 0x255   : > { %v834_v55 = vpop.permute.xlu1 %833  ;;  %v1076_v30 = vpop.permute.xlu0 %1075 }
 0x256   : > { %v7224_v25 = vadd.f32 %v834_v55, %v805_v31  ;;  %v656_v31 = vadd.f32 %v7063_v15, %v604_v8 }
 0x257   : > { %1217 = vrot.lane.b32.xlu1 %v6901_v49, %s6425_s21  ;;  %s10649_s21 = scalar_lea.vmem %s10694_s9, %s5768_s11 }
 0x258   : > { %10914 = vst [vmem:[#allocation14_spill] sm:$0xff] %v7224_v25 }
 0x259   : > { %v970_v44 = vpop.permute.xlu1 %969  ;;  %v1020_v48 = vpop.permute.xlu0 %1019 }
 0x25b   : > { %1269 = vrot.lane.b32.xlu1 %v6909_v50, %s6426_s22 }
 0x25d   : > { %v972_v54 = vpop.permute.xlu1 %971  ;;  %v1128_v33 = vpop.permute.xlu0 %1127 }
 0x25e   : > { %v988_v62 = vadd.f32 %v972_v54, %v10916_v41  ;;  %v708_v54 = vadd.f32 %v7065_v16, %v656_v31  ;;  %v10919_v31 = vld [vmem:[#allocation28_spill] sm:$0xff] }
 0x25f   : > { %885 = vrot.lane.b32.xlu1 %v10915_v56, %s6426_s22 }
 0x261   : > { %v1022_v61 = vpop.permute.xlu1 %1021  ;;  %v964_v37 = vpop.permute.xlu0 %963 }
 0x262   : > { %v7233_v43 = vadd.f32 %v964_v37, %v6917_v40 }
 0x265   : > { %v1024_v38 = vpop.permute.xlu1 %1023  ;;  %v1072_v47 = vpop.permute.xlu0 %1071 }
 0x266   : > { %v1040_v28 = vadd.f32 %v1024_v38, %v988_v62  ;;  %v760_v38 = vadd.f32 %v7079_v51, %v708_v54  ;;  %v10920_v54 = vld [vmem:[#allocation29_spill] sm:$0xff] }
 0x268   : > { %v1092_v27 = vadd.f32 %v1076_v30, %v1040_v28  ;;  %v812_v62 = vadd.f32 %v7099_v63, %v760_v38  ;;  %v987_v38 = vadd.f32 %v970_v44, %v10920_v54 }
 0x269   : > { %v7235_v4 = vpop.permute.xlu1 %965  ;;  %v1180_v49 = vpop.permute.xlu0 %1179 }
 0x26a   : > { %v1144_v55 = vadd.f32 %v1128_v33, %v1092_v27  ;;  %v864_v30 = vadd.f32 %v7123_v10, %v812_v62  ;;  %v10921_v10 = vld [vmem:[#allocation6_spill] sm:$0xff] }
 0x26c   : > { %v1196_v41 = vadd.f32 %v1180_v49, %v1144_v55  ;;  %v916_v16 = vadd.f32 %v7145_v21, %v864_v30  ;;  %v986_v55 = vadd.f32 %v968_v22, %v10919_v31 }
 0x26d   : > { %v1074_v6 = vpop.permute.xlu1 %1073  ;;  %v7237_v53 = vpop.permute.xlu0 %1015 }
 0x26e   : > { %v1038_v21 = vadd.f32 %v1020_v48, %v986_v55 }
 0x270   : > { %v1090_v30 = vadd.f32 %v1072_v47, %v1038_v21 }
 0x271   : > { %v7239_v13 = vpop.permute.xlu1 %1017  ;;  %v1124_v50 = vpop.permute.xlu0 %1123 }
 0x275   : > { %v1126_v20 = vpop.permute.xlu1 %1125  ;;  %v1232_v17 = vpop.permute.xlu0 %1231 }
 0x276   : > { %v1248_v2 = vadd.f32 %v1232_v17, %v1196_v41  ;;  %v1039_v41 = vadd.f32 %v1022_v61, %v987_v38  ;;  %v1036_v38 = vadd.f32 %v7237_v53, %v7233_v43 }
 0x279   : > { %v7242_v9 = vpop.permute.xlu1 %961  ;;  %v7244_v40 = vpop.permute.xlu0 %959 }
 0x27d   : > { %v7249_v60 = vpop.permute.xlu1 %1069  ;;  %v7251_v35 = vpop.permute.xlu0 %1067 }
 0x281   : > { %v1178_v56 = vpop.permute.xlu1 %1177  ;;  %v1176_v37 = vpop.permute.xlu0 %1175 }
 0x285   : > { %v7256_v25 = vpop.permute.xlu1 %1013  ;;  %v1284_v15 = vpop.permute.xlu0 %1283 }
 0x286   : > { %v1300_v33 = vadd.f32 %v1284_v15, %v1248_v2  ;;  %v603_v2 = vadd.f32 %v7051_v11, %v10921_v10 }
 0x288   : > { %v1316_v28 = vmul.f32 %v1308_v7, %v1300_v33  ;;  %v655_v15 = vadd.f32 %v7057_v12, %v603_v2  ;;  %v1091_v33 = vadd.f32 %v1074_v6, %v1039_v41  ;;  %v1307_v12 = vld [vmem:[%s10686_s1 + $0x30] sm:$0xff]  ;;  %v1088_v2 = vadd.f32 %v7251_v35, %v1036_v38 }
 0x289   : > { %v7263_v58 = vpop.permute.xlu1 %1121  ;;  %v1012_v51 = vpop.permute.xlu0 %1011  ;;  %v1323_v38 = vld [vmem:[%s10687_s2 + $0x30] sm:$0xff] }
 0x28a   : > { %v7265_v49 = vmul.f32 %v1316_v28, %v916_v16  ;;  %1378 = vperm.xlu0 %5820, %v1316_v28   ;;  %v707_v16 = vadd.f32 %v7077_v45, %v655_v15  ;;  %v1142_v28 = vadd.f32 %v1124_v50, %v1090_v30  ;;  %v1143_v32 = vadd.f32 %v1126_v20, %v1091_v33  ;;  %v1306_v45 = vld [vmem:[%s10686_s1 + $0x28] sm:$0xff] }
 0x28b   : > { %v985_v15 = vadd.f32 %v7235_v4, %v6925_v52  ;;  %v10922_v30 = vld [vmem:[#allocation32_spill] sm:$0xff]  ;;  %v860_v52 = vadd.f32 %v7199_v34, %v7176_v23 }
 0x28c   : > { %v759_v44 = vadd.f32 %v7091_v59, %v707_v16  ;;  %v1195_v31 = vadd.f32 %v1178_v56, %v1143_v32  ;;  %v1194_v54 = vadd.f32 %v1176_v37, %v1142_v28  ;;  %v10923_v16 = vld [vmem:[#allocation8_spill] sm:$0xff] }
 0x28d   : > { %v1230_v63 = vpop.permute.xlu1 %1229  ;;  %v1120_v17 = vpop.permute.xlu0 %1119  ;;  %v601_v28 = vadd.f32 %v7071_v42, %v10923_v16  ;;  %v1037_v43 = vadd.f32 %v7239_v13, %v985_v15  ;;  %v912_v13 = vadd.f32 %v7212_v19, %v860_v52 }
 0x28e   : > { %v811_v11 = vadd.f32 %v7113_v5, %v759_v44  ;;  %v1247_v48 = vadd.f32 %v1230_v63, %v1195_v31 }
 0x28f   : > { %v653_v35 = vadd.f32 %v7085_v57, %v601_v28  ;;  %v1089_v4 = vadd.f32 %v7249_v60, %v1037_v43 }
 0x290   : > { %v863_v50 = vadd.f32 %v7135_v18, %v811_v11 }
 0x291   : > { %v7267_v8 = vpop.permute.xlu1 %957  ;;  %v1228_v27 = vpop.permute.xlu0 %1227  ;;  %v705_v42 = vadd.f32 %v7105_v0, %v653_v35  ;;  %v1305_v0 = vld [vmem:[%s10686_s1 + $0x20] sm:$0xff] }
 0x292   : > { %10918 = vst [vmem:[#allocation7_spill] sm:$0xff] %v7267_v8  ;;  %v1246_v61 = vadd.f32 %v1228_v27, %v1194_v54  ;;  %v915_v32 = vadd.f32 %v7160_v3, %v863_v50  ;;  %v1140_v3 = vadd.f32 %v1120_v17, %v1088_v2  ;;  %v1304_v17 = vld [vmem:[%s10686_s1 + $0x18] sm:$0xff] }
 0x295   : > { %v7273_v62 = vpop.permute.xlu1 %1065  ;;  %v1064_v7 = vpop.permute.xlu0 %1063 }
 0x299   : > { %v1174_v8 = vpop.permute.xlu1 %1173  ;;  %v1172_v22 = vpop.permute.xlu0 %1171 }
 0x29a   : > { %v1192_v33 = vadd.f32 %v1172_v22, %v1140_v3 }
 0x29d   : > { %v1282_v47 = vpop.permute.xlu1 %1281  ;;  %v1280_v6 = vpop.permute.xlu0 %1279 }
 0x29e   : > { %v1299_v20 = vadd.f32 %v1282_v47, %v1247_v48  ;;  %v1298_v59 = vadd.f32 %v1280_v6, %v1246_v61 }
 0x2a0   : > { %v1315_v56 = vmul.f32 %v1307_v12, %v1299_v20  ;;  %v1314_v5 = vmul.f32 %v1306_v45, %v1298_v59  ;;  %v757_v12 = vadd.f32 %v7129_v14, %v705_v42 }
 0x2a1   : > { %v7287_v37 = vpop.permute.xlu1 %1009  ;;  %v1116_v63 = vpop.permute.xlu0 %1115 }
 0x2a2   : > { %v7289_v27 = vmul.f32 %v1315_v56, %v915_v32  ;;  %v7292_v55 = vmul.f32 %v1314_v5, %v7182_v26  ;;  %1373 = vperm.xlu1 %5819, %v1315_v56   ;;  %v982_v26 = vadd.f32 %v7244_v40, %v10922_v30  ;;  %v809_v23 = vadd.f32 %v7154_v46, %v757_v12  ;;  %v1322_v30 = vld [vmem:[%s10687_s2 + $0x28] sm:$0xff] }
 0x2a4   : > { %v1034_v53 = vadd.f32 %v1012_v51, %v982_v26  ;;  %v1141_v51 = vadd.f32 %v7263_v58, %v1089_v4  ;;  %v1302_v58 = vld [vmem:[%s10686_s1 + $0x8] sm:$0xff]  ;;  %v861_v14 = vadd.f32 %v7174_v24, %v809_v23  ;;  %v10925_v26 = vld [vmem:[#allocation33_spill] sm:$0xff]  ;;  %v1338_v28 = vsub.f32 %v1322_v30, %v7292_v55 }
 0x2a5   : > { %v7296_v10 = vpop.permute.xlu1 %1117  ;;  %v1224_v18 = vpop.permute.xlu0 %1223 }
 0x2a6   : > { %1368 = vperm.xlu1 %5819, %v1314_v5   ;;  %v1244_v44 = vadd.f32 %v1224_v18, %v1192_v33  ;;  %v1086_v40 = vadd.f32 %v1064_v7, %v1034_v53  ;;  %v1193_v47 = vadd.f32 %v1174_v8, %v1141_v51  ;;  %v806_v8 = vadd.f32 %v7206_v1, %v7188_v39  ;;  %v10924_v18 = vld [vmem:[#allocation31_spill] sm:$0xff] }
 0x2a7   : > { %v913_v46 = vadd.f32 %v7197_v36, %v861_v14  ;;  %v983_v24 = vadd.f32 %v7242_v9, %v10924_v18  ;;  %v1339_v1 = vsub.f32 %v1323_v38, %v7289_v27  ;;  %v10926_v33 = vld [vmem:[#allocation7_spill] sm:$0xff]  ;;  %v6379_v18 = vld [vmem:[%s6494_s14 + $0x70] sm:$0xff] }
 0x2a8   : > { %v1138_v57 = vadd.f32 %v1116_v63, %v1086_v40  ;;  %v858_v59 = vadd.f32 %v7216_v29, %v806_v8  ;;  %v981_v27 = vadd.f32 %v10926_v33, %v10925_v26  ;;  %v10927_v40 = vld [vmem:[#allocation13_spill] sm:$0xff]  ;;  %v1525_v8 = vld [vmem:[%s10691_s6 + $0x80] sm:$0xff] }
 0x2a9   : > { %v1226_v21 = vpop.permute.xlu1 %1225  ;;  %v1168_v41 = vpop.permute.xlu0 %1167  ;;  %v1035_v39 = vadd.f32 %v7256_v25, %v983_v24 }
 0x2aa   : > { %v1190_v45 = vadd.f32 %v1168_v41, %v1138_v57  ;;  %v1245_v34 = vadd.f32 %v1226_v21, %v1193_v47  ;;  %v1324_v21 = vld [vmem:[%s10687_s2 + $0x38] sm:$0xff]  ;;  %v1033_v43 = vadd.f32 %v7287_v37, %v981_v27  ;;  %v1318_v37 = vld [vmem:[%s10687_s2 + $0x8] sm:$0xff] }
 0x2ab   : > { %v1087_v41 = vadd.f32 %v7273_v62, %v1035_v39  ;;  %v1340_v9 = vsub.f32 %v1324_v21, %v7265_v49  ;;  %v1303_v49 = vld [vmem:[%s10686_s1 + $0x10] sm:$0xff]  ;;  %v10928_v47 = vld [vmem:[#allocation14_spill] sm:$0xff]  ;;  %v6381_v39 = vld [vmem:[%s6494_s14 + $0x60] sm:$0xff] }
 0x2ad   : > { %v1062_v31 = vpop.permute.xlu1 %1061  ;;  %v1276_v54 = vpop.permute.xlu0 %1275  ;;  %v1139_v15 = vadd.f32 %v7296_v10, %v1087_v41  ;;  %v1320_v10 = vld [vmem:[%s10687_s2 + $0x18] sm:$0xff] }
 0x2ae   : > { %v1296_v22 = vadd.f32 %v1276_v54, %v1244_v44  ;;  %v1085_v44 = vadd.f32 %v1062_v31, %v1033_v43  ;;  %v1301_v31 = vld [vmem:[%s10686_s1] sm:$0xff]  ;;  %v6383_v43 = vld [vmem:[%s6494_s14 + $0x50] sm:$0xff] }
 0x2b0   : > { %v1312_v11 = vmul.f32 %v1304_v17, %v1296_v22 }
 0x2b1   : > { %v1170_v48 = vpop.permute.xlu1 %1169  ;;  %v1220_v61 = vpop.permute.xlu0 %1219 }
 0x2b2   : > { %v1328_v6 = vmul.f32 %v1312_v11, %v912_v13  ;;  %1358 = vperm.xlu1 %5819, %v1312_v11   ;;  %v1242_v60 = vadd.f32 %v1220_v61, %v1190_v45  ;;  %v1191_v16 = vadd.f32 %v1170_v48, %v1139_v15  ;;  %v1526_v11 = vld [vmem:[%s10691_s6 + $0x88] sm:$0xff]  ;;  %v1321_v61 = vld [vmem:[%s10687_s2 + $0x20] sm:$0xff] }
 0x2b4   : > { %v1336_v17 = vsub.f32 %v1320_v10, %v1328_v6  ;;  %v1528_v6 = vld [vmem:[%s10691_s6 + $0x98] sm:$0xff] }
 0x2b5   : > { %v1278_v19 = vpop.permute.xlu1 %1277  ;;  %v1272_v7 = vpop.permute.xlu0 %1271  ;;  %v6384_v10 = vld [vmem:[%s6494_s14 + $0x58] sm:$0xff] }
 0x2b6   : > { %v1297_v50 = vadd.f32 %v1278_v19, %v1245_v34  ;;  %v1294_v20 = vadd.f32 %v1272_v7, %v1242_v60  ;;  %v1319_v60 = vld [vmem:[%s10687_s2 + $0x10] sm:$0xff]  ;;  %v1510_v7 = vld [vmem:[%s10691_s6 + $0x8] sm:$0xff] }
 0x2b8   : > { %v1313_v32 = vmul.f32 %v1305_v0, %v1297_v50  ;;  %v1310_v56 = vmul.f32 %v1302_v58, %v1294_v20  ;;  %v1512_v0 = vld [vmem:[%s10691_s6 + $0x18] sm:$0xff]  ;;  %v1317_v58 = vld [vmem:[%s10687_s2] sm:$0xff]  ;;  %v1527_v50 = vld [vmem:[%s10691_s6 + $0x90] sm:$0xff] }
 0x2b9   : > { %v1114_v5 = vpop.permute.xlu1 %1113  ;;  %v888_v63 = vpop.permute.xlu0 %887  ;;  %v1511_v20 = vld [vmem:[%s10691_s6 + $0x10] sm:$0xff] }
 0x2ba   : > { %v1329_v2 = vmul.f32 %v1313_v32, %v913_v46  ;;  %v910_v3 = vadd.f32 %v888_v63, %v858_v59  ;;  %1363 = vperm.xlu0 %5820, %v1313_v32   ;;  %1348 = vperm.xlu1 %5819, %v1310_v56   ;;  %v1137_v54 = vadd.f32 %v1114_v5, %v1085_v44  ;;  %v1509_v46 = vld [vmem:[%s10691_s6] sm:$0xff] }
 0x2bc   : > { %v1326_v36 = vmul.f32 %v1310_v56, %v910_v3  ;;  %v1337_v23 = vsub.f32 %v1321_v61, %v1329_v2  ;;  %v6380_v2 = vld [vmem:[%s6494_s14 + $0x78] sm:$0xff] }
 0x2bd   : > { %v1222_v29 = vpop.permute.xlu1 %1221 }
 0x2be   : > { %1429 = vperm.xlu1 %5819, %v1339_v1   ;;  %v1243_v62 = vadd.f32 %v1222_v29, %v1191_v16  ;;  %v1334_v42 = vsub.f32 %v1318_v37, %v1326_v36  ;;  %v6382_v1 = vld [vmem:[%s6494_s14 + $0x68] sm:$0xff] }
 0x2c1   : > { %v1166_v25 = vpop.permute.xlu1 %1165 }
 0x2c2   : > { %1434 = vperm.xlu1 %5819, %v1340_v9   ;;  %v1189_v4 = vadd.f32 %v1166_v25, %v1137_v54 }
 0x2c5   : > { %v1274_v53 = vpop.permute.xlu1 %1273 }
 0x2c6   : > { %v1295_v35 = vadd.f32 %v1274_v53, %v1243_v62  ;;  %1424 = vperm.xlu1 %5819, %v1338_v28   ;;  %v6385_v53 = vld [vmem:[%s6494_s14 + $0x40] sm:$0xff] }
 0x2c8   : > { %v1311_v52 = vmul.f32 %v1303_v49, %v1295_v35  ;;  %v6386_v35 = vld [vmem:[%s6494_s14 + $0x48] sm:$0xff] }
 0x2c9   : > { %v1218_v55 = vpop.permute.xlu1 %1217 }
 0x2ca   : > { %v1327_v22 = vmul.f32 %v1311_v52, %v10927_v40  ;;  %1353 = vperm.xlu0 %5820, %v1311_v52   ;;  %1414 = vperm.xlu1 %5819, %v1336_v17   ;;  %v1241_v13 = vadd.f32 %v1218_v55, %v1189_v4 }
 0x2cc   : > { %v1335_v19 = vsub.f32 %v1319_v60, %v1327_v22  ;;  %v6387_v22 = vld [vmem:[%s6494_s14 + $0x30] sm:$0xff] }
 0x2cd   : > { %v1270_v51 = vpop.permute.xlu1 %1269  ;;  %v6391_v60 = vld [vmem:[%s6494_s14 + $0x10] sm:$0xff] }
 0x2ce   : > { %v1293_v57 = vadd.f32 %v1270_v51, %v1241_v13  ;;  %1404 = vperm.xlu1 %5819, %v1334_v42   ;;  %v6388_v13 = vld [vmem:[%s6494_s14 + $0x38] sm:$0xff]  ;;  %v6389_v51 = vld [vmem:[%s6494_s14 + $0x20] sm:$0xff] }
 0x2d0   : > { %v1309_v48 = vmul.f32 %v1301_v31, %v1293_v57 }
 0x2d1   : > { %v886_v12 = vpop.permute.xlu1 %885 }
 0x2d2   : > { %v909_v45 = vadd.f32 %v886_v12, %v10928_v47  ;;  %1343 = vperm.xlu0 %5820, %v1309_v48   ;;  %1644 = vperm.xlu1 %5819, %v1526_v11   ;;  %v6390_v11 = vld [vmem:[%s6494_s14 + $0x28] sm:$0xff] }
 0x2d4   : > { %v1325_v34 = vmul.f32 %v1309_v48, %v909_v45 }
 0x2d6   : > { %1419 = vperm.xlu0 %5820, %v1337_v23   ;;  %1654 = vperm.xlu1 %5819, %v1528_v6   ;;  %v1333_v14 = vsub.f32 %v1317_v58, %v1325_v34 }
 0x2da   : > { %1409 = vperm.xlu0 %5820, %v1335_v19   ;;  %1574 = vperm.xlu1 %5819, %v1512_v0   ;;  %v6392_v19 = vld [vmem:[%s6494_s14 + $0x18] sm:$0xff] }
 0x2de   : > { %1399 = vperm.xlu0 %5820, %v1333_v14   ;;  %1564 = vperm.xlu1 %5819, %v1510_v7   ;;  %v6393_v14 = vld [vmem:[%s6494_s14] sm:$0xff] }
 0x2e2   : > { %1639 = vperm.xlu0 %5820, %v1525_v8  }
 0x2e6   : > { %1649 = vperm.xlu0 %5820, %v1527_v50   ;;  %v6394_v50 = vld [vmem:[%s6494_s14 + $0x8] sm:$0xff] }
 0x2ea   : > { %1569 = vperm.xlu0 %5820, %v1511_v20  }
 0x2ee   : > { %1559 = vperm.xlu0 %5820, %v1509_v46  }
 0x305   : > { %v1379_v63 = vpop.permute.xlu0 %1378 }
 0x306   : > { %v1395_v24 = vmul.f32 %v6379_v18, %v1379_v63  ;;  %v1396_v3 = vmul.f32 %v6380_v2, %v1379_v63 }
 0x31d   : > { %v1374_v59 = vpop.permute.xlu1 %1373 }
 0x31e   : > { %v1393_v36 = vmul.f32 %v6381_v39, %v1374_v59  ;;  %v1394_v29 = vmul.f32 %v6382_v1, %v1374_v59  ;;  %v5822_v39 = vld [vmem:[%s10690_s5 + $0x8] sm:$0xff]   ;;  %v5824_v1 = vld [vmem:[%s10690_s5 + $0x18] sm:$0xff]  }
 0x321   : > { %v1369_v32 = vpop.permute.xlu1 %1368 }
 0x322   : > { %v1391_v62 = vmul.f32 %v6383_v43, %v1369_v32  ;;  %v1392_v49 = vmul.f32 %v6384_v10, %v1369_v32  ;;  %v5837_v43 = vld [vmem:[%s10690_s5 + $0x80] sm:$0xff]  }
 0x32d   : > { %v1359_v56 = vpop.permute.xlu1 %1358 }
 0x32e   : > { %v1387_v42 = vmul.f32 %v6387_v22, %v1359_v56  ;;  %v1388_v31 = vmul.f32 %v6388_v13, %v1359_v56 }
 0x335   : > { %v1349_v5 = vpop.permute.xlu1 %1348  ;;  %v1364_v33 = vpop.permute.xlu0 %1363 }
 0x336   : > { %v1389_v44 = vmul.f32 %v6385_v53, %v1364_v33  ;;  %v1390_v17 = vmul.f32 %v6386_v35, %v1364_v33  ;;  %v1383_v0 = vmul.f32 %v6391_v60, %v1349_v5  ;;  %v1384_v58 = vmul.f32 %v6392_v19, %v1349_v5  ;;  %v5821_v5 = vld [vmem:[%s10690_s5] sm:$0xff]  }
 0x337   : > { %v5833_v33 = vld [vmem:[%s10690_s5 + $0x60] sm:$0xff]  }
 0x339   : > { %v1430_v38 = vpop.permute.xlu1 %1429 }
 0x33a   : > { %v1449_v41 = vadd.f32 %v1430_v38, %v1393_v36  ;;  %v1450_v15 = vadd.f32 %v1430_v38, %v1394_v29  ;;  %v5823_v36 = vld [vmem:[%s10690_s5 + $0x10] sm:$0xff]   ;;  %v5825_v29 = vld [vmem:[%s10690_s5 + $0x20] sm:$0xff]  }
 0x33d   : > { %v1435_v21 = vpop.permute.xlu1 %1434 }
 0x33e   : > { %v1451_v9 = vadd.f32 %v1435_v21, %v1395_v24  ;;  %v1452_v30 = vadd.f32 %v1435_v21, %v1396_v3  ;;  %v10929_v3 = vmov 0   ;;  %v5826_v21 = vld [vmem:[%s10690_s5 + $0x28] sm:$0xff]  }
 0x340   : > { %v1459_v25 = vpack.c.bf16 %v1451_v9, %v1449_v41  ;;  %v1460_v26 = vpack.c.bf16 %v1452_v30, %v1450_v15  ;;  %v5827_v41 = vld [vmem:[%s10690_s5 + $0x30] sm:$0xff]   ;;  %v5828_v15 = vld [vmem:[%s10690_s5 + $0x38] sm:$0xff]   ;;  %v5829_v9 = vld [vmem:[%s10690_s5 + $0x40] sm:$0xff]  }
 0x341   : > { %v1425_v16 = vpop.permute.xlu1 %1424  ;;  %v5830_v30 = vld [vmem:[%s10690_s5 + $0x48] sm:$0xff]  }
 0x342   : > { %1997 = vmatprep.subr.bf16.mxu0 %v1460_v26  ;;  %v1447_v37 = vadd.f32 %v1425_v16, %v1391_v62  ;;  %v1448_v55 = vadd.f32 %v1425_v16, %v1392_v49  ;;  %v5832_v26 = vld [vmem:[%s10690_s5 + $0x58] sm:$0xff]   ;;  %v5835_v16 = vld [vmem:[%s10690_s5 + $0x70] sm:$0xff]   ;;  %v5838_v62 = vld [vmem:[%s10690_s5 + $0x88] sm:$0xff]  }
 0x343   : > { %1998 = vmatpush1.bf16.msra.mxu0 %v1459_v25  ;;  %v5831_v25 = vld [vmem:[%s10690_s5 + $0x50] sm:$0xff]  }
 0x345   : > { %v1354_v27 = vpop.permute.xlu0 %1353  ;;  %v1415_v54 = vpop.permute.xlu1 %1414 }
 0x346   : > { %v1385_v57 = vmul.f32 %v6389_v51, %v1354_v27  ;;  %v1386_v48 = vmul.f32 %v6390_v11, %v1354_v27  ;;  %v1443_v45 = vadd.f32 %v1415_v54, %v1387_v42  ;;  %v1444_v6 = vadd.f32 %v1415_v54, %v1388_v31  ;;  %v5834_v27 = vld [vmem:[%s10690_s5 + $0x68] sm:$0xff]  }
 0x349   : > { %v1405_v7 = vpop.permute.xlu1 %1404 }
 0x34a   : > { %v1439_v56 = vadd.f32 %v1405_v7, %v1383_v0  ;;  %v1440_v63 = vadd.f32 %v1405_v7, %v1384_v58 }
 0x34d   : > { %v1344_v28 = vpop.permute.xlu0 %1343  ;;  %v7502_v10 = vpop.permute.xlu1 %1644 }
 0x34e   : > { %v1381_v8 = vmul.f32 %v6393_v14, %v1344_v28  ;;  %v1382_v20 = vmul.f32 %v6394_v50, %v1344_v28  ;;  %v5836_v28 = vld [vmem:[%s10690_s5 + $0x78] sm:$0xff]  }
 0x351   : > { %v1420_v52 = vpop.permute.xlu0 %1419 }
 0x352   : > { %v1445_v4 = vadd.f32 %v1420_v52, %v1389_v44  ;;  %v1446_v40 = vadd.f32 %v1420_v52, %v1390_v17  ;;  %v7504_v44 = vpop.permute.xlu1 %1654 }
 0x354   : > { %v1457_v61 = vpack.c.bf16 %v1447_v37, %v1445_v4  ;;  %v1458_v12 = vpack.c.bf16 %v1448_v55, %v1446_v40 }
 0x355   : > { %v1410_v47 = vpop.permute.xlu0 %1409 }
 0x356   : > { %v1441_v23 = vadd.f32 %v1410_v47, %v1385_v57  ;;  %v1442_v34 = vadd.f32 %v1410_v47, %v1386_v48  ;;  %1999 = vmatprep.subr.bf16.mxu0 %v1458_v12  ;;  %v1575_v37 = vpop.permute.xlu1 %1574 }
 0x357   : > { %2000 = vmatpush1.bf16.msra.mxu0 %v1457_v61 }
 0x358   : > { %v1455_v46 = vpack.c.bf16 %v1443_v45, %v1441_v23  ;;  %v1456_v59 = vpack.c.bf16 %v1444_v6, %v1442_v34 }
 0x359   : > { %v1400_v32 = vpop.permute.xlu0 %1399 }
 0x35a   : > { %v1437_v38 = vadd.f32 %v1400_v32, %v1381_v8  ;;  %v1438_v18 = vadd.f32 %v1400_v32, %v1382_v20  ;;  %2001 = vmatprep.subr.bf16.mxu0 %v1456_v59  ;;  %v1565_v42 = vpop.permute.xlu1 %1564 }
 0x35b   : > { %2002 = vmatpush1.bf16.msra.mxu0 %v1455_v46 }
 0x35c   : > { %v1453_v24 = vpack.c.bf16 %v1439_v56, %v1437_v38  ;;  %v1454_v2 = vpack.c.bf16 %v1440_v63, %v1438_v18 }
 0x35d   : > { %v1640_v49 = vpop.permute.xlu0 %1639 }
 0x35e   : > { %2003 = vmatprep.subr.bf16.mxu0 %v1454_v2 }
 0x35f   : > { %2004 = vmatpush1.bf16.msra.mxu0 %v1453_v24 }
 0x361   : > { %v7506_v17 = vpop.permute.xlu0 %1649 }
 0x362   : > { %5642 = vmatmul.mubr.msk.bf16.vlgmr.msra.gmra.mxu0 %vm359_vm0, %v5821_v5 }
 0x363   : > { %2031 = vmatprep.mubr.bf16.mxu0 %v10929_v3 }
 0x365   : > { %v1570_v4 = vpop.permute.xlu0 %1569 }
 0x369   : > { %v1560_v48 = vpop.permute.xlu0 %1559 }
 0x36a   : > { %5643 = vmatmul.mubr.msk.bf16.gmra.mxu0 %vm359_vm0, %v5822_v39 }
 0x36b   : > { %2041 = vmatprep.mubr.bf16.mxu0 %v10929_v3 }
 0x372   : > { %5644 = vmatmul.mubr.msk.bf16.gmra.mxu0 %vm359_vm0, %v5823_v36 }
 0x373   : > { %2051 = vmatprep.mubr.bf16.mxu0 %v10929_v3 }
 0x37a   : > { %5645 = vmatmul.mubr.msk.bf16.gmra.mxu0 %vm359_vm0, %v5824_v1 }
 0x37b   : > { %2061 = vmatprep.mubr.bf16.mxu0 %v10929_v3 }
 0x382   : > { %5646 = vmatmul.mubr.msk.bf16.gmra.mxu0 %vm359_vm0, %v5825_v29 }
 0x383   : > { %2071 = vmatprep.mubr.bf16.mxu0 %v10929_v3 }
 0x38a   : > { %5647 = vmatmul.mubr.msk.bf16.gmra.mxu0 %vm359_vm0, %v5826_v21 }
 0x38b   : > { %2081 = vmatprep.mubr.bf16.mxu0 %v10929_v3 }
 0x392   : > { %5648 = vmatmul.mubr.msk.bf16.gmra.mxu0 %vm359_vm0, %v5827_v41 }
 0x393   : > { %2091 = vmatprep.mubr.bf16.mxu0 %v10929_v3 }
 0x39a   : > { %5649 = vmatmul.mubr.msk.bf16.gmra.mxu0 %vm359_vm0, %v5828_v15 }
 0x39b   : > { %2101 = vmatprep.mubr.bf16.mxu0 %v10929_v3 }
 0x3a2   : > { %5650 = vmatmul.mubr.msk.bf16.gmra.mxu0 %vm359_vm0, %v5829_v9 }
 0x3a3   : > { %2111 = vmatprep.mubr.bf16.mxu0 %v10929_v3 }
 0x3aa   : > { %5651 = vmatmul.mubr.msk.bf16.gmra.mxu0 %vm359_vm0, %v5830_v30 }
 0x3ab   : > { %2121 = vmatprep.mubr.bf16.mxu0 %v10929_v3 }
 0x3b2   : > { %5652 = vmatmul.mubr.msk.bf16.gmra.mxu0 %vm359_vm0, %v5831_v25 }
 0x3b3   : > { %2131 = vmatprep.mubr.bf16.mxu0 %v10929_v3 }
 0x3ba   : > { %5653 = vmatmul.mubr.msk.bf16.gmra.mxu0 %vm359_vm0, %v5832_v26 }
 0x3bb   : > { %2141 = vmatprep.mubr.bf16.mxu0 %v10929_v3 }
 0x3c2   : > { %5654 = vmatmul.mubr.msk.bf16.gmra.mxu0 %vm359_vm0, %v5833_v33 }
 0x3c3   : > { %2151 = vmatprep.mubr.bf16.mxu0 %v10929_v3 }
 0x3ca   : > { %5655 = vmatmul.mubr.msk.bf16.gmra.mxu0 %vm359_vm0, %v5834_v27 }
 0x3cb   : > { %2161 = vmatprep.mubr.bf16.mxu0 %v10929_v3 }
 0x3d2   : > { %5656 = vmatmul.mubr.msk.bf16.gmra.mxu0 %vm359_vm0, %v5835_v16 }
 0x3d3   : > { %2171 = vmatprep.mubr.bf16.mxu0 %v10929_v3 }
 0x3da   : > { %5657 = vmatmul.mubr.msk.bf16.gmra.mxu0 %vm359_vm0, %v5836_v28 }
 0x3db   : > { %2181 = vmatprep.mubr.bf16.mxu0 %v10929_v3 }
 0x3e2   : > { %5658 = vmatmul.mubr.msk.bf16.gmra.mxu0 %vm359_vm0, %v5837_v43 }
 0x3e3   : > { %2191 = vmatprep.mubr.bf16.mxu0 %v10929_v3 }
 0x3ea   : > { %5659 = vmatmul.mubr.msk.bf16.gmra.mxu0 %vm359_vm0, %v5838_v62  ;;  %v5839_v62 = vld [vmem:[%s10690_s5 + $0x90] sm:$0xff]  }
 0x3eb   : > { %2201 = vmatprep.mubr.bf16.mxu0 %v10929_v3 }
 0x3f2   : > { %5660 = vmatmul.mubr.msk.bf16.gmra.mxu0 %vm359_vm0, %v5839_v62 }
 0x3f3   : > { %2211 = vmatprep.mubr.bf16.mxu0 %v10929_v3 }
 0x422   : > { %v2023_v53 = vpop.f32.mrf.mxu0 }
 0x423   : > { %v2024_v0 = vadd.f32 %v2023_v53, %v1560_v48 }
 0x424   : > { %v2025_v35 = vpop.f32.mrf.mxu0 }
 0x425   : > { %v2026_v47 = vadd.f32 %v2025_v35, %v1560_v48 }
 0x426   : > { %v2027_v54 = vpop.f32.mrf.mxu0 }
 0x427   : > { %v2028_v6 = vadd.f32 %v2027_v54, %v1565_v42 }
 0x428   : > { %v2029_v52 = vpop.f32.mrf.mxu0 }
 0x429   : > { %v2030_v51 = vadd.f32 %v2029_v52, %v1565_v42  ;;  %v2262_v58 = vpack.c.bf16 %v2028_v6, %v2024_v0  ;;  %v1530_v42 = vld [vmem:[%s10691_s6 + $0xa8] sm:$0xff] }
 0x42a   : > { %v2033_v55 = vpop.f32.mrf.mxu0  ;;  %v1514_v6 = vld [vmem:[%s10691_s6 + $0x28] sm:$0xff] }
 0x42b   : > { %v2034_v61 = vadd.f32 %v2033_v55, %v1570_v4  ;;  %v2263_v60 = vpack.c.bf16 %v2030_v51, %v2026_v47  ;;  %v1541_v51 = vld [vmem:[%s10691_s6 + $0x100] sm:$0xff]  ;;  %v1515_v47 = vld [vmem:[%s10691_s6 + $0x30] sm:$0xff] }
 0x42c   : > { %v2035_v40 = vpop.f32.mrf.mxu0 }
 0x42d   : > { %v2036_v57 = vadd.f32 %v2035_v40, %v1570_v4  ;;  %v5840_v40 = vld [vmem:[%s10690_s5 + $0x98] sm:$0xff]  }
 0x42e   : > { %v2037_v22 = vpop.f32.mrf.mxu0  ;;  %5661 = vmatmul.mubr.msk.bf16.gmra.mxu0 %vm359_vm0, %v5840_v40 }
 0x42f   : > { %v2038_v13 = vadd.f32 %v2037_v22, %v1575_v37  ;;  %2221 = vmatprep.mubr.bf16.mxu0 %v10929_v3 }
 0x430   : > { %v2039_v31 = vpop.f32.mrf.mxu0 }
 0x431   : > { %v2040_v11 = vadd.f32 %v2039_v31, %v1575_v37  ;;  %v2264_v23 = vpack.c.bf16 %v2038_v13, %v2034_v61  ;;  %v1531_v13 = vld [vmem:[%s10691_s6 + $0xb0] sm:$0xff]  ;;  %v1542_v31 = vld [vmem:[%s10691_s6 + $0x108] sm:$0xff]  ;;  %v1516_v61 = vld [vmem:[%s10691_s6 + $0x38] sm:$0xff] }
 0x432   : > { %v7508_v12 = vpop.f32.mrf.mxu0 }
 0x433   : > { %10930 = vst [vmem:[#allocation9_spill] sm:$0xff] %v7508_v12  ;;  %v2265_v45 = vpack.c.bf16 %v2040_v11, %v2036_v57  ;;  %v1544_v57 = vld [vmem:[%s10691_s6 + $0x118] sm:$0xff]  ;;  %v1543_v11 = vld [vmem:[%s10691_s6 + $0x110] sm:$0xff] }
 0x434   : > { %v7510_v34 = vpop.f32.mrf.mxu0 }
 0x435   : > { %10931 = vst [vmem:[#allocation11_spill] sm:$0xff] %v7510_v34  ;;  %2367 = vmatprep.subr.bf16.mxu1 %v2265_v45 }
 0x436   : > { %v7512_v19 = vpop.f32.mrf.mxu0  ;;  %2368 = vmatpush1.bf16.msra.mxu1 %v2264_v23  ;;  %v1513_v23 = vld [vmem:[%s10691_s6 + $0x20] sm:$0xff] }
 0x437   : > { %10932 = vst [vmem:[#allocation15_spill] sm:$0xff] %v7512_v19  ;;  %2369 = vmatprep.subr.bf16.mxu1 %v2263_v60 }
 0x438   : > { %v7514_v7 = vpop.f32.mrf.mxu0 }
 0x439   : > { %10933 = vst [vmem:[#allocation16_spill] sm:$0xff] %v7514_v7 }
 0x43a   : > { %v7516_v14 = vpop.f32.mrf.mxu0  ;;  %2370 = vmatpush1.bf16.msra.mxu1 %v2262_v58 }
 0x43c   : > { %v7518_v8 = vpop.f32.mrf.mxu0 }
 0x43e   : > { %v7520_v50 = vpop.f32.mrf.mxu0 }
 0x440   : > { %v7522_v20 = vpop.f32.mrf.mxu0 }
 0x442   : > { %v7524_v46 = vpop.f32.mrf.mxu0 }
 0x443   : > { %10934 = vst [vmem:[#allocation17_spill] sm:$0xff] %v7524_v46 }
 0x444   : > { %v7526_v59 = vpop.f32.mrf.mxu0 }
 0x445   : > { %10935 = vst [vmem:[#allocation18_spill] sm:$0xff] %v7526_v59 }
 0x446   : > { %v7528_v32 = vpop.f32.mrf.mxu0 }
 0x447   : > { %10936 = vst [vmem:[#allocation19_spill] sm:$0xff] %v7528_v32 }
 0x448   : > { %v7530_v56 = vpop.f32.mrf.mxu0 }
 0x449   : > { %10937 = vst [vmem:[#allocation20_spill] sm:$0xff] %v7530_v56 }
 0x44a   : > { %v7532_v63 = vpop.f32.mrf.mxu0 }
 0x44c   : > { %v7534_v38 = vpop.f32.mrf.mxu0 }
 0x44e   : > { %v7536_v18 = vpop.f32.mrf.mxu0 }
 0x450   : > { %v7538_v24 = vpop.f32.mrf.mxu0 }
 0x452   : > { %v7540_v2 = vpop.f32.mrf.mxu0 }
 0x453   : > { %10938 = vst [vmem:[#allocation21_spill] sm:$0xff] %v7540_v2 }
 0x454   : > { %v7542_v5 = vpop.f32.mrf.mxu0 }
 0x455   : > { %10939 = vst [vmem:[#allocation22_spill] sm:$0xff] %v7542_v5 }
 0x456   : > { %v7544_v39 = vpop.f32.mrf.mxu0 }
 0x457   : > { %10940 = vst [vmem:[#allocation23_spill] sm:$0xff] %v7544_v39 }
 0x458   : > { %v7546_v36 = vpop.f32.mrf.mxu0 }
 0x459   : > { %10941 = vst [vmem:[#allocation24_spill] sm:$0xff] %v7546_v36 }
 0x45a   : > { %v7548_v1 = vpop.f32.mrf.mxu0 }
 0x45b   : > { %10942 = vst [vmem:[#allocation10_spill] sm:$0xff] %v7548_v1 }
 0x45c   : > { %v7550_v29 = vpop.f32.mrf.mxu0 }
 0x45d   : > { %10943 = vst [vmem:[#allocation12_spill] sm:$0xff] %v7550_v29 }
 0x45e   : > { %v7552_v21 = vpop.f32.mrf.mxu0 }
 0x45f   : > { %10944 = vst [vmem:[#allocation25_spill] sm:$0xff] %v7552_v21 }
 0x460   : > { %v7554_v41 = vpop.f32.mrf.mxu0 }
 0x461   : > { %10945 = vst [vmem:[#allocation26_spill] sm:$0xff] %v7554_v41 }
 0x462   : > { %v2103_v15 = vpop.f32.mrf.mxu0 }
 0x463   : > { %v2104_v25 = vadd.f32 %v2103_v15, %v1640_v49 }
 0x464   : > { %v2105_v9 = vpop.f32.mrf.mxu0 }
 0x465   : > { %v2106_v27 = vadd.f32 %v2105_v9, %v1640_v49 }
 0x466   : > { %v2107_v30 = vpop.f32.mrf.mxu0 }
 0x467   : > { %v2108_v26 = vadd.f32 %v2107_v30, %v7502_v10 }
 0x468   : > { %v2109_v33 = vpop.f32.mrf.mxu0 }
 0x469   : > { %v2266_v16 = vpack.c.bf16 %v2108_v26, %v2104_v25  ;;  %v2110_v28 = vadd.f32 %v2109_v33, %v7502_v10 }
 0x46a   : > { %v2113_v43 = vpop.f32.mrf.mxu0 }
 0x46b   : > { %v2267_v53 = vpack.c.bf16 %v2110_v28, %v2106_v27  ;;  %2274 = vxpose.xlu0.c.b16.start [1/2] (short) %v2266_v16, 128  ;;  %v2114_v52 = vadd.f32 %v2113_v43, %v7506_v17 }
 0x46c   : > { %v2115_v35 = vpop.f32.mrf.mxu0 }
 0x46d   : > { %2290 = vxpose.xlu1.c.b16.start [1/2] (short) %v2267_v53, 128  ;;  %v2116_v10 = vadd.f32 %v2115_v35, %v7506_v17  ;;  %v1532_v17 = vld [vmem:[%s10691_s6 + $0xb8] sm:$0xff] }
 0x46e   : > { %v2117_v54 = vpop.f32.mrf.mxu0 }
 0x46f   : > { %v2118_v49 = vadd.f32 %v2117_v54, %v7504_v44 }
 0x470   : > { %v2119_v37 = vpop.f32.mrf.mxu0 }
 0x471   : > { %v2268_v55 = vpack.c.bf16 %v2118_v49, %v2114_v52  ;;  %v2120_v4 = vadd.f32 %v2119_v37, %v7504_v44  ;;  %v1529_v44 = vld [vmem:[%s10691_s6 + $0xa0] sm:$0xff] }
 0x472   : > { %v7596_v48 = vpop.f32.mrf.mxu0 }
 0x473   : > { %v2269_v22 = vpack.c.bf16 %v2120_v4, %v2116_v10  ;;  %2275 = vxpose.xlu0.c.b16.end [2/2] (short) %v2268_v55, 128 }
 0x474   : > { %v7604_v45 = vpop.f32.mrf.mxu0 }
 0x475   : > { %2291 = vxpose.xlu1.c.b16.end [2/2] (short) %v2269_v22, 128 }
 0x476   : > { %v7612_v60 = vpop.f32.mrf.mxu0 }
 0x478   : > { %v7614_v0 = vpop.f32.mrf.mxu0 }
 0x47a   : > { %v7616_v58 = vpop.f32.mrf.mxu0 }
 0x47c   : > { %v7618_v15 = vpop.f32.mrf.mxu0 }
 0x47e   : > { %v7620_v9 = vpop.f32.mrf.mxu0 }
 0x480   : > { %v7622_v30 = vpop.f32.mrf.mxu0 }
 0x482   : > { %v7624_v25 = vpop.f32.mrf.mxu0 }
 0x484   : > { %v7626_v26 = vpop.f32.mrf.mxu0 }
 0x486   : > { %v7628_v33 = vpop.f32.mrf.mxu0 }
 0x488   : > { %v7630_v27 = vpop.f32.mrf.mxu0 }
 0x48a   : > { %v7632_v16 = vpop.f32.mrf.mxu0 }
 0x48c   : > { %v7634_v43 = vpop.f32.mrf.mxu0 }
 0x48e   : > { %v7638_v62 = vpop.f32.mrf.mxu0 }
 0x490   : > { %v7640_v35 = vpop.f32.mrf.mxu0 }
 0x491   : > { %1664 = vperm.xlu1 %5819, %v1530_v42  }
 0x492   : > { %v7644_v52 = vpop.f32.mrf.mxu0 }
 0x493   : > { %10946 = vst [vmem:[#allocation3_spill] sm:$0xff] %v7644_v52 }
 0x494   : > { %1659 = vperm.xlu0 %5820, %v1529_v44   ;;  %v7646_v37 = vpop.f32.mrf.mxu0 }
 0x495   : > { %1674 = vperm.xlu1 %5819, %v1532_v17   ;;  %10947 = vst [vmem:[#allocation27_spill] sm:$0xff] %v7646_v37 }
 0x496   : > { %v7652_v55 = vpop.f32.mrf.mxu0 }
 0x497   : > { %10948 = vst [vmem:[#allocation4_spill] sm:$0xff] %v7652_v55 }
 0x498   : > { %1669 = vperm.xlu0 %5820, %v1531_v13   ;;  %v7656_v22 = vpop.f32.mrf.mxu0 }
 0x499   : > { %1724 = vperm.xlu1 %5819, %v1542_v31   ;;  %10949 = vst [vmem:[#allocation30_spill] sm:$0xff] %v7656_v22 }
 0x49a   : > { %v7660_v42 = vpop.f32.mrf.mxu0 }
 0x49b   : > { %10950 = vst [vmem:[#allocation5_spill] sm:$0xff] %v7660_v42 }
 0x49c   : > { %1719 = vperm.xlu0 %5820, %v1541_v51   ;;  %v7664_v13 = vpop.f32.mrf.mxu0 }
 0x49d   : > { %1734 = vperm.xlu1 %5819, %v1544_v57   ;;  %10951 = vst [vmem:[#allocation28_spill] sm:$0xff] %v7664_v13  ;;  %v5841_v57 = vld [vmem:[%s10690_s5 + $0xa0] sm:$0xff]  }
 0x49e   : > { %v7670_v51 = vpop.f32.mrf.mxu0  ;;  %5662 = vmatmul.mubr.msk.bf16.gmra.mxu0 %vm359_vm0, %v5841_v57 }
 0x49f   : > { %10952 = vst [vmem:[#allocation29_spill] sm:$0xff] %v7670_v51  ;;  %2231 = vmatprep.mubr.bf16.mxu0 %v10929_v3 }
 0x4a0   : > { %1729 = vperm.xlu0 %5820, %v1543_v11  }
 0x4a1   : > { %1594 = vperm.xlu1 %5819, %v1516_v61   ;;  %v7676_v61 = vpop.f32.mrf.mxu0 }
 0x4a2   : > { %10953 = vst [vmem:[#allocation6_spill] sm:$0xff] %v7676_v61 }
 0x4a4   : > { %1589 = vperm.xlu0 %5820, %v1515_v47  }
 0x4a5   : > { %1584 = vperm.xlu1 %5819, %v1514_v6   ;;  %v2183_v6 = vpop.f32.mrf.mxu0 }
 0x4a8   : > { %1579 = vperm.xlu0 %5820, %v1513_v23  }
 0x4d1   : > { %v2282_v28 = vpop.trf.xlu0 }
 0x4d2   : > { %5666 = vmatmul.mubr.msk.bf16.vlgmr.msra.gmra.mxu1 %vm2306_vm1, %v2282_v28 }
 0x4d3   : > { %2397 = vmatprep.mubr.bf16.mxu1 %v10929_v3  ;;  %v2298_v54 = vpop.trf.xlu1 }
 0x4d5   : > { %v2283_v53 = vpop.trf.xlu0 }
 0x4d7   : > { %v7649_v10 = vpop.trf.xlu1 }
 0x4d9   : > { %v2284_v49 = vpop.trf.xlu0 }
 0x4da   : > { %5667 = vmatmul.mubr.msk.bf16.gmra.mxu1 %vm2306_vm1, %v2283_v53  ;;  %v7685_v53 = vpop.f32.mrf.mxu0 }
 0x4db   : > { %2407 = vmatprep.mubr.bf16.mxu1 %v10929_v3  ;;  %v7654_v40 = vpop.trf.xlu1 }
 0x4dd   : > { %v2285_v4 = vpop.trf.xlu0 }
 0x4df   : > { %v7662_v44 = vpop.trf.xlu1 }
 0x4e1   : > { %v2286_v17 = vpop.trf.xlu0 }
 0x4e2   : > { %5668 = vmatmul.mubr.msk.bf16.gmra.mxu1 %vm2306_vm1, %v2284_v49  ;;  %v2187_v49 = vpop.f32.mrf.mxu0 }
 0x4e3   : > { %2417 = vmatprep.mubr.bf16.mxu1 %v10929_v3  ;;  %v7668_v31 = vpop.trf.xlu1 }
 0x4e4   : > { %v7691_v57 = vpop.f32.mrf.mxu0 }
 0x4e5   : > { %v2287_v11 = vpop.trf.xlu0 }
 0x4e6   : > { %v2193_v39 = vpop.f32.mrf.mxu0 }
 0x4e7   : > { %v7680_v47 = vpop.trf.xlu1 }
 0x4e8   : > { %v2195_v56 = vpop.f32.mrf.mxu0 }
 0x4e9   : > { %v2288_v23 = vpop.trf.xlu0 }
 0x4ea   : > { %5669 = vmatmul.mubr.msk.bf16.gmra.mxu1 %vm2306_vm1, %v2285_v4 }
 0x4eb   : > { %2427 = vmatprep.mubr.bf16.mxu1 %v10929_v3  ;;  %v7683_v28 = vpop.trf.xlu1 }
 0x4ef   : > { %v7689_v4 = vpop.trf.xlu1 }
 0x4f2   : > { %5670 = vmatmul.mubr.msk.bf16.gmra.mxu1 %vm2306_vm1, %v2286_v17  ;;  %v2289_v17 = vpop.trf.xlu0 }
 0x4f3   : > { %2437 = vmatprep.mubr.bf16.mxu1 %v10929_v3 }
 0x4fa   : > { %5671 = vmatmul.mubr.msk.bf16.gmra.mxu1 %vm2306_vm1, %v2287_v11 }
 0x4fb   : > { %2447 = vmatprep.mubr.bf16.mxu1 %v10929_v3 }
 0x502   : > { %5672 = vmatmul.mubr.msk.bf16.gmra.mxu1 %vm2306_vm1, %v2288_v23 }
 0x503   : > { %2457 = vmatprep.mubr.bf16.mxu1 %v10929_v3 }
 0x50a   : > { %5673 = vmatmul.mubr.msk.bf16.gmra.mxu1 %vm2306_vm1, %v2289_v17 }
 0x50b   : > { %2467 = vmatprep.mubr.bf16.mxu1 %v10929_v3 }
 0x50c   : > { %v1665_v11 = vpop.permute.xlu1 %1664 }
 0x50d   : > { %v2128_v36 = vadd.f32 %v7612_v60, %v1665_v11  ;;  %v2130_v5 = vadd.f32 %v7614_v0, %v1665_v11 }
 0x50f   : > { %v1660_v2 = vpop.permute.xlu0 %1659 }
 0x510   : > { %v2124_v23 = vadd.f32 %v7596_v48, %v1660_v2  ;;  %v2126_v32 = vadd.f32 %v7604_v45, %v1660_v2  ;;  %v1675_v46 = vpop.permute.xlu1 %1674  ;;  %v2197_v2 = vpop.f32.mrf.mxu0 }
 0x511   : > { %v2138_v17 = vadd.f32 %v7620_v9, %v1675_v46  ;;  %v2140_v7 = vadd.f32 %v7622_v30, %v1675_v46 }
 0x512   : > { %v3015_v59 = vpack.c.bf16 %v2128_v36, %v2124_v23  ;;  %v3016_v19 = vpack.c.bf16 %v2130_v5, %v2126_v32  ;;  %5674 = vmatmul.mubr.msk.bf16.gmra.mxu1 %vm2306_vm1, %v2298_v54  ;;  %v2199_v46 = vpop.f32.mrf.mxu0 }
 0x513   : > { %v1670_v12 = vpop.permute.xlu0 %1669  ;;  %2477 = vmatprep.mubr.bf16.mxu1 %v10929_v3 }
 0x514   : > { %v2134_v60 = vadd.f32 %v7616_v58, %v1670_v12  ;;  %v2136_v0 = vadd.f32 %v7618_v15, %v1670_v12  ;;  %v7705_v48 = vpop.permute.xlu1 %1724  ;;  %3039 = vxpose.xlu1.c.b16.start [1/2] (short) %v3016_v19, 128  ;;  %3023 = vxpose.xlu0.c.b16.start [1/2] (short) %v3015_v59, 128  ;;  %v5842_v12 = vld [vmem:[%s10690_s5 + $0xa8] sm:$0xff]  }
 0x515   : > { %v7708_v45 = vadd.f32 %v2187_v49, %v7705_v48  ;;  %5663 = vmatmul.mubr.msk.bf16.gmra.mxu0 %vm359_vm0, %v5842_v12  ;;  %v1518_v12 = vld [vmem:[%s10691_s6 + $0x48] sm:$0xff] }
 0x516   : > { %v3017_v36 = vpack.c.bf16 %v2138_v17, %v2134_v60  ;;  %v3018_v32 = vpack.c.bf16 %v2140_v7, %v2136_v0  ;;  %2241 = vmatprep.mubr.bf16.mxu0 %v10929_v3 }
 0x517   : > { %v1720_v5 = vpop.permute.xlu0 %1719  ;;  %10954 = vst [vmem:[#allocation32_spill] sm:$0xff] %v7708_v45 }
 0x518   : > { %v7710_v9 = vadd.f32 %v2183_v6, %v1720_v5  ;;  %v1735_v54 = vpop.permute.xlu1 %1734  ;;  %3040 = vxpose.xlu1.c.b16.end [2/2] (short) %v3018_v32, 128  ;;  %3024 = vxpose.xlu0.c.b16.end [2/2] (short) %v3017_v36, 128  ;;  %v1520_v36 = vld [vmem:[%s10691_s6 + $0x58] sm:$0xff]  ;;  %v1547_v32 = vld [vmem:[%s10691_s6 + $0x130] sm:$0xff] }
 0x519   : > { %v7722_v59 = vadd.f32 %v2197_v2, %v1735_v54  ;;  %v7724_v58 = vadd.f32 %v2199_v46, %v1735_v54  ;;  %v5844_v2 = vld [vmem:[%s10690_s5 + $0xb8] sm:$0xff]   ;;  %v2186_v54 = vadd.f32 %v7685_v53, %v1720_v5  ;;  %v2190_v46 = vadd.f32 %v7691_v57, %v7705_v48  ;;  %v1517_v53 = vld [vmem:[%s10691_s6 + $0x40] sm:$0xff] }
 0x51a   : > { %10955 = vst [vmem:[#allocation8_spill] sm:$0xff] %v7710_v9  ;;  %5675 = vmatmul.mubr.msk.bf16.gmra.mxu1 %vm2306_vm1, %v7649_v10 }
 0x51b   : > { %v1730_v7 = vpop.permute.xlu0 %1729  ;;  %2487 = vmatprep.mubr.bf16.mxu1 %v10929_v3  ;;  %10956 = vst [vmem:[#allocation31_spill] sm:$0xff] %v7722_v59  ;;  %10957 = vst [vmem:[#allocation33_spill] sm:$0xff] %v7724_v58 }
 0x51c   : > { %v7726_v15 = vadd.f32 %v2193_v39, %v1730_v7  ;;  %v7728_v30 = vadd.f32 %v2195_v56, %v1730_v7  ;;  %v1595_v6 = vpop.permute.xlu1 %1594  ;;  %v2271_v7 = vpack.c.bf16 %v2190_v46, %v2186_v54 }
 0x51d   : > { %v7735_v23 = vadd.f32 %v7520_v50, %v1595_v6  ;;  %v7738_v17 = vadd.f32 %v7522_v20, %v1595_v6  ;;  %v1533_v50 = vld [vmem:[%s10691_s6 + $0xc0] sm:$0xff]  ;;  %v5843_v20 = vld [vmem:[%s10690_s5 + $0xb0] sm:$0xff]  }
 0x51e   : > { %10958 = vst [vmem:[#allocation7_spill] sm:$0xff] %v7726_v15  ;;  %10959 = vst [vmem:[#allocation13_spill] sm:$0xff] %v7728_v30  ;;  %5664 = vmatmul.mubr.msk.bf16.gmra.mxu0 %vm359_vm0, %v5843_v20 }
 0x51f   : > { %v1590_v11 = vpop.permute.xlu0 %1589  ;;  %10960 = vst [vmem:[#allocation14_spill] sm:$0xff] %v7735_v23  ;;  %10961 = vst [vmem:[#allocation34_spill] sm:$0xff] %v7738_v17  ;;  %2251 = vmatprep.mubr.bf16.mxu0 %v10929_v3 }
 0x520   : > { %v7741_v60 = vadd.f32 %v7516_v14, %v1590_v11  ;;  %v7744_v56 = vadd.f32 %v7518_v8, %v1590_v11  ;;  %v1534_v14 = vld [vmem:[%s10691_s6 + $0xc8] sm:$0xff]  ;;  %v1536_v8 = vld [vmem:[%s10691_s6 + $0xd8] sm:$0xff]  ;;  %v7815_v5 = vpop.permute.xlu1 %1584 }
 0x521   : > { %10964 = vst [vmem:[#allocation37_spill] sm:$0xff] %v7815_v5 }
 0x522   : > { %10962 = vst [vmem:[#allocation35_spill] sm:$0xff] %v7741_v60  ;;  %10963 = vst [vmem:[#allocation36_spill] sm:$0xff] %v7744_v56  ;;  %5676 = vmatmul.mubr.msk.bf16.gmra.mxu1 %vm2306_vm1, %v7654_v40  ;;  %v1546_v40 = vld [vmem:[%s10691_s6 + $0x128] sm:$0xff] }
 0x523   : > { %2497 = vmatprep.mubr.bf16.mxu1 %v10929_v3  ;;  %v7819_v11 = vpop.permute.xlu0 %1579 }
 0x524   : > { %10966 = vst [vmem:[#allocation39_spill] sm:$0xff] %v7819_v11 }
 0x526   : > { %5665 = vmatmul.mubr.msk.bf16.gmra.mxu0 %vm359_vm0, %v5844_v2 }
 0x52a   : > { %5677 = vmatmul.mubr.msk.bf16.gmra.mxu1 %vm2306_vm1, %v7662_v44  ;;  %v1535_v44 = vld [vmem:[%s10691_s6 + $0xd0] sm:$0xff] }
 0x52b   : > { %2507 = vmatprep.mubr.bf16.mxu1 %v10929_v3 }
 0x532   : > { %5678 = vmatmul.mubr.msk.bf16.gmra.mxu1 %vm2306_vm1, %v7668_v31  ;;  %v1548_v31 = vld [vmem:[%s10691_s6 + $0x138] sm:$0xff] }
 0x533   : > { %2517 = vmatprep.mubr.bf16.mxu1 %v10929_v3 }
 0x534   : > { %1684 = vperm.xlu1 %5819, %v1534_v14  }
 0x538   : > { %1694 = vperm.xlu1 %5819, %v1536_v8  }
 0x539   : > { %1679 = vperm.xlu0 %5820, %v1533_v50  }
 0x53a   : > { %5679 = vmatmul.mubr.msk.bf16.gmra.mxu1 %vm2306_vm1, %v7680_v47  ;;  %v1545_v47 = vld [vmem:[%s10691_s6 + $0x120] sm:$0xff] }
 0x53b   : > { %2527 = vmatprep.mubr.bf16.mxu1 %v10929_v3 }
 0x53c   : > { %1744 = vperm.xlu1 %5819, %v1546_v40  }
 0x53d   : > { %1689 = vperm.xlu0 %5820, %v1535_v44  }
 0x540   : > { %1754 = vperm.xlu1 %5819, %v1548_v31  }
 0x541   : > { %1739 = vperm.xlu0 %5820, %v1545_v47  }
 0x542   : > { %5680 = vmatmul.mubr.msk.bf16.gmra.mxu1 %vm2306_vm1, %v7683_v28  ;;  %v1519_v28 = vld [vmem:[%s10691_s6 + $0x50] sm:$0xff] }
 0x543   : > { %2537 = vmatprep.mubr.bf16.mxu1 %v10929_v3 }
 0x544   : > { %1614 = vperm.xlu1 %5819, %v1520_v36  }
 0x545   : > { %1749 = vperm.xlu0 %5820, %v1547_v32  }
 0x548   : > { %1604 = vperm.xlu1 %5819, %v1518_v12  }
 0x549   : > { %1609 = vperm.xlu0 %5820, %v1519_v28  }
 0x54a   : > { %5681 = vmatmul.mubr.msk.bf16.gmra.mxu1 %vm2306_vm1, %v7689_v4 }
 0x54b   : > { %2952 = vmatprep.mubr.bf16.mxu1 %v2271_v7  ;;  %v2203_v7 = vpop.f32.mrf.mxu0 }
 0x54d   : > { %1599 = vperm.xlu0 %5820, %v1517_v53   ;;  %v2205_v19 = vpop.f32.mrf.mxu0 }
 0x576   : > { %v7817_v6 = vpop.trf.xlu1  ;;  %v7821_v14 = vpop.trf.xlu0 }
 0x577   : > { %10965 = vst [vmem:[#allocation38_spill] sm:$0xff] %v7817_v6  ;;  %10967 = vst [vmem:[#allocation40_spill] sm:$0xff] %v7821_v14 }
 0x57a   : > { %v7823_v57 = vpop.trf.xlu1  ;;  %v7825_v48 = vpop.trf.xlu0 }
 0x57b   : > { %10968 = vst [vmem:[#allocation41_spill] sm:$0xff] %v7823_v57  ;;  %10969 = vst [vmem:[#allocation42_spill] sm:$0xff] %v7825_v48 }
 0x57e   : > { %v7827_v8 = vpop.trf.xlu1  ;;  %v7829_v4 = vpop.trf.xlu0 }
 0x57f   : > { %10970 = vst [vmem:[#allocation43_spill] sm:$0xff] %v7827_v8  ;;  %10971 = vst [vmem:[#allocation44_spill] sm:$0xff] %v7829_v4  ;;  %v2207_v8 = vpop.f32.mrf.mxu0 }
 0x582   : > { %v7831_v50 = vpop.trf.xlu1  ;;  %v7839_v31 = vpop.trf.xlu0 }
 0x583   : > { %10972 = vst [vmem:[#allocation45_spill] sm:$0xff] %v7831_v50  ;;  %10973 = vst [vmem:[#allocation46_spill] sm:$0xff] %v7839_v31 }
 0x586   : > { %v7841_v47 = vpop.trf.xlu1  ;;  %v7849_v54 = vpop.trf.xlu0 }
 0x587   : > { %10974 = vst [vmem:[#allocation47_spill] sm:$0xff] %v7841_v47  ;;  %10975 = vst [vmem:[#allocation48_spill] sm:$0xff] %v7849_v54  ;;  %v2209_v54 = vpop.f32.mrf.mxu0 }
 0x589   : > { %v2213_v14 = vpop.f32.mrf.mxu0 }
 0x58a   : > { %v7851_v12 = vpop.trf.xlu1  ;;  %v7859_v49 = vpop.trf.xlu0 }
 0x58b   : > { %10976 = vst [vmem:[#allocation49_spill] sm:$0xff] %v7851_v12  ;;  %10978 = vst [vmem:[#allocation51_spill] sm:$0xff] %v7859_v49 }
 0x58e   : > { %v7861_v39 = vpop.trf.xlu1  ;;  %v7869_v50 = vpop.trf.xlu0 }
 0x58f   : > { %10979 = vst [vmem:[#allocation52_spill] sm:$0xff] %v7861_v39  ;;  %10981 = vst [vmem:[#allocation54_spill] sm:$0xff] %v7869_v50 }
 0x592   : > { %v7833_v20 = vpop.f32.mrf.mxu1  ;;  %v7871_v12 = vpop.trf.xlu1 }
 0x593   : > { %10982 = vst [vmem:[#allocation55_spill] sm:$0xff] %v7871_v12  ;;  %v7879_v39 = vpop.trf.xlu0 }
 0x594   : > { %v7835_v40 = vpop.f32.mrf.mxu1  ;;  %10983 = vst [vmem:[#allocation56_spill] sm:$0xff] %v7879_v39  ;;  %v2215_v39 = vpop.f32.mrf.mxu0 }
 0x596   : > { %v7837_v44 = vpop.f32.mrf.mxu1 }
 0x598   : > { %v7843_v2 = vpop.f32.mrf.mxu1 }
 0x59a   : > { %v7845_v36 = vpop.f32.mrf.mxu1 }
 0x59b   : > { %v2548_v41 = vmax.f32 %v7833_v20, %v7845_v36 }
 0x59c   : > { %v7847_v32 = vpop.f32.mrf.mxu1 }
 0x59e   : > { %v7853_v28 = vpop.f32.mrf.mxu1 }
 0x59f   : > { %v2549_v29 = vmax.f32 %v7837_v44, %v7853_v28 }
 0x5a0   : > { %v7855_v46 = vpop.f32.mrf.mxu1 }
 0x5a1   : > { %10977 = vst [vmem:[#allocation50_spill] sm:$0xff] %v7855_v46 }
 0x5a2   : > { %v7857_v53 = vpop.f32.mrf.mxu1 }
 0x5a4   : > { %v7863_v10 = vpop.f32.mrf.mxu1 }
 0x5a6   : > { %v7865_v0 = vpop.f32.mrf.mxu1 }
 0x5a8   : > { %v7867_v47 = vpop.f32.mrf.mxu1 }
 0x5a9   : > { %10980 = vst [vmem:[#allocation53_spill] sm:$0xff] %v7867_v47 }
 0x5aa   : > { %v7873_v57 = vpop.f32.mrf.mxu1 }
 0x5ac   : > { %v7875_v6 = vpop.f32.mrf.mxu1 }
 0x5ae   : > { %v7877_v49 = vpop.f32.mrf.mxu1 }
 0x5af   : > { %v1685_v31 = vpop.permute.xlu1 %1684 }
 0x5b0   : > { %v7881_v4 = vpop.f32.mrf.mxu1  ;;  %v2148_v15 = vadd.f32 %v7628_v33, %v1685_v31  ;;  %v2150_v59 = vadd.f32 %v7630_v27, %v1685_v31 }
 0x5b1   : > { %10984 = vst [vmem:[#allocation57_spill] sm:$0xff] %v7881_v4 }
 0x5b2   : > { %v7883_v48 = vpop.f32.mrf.mxu1 }
 0x5b3   : > { %10985 = vst [vmem:[#allocation58_spill] sm:$0xff] %v7883_v48  ;;  %v1695_v3 = vpop.permute.xlu1 %1694 }
 0x5b4   : > { %v7885_v50 = vpop.f32.mrf.mxu1  ;;  %v1680_v12 = vpop.permute.xlu0 %1679  ;;  %v2158_v56 = vadd.f32 %v7638_v62, %v1695_v3  ;;  %v2160_v34 = vadd.f32 %v7640_v35, %v1695_v3 }
 0x5b5   : > { %10986 = vst [vmem:[#allocation59_spill] sm:$0xff] %v7885_v50  ;;  %v2144_v60 = vadd.f32 %v7624_v25, %v1680_v12  ;;  %v2146_v23 = vadd.f32 %v7626_v26, %v1680_v12  ;;  %v2217_v25 = vpop.f32.mrf.mxu0 }
 0x5b6   : > { %v7891_v30 = vpop.f32.mrf.mxu1 }
 0x5b7   : > { %v3763_v58 = vpack.c.bf16 %v2148_v15, %v2144_v60  ;;  %v3764_v9 = vpack.c.bf16 %v2150_v59, %v2146_v23  ;;  %v1745_v45 = vpop.permute.xlu1 %1744 }
 0x5b8   : > { %v7894_v17 = vpop.f32.mrf.mxu1  ;;  %v1690_v5 = vpop.permute.xlu0 %1689  ;;  %v7901_v23 = vadd.f32 %v2207_v8, %v1745_v45  ;;  %v2210_v12 = vadd.f32 %v2209_v54, %v1745_v45 }
 0x5b9   : > { %10987 = vst [vmem:[#allocation60_spill] sm:$0xff] %v7894_v17  ;;  %v2154_v33 = vadd.f32 %v7632_v16, %v1690_v5  ;;  %v2156_v27 = vadd.f32 %v7634_v43, %v1690_v5  ;;  %3787 = vxpose.xlu1.c.b16.start [1/2] (short) %v3764_v9, 128  ;;  %3771 = vxpose.xlu0.c.b16.start [1/2] (short) %v3763_v58, 128  ;;  %v2219_v16 = vpop.f32.mrf.mxu0 }
 0x5ba   : > { %v7899_v26 = vpop.f32.mrf.mxu1  ;;  %10989 = vst [vmem:[#allocation62_spill] sm:$0xff] %v7901_v23 }
 0x5bb   : > { %10988 = vst [vmem:[#allocation61_spill] sm:$0xff] %v7899_v26  ;;  %v3765_v31 = vpack.c.bf16 %v2158_v56, %v2154_v33  ;;  %v3766_v15 = vpack.c.bf16 %v2160_v34, %v2156_v27  ;;  %v1755_v59 = vpop.permute.xlu1 %1754  ;;  %v1537_v33 = vld [vmem:[%s10691_s6 + $0xe0] sm:$0xff] }
 0x5bc   : > { %v7903_v62 = vpop.f32.mrf.mxu1  ;;  %v1740_v60 = vpop.permute.xlu0 %1739  ;;  %v7913_v56 = vadd.f32 %v2217_v25, %v1755_v59  ;;  %v7915_v5 = vadd.f32 %v2219_v16, %v1755_v59 }
 0x5bd   : > { %v7905_v11 = vadd.f32 %v2203_v7, %v1740_v60  ;;  %v2206_v3 = vadd.f32 %v2205_v19, %v1740_v60  ;;  %3788 = vxpose.xlu1.c.b16.end [2/2] (short) %v3766_v15, 128  ;;  %3772 = vxpose.xlu0.c.b16.end [2/2] (short) %v3765_v31, 128  ;;  %v1540_v60 = vld [vmem:[%s10691_s6 + $0xf8] sm:$0xff] }
 0x5be   : > { %v7907_v43 = vpop.f32.mrf.mxu1  ;;  %10992 = vst [vmem:[#allocation65_spill] sm:$0xff] %v7913_v56  ;;  %10993 = vst [vmem:[#allocation66_spill] sm:$0xff] %v7915_v5 }
 0x5bf   : > { %10990 = vst [vmem:[#allocation63_spill] sm:$0xff] %v7905_v11  ;;  %v3020_v9 = vpack.c.bf16 %v2210_v12, %v2206_v3  ;;  %v1615_v19 = vpop.permute.xlu1 %1614 }
 0x5c0   : > { %v7911_v34 = vpop.f32.mrf.mxu1  ;;  %v1750_v58 = vpop.permute.xlu0 %1749  ;;  %v7930_v31 = vadd.f32 %v7536_v18, %v1615_v19 }
 0x5c1   : > { %10991 = vst [vmem:[#allocation64_spill] sm:$0xff] %v7911_v34  ;;  %v7917_v45 = vadd.f32 %v2213_v14, %v1750_v58  ;;  %v7919_v8 = vadd.f32 %v2215_v39, %v1750_v58  ;;  %3700 = vmatprep.mubr.bf16.mxu0 %v3020_v9  ;;  %v7933_v14 = vadd.f32 %v7538_v24, %v1615_v19  ;;  %v1538_v19 = vld [vmem:[%s10691_s6 + $0xe8] sm:$0xff] }
 0x5c2   : > { %v7921_v54 = vpop.f32.mrf.mxu1  ;;  %10997 = vst [vmem:[#allocation70_spill] sm:$0xff] %v7930_v31 }
 0x5c3   : > { %10994 = vst [vmem:[#allocation67_spill] sm:$0xff] %v7917_v45  ;;  %10995 = vst [vmem:[#allocation68_spill] sm:$0xff] %v7919_v8  ;;  %v1539_v45 = vld [vmem:[%s10691_s6 + $0xf0] sm:$0xff] }
 0x5c4   : > { %10996 = vst [vmem:[#allocation69_spill] sm:$0xff] %v7921_v54  ;;  %v7927_v27 = vpop.f32.mrf.mxu1  ;;  %v1610_v25 = vpop.permute.xlu0 %1609  ;;  %10998 = vst [vmem:[#allocation71_spill] sm:$0xff] %v7933_v14 }
 0x5c5   : > { %v7936_v39 = vadd.f32 %v7532_v63, %v1610_v25  ;;  %v7939_v15 = vadd.f32 %v7534_v38, %v1610_v25 }
 0x5c6   : > { %v7941_v59 = vpop.f32.mrf.mxu1 }
 0x5c7   : > { %10999 = vst [vmem:[#allocation72_spill] sm:$0xff] %v7936_v39  ;;  %11000 = vst [vmem:[#allocation73_spill] sm:$0xff] %v7939_v15 }
 0x5c8   : > { %v7947_v3 = vpop.f32.mrf.mxu1 }
 0x5ca   : > { %v7949_v18 = vpop.f32.mrf.mxu1 }
 0x5cc   : > { %v7951_v24 = vpop.f32.mrf.mxu1 }
 0x5ce   : > { %v7953_v16 = vpop.f32.mrf.mxu1 }
 0x5cf   : > { %11001 = vst [vmem:[#allocation74_spill] sm:$0xff] %v7953_v16 }
 0x5d0   : > { %v7955_v63 = vpop.f32.mrf.mxu1 }
 0x5d2   : > { %v7957_v38 = vpop.f32.mrf.mxu1 }
 0x5d4   : > { %v7959_v9 = vpop.f32.mrf.mxu1 }
 0x5d6   : > { %v7961_v58 = vpop.f32.mrf.mxu1 }
 0x5d8   : > { %v7966_v25 = vpop.f32.mrf.mxu1 }
 0x5d9   : > { %1704 = vperm.xlu1 %5819, %v1538_v19   ;;  %v1550_v19 = vld [vmem:[%s10691_s6 + $0x148] sm:$0xff] }
 0x5da   : > { %v7968_v7 = vpop.f32.mrf.mxu1 }
 0x5db   : > { %11002 = vst [vmem:[#allocation75_spill] sm:$0xff] %v7968_v7 }
 0x5dc   : > { %v7976_v35 = vpop.f32.mrf.mxu1 }
 0x5dd   : > { %1714 = vperm.xlu1 %5819, %v1540_v60   ;;  %v1552_v60 = vld [vmem:[%s10691_s6 + $0x158] sm:$0xff] }
 0x5de   : > { %v7978_v12 = vpop.f32.mrf.mxu1  ;;  %1699 = vperm.xlu0 %5820, %v1537_v33   ;;  %v1549_v33 = vld [vmem:[%s10691_s6 + $0x140] sm:$0xff] }
 0x5df   : > { %11003 = vst [vmem:[#allocation76_spill] sm:$0xff] %v7978_v12 }
 0x5e0   : > { %v7986_v56 = vpop.f32.mrf.mxu1 }
 0x5e1   : > { %1764 = vperm.xlu1 %5819, %v1550_v19   ;;  %v1524_v19 = vld [vmem:[%s10691_s6 + $0x78] sm:$0xff] }
 0x5e2   : > { %v7988_v39 = vpop.f32.mrf.mxu1  ;;  %1709 = vperm.xlu0 %5820, %v1539_v45   ;;  %v1551_v45 = vld [vmem:[%s10691_s6 + $0x150] sm:$0xff] }
 0x5e3   : > { %11004 = vst [vmem:[#allocation77_spill] sm:$0xff] %v7988_v39 }
 0x5e4   : > { %v7996_v31 = vpop.f32.mrf.mxu1 }
 0x5e5   : > { %1774 = vperm.xlu1 %5819, %v1552_v60   ;;  %v1522_v60 = vld [vmem:[%s10691_s6 + $0x68] sm:$0xff] }
 0x5e6   : > { %v7998_v8 = vpop.f32.mrf.mxu1  ;;  %1759 = vperm.xlu0 %5820, %v1549_v33   ;;  %v1523_v33 = vld [vmem:[%s10691_s6 + $0x70] sm:$0xff] }
 0x5e7   : > { %11005 = vst [vmem:[#allocation78_spill] sm:$0xff] %v7998_v8 }
 0x5e8   : > { %v8006_v5 = vpop.f32.mrf.mxu1 }
 0x5e9   : > { %1634 = vperm.xlu1 %5819, %v1524_v19   ;;  %v1521_v19 = vld [vmem:[%s10691_s6 + $0x60] sm:$0xff] }
 0x5ea   : > { %v8008_v11 = vpop.f32.mrf.mxu1  ;;  %1769 = vperm.xlu0 %5820, %v1551_v45  }
 0x5ec   : > { %v8016_v23 = vpop.f32.mrf.mxu1 }
 0x5ed   : > { %1624 = vperm.xlu1 %5819, %v1522_v60   ;;  %v2550_v60 = vmax.f32 %v2548_v41, %v7857_v53 }
 0x5ee   : > { %v8018_v15 = vpop.f32.mrf.mxu1  ;;  %1629 = vperm.xlu0 %5820, %v1523_v33   ;;  %v2551_v33 = vmax.f32 %v2549_v29, %v7865_v0 }
 0x5ef   : > { %v2552_v13 = vmax.f32 %v2550_v60, %v7873_v57 }
 0x5f0   : > { %v8023_v14 = vpop.f32.mrf.mxu1  ;;  %v2553_v42 = vmax.f32 %v2551_v33, %v7877_v49 }
 0x5f2   : > { %v8025_v45 = vpop.f32.mrf.mxu1  ;;  %1619 = vperm.xlu0 %5820, %v1521_v19   ;;  %v2554_v19 = vmax.f32 %v2552_v13, %v7883_v48  ;;  %v2555_v51 = vmax.f32 %v2553_v42, %v7891_v30 }
 0x5f4   : > { %v8031_v1 = vpop.f32.mrf.mxu1  ;;  %v2556_v52 = vmax.f32 %v2554_v19, %v7899_v26  ;;  %v2557_v41 = vmax.f32 %v2555_v51, %v7907_v43 }
 0x5f6   : > { %v8035_v21 = vpop.f32.mrf.mxu1  ;;  %v2558_v29 = vmax.f32 %v2556_v52, %v7921_v54  ;;  %v2559_v60 = vmax.f32 %v2557_v41, %v7941_v59  ;;  %v2586_v41 = vmax.f32 %v7843_v2, %v7855_v46 }
 0x5f8   : > { %v8039_v61 = vpop.f32.mrf.mxu1  ;;  %v2560_v33 = vmax.f32 %v2558_v29, %v7949_v18  ;;  %v2561_v13 = vmax.f32 %v2559_v60, %v7953_v16 }
 0x5fa   : > { %v8043_v37 = vpop.f32.mrf.mxu1  ;;  %v2562_v42 = vmax.f32 %v2560_v33, %v7957_v38  ;;  %v2563_v19 = vmax.f32 %v2561_v13, %v7961_v58  ;;  %v2585_v33 = vmax.f32 %v7835_v40, %v7847_v32  ;;  %v2588_v13 = vmax.f32 %v2586_v41, %v7867_v47 }
 0x5fc   : > { %v8047_v22 = vpop.f32.mrf.mxu1  ;;  %v2564_v51 = vmax.f32 %v2562_v42, %v7968_v7  ;;  %v2565_v52 = vmax.f32 %v2563_v19, %v7978_v12  ;;  %v2587_v7 = vmax.f32 %v2585_v33, %v7863_v10  ;;  %v2590_v46 = vmax.f32 %v2588_v13, %v7881_v4 }
 0x5fe   : > { %v8051_v55 = vpop.f32.mrf.mxu1  ;;  %v2566_v29 = vmax.f32 %v2564_v51, %v7988_v39  ;;  %v2567_v60 = vmax.f32 %v2565_v52, %v7998_v8  ;;  %v2589_v39 = vmax.f32 %v2587_v7, %v7875_v6  ;;  %v2592_v41 = vmax.f32 %v2590_v46, %v7894_v17 }
 0x600   : > { %v8055_v48 = vpop.f32.mrf.mxu1  ;;  %v2568_v42 = vmax.f32 %v2566_v29, %v8008_v11  ;;  %v2569_v19 = vmax.f32 %v2567_v60, %v8018_v15  ;;  %v2591_v33 = vmax.f32 %v2589_v39, %v7885_v50  ;;  %v2594_v13 = vmax.f32 %v2592_v41, %v7911_v34 }
 0x602   : > { %v8059_v26 = vpop.f32.mrf.mxu1  ;;  %v2570_v51 = vmax.f32 %v2568_v42, %v8025_v45  ;;  %v2571_v52 = vmax.f32 %v2569_v19, %v8035_v21  ;;  %v2593_v7 = vmax.f32 %v2591_v33, %v7903_v62  ;;  %v2596_v46 = vmax.f32 %v2594_v13, %v7947_v3 }
 0x604   : > { %v8063_v54 = vpop.f32.mrf.mxu1  ;;  %v2572_v29 = vmax.f32 %v2570_v51, %v8043_v37  ;;  %v2573_v60 = vmax.f32 %v2571_v52, %v8051_v55  ;;  %v2595_v17 = vmax.f32 %v2593_v7, %v7927_v27  ;;  %v2598_v39 = vmax.f32 %v2596_v46, %v7955_v63 }
 0x606   : > { %v8069_v16 = vpop.f32.mrf.mxu1  ;;  %v2574_v42 = vmax.f32 %v2572_v29, %v8059_v26  ;;  %v2597_v41 = vmax.f32 %v2595_v17, %v7951_v24  ;;  %v2600_v29 = vmax.f32 %v2598_v39, %v7966_v25 }
 0x607   : > { %11006 = vst [vmem:[#allocation79_spill] sm:$0xff] %v8069_v16  ;;  %v2575_v19 = vmax.f32 %v2573_v60, %v8069_v16 }
 0x608   : > { %v8076_v12 = vpop.f32.mrf.mxu1  ;;  %v2599_v34 = vmax.f32 %v2597_v41, %v7959_v9  ;;  %v2602_v33 = vmax.f32 %v2600_v29, %v7986_v56 }
 0x60a   : > { %v8082_v8 = vpop.f32.mrf.mxu1  ;;  %v2601_v13 = vmax.f32 %v2599_v34, %v7976_v35 }
 0x60b   : > { %v2576_v51 = vmax.f32 %v2574_v42, %v8082_v8  ;;  %v2604_v42 = vmax.f32 %v2602_v33, %v8006_v5 }
 0x60c   : > { %v8088_v47 = vpop.f32.mrf.mxu1  ;;  %v2603_v7 = vmax.f32 %v2601_v13, %v7996_v31  ;;  %v8120_v13 = vpop.permute.xlu1 %1604 }
 0x60d   : > { %v2606_v46 = vmax.f32 %v2604_v42, %v8023_v14  ;;  %11007 = vst [vmem:[#allocation80_spill] sm:$0xff] %v8120_v13 }
 0x60e   : > { %v8094_v4 = vpop.f32.mrf.mxu1  ;;  %v2605_v17 = vmax.f32 %v2603_v7, %v8016_v23 }
 0x60f   : > { %v2577_v52 = vmax.f32 %v2575_v19, %v8094_v4 }
 0x610   : > { %v2607_v41 = vmax.f32 %v2605_v17, %v8031_v1 }
 0x611   : > { %v2578_v50 = vmax.f32 %v2576_v51, %v2577_v52  ;;  %v2608_v52 = vmax.f32 %v2606_v46, %v8039_v61 }
 0x612   : > { %v2609_v34 = vmax.f32 %v2607_v41, %v8047_v22 }
 0x613   : > { %v2579_v60 = vrot.slane %v2578_v50, 4  ;;  %v2610_v29 = vmax.f32 %v2608_v52, %v8055_v48 }
 0x615   : > { %v2580_v16 = vmax.f32 %v2578_v50, %v2579_v60  ;;  %v8114_v50 = vpop.f32.mrf.mxu1  ;;  %v2612_v60 = vmax.f32 %v2610_v29, %v8076_v12 }
 0x617   : > { %v2581_v19 = vrot.slane %v2580_v16, 2  ;;  %v2614_v42 = vmax.f32 %v2612_v60, %v8114_v50 }
 0x619   : > { %v2582_v51 = vmax.f32 %v2580_v16, %v2581_v19  ;;  %v2611_v16 = vmax.f32 %v2609_v34, %v8063_v54 }
 0x61b   : > { %v2583_v39 = vrot.slane %v2582_v51, 1  ;;  %v2613_v19 = vmax.f32 %v2611_v16, %v8088_v47  ;;  %v8131_v52 = vpop.trf.xlu1 }
 0x61c   : > { %11008 = vst [vmem:[#allocation81_spill] sm:$0xff] %v8131_v52 }
 0x61d   : > { %v8118_v33 = vmax.f32 %v2582_v51, %v2583_v39  ;;  %v8133_v51 = vpop.permute.xlu0 %1599  ;;  %v2615_v39 = vmax.f32 %v2613_v19, %v2614_v42 }
 0x61e   : > { %11009 = vst [vmem:[#allocation82_spill] sm:$0xff] %v8133_v51 }
 0x61f   : > { %v2622_v7 = vsub.f32 %v7833_v20, %v8118_v33  ;;  %v2624_v46 = vsub.f32 %v7837_v44, %v8118_v33  ;;  %v2626_v17 = vsub.f32 %v7845_v36, %v8118_v33  ;;  %v2628_v41 = vsub.f32 %v7853_v28, %v8118_v33  ;;  %v8143_v13 = vpop.trf.xlu1 }
 0x620   : > { %v2630_v60 = vsub.f32 %v7857_v53, %v8118_v33  ;;  %v2616_v16 = vrot.slane %v2615_v39, 4  ;;  %v2632_v36 = vsub.f32 %v7865_v0, %v8118_v33  ;;  %11011 = vst [vmem:[#allocation84_spill] sm:$0xff] %v8143_v13  ;;  %v2634_v28 = vsub.f32 %v7873_v57, %v8118_v33 }
 0x621   : > { %v2686_v29 = vmul.f32 1.442695, %v2622_v7  ;;  %v2690_v34 = vmul.f32 1.442695, %v2624_v46  ;;  %v2694_v20 = vmul.f32 1.442695, %v2626_v17  ;;  %v8139_v44 = vpop.trf.xlu0  ;;  %v2636_v53 = vsub.f32 %v7877_v49, %v8118_v33 }
 0x622   : > { %11010 = vst [vmem:[#allocation83_spill] sm:$0xff] %v8139_v44  ;;  %v2698_v52 = vmul.f32 1.442695, %v2628_v41  ;;  %v2702_v42 = vmul.f32 1.442695, %v2630_v60  ;;  %v2617_v19 = vmax.f32 %v2615_v39, %v2616_v16  ;;  %v11013_v17 = vld [vmem:[#allocation58_spill] sm:$0xff]  ;;  %v2640_v57 = vsub.f32 %v7891_v30, %v8118_v33 }
 0x623   : > { %5851 = vpow2.f32 %v2686_v29  ;;  %v2706_v7 = vmul.f32 1.442695, %v2632_v36  ;;  %v2638_v0 = vsub.f32 %v11013_v17, %v8118_v33  ;;  %v2710_v41 = vmul.f32 1.442695, %v2634_v28  ;;  %v8153_v29 = vpop.trf.xlu1  ;;  %v11015_v39 = vld [vmem:[#allocation61_spill] sm:$0xff] }
 0x624   : > { %5853 = vpow2.f32 %v2690_v34  ;;  %11014 = vst [vmem:[#allocation58_spill] sm:$0xff] %v8153_v29  ;;  %v2618_v34 = vrot.slane %v2617_v19, 2  ;;  %v2642_v60 = vsub.f32 %v11015_v39, %v8118_v33  ;;  %v2714_v49 = vmul.f32 1.442695, %v2636_v53 }
 0x625   : > { %5855 = vpow2.f32 %v2694_v20  ;;  %v8149_v46 = vpop.trf.xlu0  ;;  %v11016_v20 = vld [vmem:[#allocation69_spill] sm:$0xff]  ;;  %v2718_v36 = vmul.f32 1.442695, %v2638_v0  ;;  %v2648_v28 = vsub.f32 %v7941_v59, %v8118_v33  ;;  %v2650_v53 = vsub.f32 %v7949_v18, %v8118_v33 }
 0x626   : > { %5857 = vpow2.f32 %v2698_v52  ;;  %11012 = vst [vmem:[#allocation85_spill] sm:$0xff] %v8149_v46  ;;  %v2644_v52 = vsub.f32 %v7907_v43, %v8118_v33  ;;  %v2646_v16 = vsub.f32 %v11016_v20, %v8118_v33  ;;  %v2619_v17 = vmax.f32 %v2617_v19, %v2618_v34 }
 0x627   : > { %5859 = vpow2.f32 %v2702_v42  ;;  %v2722_v42 = vmul.f32 1.442695, %v2640_v57  ;;  %v8171_v43 = vpop.trf.xlu1  ;;  %v2666_v0 = vsub.f32 %v8008_v11, %v8118_v33  ;;  %v2668_v59 = vsub.f32 %v8018_v15, %v8118_v33 }
 0x628   : > { %5861 = vpow2.f32 %v2706_v7  ;;  %v2726_v7 = vmul.f32 1.442695, %v2642_v60  ;;  %11019 = vst [vmem:[#allocation86_spill] sm:$0xff] %v8171_v43  ;;  %v2734_v19 = vmul.f32 1.442695, %v2646_v16  ;;  %v2670_v18 = vsub.f32 %v8025_v45, %v8118_v33 }
 0x629   : > { %5863 = vpow2.f32 %v2710_v41  ;;  %v8165_v30 = vpop.trf.xlu0  ;;  %v2730_v41 = vmul.f32 1.442695, %v2644_v52  ;;  %v2738_v60 = vmul.f32 1.442695, %v2648_v28  ;;  %v2672_v11 = vsub.f32 %v8035_v21, %v8118_v33 }
 0x62a   : > { %11017 = vst [vmem:[#allocation61_spill] sm:$0xff] %v8165_v30  ;;  %5865 = vpow2.f32 %v2714_v49  ;;  %v2620_v49 = vrot.slane %v2619_v17, 1  ;;  %v2742_v52 = vmul.f32 1.442695, %v2650_v53  ;;  %v2674_v16 = vsub.f32 %v8043_v37, %v8118_v33  ;;  %v11042_v30 = vld [vmem:[#allocation57_spill] sm:$0xff] }
 0x62b   : > { %5867 = vpow2.f32 %v2718_v36  ;;  %v2774_v36 = vmul.f32 1.442695, %v2666_v0  ;;  %v2676_v45 = vsub.f32 %v8051_v55, %v8118_v33  ;;  %v2778_v28 = vmul.f32 1.442695, %v2668_v59 }
 0x62c   : > { %5869 = vpow2.f32 %v2722_v42  ;;  %v8197_v42 = vpop.trf.xlu1  ;;  %v2782_v37 = vmul.f32 1.442695, %v2670_v18  ;;  %v2654_v0 = vsub.f32 %v7957_v38, %v8118_v33  ;;  %v2786_v55 = vmul.f32 1.442695, %v2672_v11 }
 0x62d   : > { %5871 = vpow2.f32 %v2726_v7  ;;  %v8192_v43 = vpop.trf.xlu0  ;;  %11024 = vst [vmem:[#allocation91_spill] sm:$0xff] %v8197_v42  ;;  %v11026_v7 = vld [vmem:[#allocation74_spill] sm:$0xff]  ;;  %v2790_v42 = vmul.f32 1.442695, %v2674_v16 }
 0x62e   : > { %5873 = vpow2.f32 %v2730_v41  ;;  %11023 = vst [vmem:[#allocation90_spill] sm:$0xff] %v8192_v43  ;;  %v8203_v41 = vmax.f32 %v2619_v17, %v2620_v49  ;;  %v2794_v17 = vmul.f32 1.442695, %v2676_v45 }
 0x62f   : > { %5875 = vpow2.f32 %v2734_v19 }
 0x630   : > { %v8167_v29 = vpop.eup %5851  ;;  %5877 = vpow2.f32 %v2738_v60  ;;  %v2623_v11 = vsub.f32 %v7835_v40, %v8203_v41  ;;  %v2625_v16 = vsub.f32 %v7843_v2, %v8203_v41  ;;  %v11034_v2 = vld [vmem:[#allocation77_spill] sm:$0xff] }
 0x631   : > { %11018 = vst [vmem:[#allocation69_spill] sm:$0xff] %v8167_v29  ;;  %v8173_v39 = vpop.eup %5853  ;;  %5879 = vpow2.f32 %v2742_v52  ;;  %v8219_v52 = vpop.trf.xlu0 }
 0x632   : > { %11020 = vst [vmem:[#allocation87_spill] sm:$0xff] %v8173_v39  ;;  %v2814_v57 = vadd.f32 %v8173_v39, %v8167_v29  ;;  %v8181_v34 = vpop.eup %5855  ;;  %5881 = vpow2.f32 %v2774_v36  ;;  %11030 = vst [vmem:[#allocation93_spill] sm:$0xff] %v8219_v52  ;;  %v8224_v36 = vpop.trf.xlu1 }
 0x633   : > { %11021 = vst [vmem:[#allocation88_spill] sm:$0xff] %v8181_v34  ;;  %v8188_v20 = vpop.eup %5857  ;;  %5883 = vpow2.f32 %v2778_v28  ;;  %11031 = vst [vmem:[#allocation94_spill] sm:$0xff] %v8224_v36  ;;  %v11033_v28 = vld [vmem:[#allocation76_spill] sm:$0xff]  ;;  %v2688_v36 = vmul.f32 1.442695, %v2623_v11 }
 0x634   : > { %v2815_v15 = vadd.f32 %v8181_v34, %v2814_v57  ;;  %11022 = vst [vmem:[#allocation89_spill] sm:$0xff] %v8188_v20  ;;  %v8199_v53 = vpop.eup %5859  ;;  %v2652_v57 = vsub.f32 %v11026_v7, %v8118_v33  ;;  %v11028_v7 = vld [vmem:[#allocation75_spill] sm:$0xff]  ;;  %5885 = vpow2.f32 %v2782_v37 }
 0x635   : > { %11025 = vst [vmem:[#allocation92_spill] sm:$0xff] %v8199_v53  ;;  %v8208_v19 = vpop.eup %5861  ;;  %v2658_v60 = vsub.f32 %v11028_v7, %v8118_v33  ;;  %5887 = vpow2.f32 %v2786_v55  ;;  %v8233_v55 = vpop.f32.mrf.mxu0 }
 0x636   : > { %v2816_v21 = vadd.f32 %v8188_v20, %v2815_v15  ;;  %11027 = vst [vmem:[#allocation74_spill] sm:$0xff] %v8208_v19  ;;  %v2656_v15 = vsub.f32 %v7961_v58, %v8118_v33  ;;  %v8215_v49 = vpop.eup %5863  ;;  %v2746_v38 = vmul.f32 1.442695, %v2652_v57  ;;  %v2660_v57 = vsub.f32 %v11033_v28, %v8118_v33  ;;  %v8248_v43 = vpop.trf.xlu0 }
 0x637   : > { %11029 = vst [vmem:[#allocation75_spill] sm:$0xff] %v8215_v49  ;;  %v8226_v45 = vpop.eup %5865  ;;  %5889 = vpow2.f32 %v2790_v42  ;;  %11038 = vst [vmem:[#allocation77_spill] sm:$0xff] %v8248_v43 }
 0x638   : > { %v2817_v59 = vadd.f32 %v8199_v53, %v2816_v21  ;;  %v2750_v21 = vmul.f32 1.442695, %v2654_v0  ;;  %11032 = vst [vmem:[#allocation95_spill] sm:$0xff] %v8226_v45  ;;  %v2754_v37 = vmul.f32 1.442695, %v2656_v15  ;;  %5891 = vpow2.f32 %v2794_v17  ;;  %v8235_v7 = vpop.eup %5867  ;;  %v11036_v15 = vld [vmem:[#allocation50_spill] sm:$0xff] }
 0x639   : > { %v2627_v0 = vsub.f32 %v7847_v32, %v8203_v41  ;;  %5893 = vpow2.f32 %v2746_v38  ;;  %v8239_v13 = vpop.eup %5869  ;;  %v2692_v17 = vmul.f32 1.442695, %v2625_v16  ;;  %v11037_v32 = vld [vmem:[#allocation78_spill] sm:$0xff]  ;;  %v2762_v52 = vmul.f32 1.442695, %v2660_v57  ;;  %v8257_v16 = vpop.f32.mrf.mxu0  ;;  %v11041_v57 = vld [vmem:[#allocation53_spill] sm:$0xff] }
 0x63a   : > { %v2818_v18 = vadd.f32 %v8208_v19, %v2817_v59  ;;  %v2758_v59 = vmul.f32 1.442695, %v2658_v60  ;;  %11035 = vst [vmem:[#allocation76_spill] sm:$0xff] %v8239_v13  ;;  %5895 = vpow2.f32 %v2750_v21  ;;  %v2629_v60 = vsub.f32 %v11036_v15, %v8203_v41  ;;  %11040 = vst [vmem:[#allocation78_spill] sm:$0xff] %v8257_v16 }
 0x63b   : > { %v2664_v28 = vsub.f32 %v11037_v32, %v8118_v33  ;;  %5897 = vpow2.f32 %v2754_v37  ;;  %v2631_v21 = vsub.f32 %v7863_v10, %v8203_v41  ;;  %v2633_v37 = vsub.f32 %v11041_v57, %v8203_v41  ;;  %v11043_v57 = vld [vmem:[#allocation59_spill] sm:$0xff]  ;;  %v8277_v51 = vpop.f32.mrf.mxu0 }
 0x63c   : > { %v2819_v58 = vadd.f32 %v8215_v49, %v2818_v18  ;;  %v2662_v18 = vsub.f32 %v11034_v2, %v8118_v33  ;;  %5899 = vpow2.f32 %v2758_v59  ;;  %v8255_v2 = vpop.trf.xlu1  ;;  %v2700_v10 = vmul.f32 1.442695, %v2629_v60  ;;  %v11065_v49 = vld [vmem:[#allocation6_spill] sm:$0xff] }
 0x63d   : > { %11039 = vst [vmem:[#allocation50_spill] sm:$0xff] %v8255_v2  ;;  %5901 = vpow2.f32 %v2688_v36  ;;  %v2770_v2 = vmul.f32 1.442695, %v2664_v28  ;;  %v2639_v44 = vsub.f32 %v11043_v57, %v8203_v41  ;;  %v2708_v60 = vmul.f32 1.442695, %v2633_v37 }
 0x63e   : > { %v2820_v40 = vadd.f32 %v8226_v45, %v2819_v58  ;;  %v8244_v58 = vpop.eup %5871  ;;  %v2766_v32 = vmul.f32 1.442695, %v2662_v18  ;;  %5903 = vpow2.f32 %v2692_v17  ;;  %v2637_v18 = vsub.f32 %v11042_v30, %v8203_v41  ;;  %v8285_v17 = vpop.trf.xlu0 }
 0x63f   : > { %v8250_v38 = vpop.eup %5873  ;;  %5905 = vpow2.f32 %v2762_v52  ;;  %v2647_v52 = vsub.f32 %v7927_v27, %v8203_v41  ;;  %v2649_v30 = vsub.f32 %v7947_v3, %v8203_v41  ;;  %11044 = vst [vmem:[#allocation53_spill] sm:$0xff] %v8285_v17  ;;  %v2651_v27 = vsub.f32 %v7951_v24, %v8203_v41 }
 0x640   : > { %v2821_v42 = vadd.f32 %v8235_v7, %v2820_v40  ;;  %v2696_v40 = vmul.f32 1.442695, %v2627_v0  ;;  %v8259_v15 = vpop.eup %5875  ;;  %v2653_v3 = vsub.f32 %v7955_v63, %v8203_v41  ;;  %v2716_v37 = vmul.f32 1.442695, %v2637_v18 }
 0x641   : > { %v8263_v43 = vpop.eup %5877  ;;  %v2643_v63 = vsub.f32 %v7903_v62, %v8203_v41  ;;  %v2736_v18 = vmul.f32 1.442695, %v2647_v52  ;;  %v2744_v62 = vmul.f32 1.442695, %v2651_v27 }
 0x642   : > { %v2822_v11 = vadd.f32 %v8239_v13, %v2821_v42  ;;  %v2635_v42 = vsub.f32 %v7875_v6, %v8203_v41  ;;  %v8268_v0 = vpop.eup %5879  ;;  %5907 = vpow2.f32 %v2696_v40  ;;  %v8290_v40 = vpop.trf.xlu1 }
 0x643   : > { %v8272_v46 = vpop.eup %5881  ;;  %5909 = vpow2.f32 %v2766_v32  ;;  %11045 = vst [vmem:[#allocation57_spill] sm:$0xff] %v8290_v40  ;;  %v8324_v52 = vpop.trf.xlu0 }
 0x644   : > { %v2823_v59 = vadd.f32 %v8244_v58, %v2822_v11  ;;  %v2704_v11 = vmul.f32 1.442695, %v2631_v21  ;;  %v8279_v6 = vpop.eup %5883  ;;  %5911 = vpow2.f32 %v2700_v10  ;;  %v2712_v21 = vmul.f32 1.442695, %v2635_v42 }
 0x645   : > { %v8287_v28 = vpop.eup %5885  ;;  %5913 = vpow2.f32 %v2770_v2  ;;  %v2720_v42 = vmul.f32 1.442695, %v2639_v44  ;;  %v11047_v2 = vld [vmem:[#allocation60_spill] sm:$0xff]  ;;  %v2740_v44 = vmul.f32 1.442695, %v2649_v30 }
 0x646   : > { %v2824_v36 = vadd.f32 %v8250_v38, %v2823_v59  ;;  %v8294_v57 = vpop.eup %5887  ;;  %5915 = vpow2.f32 %v2704_v11  ;;  %v2641_v24 = vsub.f32 %v11047_v2, %v8203_v41  ;;  %v11049_v2 = vld [vmem:[#allocation79_spill] sm:$0xff]  ;;  %v11052_v30 = vld [vmem:[#allocation64_spill] sm:$0xff] }
 0x647   : > { %v8300_v17 = vpop.eup %5889  ;;  %5917 = vpow2.f32 %v2708_v60  ;;  %v2680_v39 = vsub.f32 %v11049_v2, %v8118_v33  ;;  %11050 = vst [vmem:[#allocation79_spill] sm:$0xff] %v8324_v52 }
 0x648   : > { %v2825_v59 = vadd.f32 %v8259_v15, %v2824_v36  ;;  %v8303_v36 = vpop.f32.mrf.mxu0  ;;  %v8307_v40 = vpop.eup %5891  ;;  %5919 = vpow2.f32 %v2712_v21  ;;  %v2724_v27 = vmul.f32 1.442695, %v2641_v24 }
 0x649   : > { %11046 = vst [vmem:[#allocation59_spill] sm:$0xff] %v8303_v36  ;;  %v8313_v16 = vpop.eup %5893  ;;  %v2678_v36 = vsub.f32 %v8059_v26, %v8118_v33  ;;  %5921 = vpow2.f32 %v2716_v37  ;;  %v2682_v37 = vsub.f32 %v8082_v8, %v8118_v33 }
 0x64a   : > { %v2826_v10 = vadd.f32 %v8263_v43, %v2825_v59  ;;  %v8318_v32 = vpop.eup %5895  ;;  %5923 = vpow2.f32 %v2720_v42  ;;  %v2748_v59 = vmul.f32 1.442695, %v2653_v3  ;;  %v8331_v20 = vpop.f32.mrf.mxu0  ;;  %v2684_v3 = vsub.f32 %v8094_v4, %v8118_v33  ;;  %v11061_v4 = vld [vmem:[#allocation30_spill] sm:$0xff] }
 0x64b   : > { %11048 = vst [vmem:[#allocation60_spill] sm:$0xff] %v8318_v32  ;;  %v8326_v60 = vpop.eup %5897  ;;  %5925 = vpow2.f32 %v2736_v18  ;;  %v2798_v42 = vmul.f32 1.442695, %v2678_v36 }
 0x64c   : > { %v2827_v11 = vadd.f32 %v8268_v0, %v2826_v10  ;;  %11051 = vst [vmem:[#allocation96_spill] sm:$0xff] %v8326_v60  ;;  %v2645_v10 = vsub.f32 %v11052_v30, %v8203_v41  ;;  %v8333_v26 = vpop.eup %5899  ;;  %5927 = vpow2.f32 %v2740_v44  ;;  %v8344_v30 = vmul.f32 1.442695, %v2680_v39  ;;  %v8351_v44 = vpop.f32.mrf.mxu0 }
 0x64d   : > { %11053 = vst [vmem:[#allocation64_spill] sm:$0xff] %v8333_v26  ;;  %v8337_v2 = vpop.eup %5901  ;;  %5929 = vpow2.f32 %v2744_v62 }
 0x64e   : > { %v2828_v21 = vadd.f32 %v8313_v16, %v2827_v11  ;;  %11054 = vst [vmem:[#allocation97_spill] sm:$0xff] %v8337_v2  ;;  %v2728_v11 = vmul.f32 1.442695, %v2643_v63  ;;  %v8340_v34 = vpop.eup %5903  ;;  %v2732_v24 = vmul.f32 1.442695, %v2645_v10  ;;  %5931 = vpow2.f32 %v2748_v59 }
 0x64f   : > { %11055 = vst [vmem:[#allocation98_spill] sm:$0xff] %v8340_v34  ;;  %v8346_v19 = vpop.eup %5905  ;;  %v2851_v18 = vadd.f32 %v8340_v34, %v8337_v2  ;;  %5933 = vpow2.f32 %v2724_v27  ;;  %v11062_v2 = vld [vmem:[#allocation3_spill] sm:$0xff] }
 0x650   : > { %v2829_v52 = vadd.f32 %v8318_v32, %v2828_v21  ;;  %11056 = vst [vmem:[#allocation99_spill] sm:$0xff] %v8346_v19  ;;  %v8353_v21 = vpop.eup %5907  ;;  %v8355_v32 = vmul.f32 1.442695, %v2682_v37  ;;  %5935 = vpow2.f32 %v2728_v11  ;;  %v11060_v37 = vld [vmem:[#allocation4_spill] sm:$0xff]  ;;  %v11063_v27 = vld [vmem:[#allocation27_spill] sm:$0xff] }
 0x651   : > { %11057 = vst [vmem:[#allocation100_spill] sm:$0xff] %v8353_v21  ;;  %v8361_v36 = vpop.eup %5909  ;;  %5937 = vpow2.f32 %v2732_v24 }
 0x652   : > { %v2830_v8 = vadd.f32 %v8326_v60, %v2829_v52  ;;  %11058 = vst [vmem:[#allocation101_spill] sm:$0xff] %v8361_v36  ;;  %v2852_v52 = vadd.f32 %v8353_v21, %v2851_v18  ;;  %v8367_v10 = vpop.eup %5911  ;;  %5939 = vpow2.f32 %v2798_v42 }
 0x653   : > { %11059 = vst [vmem:[#allocation102_spill] sm:$0xff] %v8367_v10  ;;  %v8373_v45 = vpop.eup %5913  ;;  %5941 = vpow2.f32 %v8344_v30 }
 0x654   : > { %v1705_v29 = vpop.permute.xlu1 %1704  ;;  %v2831_v59 = vadd.f32 %v8333_v26, %v2830_v8  ;;  %v2853_v11 = vadd.f32 %v8367_v10, %v2852_v52  ;;  %v2237_v26 = vpop.f32.mrf.mxu0  ;;  %5943 = vpow2.f32 %v8355_v32  ;;  %v11074_v32 = vsub.f32 %v7976_v35, %v8203_v41 }
 0x655   : > { %v2168_v60 = vadd.f32 %v11060_v37, %v1705_v29  ;;  %v2170_v34 = vadd.f32 %v11061_v4, %v1705_v29  ;;  %v8381_v37 = vpop.eup %5915  ;;  %v2810_v29 = vmul.f32 1.442695, %v2684_v3  ;;  %v11075_v35 = vsub.f32 %v7986_v56, %v8203_v41 }
 0x656   : > { %v2832_v8 = vadd.f32 %v8346_v19, %v2831_v59  ;;  %v2854_v62 = vadd.f32 %v8381_v37, %v2853_v11  ;;  %v11064_v19 = vld [vmem:[#allocation29_spill] sm:$0xff]  ;;  %v2239_v52 = vpop.f32.mrf.mxu0 }
 0x657   : > { %5945 = vpow2.f32 %v2810_v29 }
 0x658   : > { %v1715_v63 = vpop.permute.xlu1 %1714  ;;  %v2833_v24 = vadd.f32 %v8361_v36, %v2832_v8 }
 0x659   : > { %v1700_v39 = vpop.permute.xlu0 %1699  ;;  %v2178_v10 = vadd.f32 %v11064_v19, %v1715_v63  ;;  %v2180_v13 = vadd.f32 %v11065_v49, %v1715_v63 }
 0x65a   : > { %v2164_v33 = vadd.f32 %v11062_v2, %v1700_v39  ;;  %v2166_v53 = vadd.f32 %v11063_v27, %v1700_v39  ;;  %v8387_v27 = vpop.eup %5917  ;;  %v11066_v2 = vld [vmem:[#allocation5_spill] sm:$0xff]  ;;  %v2834_v8 = vadd.f32 %v8373_v45, %v2833_v24 }
 0x65b   : > { %v8394_v21 = vpop.eup %5919  ;;  %v2855_v19 = vadd.f32 %v8387_v27, %v2854_v62 }
 0x65c   : > { %v8379_v18 = vpop.permute.xlu1 %1764  ;;  %v4511_v4 = vpack.c.bf16 %v2168_v60, %v2164_v33  ;;  %v4512_v39 = vpack.c.bf16 %v2170_v34, %v2166_v53  ;;  %v11067_v34 = vld [vmem:[#allocation28_spill] sm:$0xff]  ;;  %v8399_v33 = vpop.eup %5921 }
 0x65d   : > { %v1710_v59 = vpop.permute.xlu0 %1709  ;;  %v8405_v36 = vpop.eup %5923  ;;  %v2856_v24 = vadd.f32 %v8394_v21, %v2855_v19  ;;  %v11073_v19 = vsub.f32 %v7966_v25, %v8203_v41 }
 0x65e   : > { %v2174_v60 = vadd.f32 %v11066_v2, %v1710_v59  ;;  %v2176_v53 = vadd.f32 %v11067_v34, %v1710_v59  ;;  %4535 = vxpose.xlu1.c.b16.start [1/2] (short) %v4512_v39, 128  ;;  %4519 = vxpose.xlu0.c.b16.start [1/2] (short) %v4511_v4, 128  ;;  %v8413_v42 = vpop.eup %5925  ;;  %v2835_v59 = vadd.f32 %v8272_v46, %v2834_v8 }
 0x65f   : > { %v8420_v34 = vpop.eup %5927 }
 0x660   : > { %v1775_v3 = vpop.permute.xlu1 %1774  ;;  %v4513_v63 = vpack.c.bf16 %v2178_v10, %v2174_v60  ;;  %v4514_v2 = vpack.c.bf16 %v2180_v13, %v2176_v53  ;;  %v8424_v13 = vadd.f32 %v8277_v51, %v8379_v18  ;;  %v8432_v30 = vpop.eup %5929  ;;  %v2836_v60 = vadd.f32 %v8279_v6, %v2835_v59 }
 0x661   : > { %v8409_v4 = vadd.f32 %v2237_v26, %v1775_v3  ;;  %v8411_v39 = vpop.permute.xlu0 %1759  ;;  %v8426_v26 = vadd.f32 %v2239_v52, %v1775_v3  ;;  %v11072_v53 = vsub.f32 %v7959_v9, %v8203_v41  ;;  %v2857_v51 = vadd.f32 %v8399_v33, %v2856_v24  ;;  %v8440_v52 = vpop.eup %5931 }
 0x662   : > { %11069 = vst [vmem:[#allocation30_spill] sm:$0xff] %v8424_v13  ;;  %v8430_v10 = vadd.f32 %v8233_v55, %v8411_v39  ;;  %4536 = vxpose.xlu1.c.b16.end [2/2] (short) %v4514_v2, 128  ;;  %4520 = vxpose.xlu0.c.b16.end [2/2] (short) %v4513_v63, 128  ;;  %v2685_v55 = vsub.f32 %v8114_v50, %v8203_v41  ;;  %v2756_v3 = vmul.f32 1.442695, %v11073_v19  ;;  %v2760_v63 = vmul.f32 1.442695, %v11074_v32  ;;  %v8452_v59 = vpop.eup %5933 }
 0x663   : > { %11068 = vst [vmem:[#allocation4_spill] sm:$0xff] %v8409_v4  ;;  %11070 = vst [vmem:[#allocation3_spill] sm:$0xff] %v8426_v26  ;;  %v2752_v8 = vmul.f32 1.442695, %v11072_v53  ;;  %v2837_v24 = vadd.f32 %v8287_v28, %v2836_v60  ;;  %v2858_v53 = vadd.f32 %v8405_v36, %v2857_v51  ;;  %v2903_v50 = vpack.c.bf16 %v8440_v52, %v8432_v30  ;;  %v5936_v19 = vpop.eup %5935 }
 0x664   : > { %11071 = vst [vmem:[#allocation27_spill] sm:$0xff] %v8430_v10  ;;  %v1635_v25 = vpop.permute.xlu1 %1634  ;;  %v2764_v32 = vmul.f32 1.442695, %v11075_v35  ;;  %v2902_v2 = vpack.c.bf16 %v8313_v16, %v8268_v0  ;;  %v2901_v11 = vpack.c.bf16 %v8420_v34, %v8413_v42  ;;  %v5938_v56 = vpop.eup %5937  ;;  %v11078_v35 = vld [vmem:[#allocation25_spill] sm:$0xff]  ;;  %v11085_v0 = vld [vmem:[#allocation26_spill] sm:$0xff] }
 0x665   : > { %v1770_v9 = vpop.permute.xlu0 %1769  ;;  %v2838_v60 = vadd.f32 %v8294_v57, %v2837_v24  ;;  %5947 = vpow2.f32 %v2752_v8  ;;  %v2859_v51 = vadd.f32 %v8452_v59, %v2858_v53  ;;  %2920 = vmatprep.subr.bf16.mxu1 %v2903_v50  ;;  %v8474_v16 = vadd.f32 %v11078_v35, %v1635_v25  ;;  %v11080_v24 = vld [vmem:[#allocation10_spill] sm:$0xff]  ;;  %v11082_v50 = vld [vmem:[#allocation12_spill] sm:$0xff] }
 0x666   : > { %v8464_v49 = vadd.f32 %v8331_v20, %v1770_v9  ;;  %v8467_v29 = vadd.f32 %v8351_v44, %v1770_v9  ;;  %5949 = vpow2.f32 %v2756_v3  ;;  %2921 = vmatpush1.bf16.msra.mxu1 %v2902_v2  ;;  %v11084_v2 = vsub.f32 %v7996_v31, %v8203_v41 }
 0x667   : > { %11079 = vst [vmem:[#allocation5_spill] sm:$0xff] %v8474_v16  ;;  %v2839_v8 = vadd.f32 %v8300_v17, %v2838_v60  ;;  %v2860_v9 = vadd.f32 %v5936_v19, %v2859_v51  ;;  %2922 = vmatprep.subr.bf16.mxu1 %v2901_v11  ;;  %5951 = vpow2.f32 %v2760_v63  ;;  %v2900_v20 = vpack.c.bf16 %v8263_v43, %v8259_v15 }
 0x668   : > { %11076 = vst [vmem:[#allocation29_spill] sm:$0xff] %v8464_v49  ;;  %11077 = vst [vmem:[#allocation6_spill] sm:$0xff] %v8467_v29  ;;  %v2768_v35 = vmul.f32 1.442695, %v11084_v2  ;;  %v8493_v62 = vadd.f32 %v11085_v0, %v1635_v25  ;;  %v2899_v51 = vpack.c.bf16 %v5938_v56, %v5936_v19  ;;  %v2673_v63 = vsub.f32 %v8039_v61, %v8203_v41 }
 0x669   : > { %v1630_v44 = vpop.permute.xlu0 %1629  ;;  %v2840_v60 = vadd.f32 %v8307_v40, %v2839_v8  ;;  %v2861_v11 = vadd.f32 %v5938_v56, %v2860_v9  ;;  %v2679_v31 = vsub.f32 %v8063_v54, %v8203_v41  ;;  %v11087_v43 = vsub.f32 %v8006_v5, %v8203_v41 }
 0x66a   : > { %v8482_v53 = vadd.f32 %v11080_v24, %v1630_v44  ;;  %v8485_v3 = vadd.f32 %v11082_v50, %v1630_v44  ;;  %11086 = vst [vmem:[#allocation10_spill] sm:$0xff] %v8493_v62  ;;  %v8498_v44 = vpop.eup %5939  ;;  %2923 = vmatpush1.bf16.msra.mxu1 %v2900_v20  ;;  %5953 = vpow2.f32 %v2764_v32  ;;  %v11088_v56 = vsub.f32 %v8016_v23, %v8203_v41 }
 0x66b   : > { %v2772_v15 = vmul.f32 1.442695, %v11087_v43  ;;  %v2841_v19 = vadd.f32 %v8498_v44, %v2840_v60  ;;  %v2862_v61 = vadd.f32 %v8413_v42, %v2861_v11  ;;  %2924 = vmatprep.subr.bf16.mxu1 %v2899_v51  ;;  %v8514_v8 = vpop.eup %5941  ;;  %v2681_v5 = vsub.f32 %v8076_v12, %v8203_v41  ;;  %v11092_v60 = vld [vmem:[#allocation76_spill] sm:$0xff] }
 0x66c   : > { %11081 = vst [vmem:[#allocation28_spill] sm:$0xff] %v8482_v53  ;;  %11083 = vst [vmem:[#allocation25_spill] sm:$0xff] %v8485_v3  ;;  %v2776_v0 = vmul.f32 1.442695, %v11088_v56  ;;  %v11089_v54 = vsub.f32 %v8088_v47, %v8203_v41  ;;  %v2812_v9 = vmul.f32 1.442695, %v2685_v55  ;;  %v2898_v32 = vpack.c.bf16 %v8250_v38, %v8244_v58  ;;  %v8527_v2 = vpop.eup %5943 }
 0x66d   : > { %v2842_v50 = vadd.f32 %v8514_v8, %v2841_v19  ;;  %5955 = vpow2.f32 %v2768_v35  ;;  %v2863_v23 = vadd.f32 %v8420_v34, %v2862_v61  ;;  %v2897_v42 = vpack.c.bf16 %v8452_v59, %v8405_v36  ;;  %v11094_v19 = vld [vmem:[#allocation95_spill] sm:$0xff] }
 0x66e   : > { %v2808_v20 = vmul.f32 1.442695, %v11089_v54  ;;  %v2675_v12 = vsub.f32 %v8047_v22, %v8203_v41  ;;  %v2677_v47 = vsub.f32 %v8055_v48, %v8203_v41  ;;  %5957 = vpow2.f32 %v2772_v15  ;;  %2925 = vmatpush1.bf16.msra.mxu1 %v2898_v32  ;;  %v8541_v22 = vpop.eup %5945  ;;  %v11093_v15 = vld [vmem:[#allocation75_spill] sm:$0xff]  ;;  %v11096_v54 = vld [vmem:[#allocation74_spill] sm:$0xff]  ;;  %v11097_v32 = vld [vmem:[#allocation100_spill] sm:$0xff] }
 0x66f   : > { %v11090_v58 = vsub.f32 %v8023_v14, %v8203_v41  ;;  %v2843_v55 = vadd.f32 %v8527_v2, %v2842_v50  ;;  %5959 = vpow2.f32 %v2776_v0  ;;  %v11091_v36 = vsub.f32 %v8031_v1, %v8203_v41  ;;  %2926 = vmatprep.subr.bf16.mxu1 %v2897_v42  ;;  %v11098_v50 = vld [vmem:[#allocation102_spill] sm:$0xff] }
 0x670   : > { %v2864_v59 = vadd.f32 %v8432_v30, %v2863_v23  ;;  %v2800_v35 = vmul.f32 1.442695, %v2679_v31  ;;  %v2804_v48 = vmul.f32 1.442695, %v2681_v5  ;;  %5961 = vpow2.f32 %v2808_v20  ;;  %v11095_v5 = vld [vmem:[#allocation92_spill] sm:$0xff] }
 0x671   : > { %v2780_v38 = vmul.f32 1.442695, %v11090_v58  ;;  %v2784_v34 = vmul.f32 1.442695, %v11091_v36  ;;  %v2896_v14 = vpack.c.bf16 %v11092_v60, %v8235_v7  ;;  %v8546_v11 = vadd.f32 %v8541_v22, %v2843_v55  ;;  %v11099_v58 = vld [vmem:[#allocation88_spill] sm:$0xff]  ;;  %v1556_v60 = vld [vmem:[%s10691_s6 + $0x178] sm:$0xff] }
 0x672   : > { %5963 = vpow2.f32 %v2812_v9  ;;  %v2865_v51 = vadd.f32 %v8440_v52, %v2864_v59  ;;  %v2895_v1 = vpack.c.bf16 %v8399_v33, %v8394_v21  ;;  %v8551_v41 = vpop.eup %5947  ;;  %v2788_v31 = vmul.f32 1.442695, %v2673_v63  ;;  %v11101_v59 = vld [vmem:[#allocation97_spill] sm:$0xff] }
 0x673   : > { %5965 = vpow2.f32 %v2780_v38  ;;  %2927 = vmatpush1.bf16.msra.mxu1 %v2896_v14  ;;  %v8553_v30 = vpop.eup %5949  ;;  %v2792_v7 = vmul.f32 1.442695, %v2675_v12  ;;  %v2894_v56 = vpack.c.bf16 %v11094_v19, %v11093_v15  ;;  %v2796_v0 = vmul.f32 1.442695, %v2677_v47  ;;  %v11100_v38 = vld [vmem:[#allocation89_spill] sm:$0xff]  ;;  %v11104_v15 = vld [vmem:[#allocation87_spill] sm:$0xff] }
 0x674   : > { %5967 = vpow2.f32 %v2784_v34  ;;  %v2866_v43 = vadd.f32 %v8551_v41, %v2865_v51  ;;  %2928 = vmatprep.subr.bf16.mxu1 %v2895_v1  ;;  %v8558_v52 = vpop.eup %5951  ;;  %v2893_v33 = vpack.c.bf16 %v8387_v27, %v8381_v37  ;;  %v2892_v20 = vpack.c.bf16 %v11096_v54, %v11095_v5  ;;  %v1554_v37 = vld [vmem:[%s10691_s6 + $0x168] sm:$0xff]  ;;  %v1553_v51 = vld [vmem:[%s10691_s6 + $0x160] sm:$0xff]  ;;  %v1555_v5 = vld [vmem:[%s10691_s6 + $0x170] sm:$0xff] }
 0x675   : > { %5969 = vpow2.f32 %v2800_v35  ;;  %v2891_v23 = vpack.c.bf16 %v11098_v50, %v11097_v32  ;;  %v2890_v55 = vpack.c.bf16 %v11100_v38, %v11099_v58  ;;  %v11102_v35 = vld [vmem:[#allocation98_spill] sm:$0xff]  ;;  %v5456_v58 = vld [vmem:[%s10693_s8] sm:$0xff] }
 0x676   : > { %5971 = vpow2.f32 %v2804_v48  ;;  %v2867_v21 = vadd.f32 %v8553_v30, %v2866_v43  ;;  %v2889_v48 = vpack.c.bf16 %v11102_v35, %v11101_v59  ;;  %v5458_v59 = vld [vmem:[%s10693_s8 + $0x10] sm:$0xff] }
 0x677   : > { %2929 = vmatpush1.bf16.msra.mxu1 %v2894_v56  ;;  %5973 = vpow2.f32 %v2788_v31  ;;  %v8564_v61 = vpop.eup %5953 }
 0x678   : > { %v2868_v63 = vadd.f32 %v8558_v52, %v2867_v21  ;;  %2930 = vmatprep.subr.bf16.mxu1 %v2893_v33  ;;  %5975 = vpow2.f32 %v2792_v7  ;;  %v11103_v7 = vld [vmem:[#allocation69_spill] sm:$0xff]  ;;  %v5457_v33 = vld [vmem:[%s10693_s8 + $0x8] sm:$0xff] }
 0x679   : > { %5977 = vpow2.f32 %v2796_v0  ;;  %v2888_v19 = vpack.c.bf16 %v11104_v15, %v11103_v7  ;;  %v11106_v15 = vpack.c.bf16 %v8294_v57, %v8287_v28  ;;  %v2907_v28 = vpack.c.bf16 %v8564_v61, %v8558_v52  ;;  %v11109_v57 = vld [vmem:[#allocation64_spill] sm:$0xff] }
 0x67a   : > { %v2869_v9 = vadd.f32 %v8564_v61, %v2868_v63  ;;  %v8574_v27 = vpop.eup %5955  ;;  %v11117_v61 = vld [vmem:[#allocation34_spill] sm:$0xff] }
 0x67b   : > { %2931 = vmatpush1.bf16.msra.mxu1 %v2892_v20  ;;  %v8576_v42 = vpop.eup %5957 }
 0x67c   : > { %v2870_v12 = vadd.f32 %v8574_v27, %v2869_v9  ;;  %2932 = vmatprep.subr.bf16.mxu1 %v2891_v23  ;;  %v8579_v47 = vpop.eup %5959  ;;  %v2918_v9 = vpack.c.bf16 %v8541_v22, %v8527_v2  ;;  %v2916_v2 = vpack.c.bf16 %v8514_v8, %v8498_v44  ;;  %v5463_v44 = vld [vmem:[%s10693_s8 + $0x38] sm:$0xff]  ;;  %v11105_v8 = vpack.c.bf16 %v8307_v40, %v8300_v17  ;;  %v5462_v17 = vld [vmem:[%s10693_s8 + $0x30] sm:$0xff] }
 0x67d   : > { %v5962_v36 = vpop.eup %5961  ;;  %v2909_v40 = vpack.c.bf16 %v8576_v42, %v8574_v27  ;;  %v2905_v27 = vpack.c.bf16 %v8553_v30, %v8551_v41  ;;  %v11121_v30 = vld [vmem:[#allocation32_spill] sm:$0xff] }
 0x67e   : > { %1784 = vperm.xlu1 %5819, %v1554_v37   ;;  %v2871_v34 = vadd.f32 %v8576_v42, %v2870_v12  ;;  %v5459_v37 = vld [vmem:[%s10693_s8 + $0x18] sm:$0xff]  ;;  %v11111_v42 = vld [vmem:[#allocation60_spill] sm:$0xff] }
 0x67f   : > { %v5964_v14 = vpop.eup %5963  ;;  %2933 = vmatpush1.bf16.msra.mxu1 %v2890_v55 }
 0x680   : > { %v5966_v1 = vpop.eup %5965  ;;  %v2872_v31 = vadd.f32 %v8579_v47, %v2871_v34  ;;  %2934 = vmatprep.subr.bf16.mxu1 %v2889_v48  ;;  %v2919_v21 = vpack.c.bf16 %v5964_v14, %v5962_v36  ;;  %v5461_v34 = vld [vmem:[%s10693_s8 + $0x28] sm:$0xff] }
 0x681   : > { %v5968_v43 = vpop.eup %5967 }
 0x682   : > { %1794 = vperm.xlu1 %5819, %v1556_v60   ;;  %v5970_v56 = vpop.eup %5969  ;;  %v2873_v0 = vadd.f32 %v5966_v1, %v2872_v31 }
 0x683   : > { %1779 = vperm.xlu0 %5820, %v1553_v51   ;;  %v5972_v63 = vpop.eup %5971  ;;  %2935 = vmatpush1.bf16.msra.mxu1 %v2888_v19  ;;  %v5460_v51 = vld [vmem:[%s10693_s8 + $0x20] sm:$0xff] }
 0x684   : > { %v2874_v54 = vadd.f32 %v5968_v43, %v2873_v0  ;;  %2936 = vmatprep.subr.bf16.mxu1 %v2919_v21  ;;  %v5974_v20 = vpop.eup %5973  ;;  %v2917_v23 = vpack.c.bf16 %v5972_v63, %v5970_v56  ;;  %v11114_v0 = vld [vmem:[#allocation11_spill] sm:$0xff] }
 0x685   : > { %v5976_v32 = vpop.eup %5975  ;;  %v2913_v60 = vpack.c.bf16 %v5974_v20, %v5968_v43  ;;  %v2911_v43 = vpack.c.bf16 %v5966_v1, %v8579_v47  ;;  %v11108_v47 = vld [vmem:[#allocation101_spill] sm:$0xff]  ;;  %v11110_v1 = vld [vmem:[#allocation99_spill] sm:$0xff] }
 0x686   : > { %5471 = vperm.xlu1 %5819, %v5457_v33   ;;  %v2875_v50 = vadd.f32 %v5974_v20, %v2874_v54  ;;  %v5978_v12 = vpop.eup %5977  ;;  %v2906_v19 = vpack.c.bf16 %v11110_v1, %v11109_v57  ;;  %v11116_v33 = vld [vmem:[#allocation16_spill] sm:$0xff]  ;;  %v11120_v54 = vld [vmem:[#allocation9_spill] sm:$0xff]  ;;  %v11149_v1 = vld [vmem:[#allocation51_spill] sm:$0xff] }
 0x687   : > { %1789 = vperm.xlu0 %5820, %v1555_v5   ;;  %2937 = vmatpush2.bf16.msra.mxu1 %v2918_v9  ;;  %v2915_v55 = vpack.c.bf16 %v5978_v12, %v5976_v32  ;;  %v11122_v9 = vld [vmem:[#allocation8_spill] sm:$0xff] }
 0x688   : > { %v2876_v38 = vadd.f32 %v5976_v32, %v2875_v50  ;;  %2938 = vmatprep.subr.bf16.mxu1 %v2917_v23  ;;  %v11123_v32 = vpack.c.bf16 %v11121_v30, %v11122_v9  ;;  %v11124_v50 = vld [vmem:[#allocation15_spill] sm:$0xff]  ;;  %v11165_v30 = vld [vmem:[#allocation41_spill] sm:$0xff] }
 0x68a   : > { %5481 = vperm.xlu1 %5819, %v5459_v37   ;;  %v2877_v22 = vadd.f32 %v5978_v12, %v2876_v38  ;;  %v11125_v37 = vld [vmem:[#allocation33_spill] sm:$0xff]  ;;  %v11128_v38 = vld [vmem:[#allocation14_spill] sm:$0xff] }
 0x68b   : > { %5466 = vperm.xlu0 %5820, %v5456_v58   ;;  %2939 = vmatpush2.bf16.msra.mxu1 %v2916_v2  ;;  %v11126_v12 = vld [vmem:[#allocation13_spill] sm:$0xff]  ;;  %v11129_v2 = vld [vmem:[#allocation35_spill] sm:$0xff] }
 0x68c   : > { %v2878_v35 = vadd.f32 %v5970_v56, %v2877_v22  ;;  %2940 = vmatprep.subr.bf16.mxu1 %v2915_v55  ;;  %v11113_v56 = vld [vmem:[#allocation39_spill] sm:$0xff]  ;;  %v11127_v58 = vpack.c.bf16 %v11125_v37, %v11126_v12  ;;  %v11130_v22 = vpack.c.bf16 %v11128_v38, %v11129_v2  ;;  %v11169_v37 = vld [vmem:[#allocation45_spill] sm:$0xff]  ;;  %v11172_v38 = vld [vmem:[#allocation52_spill] sm:$0xff] }
 0x68d   : > { %v2046_v21 = vadd.f32 %v11114_v0, %v11113_v56  ;;  %v2044_v20 = vadd.f32 %v11120_v54, %v11113_v56  ;;  %v11156_v0 = vld [vmem:[#allocation56_spill] sm:$0xff]  ;;  %v11170_v12 = vld [vmem:[#allocation47_spill] sm:$0xff]  ;;  %v11173_v2 = vld [vmem:[#allocation78_spill] sm:$0xff] }
 0x68e   : > { %5491 = vperm.xlu1 %5819, %v5461_v34   ;;  %v2879_v48 = vadd.f32 %v5972_v63, %v2878_v35  ;;  %v11118_v63 = vld [vmem:[#allocation36_spill] sm:$0xff]  ;;  %v11131_v34 = vld [vmem:[#allocation31_spill] sm:$0xff] }
 0x68f   : > { %5476 = vperm.xlu0 %5820, %v5458_v59   ;;  %2941 = vmatpush2.bf16.msra.mxu1 %v11105_v8  ;;  %v11119_v5 = vpack.c.bf16 %v11117_v61, %v11118_v63  ;;  %v11132_v59 = vld [vmem:[#allocation7_spill] sm:$0xff]  ;;  %v11137_v8 = vld [vmem:[#allocation44_spill] sm:$0xff]  ;;  %v11160_v61 = vld [vmem:[#allocation38_spill] sm:$0xff] }
 0x690   : > { %v2880_v31 = vadd.f32 %v5962_v36, %v2879_v48  ;;  %2942 = vmatprep.subr.bf16.mxu1 %v2913_v60  ;;  %v11107_v36 = vpack.c.bf16 %v8279_v6, %v8272_v46  ;;  %v11112_v46 = vld [vmem:[#allocation96_spill] sm:$0xff]  ;;  %v11133_v35 = vpack.c.bf16 %v11131_v34, %v11132_v59  ;;  %v11134_v48 = vmov 0  }
 0x691   : > { %v2904_v6 = vpack.c.bf16 %v11112_v46, %v11111_v42  ;;  %v11135_v60 = vld [vmem:[#allocation40_spill] sm:$0xff]  ;;  %v11153_v46 = vld [vmem:[#allocation54_spill] sm:$0xff] }
 0x692   : > { %5501 = vperm.xlu1 %5819, %v5463_v44   ;;  %v8626_v7 = vadd.f32 %v5964_v14, %v2880_v31  ;;  %v2908_v14 = vpack.c.bf16 %v8373_v45, %v11108_v47  ;;  %v11115_v45 = vld [vmem:[#allocation37_spill] sm:$0xff]  ;;  %v11136_v44 = vld [vmem:[#allocation42_spill] sm:$0xff]  ;;  %v8685_v31 = vpop.permute.xlu0 %1619  ;;  %v11145_v47 = vld [vmem:[#allocation48_spill] sm:$0xff] }
 0x693   : > { %5486 = vperm.xlu0 %5820, %v5460_v51   ;;  %2943 = vmatpush2.bf16.msra.mxu1 %v11106_v15  ;;  %v2050_v52 = vadd.f32 %v11116_v33, %v11115_v45  ;;  %v2048_v23 = vadd.f32 %v11124_v50, %v11115_v45  ;;  %v8682_v51 = vpop.permute.xlu1 %1624  ;;  %11139 = vst [vmem:[#allocation26_spill] sm:$0xff] %v8685_v31  ;;  %v2243_v33 = vpop.f32.mrf.mxu0 }
 0x694   : > { %2944 = vmatprep.subr.bf16.mxu1 %v2911_v43  ;;  %11138 = vst [vmem:[#allocation12_spill] sm:$0xff] %v8682_v51 }
 0x695   : > { %v3012_v41 = vpack.c.bf16 %v2050_v52, %v2046_v21  ;;  %v3011_v55 = vpack.c.bf16 %v2048_v23, %v2044_v20  ;;  %v11168_v23 = vld [vmem:[#allocation43_spill] sm:$0xff] }
 0x697   : > { %5496 = vperm.xlu0 %5820, %v5462_v17   ;;  %2945 = vmatpush2.bf16.msra.mxu1 %v11107_v36  ;;  %v11142_v17 = vld [vmem:[#allocation46_spill] sm:$0xff] }
 0x698   : > { %2946 = vmatprep.subr.bf16.mxu1 %v2909_v40 }
 0x69b   : > { %2947 = vmatpush2.bf16.msra.mxu1 %v2908_v14 }
 0x69c   : > { %2948 = vmatprep.subr.bf16.mxu1 %v2907_v28 }
 0x69f   : > { %2949 = vmatpush2.bf16.msra.mxu1 %v2906_v19 }
 0x6a0   : > { %2950 = vmatprep.subr.bf16.mxu1 %v2905_v27 }
 0x6a3   : > { %2951 = vmatpush2.bf16.msra.mxu1 %v2904_v6 }
 0x6a4   : > { %3115 = vmatprep.subr.bf16.mxu1 %v11119_v5  ;;  %v8737_v5 = vpop.f32.mrf.mxu0 }
 0x6a5   : > { %11162 = vst [vmem:[#allocation60_spill] sm:$0xff] %v8737_v5 }
 0x6a6   : > { %2953 = vmatmul.mubr.bf16.vlgmr.msra.gmra.mxu1 %v11123_v32  ;;  %v2247_v20 = vpop.f32.mrf.mxu0 }
 0x6a7   : > { %2962 = vmatprep.mubr.bf16.mxu1 %v11127_v58  ;;  %3116 = vmatpush1.bf16.msra.mxu1 %v11130_v22  ;;  %v11171_v58 = vld [vmem:[#allocation49_spill] sm:$0xff]  ;;  %v2226_v22 = vadd.f32 %v11173_v2, %v8411_v39 }
 0x6a8   : > { %3117 = vmatprep.subr.bf16.mxu1 %v3012_v41 }
 0x6ab   : > { %3118 = vmatpush1.bf16.msra.mxu1 %v3011_v55  ;;  %v11174_v55 = vld [vmem:[#allocation59_spill] sm:$0xff] }
 0x6ac   : > { %v2230_v34 = vadd.f32 %v11174_v55, %v8379_v18 }
 0x6ae   : > { %2963 = vmatmul.mubr.bf16.gmra.mxu1 %v11133_v35  ;;  %v3768_v59 = vpack.c.bf16 %v2230_v34, %v2226_v22  ;;  %v11175_v35 = vld [vmem:[#allocation55_spill] sm:$0xff] }
 0x6af   : > { %3135 = vmatprep.mubr.bf16.mxu1 %v11134_v48 }
 0x6b6   : > { %5686 = vmatmul.mubr.msk.bf16.vlgmr.msra.gmra.mxu1 %vm2306_vm1, %v11135_v60  ;;  %v2845_v60 = vrot.slane %v8546_v11, 4 }
 0x6b7   : > { %3145 = vmatprep.mubr.bf16.mxu1 %v11134_v48 }
 0x6be   : > { %5687 = vmatmul.mubr.msk.bf16.gmra.mxu1 %vm2306_vm1, %v11136_v44  ;;  %v2882_v44 = vrot.slane %v8626_v7, 4 }
 0x6bf   : > { %3155 = vmatprep.mubr.bf16.mxu1 %v11134_v48 }
 0x6c0   : > { %v8687_v43 = vpop.trf.xlu1  ;;  %v8689_v15 = vpop.trf.xlu0 }
 0x6c1   : > { %11140 = vst [vmem:[#allocation76_spill] sm:$0xff] %v8687_v43  ;;  %11141 = vst [vmem:[#allocation75_spill] sm:$0xff] %v8689_v15 }
 0x6c4   : > { %v8694_v40 = vpop.trf.xlu1  ;;  %v8696_v36 = vpop.trf.xlu0 }
 0x6c5   : > { %11143 = vst [vmem:[#allocation95_spill] sm:$0xff] %v8694_v40  ;;  %11144 = vst [vmem:[#allocation92_spill] sm:$0xff] %v8696_v36 }
 0x6c6   : > { %5688 = vmatmul.mubr.msk.bf16.gmra.mxu1 %vm2306_vm1, %v11137_v8  ;;  %v2846_v8 = vadd.f32 %v2845_v60, %v8546_v11 }
 0x6c7   : > { %3165 = vmatprep.mubr.bf16.mxu1 %v11134_v48 }
 0x6c8   : > { %v8701_v14 = vpop.trf.xlu1  ;;  %v8703_v28 = vpop.trf.xlu0 }
 0x6c9   : > { %11146 = vst [vmem:[#allocation74_spill] sm:$0xff] %v8701_v14  ;;  %11147 = vst [vmem:[#allocation100_spill] sm:$0xff] %v8703_v28 }
 0x6cc   : > { %v8705_v57 = vpop.trf.xlu1  ;;  %v8710_v19 = vpop.trf.xlu0 }
 0x6cd   : > { %11148 = vst [vmem:[#allocation102_spill] sm:$0xff] %v8705_v57  ;;  %11150 = vst [vmem:[#allocation88_spill] sm:$0xff] %v8710_v19 }
 0x6ce   : > { %5689 = vmatmul.mubr.msk.bf16.gmra.mxu1 %vm2306_vm1, %v11142_v17  ;;  %v2883_v17 = vadd.f32 %v2882_v44, %v8626_v7 }
 0x6cf   : > { %3175 = vmatprep.mubr.bf16.mxu1 %v11134_v48 }
 0x6d0   : > { %v8712_v27 = vpop.trf.xlu1  ;;  %v8714_v42 = vpop.trf.xlu0 }
 0x6d1   : > { %11151 = vst [vmem:[#allocation89_spill] sm:$0xff] %v8712_v27  ;;  %11152 = vst [vmem:[#allocation97_spill] sm:$0xff] %v8714_v42 }
 0x6d4   : > { %v8719_v6 = vpop.trf.xlu1  ;;  %v8721_v56 = vpop.trf.xlu0 }
 0x6d5   : > { %11154 = vst [vmem:[#allocation98_spill] sm:$0xff] %v8719_v6  ;;  %11155 = vst [vmem:[#allocation69_spill] sm:$0xff] %v8721_v56 }
 0x6d6   : > { %5690 = vmatmul.mubr.msk.bf16.gmra.mxu1 %vm2306_vm1, %v11145_v47  ;;  %v2847_v47 = vrot.slane %v2846_v8, 2 }
 0x6d7   : > { %3185 = vmatprep.mubr.bf16.mxu1 %v11134_v48 }
 0x6d8   : > { %v8726_v21 = vpop.trf.xlu1  ;;  %v8728_v45 = vpop.trf.xlu0 }
 0x6d9   : > { %11157 = vst [vmem:[#allocation87_spill] sm:$0xff] %v8726_v21  ;;  %11158 = vst [vmem:[#allocation101_spill] sm:$0xff] %v8728_v45 }
 0x6dc   : > { %v8730_v52 = vpop.trf.xlu1  ;;  %v8735_v63 = vpop.trf.xlu0 }
 0x6dd   : > { %11159 = vst [vmem:[#allocation64_spill] sm:$0xff] %v8730_v52  ;;  %11161 = vst [vmem:[#allocation99_spill] sm:$0xff] %v8735_v63 }
 0x6de   : > { %5691 = vmatmul.mubr.msk.bf16.gmra.mxu1 %vm2306_vm1, %v11149_v1  ;;  %v2884_v1 = vrot.slane %v2883_v17, 2 }
 0x6df   : > { %3195 = vmatprep.mubr.bf16.mxu1 %v11134_v48 }
 0x6e0   : > { %v2885_v39 = vadd.f32 %v2884_v1, %v2883_v17 }
 0x6e6   : > { %5692 = vmatmul.mubr.msk.bf16.gmra.mxu1 %vm2306_vm1, %v11153_v46  ;;  %v2848_v46 = vadd.f32 %v2847_v47, %v2846_v8 }
 0x6e7   : > { %3205 = vmatprep.mubr.bf16.mxu1 %v11134_v48 }
 0x6ee   : > { %5693 = vmatmul.mubr.msk.bf16.gmra.mxu1 %vm2306_vm1, %v11156_v0  ;;  %v2849_v0 = vrot.slane %v2848_v46, 1 }
 0x6ef   : > { %3215 = vmatprep.mubr.bf16.mxu1 %v11134_v48 }
 0x6f0   : > { %v2850_v18 = vadd.f32 %v2849_v0, %v2848_v46 }
 0x6f2   : > { %5979 = vrcp.f32 %v2850_v18 }
 0x6f6   : > { %5694 = vmatmul.mubr.msk.bf16.gmra.mxu1 %vm2306_vm1, %v11160_v61 }
 0x6f7   : > { %3225 = vmatprep.mubr.bf16.mxu1 %v11134_v48 }
 0x6f9   : > { %v8739_v54 = vpop.permute.xlu1 %1784 }
 0x6fa   : > { %11163 = vst [vmem:[#allocation96_spill] sm:$0xff] %v8739_v54  ;;  %v8746_v9 = vadd.f32 %v2247_v20, %v8739_v54 }
 0x6fc   : > { %11166 = vst [vmem:[#allocation11_spill] sm:$0xff] %v8746_v9 }
 0x6fe   : > { %v8741_v41 = vpop.permute.xlu0 %1779  ;;  %5695 = vmatmul.mubr.msk.bf16.gmra.mxu1 %vm2306_vm1, %v11165_v30 }
 0x6ff   : > { %11164 = vst [vmem:[#allocation39_spill] sm:$0xff] %v8741_v41  ;;  %v8749_v32 = vadd.f32 %v2243_v33, %v8741_v41  ;;  %3235 = vmatprep.mubr.bf16.mxu1 %v11134_v48  ;;  %v2886_v33 = vrot.slane %v2885_v39, 1  ;;  %v5980_v20 = vpop.eup %5979 }
 0x701   : > { %11167 = vst [vmem:[#allocation37_spill] sm:$0xff] %v8749_v32  ;;  %v2887_v61 = vadd.f32 %v2886_v33, %v2885_v39 }
 0x703   : > { %5981 = vrcp.f32 %v2887_v61 }
 0x706   : > { %5696 = vmatmul.mubr.msk.bf16.gmra.mxu1 %vm2306_vm1, %v11168_v23 }
 0x707   : > { %3245 = vmatprep.mubr.bf16.mxu1 %v11134_v48 }
 0x70e   : > { %5697 = vmatmul.mubr.msk.bf16.gmra.mxu1 %vm2306_vm1, %v11169_v37 }
 0x70f   : > { %3255 = vmatprep.mubr.bf16.mxu1 %v11134_v48 }
 0x710   : > { %v5982_v37 = vpop.eup %5981 }
 0x716   : > { %5698 = vmatmul.mubr.msk.bf16.gmra.mxu1 %vm2306_vm1, %v11170_v12 }
 0x717   : > { %3265 = vmatprep.mubr.bf16.mxu1 %v11134_v48 }
 0x71e   : > { %5699 = vmatmul.mubr.msk.bf16.gmra.mxu1 %vm2306_vm1, %v11171_v58 }
 0x71f   : > { %3275 = vmatprep.mubr.bf16.mxu1 %v11134_v48 }
 0x726   : > { %5700 = vmatmul.mubr.msk.bf16.gmra.mxu1 %vm2306_vm1, %v11172_v38 }
 0x727   : > { %3285 = vmatprep.mubr.bf16.mxu1 %v11134_v48 }
 0x72e   : > { %5701 = vmatmul.mubr.msk.bf16.gmra.mxu1 %vm2306_vm1, %v11175_v35 }
 0x72f   : > { %4448 = vmatprep.mubr.bf16.mxu1 %v3768_v59 }
 0x766   : > { %v2954_v30 = vpop.f32.mrf.mxu1 }
 0x767   : > { %v8779_v23 = vmul.f32 %v5980_v20, %v2954_v30 }
 0x768   : > { %v2956_v12 = vpop.f32.mrf.mxu1 }
 0x769   : > { %11176 = vst [vmem:[#allocation16_spill] sm:$0xff] %v8779_v23  ;;  %v8781_v58 = vmul.f32 %v5982_v37, %v2956_v12 }
 0x76a   : > { %v2958_v11 = vpop.f32.mrf.mxu1 }
 0x76b   : > { %11177 = vst [vmem:[#allocation34_spill] sm:$0xff] %v8781_v58  ;;  %v8783_v7 = vmul.f32 %v5980_v20, %v2958_v11 }
 0x76c   : > { %v2960_v38 = vpop.f32.mrf.mxu1 }
 0x76d   : > { %11178 = vst [vmem:[#allocation36_spill] sm:$0xff] %v8783_v7  ;;  %v8787_v22 = vmul.f32 %v5982_v37, %v2960_v38 }
 0x76e   : > { %v2964_v55 = vpop.f32.mrf.mxu1 }
 0x76f   : > { %11179 = vst [vmem:[#allocation9_spill] sm:$0xff] %v8787_v22  ;;  %v8791_v59 = vmul.f32 %v5980_v20, %v2964_v55 }
 0x770   : > { %v2966_v35 = vpop.f32.mrf.mxu1 }
 0x771   : > { %11180 = vst [vmem:[#allocation32_spill] sm:$0xff] %v8791_v59  ;;  %v8793_v60 = vmul.f32 %v5982_v37, %v2966_v35 }
 0x772   : > { %v2968_v44 = vpop.f32.mrf.mxu1 }
 0x773   : > { %11181 = vst [vmem:[#allocation8_spill] sm:$0xff] %v8793_v60  ;;  %v8795_v8 = vmul.f32 %v5980_v20, %v2968_v44 }
 0x774   : > { %v2970_v17 = vpop.f32.mrf.mxu1 }
 0x775   : > { %11182 = vst [vmem:[#allocation15_spill] sm:$0xff] %v8795_v8  ;;  %v8799_v1 = vmul.f32 %v5982_v37, %v2970_v17 }
 0x776   : > { %v8801_v46 = vpop.f32.mrf.mxu1 }
 0x777   : > { %11183 = vst [vmem:[#allocation33_spill] sm:$0xff] %v8799_v1 }
 0x778   : > { %v8805_v0 = vpop.f32.mrf.mxu1 }
 0x77a   : > { %v8807_v33 = vpop.f32.mrf.mxu1 }
 0x77c   : > { %v8809_v18 = vpop.f32.mrf.mxu1 }
 0x77e   : > { %v8811_v61 = vpop.f32.mrf.mxu1 }
 0x77f   : > { %v3296_v4 = vmax.f32 %v8801_v46, %v8811_v61 }
 0x780   : > { %v8813_v20 = vpop.f32.mrf.mxu1 }
 0x782   : > { %v8815_v30 = vpop.f32.mrf.mxu1 }
 0x783   : > { %v3297_v53 = vmax.f32 %v8807_v33, %v8815_v30 }
 0x784   : > { %v8817_v12 = vpop.f32.mrf.mxu1 }
 0x785   : > { %11184 = vst [vmem:[#allocation13_spill] sm:$0xff] %v8817_v12 }
 0x786   : > { %v8819_v37 = vpop.f32.mrf.mxu1 }
 0x787   : > { %v3298_v29 = vmax.f32 %v3296_v4, %v8819_v37 }
 0x788   : > { %v8821_v11 = vpop.f32.mrf.mxu1 }
 0x78a   : > { %v8823_v38 = vpop.f32.mrf.mxu1 }
 0x78b   : > { %v3299_v26 = vmax.f32 %v3297_v53, %v8823_v38 }
 0x78c   : > { %v8825_v55 = vpop.f32.mrf.mxu1 }
 0x78d   : > { %11185 = vst [vmem:[#allocation14_spill] sm:$0xff] %v8825_v55 }
 0x78e   : > { %v8827_v35 = vpop.f32.mrf.mxu1 }
 0x78f   : > { %v3300_v13 = vmax.f32 %v3298_v29, %v8827_v35 }
 0x790   : > { %v8829_v44 = vpop.f32.mrf.mxu1 }
 0x792   : > { %v8831_v17 = vpop.f32.mrf.mxu1 }
 0x793   : > { %v3301_v3 = vmax.f32 %v3299_v26, %v8831_v17 }
 0x794   : > { %v8833_v2 = vpop.f32.mrf.mxu1 }
 0x795   : > { %11186 = vst [vmem:[#allocation35_spill] sm:$0xff] %v8833_v2 }
 0x796   : > { %v8835_v34 = vpop.f32.mrf.mxu1 }
 0x797   : > { %11187 = vst [vmem:[#allocation31_spill] sm:$0xff] %v8835_v34  ;;  %v3302_v51 = vmax.f32 %v3300_v13, %v8835_v34 }
 0x798   : > { %v8837_v47 = vpop.f32.mrf.mxu1 }
 0x799   : > { %11188 = vst [vmem:[#allocation7_spill] sm:$0xff] %v8837_v47 }
 0x79a   : > { %v8839_v39 = vpop.f32.mrf.mxu1 }
 0x79b   : > { %v3303_v31 = vmax.f32 %v3301_v3, %v8839_v39 }
 0x79c   : > { %v8841_v50 = vpop.f32.mrf.mxu1 }
 0x79d   : > { %11189 = vst [vmem:[#allocation40_spill] sm:$0xff] %v8841_v50 }
 0x79e   : > { %v8843_v24 = vpop.f32.mrf.mxu1 }
 0x79f   : > { %11190 = vst [vmem:[#allocation42_spill] sm:$0xff] %v8843_v24  ;;  %v3304_v5 = vmax.f32 %v3302_v51, %v8843_v24 }
 0x7a0   : > { %v8845_v25 = vpop.f32.mrf.mxu1 }
 0x7a2   : > { %v8847_v23 = vpop.f32.mrf.mxu1 }
 0x7a3   : > { %v3305_v4 = vmax.f32 %v3303_v31, %v8847_v23 }
 0x7a4   : > { %v8849_v7 = vpop.f32.mrf.mxu1 }
 0x7a6   : > { %v8851_v58 = vpop.f32.mrf.mxu1 }
 0x7a7   : > { %11191 = vst [vmem:[#allocation44_spill] sm:$0xff] %v8851_v58  ;;  %v3306_v53 = vmax.f32 %v3304_v5, %v8851_v58 }
 0x7a8   : > { %v8853_v22 = vpop.f32.mrf.mxu1 }
 0x7aa   : > { %v8855_v59 = vpop.f32.mrf.mxu1 }
 0x7ab   : > { %v3307_v29 = vmax.f32 %v3305_v4, %v8855_v59  ;;  %v3334_v4 = vmax.f32 %v8809_v18, %v8817_v12 }
 0x7ac   : > { %v8857_v8 = vpop.f32.mrf.mxu1 }
 0x7ae   : > { %v8859_v60 = vpop.f32.mrf.mxu1 }
 0x7af   : > { %v3308_v26 = vmax.f32 %v3306_v53, %v8859_v60 }
 0x7b0   : > { %v8861_v1 = vpop.f32.mrf.mxu1 }
 0x7b2   : > { %v8863_v32 = vpop.f32.mrf.mxu1 }
 0x7b3   : > { %11192 = vst [vmem:[#allocation46_spill] sm:$0xff] %v8863_v32  ;;  %v3309_v13 = vmax.f32 %v3307_v29, %v8863_v32 }
 0x7b4   : > { %v8865_v9 = vpop.f32.mrf.mxu1 }
 0x7b6   : > { %v8867_v52 = vpop.f32.mrf.mxu1 }
 0x7b7   : > { %v3310_v3 = vmax.f32 %v3308_v26, %v8867_v52  ;;  %v3333_v26 = vmax.f32 %v8805_v0, %v8813_v20 }
 0x7b8   : > { %v8869_v21 = vpop.f32.mrf.mxu1 }
 0x7ba   : > { %v8871_v6 = vpop.f32.mrf.mxu1 }
 0x7bb   : > { %v3311_v51 = vmax.f32 %v3309_v13, %v8871_v6  ;;  %v3336_v13 = vmax.f32 %v3334_v4, %v8825_v55 }
 0x7bc   : > { %v8873_v27 = vpop.f32.mrf.mxu1 }
 0x7bd   : > { %v3338_v12 = vmax.f32 %v3336_v13, %v8833_v2 }
 0x7be   : > { %v8875_v57 = vpop.f32.mrf.mxu1 }
 0x7bf   : > { %11193 = vst [vmem:[#allocation48_spill] sm:$0xff] %v8875_v57  ;;  %v3312_v31 = vmax.f32 %v3310_v3, %v8875_v57  ;;  %v3335_v57 = vmax.f32 %v3333_v26, %v8821_v11  ;;  %v3340_v4 = vmax.f32 %v3338_v12, %v8841_v50 }
 0x7c0   : > { %v8877_v14 = vpop.f32.mrf.mxu1 }
 0x7c1   : > { %v3342_v13 = vmax.f32 %v3340_v4, %v8849_v7 }
 0x7c2   : > { %v8879_v40 = vpop.f32.mrf.mxu1 }
 0x7c3   : > { %11194 = vst [vmem:[#allocation51_spill] sm:$0xff] %v8879_v40  ;;  %v3313_v5 = vmax.f32 %v3311_v51, %v8879_v40  ;;  %v3344_v12 = vmax.f32 %v3342_v13, %v8857_v8 }
 0x7c4   : > { %v8881_v43 = vpop.f32.mrf.mxu1 }
 0x7c6   : > { %v8883_v63 = vpop.f32.mrf.mxu1 }
 0x7c7   : > { %11195 = vst [vmem:[#allocation54_spill] sm:$0xff] %v8883_v63  ;;  %v3314_v53 = vmax.f32 %v3312_v31, %v8883_v63  ;;  %v3337_v63 = vmax.f32 %v3335_v57, %v8829_v44 }
 0x7c8   : > { %v8885_v45 = vpop.f32.mrf.mxu1 }
 0x7c9   : > { %v3339_v26 = vmax.f32 %v3337_v63, %v8837_v47  ;;  %v3346_v63 = vmax.f32 %v3344_v12, %v8865_v9 }
 0x7ca   : > { %v8887_v56 = vpop.f32.mrf.mxu1 }
 0x7cb   : > { %11196 = vst [vmem:[#allocation56_spill] sm:$0xff] %v8887_v56  ;;  %v3315_v29 = vmax.f32 %v3313_v5, %v8887_v56  ;;  %v3341_v57 = vmax.f32 %v3339_v26, %v8845_v25 }
 0x7cc   : > { %v8889_v42 = vpop.f32.mrf.mxu1 }
 0x7cd   : > { %v3343_v50 = vmax.f32 %v3341_v57, %v8853_v22 }
 0x7ce   : > { %v8891_v19 = vpop.f32.mrf.mxu1 }
 0x7cf   : > { %v3316_v3 = vmax.f32 %v3314_v53, %v8891_v19  ;;  %v3345_v4 = vmax.f32 %v3343_v50, %v8861_v1 }
 0x7d0   : > { %v8893_v28 = vpop.f32.mrf.mxu1 }
 0x7d2   : > { %v8895_v36 = vpop.f32.mrf.mxu1 }
 0x7d3   : > { %v3317_v51 = vmax.f32 %v3315_v29, %v8895_v36 }
 0x7d4   : > { %v8897_v15 = vpop.f32.mrf.mxu1 }
 0x7d6   : > { %v8899_v49 = vpop.f32.mrf.mxu1 }
 0x7d7   : > { %v3318_v31 = vmax.f32 %v3316_v3, %v8899_v49 }
 0x7d8   : > { %v8905_v16 = vpop.f32.mrf.mxu1 }
 0x7da   : > { %v8909_v10 = vpop.f32.mrf.mxu1 }
 0x7db   : > { %v3319_v5 = vmax.f32 %v3317_v51, %v8909_v10 }
 0x7dc   : > { %v8913_v62 = vpop.f32.mrf.mxu1 }
 0x7de   : > { %v8917_v54 = vpop.f32.mrf.mxu1 }
 0x7df   : > { %v3320_v53 = vmax.f32 %v3318_v31, %v8917_v54 }
 0x7e0   : > { %v8921_v41 = vpop.f32.mrf.mxu1 }
 0x7e2   : > { %v8925_v48 = vpop.f32.mrf.mxu1 }
 0x7e3   : > { %v3321_v29 = vmax.f32 %v3319_v5, %v8925_v48 }
 0x7e4   : > { %v8929_v34 = vpop.f32.mrf.mxu1 }
 0x7e6   : > { %v8933_v24 = vpop.f32.mrf.mxu1 }
 0x7e7   : > { %11197 = vst [vmem:[#allocation38_spill] sm:$0xff] %v8933_v24  ;;  %v3322_v3 = vmax.f32 %v3320_v53, %v8933_v24  ;;  %v3348_v53 = vmax.f32 %v3346_v63, %v8873_v27 }
 0x7e8   : > { %v8937_v58 = vpop.f32.mrf.mxu1 }
 0x7e9   : > { %v3350_v26 = vmax.f32 %v3348_v53, %v8881_v43 }
 0x7ea   : > { %v8943_v32 = vpop.f32.mrf.mxu1 }
 0x7eb   : > { %11198 = vst [vmem:[#allocation41_spill] sm:$0xff] %v8943_v32  ;;  %v3323_v51 = vmax.f32 %v3321_v29, %v8943_v32  ;;  %v3347_v32 = vmax.f32 %v3345_v4, %v8869_v21 }
 0x7ec   : > { %v8950_v40 = vpop.f32.mrf.mxu1 }
 0x7ed   : > { %v3349_v13 = vmax.f32 %v3347_v32, %v8877_v14 }
 0x7ee   : > { %v8956_v56 = vpop.f32.mrf.mxu1 }
 0x7ef   : > { %v3324_v31 = vmax.f32 %v3322_v3, %v8956_v56  ;;  %v3352_v3 = vmax.f32 %v3350_v26, %v8889_v42  ;;  %v3351_v57 = vmax.f32 %v3349_v13, %v8885_v45 }
 0x7f0   : > { %v8962_v55 = vpop.f32.mrf.mxu1 }
 0x7f1   : > { %v3354_v12 = vmax.f32 %v3352_v3, %v8897_v15  ;;  %v3353_v50 = vmax.f32 %v3351_v57, %v8893_v28 }
 0x7f2   : > { %v8968_v2 = vpop.f32.mrf.mxu1 }
 0x7f3   : > { %v3325_v5 = vmax.f32 %v3323_v51, %v8968_v2  ;;  %v3355_v4 = vmax.f32 %v3353_v50, %v8905_v16 }
 0x7f5   : > { %v3326_v47 = vmax.f32 %v3324_v31, %v3325_v5  ;;  %v3356_v5 = vmax.f32 %v3354_v12, %v8913_v62  ;;  %v3357_v32 = vmax.f32 %v3355_v4, %v8921_v41 }
 0x7f7   : > { %v3327_v29 = vrot.slane %v3326_v47, 4  ;;  %v3358_v53 = vmax.f32 %v3356_v5, %v8929_v34  ;;  %v3359_v13 = vmax.f32 %v3357_v32, %v8937_v58 }
 0x7f9   : > { %v3328_v24 = vmax.f32 %v3326_v47, %v3327_v29  ;;  %v8988_v47 = vpop.f32.mrf.mxu1  ;;  %v3360_v29 = vmax.f32 %v3358_v53, %v8950_v40  ;;  %v3361_v3 = vmax.f32 %v3359_v13, %v8962_v55 }
 0x7fb   : > { %v3329_v51 = vrot.slane %v3328_v24, 2 }
 0x7fd   : > { %v3330_v31 = vmax.f32 %v3328_v24, %v3329_v51  ;;  %v3362_v24 = vmax.f32 %v3360_v29, %v8988_v47 }
 0x7ff   : > { %v3331_v63 = vrot.slane %v3330_v31, 1  ;;  %v3363_v50 = vmax.f32 %v3361_v3, %v3362_v24 }
 0x801   : > { %v8992_v26 = vmax.f32 %v3330_v31, %v3331_v63  ;;  %v3364_v32 = vrot.slane %v3363_v50, 4 }
 0x803   : > { %v3370_v51 = vsub.f32 %v8801_v46, %v8992_v26  ;;  %v3372_v57 = vsub.f32 %v8807_v33, %v8992_v26  ;;  %v3374_v12 = vsub.f32 %v8811_v61, %v8992_v26  ;;  %v3376_v31 = vsub.f32 %v8815_v30, %v8992_v26 }
 0x804   : > { %v3378_v4 = vsub.f32 %v8819_v37, %v8992_v26  ;;  %v3380_v46 = vsub.f32 %v8823_v38, %v8992_v26  ;;  %v3382_v61 = vsub.f32 %v8827_v35, %v8992_v26  ;;  %v3365_v13 = vmax.f32 %v3363_v50, %v3364_v32  ;;  %v11199_v37 = vld [vmem:[#allocation31_spill] sm:$0xff] }
 0x805   : > { %v3434_v5 = vmul.f32 1.442695, %v3370_v51  ;;  %v3438_v63 = vmul.f32 1.442695, %v3372_v57  ;;  %v3442_v53 = vmul.f32 1.442695, %v3374_v12  ;;  %v3384_v30 = vsub.f32 %v8831_v17, %v8992_v26 }
 0x806   : > { %v3446_v33 = vmul.f32 1.442695, %v3376_v31  ;;  %v3450_v29 = vmul.f32 1.442695, %v3378_v4  ;;  %v3454_v24 = vmul.f32 1.442695, %v3380_v46  ;;  %v3386_v3 = vsub.f32 %v11199_v37, %v8992_v26 }
 0x807   : > { %5983 = vpow2.f32 %v3434_v5  ;;  %v3458_v51 = vmul.f32 1.442695, %v3382_v61  ;;  %v3388_v38 = vsub.f32 %v8839_v39, %v8992_v26  ;;  %v3366_v57 = vrot.slane %v3365_v13, 2  ;;  %v11200_v12 = vld [vmem:[#allocation42_spill] sm:$0xff]  ;;  %v11201_v17 = vld [vmem:[#allocation44_spill] sm:$0xff] }
 0x808   : > { %5985 = vpow2.f32 %v3438_v63  ;;  %v3390_v35 = vsub.f32 %v11200_v12, %v8992_v26  ;;  %v3462_v31 = vmul.f32 1.442695, %v3384_v30  ;;  %v3392_v50 = vsub.f32 %v8847_v23, %v8992_v26 }
 0x809   : > { %5987 = vpow2.f32 %v3442_v53  ;;  %v3394_v5 = vsub.f32 %v11201_v17, %v8992_v26  ;;  %v3466_v63 = vmul.f32 1.442695, %v3386_v3  ;;  %v3396_v4 = vsub.f32 %v8855_v59, %v8992_v26 }
 0x80a   : > { %5989 = vpow2.f32 %v3446_v33  ;;  %v3470_v53 = vmul.f32 1.442695, %v3388_v38  ;;  %v3367_v32 = vmax.f32 %v3365_v13, %v3366_v57  ;;  %v3398_v46 = vsub.f32 %v8859_v60, %v8992_v26 }
 0x80b   : > { %5991 = vpow2.f32 %v3450_v29  ;;  %v3474_v33 = vmul.f32 1.442695, %v3390_v35  ;;  %v3414_v23 = vsub.f32 %v8891_v19, %v8992_v26  ;;  %v3478_v29 = vmul.f32 1.442695, %v3392_v50 }
 0x80c   : > { %5993 = vpow2.f32 %v3454_v24  ;;  %v3416_v30 = vsub.f32 %v8895_v36, %v8992_v26  ;;  %v3482_v59 = vmul.f32 1.442695, %v3394_v5  ;;  %v3418_v60 = vsub.f32 %v8899_v49, %v8992_v26 }
 0x80d   : > { %5995 = vpow2.f32 %v3458_v51  ;;  %v3486_v37 = vmul.f32 1.442695, %v3396_v4  ;;  %v3368_v3 = vrot.slane %v3367_v32, 1  ;;  %v3420_v19 = vsub.f32 %v8909_v10, %v8992_v26  ;;  %v11203_v10 = vld [vmem:[#allocation46_spill] sm:$0xff] }
 0x80e   : > { %5997 = vpow2.f32 %v3462_v31  ;;  %v3490_v51 = vmul.f32 1.442695, %v3398_v46  ;;  %v3422_v57 = vsub.f32 %v8917_v54, %v8992_v26  ;;  %v3522_v12 = vmul.f32 1.442695, %v3414_v23  ;;  %v11204_v23 = vld [vmem:[#allocation48_spill] sm:$0xff] }
 0x80f   : > { %5999 = vpow2.f32 %v3466_v63  ;;  %v3424_v49 = vsub.f32 %v8925_v48, %v8992_v26  ;;  %v3526_v35 = vmul.f32 1.442695, %v3416_v30  ;;  %v3400_v17 = vsub.f32 %v11203_v10, %v8992_v26 }
 0x810   : > { %6001 = vpow2.f32 %v3470_v53  ;;  %v3530_v5 = vmul.f32 1.442695, %v3418_v60  ;;  %v9055_v63 = vmax.f32 %v3367_v32, %v3368_v3  ;;  %v3402_v54 = vsub.f32 %v8867_v52, %v8992_v26 }
 0x811   : > { %6003 = vpow2.f32 %v3474_v33  ;;  %v3534_v4 = vmul.f32 1.442695, %v3420_v19  ;;  %v3404_v46 = vsub.f32 %v8871_v6, %v8992_v26  ;;  %v3538_v33 = vmul.f32 1.442695, %v3422_v57  ;;  %v11205_v19 = vld [vmem:[#allocation51_spill] sm:$0xff] }
 0x812   : > { %6005 = vpow2.f32 %v3478_v29  ;;  %v3406_v29 = vsub.f32 %v11204_v23, %v8992_v26  ;;  %v3542_v32 = vmul.f32 1.442695, %v3424_v49  ;;  %v3494_v52 = vmul.f32 1.442695, %v3400_v17 }
 0x813   : > { %6007 = vpow2.f32 %v3482_v59  ;;  %v3498_v60 = vmul.f32 1.442695, %v3402_v54 }
 0x814   : > { %v9025_v39 = vpop.eup %5983  ;;  %6009 = vpow2.f32 %v3486_v37  ;;  %v3373_v37 = vsub.f32 %v8809_v18, %v9055_v63  ;;  %v3506_v57 = vmul.f32 1.442695, %v3406_v29 }
 0x815   : > { %v9029_v61 = vpop.eup %5985  ;;  %6011 = vpow2.f32 %v3490_v51  ;;  %v3408_v51 = vsub.f32 %v11205_v19, %v8992_v26 }
 0x816   : > { %11202 = vst [vmem:[#allocation43_spill] sm:$0xff] %v9029_v61  ;;  %v3562_v13 = vadd.f32 %v9029_v61, %v9025_v39  ;;  %v9037_v24 = vpop.eup %5987  ;;  %6013 = vpow2.f32 %v3522_v12 }
 0x817   : > { %v9044_v38 = vpop.eup %5989  ;;  %6015 = vpow2.f32 %v3526_v35  ;;  %v11206_v35 = vld [vmem:[#allocation54_spill] sm:$0xff] }
 0x818   : > { %v3563_v36 = vadd.f32 %v9037_v24, %v3562_v13  ;;  %v9051_v50 = vpop.eup %5991  ;;  %6017 = vpow2.f32 %v3530_v5  ;;  %v3371_v13 = vsub.f32 %v8805_v0, %v9055_v63  ;;  %v3375_v0 = vsub.f32 %v8813_v20, %v9055_v63  ;;  %v11207_v5 = vld [vmem:[#allocation13_spill] sm:$0xff]  ;;  %v11208_v20 = vld [vmem:[#allocation56_spill] sm:$0xff] }
 0x819   : > { %v9060_v53 = vpop.eup %5993  ;;  %6019 = vpow2.f32 %v3534_v4  ;;  %v3377_v54 = vsub.f32 %v11207_v5, %v9055_v63  ;;  %v3440_v4 = vmul.f32 1.442695, %v3373_v37 }
 0x81a   : > { %v3564_v31 = vadd.f32 %v9044_v38, %v3563_v36  ;;  %v9067_v59 = vpop.eup %5995  ;;  %v3502_v36 = vmul.f32 1.442695, %v3404_v46  ;;  %6021 = vpow2.f32 %v3538_v33  ;;  %v3436_v18 = vmul.f32 1.442695, %v3371_v13 }
 0x81b   : > { %v9074_v3 = vpop.eup %5997  ;;  %6023 = vpow2.f32 %v3542_v32  ;;  %v3412_v46 = vsub.f32 %v11208_v20, %v8992_v26  ;;  %v3510_v33 = vmul.f32 1.442695, %v3408_v51  ;;  %v3379_v32 = vsub.f32 %v8821_v11, %v9055_v63 }
 0x81c   : > { %v3565_v48 = vadd.f32 %v9051_v50, %v3564_v31  ;;  %v9081_v49 = vpop.eup %5999  ;;  %v3410_v31 = vsub.f32 %v11206_v35, %v8992_v26  ;;  %6025 = vpow2.f32 %v3494_v52  ;;  %v3383_v51 = vsub.f32 %v8829_v44, %v9055_v63 }
 0x81d   : > { %v9085_v10 = vpop.eup %6001  ;;  %6027 = vpow2.f32 %v3498_v60  ;;  %v11209_v60 = vld [vmem:[#allocation14_spill] sm:$0xff]  ;;  %v3518_v11 = vmul.f32 1.442695, %v3412_v46  ;;  %v3452_v5 = vmul.f32 1.442695, %v3379_v32  ;;  %v3395_v44 = vsub.f32 %v8853_v22, %v9055_v63 }
 0x81e   : > { %v3566_v30 = vadd.f32 %v9060_v53, %v3565_v48  ;;  %v9090_v48 = vpop.eup %6003  ;;  %6029 = vpow2.f32 %v3502_v36  ;;  %v3514_v13 = vmul.f32 1.442695, %v3410_v31  ;;  %v3448_v36 = vmul.f32 1.442695, %v3377_v54 }
 0x81f   : > { %v9094_v23 = vpop.eup %6005  ;;  %6031 = vpow2.f32 %v3506_v57  ;;  %v3397_v54 = vsub.f32 %v8857_v8, %v9055_v63  ;;  %v3401_v22 = vsub.f32 %v8865_v9, %v9055_v63 }
 0x820   : > { %v3567_v6 = vadd.f32 %v9067_v59, %v3566_v30  ;;  %v3444_v30 = vmul.f32 1.442695, %v3375_v0  ;;  %v9099_v52 = vpop.eup %6007  ;;  %6033 = vpow2.f32 %v3436_v18  ;;  %v11211_v18 = vld [vmem:[#allocation7_spill] sm:$0xff] }
 0x821   : > { %v9103_v37 = vpop.eup %6009  ;;  %6035 = vpow2.f32 %v3440_v4 }
 0x822   : > { %v3568_v12 = vadd.f32 %v9074_v3, %v3567_v6  ;;  %v3381_v6 = vsub.f32 %v11209_v60, %v9055_v63  ;;  %v9108_v57 = vpop.eup %6011  ;;  %6037 = vpow2.f32 %v3510_v33 }
 0x823   : > { %v9112_v35 = vpop.eup %6013  ;;  %6039 = vpow2.f32 %v3444_v30 }
 0x824   : > { %v3569_v17 = vadd.f32 %v9081_v49, %v3568_v12  ;;  %v11210_v12 = vld [vmem:[#allocation35_spill] sm:$0xff]  ;;  %v9117_v20 = vpop.eup %6015  ;;  %6041 = vpow2.f32 %v3514_v13  ;;  %v3456_v4 = vmul.f32 1.442695, %v3381_v6  ;;  %v3399_v13 = vsub.f32 %v8861_v1, %v9055_v63 }
 0x825   : > { %v3385_v0 = vsub.f32 %v11210_v12, %v9055_v63  ;;  %v9123_v46 = vpop.eup %6017  ;;  %6043 = vpow2.f32 %v3448_v36  ;;  %v3484_v1 = vmul.f32 1.442695, %v3395_v44 }
 0x826   : > { %v3570_v29 = vadd.f32 %v9085_v10, %v3569_v17  ;;  %v3387_v17 = vsub.f32 %v11211_v18, %v9055_v63  ;;  %v9128_v32 = vpop.eup %6019  ;;  %6045 = vpow2.f32 %v3518_v11  ;;  %v11212_v11 = vld [vmem:[#allocation40_spill] sm:$0xff] }
 0x827   : > { %v3464_v8 = vmul.f32 1.442695, %v3385_v0  ;;  %v9134_v60 = vpop.eup %6021  ;;  %6047 = vpow2.f32 %v3452_v5  ;;  %v3389_v12 = vsub.f32 %v11212_v11, %v9055_v63  ;;  %v3488_v0 = vmul.f32 1.442695, %v3397_v54 }
 0x828   : > { %v3571_v19 = vadd.f32 %v9090_v48, %v3570_v29  ;;  %v3460_v29 = vmul.f32 1.442695, %v3383_v51  ;;  %v9139_v36 = vpop.eup %6023  ;;  %6049 = vpow2.f32 %v3456_v4  ;;  %v3391_v5 = vsub.f32 %v8845_v25, %v9055_v63 }
 0x829   : > { %v3393_v4 = vsub.f32 %v8849_v7, %v9055_v63  ;;  %v3472_v51 = vmul.f32 1.442695, %v3389_v12  ;;  %v11218_v12 = vld [vmem:[#allocation41_spill] sm:$0xff] }
 0x82a   : > { %v3572_v31 = vadd.f32 %v9094_v23, %v3571_v19  ;;  %v3468_v19 = vmul.f32 1.442695, %v3387_v17  ;;  %6051 = vpow2.f32 %v3460_v29  ;;  %v3496_v29 = vmul.f32 1.442695, %v3401_v22 }
 0x82b   : > { %6053 = vpow2.f32 %v3464_v8  ;;  %v3480_v22 = vmul.f32 1.442695, %v3393_v4 }
 0x82c   : > { %v3573_v33 = vadd.f32 %v9099_v52, %v3572_v31  ;;  %v9143_v31 = vpop.eup %6025  ;;  %6055 = vpow2.f32 %v3468_v19 }
 0x82d   : > { %v9148_v17 = vpop.eup %6027  ;;  %6057 = vpow2.f32 %v3484_v1 }
 0x82e   : > { %v3574_v6 = vadd.f32 %v9103_v37, %v3573_v33  ;;  %11213 = vst [vmem:[#allocation45_spill] sm:$0xff] %v9148_v17  ;;  %v3492_v33 = vmul.f32 1.442695, %v3399_v13  ;;  %v9152_v30 = vpop.eup %6029  ;;  %6059 = vpow2.f32 %v3488_v0  ;;  %v11216_v13 = vld [vmem:[#allocation38_spill] sm:$0xff]  ;;  %v3428_v0 = vsub.f32 %v11218_v12, %v8992_v26 }
 0x82f   : > { %11214 = vst [vmem:[#allocation47_spill] sm:$0xff] %v9152_v30  ;;  %v9157_v54 = vpop.eup %6031  ;;  %v3426_v8 = vsub.f32 %v11216_v13, %v8992_v26  ;;  %v3423_v13 = vsub.f32 %v8921_v41, %v9055_v63 }
 0x830   : > { %v3575_v9 = vadd.f32 %v9108_v57, %v3574_v6  ;;  %11215 = vst [vmem:[#allocation49_spill] sm:$0xff] %v9157_v54  ;;  %v9159_v6 = vpop.eup %6033  ;;  %6061 = vpow2.f32 %v3492_v33 }
 0x831   : > { %v9162_v25 = vpop.eup %6035  ;;  %6063 = vpow2.f32 %v3496_v29  ;;  %v3546_v29 = vmul.f32 1.442695, %v3426_v8  ;;  %v3432_v8 = vsub.f32 %v8968_v2, %v8992_v26 }
 0x832   : > { %v3576_v44 = vadd.f32 %v9143_v31, %v3575_v9  ;;  %v3476_v9 = vmul.f32 1.442695, %v3391_v5  ;;  %v9166_v18 = vpop.eup %6037  ;;  %v3599_v19 = vadd.f32 %v9162_v25, %v9159_v6  ;;  %v3430_v5 = vsub.f32 %v8956_v56, %v8992_v26 }
 0x833   : > { %11217 = vst [vmem:[#allocation52_spill] sm:$0xff] %v9166_v18  ;;  %v9171_v1 = vpop.eup %6039  ;;  %6065 = vpow2.f32 %v3472_v51  ;;  %v3405_v26 = vsub.f32 %v8873_v27, %v9055_v63 }
 0x834   : > { %v3577_v11 = vadd.f32 %v9148_v17, %v3576_v44  ;;  %v9175_v44 = vpop.eup %6041  ;;  %6067 = vpow2.f32 %v3476_v9  ;;  %v3425_v17 = vsub.f32 %v8929_v34, %v9055_v63  ;;  %v3554_v41 = vmul.f32 1.442695, %v3430_v5 }
 0x835   : > { %v9181_v4 = vpop.eup %6043  ;;  %6069 = vpow2.f32 %v3480_v22  ;;  %v3403_v34 = vsub.f32 %v8869_v21, %v9055_v63  ;;  %v3540_v22 = vmul.f32 1.442695, %v3423_v13 }
 0x836   : > { %v3578_v7 = vadd.f32 %v9152_v30, %v3577_v11  ;;  %v3600_v11 = vadd.f32 %v9171_v1, %v3599_v19  ;;  %v9185_v30 = vpop.eup %6045  ;;  %6071 = vpow2.f32 %v3546_v29  ;;  %v3407_v29 = vsub.f32 %v8877_v14, %v9055_v63 }
 0x837   : > { %11219 = vst [vmem:[#allocation78_spill] sm:$0xff] %v9185_v30  ;;  %v9191_v51 = vpop.eup %6047 }
 0x838   : > { %v3579_v33 = vadd.f32 %v9157_v54, %v3578_v7  ;;  %v3601_v56 = vadd.f32 %v9181_v4, %v3600_v11  ;;  %v3550_v7 = vmul.f32 1.442695, %v3428_v0  ;;  %v9193_v19 = vpop.eup %6049 }
 0x83a   : > { %v3580_v12 = vadd.f32 %v9166_v18, %v3579_v33  ;;  %v3602_v54 = vadd.f32 %v9191_v51, %v3601_v56  ;;  %v9199_v33 = vpop.eup %6051  ;;  %v3544_v18 = vmul.f32 1.442695, %v3425_v17  ;;  %6073 = vpow2.f32 %v3550_v7 }
 0x83b   : > { %v9203_v11 = vpop.eup %6053  ;;  %6075 = vpow2.f32 %v3554_v41  ;;  %v3500_v7 = vmul.f32 1.442695, %v3403_v34  ;;  %v3504_v41 = vmul.f32 1.442695, %v3405_v26  ;;  %v3508_v34 = vmul.f32 1.442695, %v3407_v29 }
 0x83c   : > { %v3581_v9 = vadd.f32 %v9175_v44, %v3580_v12  ;;  %v3603_v61 = vadd.f32 %v9193_v19, %v3602_v54  ;;  %v9207_v2 = vpop.eup %6055  ;;  %v3558_v12 = vmul.f32 1.442695, %v3432_v8  ;;  %6077 = vpow2.f32 %v3540_v22 }
 0x83d   : > { %v6058_v5 = vpop.eup %6057  ;;  %6079 = vpow2.f32 %v3544_v18  ;;  %v3409_v8 = vsub.f32 %v8881_v43, %v9055_v63  ;;  %v3411_v18 = vsub.f32 %v8885_v45, %v9055_v63 }
 0x83e   : > { %v3582_v0 = vadd.f32 %v9185_v30, %v3581_v9  ;;  %v3604_v13 = vadd.f32 %v9199_v33, %v3603_v61  ;;  %v6060_v56 = vpop.eup %6059  ;;  %6081 = vpow2.f32 %v3558_v12  ;;  %v3415_v30 = vsub.f32 %v8893_v28, %v9055_v63 }
 0x83f   : > { %v9215_v17 = vpop.eup %6061  ;;  %6083 = vpow2.f32 %v3500_v7  ;;  %v3649_v12 = vpack.c.bf16 %v6060_v56, %v6058_v5  ;;  %v3512_v29 = vmul.f32 1.442695, %v3409_v8  ;;  %v3433_v7 = vsub.f32 %v8988_v47, %v9055_v63 }
 0x840   : > { %v3583_v21 = vadd.f32 %v9112_v35, %v3582_v0  ;;  %v3605_v27 = vadd.f32 %v9203_v11, %v3604_v13  ;;  %v9219_v9 = vpop.eup %6063  ;;  %6085 = vpow2.f32 %v3504_v41  ;;  %v3417_v8 = vsub.f32 %v8897_v15, %v9055_v63 }
 0x841   : > { %v3651_v22 = vpack.c.bf16 %v9219_v9, %v9215_v17  ;;  %v6066_v0 = vpop.eup %6065  ;;  %6087 = vpow2.f32 %v3508_v34  ;;  %v3427_v47 = vsub.f32 %v8937_v58, %v9055_v63  ;;  %v3429_v15 = vsub.f32 %v8950_v40, %v9055_v63 }
 0x842   : > { %v3584_v54 = vadd.f32 %v9117_v20, %v3583_v21  ;;  %v3606_v14 = vadd.f32 %v9207_v2, %v3605_v27  ;;  %v3650_v21 = vpack.c.bf16 %v9143_v31, %v9108_v57  ;;  %v6068_v13 = vpop.eup %6067  ;;  %v3413_v27 = vsub.f32 %v8889_v42, %v9055_v63 }
 0x843   : > { %3668 = vmatprep.subr.bf16.mxu0 %v3651_v22  ;;  %v3431_v31 = vsub.f32 %v8962_v55, %v9055_v63  ;;  %v3648_v42 = vpack.c.bf16 %v9103_v37, %v9099_v52  ;;  %v3419_v55 = vsub.f32 %v8905_v16, %v9055_v63  ;;  %6089 = vpow2.f32 %v3512_v29 }
 0x844   : > { %v3585_v61 = vadd.f32 %v9123_v46, %v3584_v54  ;;  %v3607_v26 = vadd.f32 %v6066_v0, %v3606_v14  ;;  %v6070_v54 = vpop.eup %6069  ;;  %3669 = vmatpush1.bf16.msra.mxu0 %v3650_v21  ;;  %v3520_v41 = vmul.f32 1.442695, %v3413_v27  ;;  %v3524_v37 = vmul.f32 1.442695, %v3415_v30 }
 0x845   : > { %3670 = vmatprep.subr.bf16.mxu0 %v3649_v12  ;;  %v3647_v22 = vpack.c.bf16 %v6070_v54, %v6068_v13  ;;  %v9244_v21 = vpop.eup %6071  ;;  %v3560_v16 = vmul.f32 1.442695, %v3433_v7  ;;  %v3646_v58 = vpack.c.bf16 %v9094_v23, %v9090_v48  ;;  %v3645_v30 = vpack.c.bf16 %v6066_v0, %v9207_v2 }
 0x846   : > { %v3586_v43 = vadd.f32 %v9128_v32, %v3585_v61  ;;  %v3608_v57 = vadd.f32 %v6068_v13, %v3607_v26  ;;  %v3516_v61 = vmul.f32 1.442695, %v3411_v18  ;;  %v3421_v27 = vsub.f32 %v8913_v62, %v9055_v63 }
 0x847   : > { %v9252_v18 = vpop.eup %6073  ;;  %v3528_v40 = vmul.f32 1.442695, %v3417_v8  ;;  %v3548_v2 = vmul.f32 1.442695, %v3427_v47  ;;  %v3552_v0 = vmul.f32 1.442695, %v3429_v15  ;;  %v3644_v62 = vpack.c.bf16 %v9085_v10, %v9081_v49 }
 0x848   : > { %v3587_v45 = vadd.f32 %v9134_v60, %v3586_v43  ;;  %v3609_v28 = vadd.f32 %v6070_v54, %v3608_v57  ;;  %3671 = vmatpush1.bf16.msra.mxu0 %v3648_v42  ;;  %v9255_v13 = vpop.eup %6075  ;;  %v3556_v43 = vmul.f32 1.442695, %v3431_v31  ;;  %6091 = vpow2.f32 %v3516_v61 }
 0x849   : > { %3672 = vmatprep.subr.bf16.mxu0 %v3647_v22  ;;  %v9261_v26 = vpop.eup %6077  ;;  %6093 = vpow2.f32 %v3520_v41  ;;  %v3643_v31 = vpack.c.bf16 %v9203_v11, %v9199_v33  ;;  %v3536_v7 = vmul.f32 1.442695, %v3421_v27  ;;  %v3642_v49 = vpack.c.bf16 %v9074_v3, %v9067_v59 }
 0x84a   : > { %v3588_v14 = vadd.f32 %v9139_v36, %v3587_v45  ;;  %v3610_v34 = vadd.f32 %v6058_v5, %v3609_v28  ;;  %v9265_v5 = vpop.eup %6079  ;;  %v3532_v45 = vmul.f32 1.442695, %v3419_v55  ;;  %6095 = vpow2.f32 %v3524_v37 }
 0x84b   : > { %v3663_v23 = vpack.c.bf16 %v9265_v5, %v9261_v26  ;;  %6097 = vpow2.f32 %v3556_v43  ;;  %v3641_v33 = vpack.c.bf16 %v9193_v19, %v9191_v51  ;;  %v3640_v28 = vpack.c.bf16 %v9060_v53, %v9051_v50 }
 0x84c   : > { %v3589_v52 = vadd.f32 %v9244_v21, %v3588_v14  ;;  %v3611_v54 = vadd.f32 %v6060_v56, %v3610_v34  ;;  %3673 = vmatpush1.bf16.msra.mxu0 %v3646_v58  ;;  %v6082_v56 = vpop.eup %6081  ;;  %6099 = vpow2.f32 %v3560_v16  ;;  %v3639_v8 = vpack.c.bf16 %v9181_v4, %v9171_v1  ;;  %v11220_v4 = vld [vmem:[#allocation43_spill] sm:$0xff] }
 0x84d   : > { %3674 = vmatprep.subr.bf16.mxu0 %v3645_v30  ;;  %6101 = vpow2.f32 %v3528_v40  ;;  %v3638_v51 = vpack.c.bf16 %v9044_v38, %v9037_v24  ;;  %v3636_v34 = vpack.c.bf16 %v11220_v4, %v9025_v39  ;;  %v3664_v30 = vpack.c.bf16 %v9252_v18, %v9244_v21  ;;  %v11252_v4 = vld [vmem:[#allocation85_spill] sm:$0xff] }
 0x84e   : > { %v3590_v12 = vadd.f32 %v9252_v18, %v3589_v52  ;;  %v3612_v48 = vadd.f32 %v9215_v17, %v3611_v54  ;;  %v9280_v17 = vpop.eup %6083  ;;  %6103 = vpow2.f32 %v3532_v45  ;;  %v3637_v52 = vpack.c.bf16 %v9162_v25, %v9159_v6 }
 0x84f   : > { %v9283_v42 = vpop.eup %6085  ;;  %6105 = vpow2.f32 %v3548_v2  ;;  %v11222_v21 = vpack.c.bf16 %v9128_v32, %v9123_v46  ;;  %v11226_v2 = vld [vmem:[#allocation52_spill] sm:$0xff]  ;;  %v11227_v32 = vld [vmem:[#allocation45_spill] sm:$0xff] }
 0x850   : > { %v3591_v29 = vadd.f32 %v9255_v13, %v3590_v12  ;;  %v3613_v57 = vadd.f32 %v9219_v9, %v3612_v48  ;;  %3675 = vmatpush1.bf16.msra.mxu0 %v3644_v62  ;;  %6107 = vpow2.f32 %v3552_v0  ;;  %v6088_v11 = vpop.eup %6087  ;;  %v3666_v12 = vpack.c.bf16 %v6082_v56, %v9255_v13  ;;  %v11228_v62 = vld [vmem:[#allocation47_spill] sm:$0xff] }
 0x851   : > { %3676 = vmatprep.subr.bf16.mxu0 %v3643_v31  ;;  %6109 = vpow2.f32 %v3536_v7  ;;  %v6090_v14 = vpop.eup %6089  ;;  %v11221_v13 = vpack.c.bf16 %v9139_v36, %v9134_v60  ;;  %v3653_v46 = vpack.c.bf16 %v9283_v42, %v9280_v17  ;;  %v11231_v7 = vld [vmem:[#allocation80_spill] sm:$0xff] }
 0x852   : > { %v9275_v63 = vadd.f32 %v6082_v56, %v3591_v29  ;;  %v3614_v61 = vadd.f32 %v9280_v17, %v3613_v57  ;;  %v3655_v36 = vpack.c.bf16 %v6090_v14, %v6088_v11  ;;  %v3652_v57 = vpack.c.bf16 %v11228_v62, %v11227_v32 }
 0x854   : > { %v3615_v10 = vadd.f32 %v9283_v42, %v3614_v61  ;;  %3677 = vmatpush1.bf16.msra.mxu0 %v3642_v49  ;;  %v11233_v49 = vld [vmem:[#allocation71_spill] sm:$0xff]  ;;  %v11237_v42 = vld [vmem:[#allocation62_spill] sm:$0xff] }
 0x855   : > { %3678 = vmatprep.subr.bf16.mxu0 %v3641_v33  ;;  %v6092_v59 = vpop.eup %6091 }
 0x856   : > { %v3616_v9 = vadd.f32 %v6088_v11, %v3615_v10  ;;  %v6094_v3 = vpop.eup %6093  ;;  %v11234_v10 = vld [vmem:[#allocation73_spill] sm:$0xff] }
 0x857   : > { %v6096_v47 = vpop.eup %6095  ;;  %v3657_v18 = vpack.c.bf16 %v6094_v3, %v6092_v59  ;;  %v11235_v33 = vpack.c.bf16 %v11233_v49, %v11234_v10  ;;  %v11236_v11 = vld [vmem:[#allocation17_spill] sm:$0xff] }
 0x858   : > { %v3617_v22 = vadd.f32 %v6090_v14, %v3616_v9  ;;  %3679 = vmatpush1.bf16.msra.mxu0 %v3640_v28  ;;  %v6098_v19 = vpop.eup %6097  ;;  %v11238_v14 = vld [vmem:[#allocation63_spill] sm:$0xff] }
 0x859   : > { %3680 = vmatprep.subr.bf16.mxu0 %v3639_v8  ;;  %v6100_v37 = vpop.eup %6099  ;;  %v11239_v28 = vpack.c.bf16 %v11237_v42, %v11238_v14 }
 0x85a   : > { %v3618_v55 = vadd.f32 %v6092_v59, %v3617_v22  ;;  %v6102_v50 = vpop.eup %6101  ;;  %v3667_v16 = vpack.c.bf16 %v6100_v37, %v6098_v19  ;;  %v11240_v22 = vld [vmem:[#allocation19_spill] sm:$0xff]  ;;  %v11241_v59 = vld [vmem:[#allocation66_spill] sm:$0xff] }
 0x85b   : > { %v6104_v1 = vpop.eup %6103  ;;  %v3659_v56 = vpack.c.bf16 %v6102_v50, %v6096_v47  ;;  %v2068_v8 = vadd.f32 %v11240_v22, %v11231_v7 }
 0x85c   : > { %v3619_v41 = vadd.f32 %v6094_v3, %v3618_v55  ;;  %3681 = vmatpush1.bf16.msra.mxu0 %v3638_v51  ;;  %v6106_v15 = vpop.eup %6105  ;;  %v11242_v3 = vld [vmem:[#allocation68_spill] sm:$0xff] }
 0x85d   : > { %3682 = vmatprep.subr.bf16.mxu0 %v3637_v52  ;;  %v6108_v58 = vpop.eup %6107  ;;  %v11243_v55 = vpack.c.bf16 %v11241_v59, %v11242_v3  ;;  %v11245_v51 = vld [vmem:[#allocation72_spill] sm:$0xff]  ;;  %v11247_v52 = vld [vmem:[#allocation65_spill] sm:$0xff] }
 0x85e   : > { %v3620_v53 = vadd.f32 %v6096_v47, %v3619_v41  ;;  %v6110_v38 = vpop.eup %6109  ;;  %v3665_v25 = vpack.c.bf16 %v6108_v58, %v6106_v15  ;;  %v11244_v47 = vld [vmem:[#allocation70_spill] sm:$0xff] }
 0x85f   : > { %v3661_v45 = vpack.c.bf16 %v6110_v38, %v6104_v1 }
 0x860   : > { %v3621_v43 = vadd.f32 %v6102_v50, %v3620_v53  ;;  %3683 = vmatpush1.bf16.msra.mxu0 %v3636_v34  ;;  %v11250_v53 = vmov 0   ;;  %v11253_v34 = vld [vmem:[#allocation61_spill] sm:$0xff] }
 0x861   : > { %3684 = vmatprep.subr.bf16.mxu0 %v3667_v16  ;;  %v11256_v16 = vld [vmem:[#allocation77_spill] sm:$0xff] }
 0x862   : > { %v3622_v24 = vadd.f32 %v6104_v1, %v3621_v43  ;;  %v11251_v1 = vld [vmem:[#allocation83_spill] sm:$0xff]  ;;  %v11255_v43 = vld [vmem:[#allocation93_spill] sm:$0xff] }
 0x864   : > { %v3623_v6 = vadd.f32 %v6110_v38, %v3622_v24  ;;  %3685 = vmatpush2.bf16.msra.mxu0 %v3666_v12  ;;  %v11258_v24 = vld [vmem:[#allocation79_spill] sm:$0xff]  ;;  %v11259_v38 = vld [vmem:[#allocation81_spill] sm:$0xff]  ;;  %v11260_v12 = vld [vmem:[#allocation84_spill] sm:$0xff] }
 0x865   : > { %3686 = vmatprep.subr.bf16.mxu0 %v3665_v25  ;;  %v11262_v25 = vld [vmem:[#allocation86_spill] sm:$0xff] }
 0x866   : > { %v3624_v54 = vadd.f32 %v9261_v26, %v3623_v6  ;;  %v11223_v26 = vpack.c.bf16 %v9117_v20, %v9112_v35  ;;  %v11229_v35 = vld [vmem:[#allocation82_spill] sm:$0xff] }
 0x867   : > { %v11230_v20 = vld [vmem:[#allocation18_spill] sm:$0xff]  ;;  %v2064_v9 = vadd.f32 %v11236_v11, %v11229_v35 }
 0x868   : > { %v3625_v39 = vadd.f32 %v9265_v5, %v3624_v54  ;;  %3687 = vmatpush2.bf16.msra.mxu0 %v3664_v30  ;;  %v11224_v5 = vld [vmem:[#allocation78_spill] sm:$0xff]  ;;  %v2066_v31 = vadd.f32 %v11230_v20, %v11229_v35  ;;  %v11263_v54 = vld [vmem:[#allocation91_spill] sm:$0xff] }
 0x869   : > { %3688 = vmatprep.subr.bf16.mxu0 %v3663_v23  ;;  %v3656_v60 = vpack.c.bf16 %v11224_v5, %v9175_v44  ;;  %v11225_v23 = vld [vmem:[#allocation49_spill] sm:$0xff]  ;;  %v11232_v44 = vld [vmem:[#allocation20_spill] sm:$0xff]  ;;  %v3759_v41 = vpack.c.bf16 %v2068_v8, %v2064_v9  ;;  %v11261_v6 = vld [vmem:[#allocation58_spill] sm:$0xff] }
 0x86a   : > { %v3626_v27 = vadd.f32 %v6106_v15, %v3625_v39  ;;  %v3654_v0 = vpack.c.bf16 %v11226_v2, %v11225_v23  ;;  %v2070_v61 = vadd.f32 %v11232_v44, %v11231_v7  ;;  %v11254_v15 = vld [vmem:[#allocation90_spill] sm:$0xff] }
 0x86b   : > { %v11264_v30 = vld [vmem:[#allocation94_spill] sm:$0xff] }
 0x86c   : > { %v3627_v40 = vadd.f32 %v6108_v58, %v3626_v27  ;;  %3689 = vmatpush2.bf16.msra.mxu0 %v11221_v13  ;;  %v3760_v17 = vpack.c.bf16 %v2070_v61, %v2066_v31  ;;  %v11257_v58 = vld [vmem:[#allocation53_spill] sm:$0xff]  ;;  %v11265_v39 = vld [vmem:[#allocation50_spill] sm:$0xff]  ;;  %v11266_v27 = vld [vmem:[#allocation39_spill] sm:$0xff]  ;;  %v2249_v13 = vpop.f32.mrf.mxu0 }
 0x86d   : > { %3690 = vmatprep.subr.bf16.mxu0 %v3661_v45 }
 0x86e   : > { %v3628_v29 = vadd.f32 %v6098_v19, %v3627_v40  ;;  %v11246_v19 = vpack.c.bf16 %v11244_v47, %v11245_v51  ;;  %v11267_v40 = vld [vmem:[#allocation60_spill] sm:$0xff]  ;;  %v9405_v20 = vpop.f32.mrf.mxu0 }
 0x86f   : > { %v2246_v45 = vadd.f32 %v11267_v40, %v11266_v27  ;;  %11270 = vst [vmem:[#allocation59_spill] sm:$0xff] %v9405_v20 }
 0x870   : > { %v9311_v48 = vadd.f32 %v6100_v37, %v3628_v29  ;;  %3691 = vmatpush2.bf16.msra.mxu0 %v11222_v21  ;;  %v11248_v37 = vld [vmem:[#allocation67_spill] sm:$0xff]  ;;  %v11268_v29 = vld [vmem:[#allocation96_spill] sm:$0xff]  ;;  %v9407_v31 = vpop.f32.mrf.mxu0 }
 0x871   : > { %3692 = vmatprep.subr.bf16.mxu0 %v3659_v56  ;;  %v11249_v50 = vpack.c.bf16 %v11247_v52, %v11248_v37  ;;  %v2250_v56 = vadd.f32 %v2249_v13, %v11268_v29  ;;  %11271 = vst [vmem:[#allocation55_spill] sm:$0xff] %v9407_v31 }
 0x872   : > { %v3630_v5 = vrot.slane %v9311_v48, 4  ;;  %v9409_v7 = vpop.f32.mrf.mxu0 }
 0x873   : > { %v4516_v21 = vpack.c.bf16 %v2250_v56, %v2246_v45  ;;  %11272 = vst [vmem:[#allocation31_spill] sm:$0xff] %v9409_v7 }
 0x874   : > { %3693 = vmatpush2.bf16.msra.mxu0 %v11223_v26  ;;  %v3593_v26 = vrot.slane %v9275_v63, 4  ;;  %v9411_v44 = vpop.f32.mrf.mxu0 }
 0x875   : > { %3694 = vmatprep.subr.bf16.mxu0 %v3657_v18  ;;  %v11269_v18 = vld [vmem:[#allocation57_spill] sm:$0xff]  ;;  %11273 = vst [vmem:[#allocation42_spill] sm:$0xff] %v9411_v44 }
 0x878   : > { %3695 = vmatpush2.bf16.msra.mxu0 %v3656_v60  ;;  %v3594_v60 = vadd.f32 %v3593_v26, %v9275_v63 }
 0x879   : > { %3696 = vmatprep.subr.bf16.mxu0 %v3655_v36  ;;  %v3631_v36 = vadd.f32 %v3630_v5, %v9311_v48 }
 0x87a   : > { %v3595_v23 = vrot.slane %v3594_v60, 2 }
 0x87b   : > { %v3632_v2 = vrot.slane %v3631_v36, 2 }
 0x87c   : > { %3697 = vmatpush2.bf16.msra.mxu0 %v3654_v0  ;;  %v3596_v0 = vadd.f32 %v3595_v23, %v3594_v60 }
 0x87d   : > { %3698 = vmatprep.subr.bf16.mxu0 %v3653_v46  ;;  %v3633_v46 = vadd.f32 %v3632_v2, %v3631_v36 }
 0x87e   : > { %v3597_v32 = vrot.slane %v3596_v0, 1 }
 0x87f   : > { %v3634_v62 = vrot.slane %v3633_v46, 1 }
 0x880   : > { %3699 = vmatpush2.bf16.msra.mxu0 %v3652_v57  ;;  %v3598_v57 = vadd.f32 %v3597_v32, %v3596_v0 }
 0x881   : > { %3863 = vmatprep.subr.bf16.mxu0 %v11235_v33  ;;  %v3635_v35 = vadd.f32 %v3634_v62, %v3633_v46 }
 0x882   : > { %6111 = vrcp.f32 %v3598_v57 }
 0x883   : > { %3701 = vmatmul.mubr.bf16.vlgmr.msra.gmra.mxu0 %v11239_v28  ;;  %6113 = vrcp.f32 %v3635_v35 }
 0x884   : > { %3710 = vmatprep.mubr.bf16.mxu0 %v11243_v55  ;;  %3864 = vmatpush1.bf16.msra.mxu0 %v11246_v19 }
 0x885   : > { %3865 = vmatprep.subr.bf16.mxu0 %v3760_v17 }
 0x888   : > { %3866 = vmatpush1.bf16.msra.mxu0 %v3759_v41 }
 0x88b   : > { %3711 = vmatmul.mubr.bf16.gmra.mxu0 %v11249_v50 }
 0x88c   : > { %3883 = vmatprep.mubr.bf16.mxu0 %v11250_v53 }
 0x88f   : > { %v6112_v63 = vpop.eup %6111 }
 0x890   : > { %v6114_v49 = vpop.eup %6113 }
 0x893   : > { %5706 = vmatmul.mubr.msk.bf16.vlgmr.msra.gmra.mxu0 %vm2306_vm1, %v11251_v1 }
 0x894   : > { %3893 = vmatprep.mubr.bf16.mxu0 %v11250_v53 }
 0x89b   : > { %5707 = vmatmul.mubr.msk.bf16.gmra.mxu0 %vm2306_vm1, %v11252_v4 }
 0x89c   : > { %3903 = vmatprep.mubr.bf16.mxu0 %v11250_v53 }
 0x8a3   : > { %5708 = vmatmul.mubr.msk.bf16.gmra.mxu0 %vm2306_vm1, %v11253_v34 }
 0x8a4   : > { %3913 = vmatprep.mubr.bf16.mxu0 %v11250_v53 }
 0x8ab   : > { %5709 = vmatmul.mubr.msk.bf16.gmra.mxu0 %vm2306_vm1, %v11254_v15 }
 0x8ac   : > { %3923 = vmatprep.mubr.bf16.mxu0 %v11250_v53 }
 0x8b3   : > { %5710 = vmatmul.mubr.msk.bf16.gmra.mxu0 %vm2306_vm1, %v11255_v43 }
 0x8b4   : > { %3933 = vmatprep.mubr.bf16.mxu0 %v11250_v53 }
 0x8bb   : > { %5711 = vmatmul.mubr.msk.bf16.gmra.mxu0 %vm2306_vm1, %v11256_v16 }
 0x8bc   : > { %3943 = vmatprep.mubr.bf16.mxu0 %v11250_v53 }
 0x8c3   : > { %5712 = vmatmul.mubr.msk.bf16.gmra.mxu0 %vm2306_vm1, %v11257_v58 }
 0x8c4   : > { %3953 = vmatprep.mubr.bf16.mxu0 %v11250_v53 }
 0x8cb   : > { %5713 = vmatmul.mubr.msk.bf16.gmra.mxu0 %vm2306_vm1, %v11258_v24 }
 0x8cc   : > { %3963 = vmatprep.mubr.bf16.mxu0 %v11250_v53 }
 0x8d3   : > { %5714 = vmatmul.mubr.msk.bf16.gmra.mxu0 %vm2306_vm1, %v11259_v38 }
 0x8d4   : > { %3973 = vmatprep.mubr.bf16.mxu0 %v11250_v53 }
 0x8db   : > { %5715 = vmatmul.mubr.msk.bf16.gmra.mxu0 %vm2306_vm1, %v11260_v12 }
 0x8dc   : > { %3983 = vmatprep.mubr.bf16.mxu0 %v11250_v53 }
 0x8e3   : > { %5716 = vmatmul.mubr.msk.bf16.gmra.mxu0 %vm2306_vm1, %v11261_v6 }
 0x8e4   : > { %3993 = vmatprep.mubr.bf16.mxu0 %v11250_v53 }
 0x8eb   : > { %5717 = vmatmul.mubr.msk.bf16.gmra.mxu0 %vm2306_vm1, %v11262_v25 }
 0x8ec   : > { %4003 = vmatprep.mubr.bf16.mxu0 %v11250_v53 }
 0x8f3   : > { %5718 = vmatmul.mubr.msk.bf16.gmra.mxu0 %vm2306_vm1, %v11263_v54 }
 0x8f4   : > { %4013 = vmatprep.mubr.bf16.mxu0 %v11250_v53 }
 0x8fb   : > { %5719 = vmatmul.mubr.msk.bf16.gmra.mxu0 %vm2306_vm1, %v11264_v30 }
 0x8fc   : > { %4023 = vmatprep.mubr.bf16.mxu0 %v11250_v53 }
 0x903   : > { %5720 = vmatmul.mubr.msk.bf16.gmra.mxu0 %vm2306_vm1, %v11265_v39 }
 0x904   : > { %4033 = vmatprep.mubr.bf16.mxu0 %v11250_v53 }
 0x90b   : > { %5721 = vmatmul.mubr.msk.bf16.gmra.mxu0 %vm2306_vm1, %v11269_v18 }
 0x90c   : > { %5196 = vmatprep.mubr.bf16.mxu0 %v4516_v21 }
 0x943   : > { %v3702_v48 = vpop.f32.mrf.mxu0 }
 0x944   : > { %v9413_v61 = vmul.f32 %v6112_v63, %v3702_v48 }
 0x945   : > { %v3704_v10 = vpop.f32.mrf.mxu0 }
 0x946   : > { %11274 = vst [vmem:[#allocation44_spill] sm:$0xff] %v9413_v61  ;;  %v9415_v33 = vmul.f32 %v6114_v49, %v3704_v10 }
 0x947   : > { %v3706_v11 = vpop.f32.mrf.mxu0 }
 0x948   : > { %11275 = vst [vmem:[#allocation46_spill] sm:$0xff] %v9415_v33  ;;  %v9417_v9 = vmul.f32 %v6112_v63, %v3706_v11 }
 0x949   : > { %v3708_v17 = vpop.f32.mrf.mxu0 }
 0x94a   : > { %11276 = vst [vmem:[#allocation48_spill] sm:$0xff] %v9417_v9  ;;  %v9421_v14 = vmul.f32 %v6114_v49, %v3708_v17 }
 0x94b   : > { %v3712_v28 = vpop.f32.mrf.mxu0 }
 0x94c   : > { %11277 = vst [vmem:[#allocation51_spill] sm:$0xff] %v9421_v14  ;;  %v9425_v8 = vmul.f32 %v6112_v63, %v3712_v28 }
 0x94d   : > { %v3714_v59 = vpop.f32.mrf.mxu0 }
 0x94e   : > { %11278 = vst [vmem:[#allocation54_spill] sm:$0xff] %v9425_v8  ;;  %v9427_v3 = vmul.f32 %v6114_v49, %v3714_v59 }
 0x94f   : > { %v3716_v55 = vpop.f32.mrf.mxu0 }
 0x950   : > { %11279 = vst [vmem:[#allocation13_spill] sm:$0xff] %v9427_v3  ;;  %v9429_v47 = vmul.f32 %v6112_v63, %v3716_v55 }
 0x951   : > { %v3718_v51 = vpop.f32.mrf.mxu0 }
 0x952   : > { %11280 = vst [vmem:[#allocation56_spill] sm:$0xff] %v9429_v47  ;;  %v9433_v41 = vmul.f32 %v6114_v49, %v3718_v51 }
 0x953   : > { %v9435_v52 = vpop.f32.mrf.mxu0 }
 0x954   : > { %11281 = vst [vmem:[#allocation14_spill] sm:$0xff] %v9433_v41 }
 0x955   : > { %v9439_v50 = vpop.f32.mrf.mxu0 }
 0x957   : > { %v9441_v1 = vpop.f32.mrf.mxu0 }
 0x959   : > { %v9443_v4 = vpop.f32.mrf.mxu0 }
 0x95b   : > { %v9445_v34 = vpop.f32.mrf.mxu0 }
 0x95c   : > { %v4044_v19 = vmax.f32 %v9435_v52, %v9445_v34 }
 0x95d   : > { %v9447_v15 = vpop.f32.mrf.mxu0 }
 0x95f   : > { %v9449_v43 = vpop.f32.mrf.mxu0 }
 0x960   : > { %v4045_v37 = vmax.f32 %v9441_v1, %v9449_v43 }
 0x961   : > { %v9451_v16 = vpop.f32.mrf.mxu0 }
 0x962   : > { %11282 = vst [vmem:[#allocation35_spill] sm:$0xff] %v9451_v16 }
 0x963   : > { %v9453_v58 = vpop.f32.mrf.mxu0 }
 0x964   : > { %v4046_v9 = vmax.f32 %v4044_v19, %v9453_v58 }
 0x965   : > { %v9455_v24 = vpop.f32.mrf.mxu0 }
 0x967   : > { %v9457_v38 = vpop.f32.mrf.mxu0 }
 0x968   : > { %v4047_v33 = vmax.f32 %v4045_v37, %v9457_v38 }
 0x969   : > { %v9459_v12 = vpop.f32.mrf.mxu0 }
 0x96a   : > { %11283 = vst [vmem:[#allocation7_spill] sm:$0xff] %v9459_v12 }
 0x96b   : > { %v9461_v6 = vpop.f32.mrf.mxu0 }
 0x96c   : > { %v4048_v8 = vmax.f32 %v4046_v9, %v9461_v6 }
 0x96d   : > { %v9463_v25 = vpop.f32.mrf.mxu0 }
 0x96f   : > { %v9465_v54 = vpop.f32.mrf.mxu0 }
 0x970   : > { %v4049_v47 = vmax.f32 %v4047_v33, %v9465_v54 }
 0x971   : > { %v9467_v30 = vpop.f32.mrf.mxu0 }
 0x972   : > { %11284 = vst [vmem:[#allocation40_spill] sm:$0xff] %v9467_v30 }
 0x973   : > { %v9469_v39 = vpop.f32.mrf.mxu0 }
 0x974   : > { %11285 = vst [vmem:[#allocation38_spill] sm:$0xff] %v9469_v39  ;;  %v4050_v41 = vmax.f32 %v4048_v8, %v9469_v39 }
 0x975   : > { %v9471_v27 = vpop.f32.mrf.mxu0 }
 0x976   : > { %11286 = vst [vmem:[#allocation41_spill] sm:$0xff] %v9471_v27 }
 0x977   : > { %v9473_v40 = vpop.f32.mrf.mxu0 }
 0x978   : > { %v4051_v7 = vmax.f32 %v4049_v47, %v9473_v40 }
 0x979   : > { %v9475_v45 = vpop.f32.mrf.mxu0 }
 0x97a   : > { %11287 = vst [vmem:[#allocation43_spill] sm:$0xff] %v9475_v45 }
 0x97b   : > { %v9477_v13 = vpop.f32.mrf.mxu0 }
 0x97c   : > { %11288 = vst [vmem:[#allocation78_spill] sm:$0xff] %v9477_v13  ;;  %v4052_v44 = vmax.f32 %v4050_v41, %v9477_v13 }
 0x97d   : > { %v9479_v29 = vpop.f32.mrf.mxu0 }
 0x97f   : > { %v9481_v56 = vpop.f32.mrf.mxu0 }
 0x980   : > { %v4053_v19 = vmax.f32 %v4051_v7, %v9481_v56 }
 0x981   : > { %v9483_v21 = vpop.f32.mrf.mxu0 }
 0x983   : > { %v9485_v18 = vpop.f32.mrf.mxu0 }
 0x984   : > { %11289 = vst [vmem:[#allocation49_spill] sm:$0xff] %v9485_v18  ;;  %v4054_v37 = vmax.f32 %v4052_v44, %v9485_v18 }
 0x985   : > { %v9487_v26 = vpop.f32.mrf.mxu0 }
 0x987   : > { %v9489_v5 = vpop.f32.mrf.mxu0 }
 0x988   : > { %v4055_v9 = vmax.f32 %v4053_v19, %v9489_v5  ;;  %v4082_v19 = vmax.f32 %v9443_v4, %v9451_v16 }
 0x989   : > { %v9491_v60 = vpop.f32.mrf.mxu0 }
 0x98b   : > { %v9493_v36 = vpop.f32.mrf.mxu0 }
 0x98c   : > { %v4056_v33 = vmax.f32 %v4054_v37, %v9493_v36 }
 0x98d   : > { %v9495_v23 = vpop.f32.mrf.mxu0 }
 0x98f   : > { %v9497_v2 = vpop.f32.mrf.mxu0 }
 0x990   : > { %11290 = vst [vmem:[#allocation52_spill] sm:$0xff] %v9497_v2  ;;  %v4057_v8 = vmax.f32 %v4055_v9, %v9497_v2 }
 0x991   : > { %v9499_v0 = vpop.f32.mrf.mxu0 }
 0x993   : > { %v9501_v46 = vpop.f32.mrf.mxu0 }
 0x994   : > { %v4058_v47 = vmax.f32 %v4056_v33, %v9501_v46  ;;  %v4081_v33 = vmax.f32 %v9439_v50, %v9447_v15 }
 0x995   : > { %v9503_v32 = vpop.f32.mrf.mxu0 }
 0x997   : > { %v9505_v62 = vpop.f32.mrf.mxu0 }
 0x998   : > { %v4059_v41 = vmax.f32 %v4057_v8, %v9505_v62  ;;  %v4084_v8 = vmax.f32 %v4082_v19, %v9459_v12 }
 0x999   : > { %v9507_v57 = vpop.f32.mrf.mxu0 }
 0x99a   : > { %v4086_v16 = vmax.f32 %v4084_v8, %v9467_v30 }
 0x99b   : > { %v9509_v35 = vpop.f32.mrf.mxu0 }
 0x99c   : > { %11291 = vst [vmem:[#allocation45_spill] sm:$0xff] %v9509_v35  ;;  %v4060_v7 = vmax.f32 %v4058_v47, %v9509_v35  ;;  %v4083_v35 = vmax.f32 %v4081_v33, %v9455_v24  ;;  %v4088_v19 = vmax.f32 %v4086_v16, %v9475_v45 }
 0x99d   : > { %v9511_v63 = vpop.f32.mrf.mxu0 }
 0x99e   : > { %v4090_v8 = vmax.f32 %v4088_v19, %v9483_v21 }
 0x99f   : > { %v9513_v48 = vpop.f32.mrf.mxu0 }
 0x9a0   : > { %11292 = vst [vmem:[#allocation47_spill] sm:$0xff] %v9513_v48  ;;  %v4061_v44 = vmax.f32 %v4059_v41, %v9513_v48  ;;  %v4092_v16 = vmax.f32 %v4090_v8, %v9491_v60 }
 0x9a1   : > { %v9515_v49 = vpop.f32.mrf.mxu0 }
 0x9a3   : > { %v9517_v10 = vpop.f32.mrf.mxu0 }
 0x9a4   : > { %11293 = vst [vmem:[#allocation82_spill] sm:$0xff] %v9517_v10  ;;  %v4062_v37 = vmax.f32 %v4060_v7, %v9517_v10  ;;  %v4085_v10 = vmax.f32 %v4083_v35, %v9463_v25 }
 0x9a5   : > { %v9519_v11 = vpop.f32.mrf.mxu0 }
 0x9a6   : > { %v4087_v33 = vmax.f32 %v4085_v10, %v9471_v27  ;;  %v4094_v10 = vmax.f32 %v4092_v16, %v9499_v0 }
 0x9a7   : > { %v9521_v17 = vpop.f32.mrf.mxu0 }
 0x9a8   : > { %11294 = vst [vmem:[#allocation18_spill] sm:$0xff] %v9521_v17  ;;  %v4063_v9 = vmax.f32 %v4061_v44, %v9521_v17  ;;  %v4089_v35 = vmax.f32 %v4087_v33, %v9479_v29 }
 0x9a9   : > { %v9523_v28 = vpop.f32.mrf.mxu0 }
 0x9aa   : > { %v4091_v45 = vmax.f32 %v4089_v35, %v9487_v26 }
 0x9ab   : > { %v9525_v59 = vpop.f32.mrf.mxu0 }
 0x9ac   : > { %v4064_v47 = vmax.f32 %v4062_v37, %v9525_v59  ;;  %v4093_v19 = vmax.f32 %v4091_v45, %v9495_v23 }
 0x9ad   : > { %v9527_v55 = vpop.f32.mrf.mxu0 }
 0x9af   : > { %v9529_v51 = vpop.f32.mrf.mxu0 }
 0x9b0   : > { %v4065_v41 = vmax.f32 %v4063_v9, %v9529_v51 }
 0x9b1   : > { %v9531_v42 = vpop.f32.mrf.mxu0 }
 0x9b3   : > { %v9533_v22 = vpop.f32.mrf.mxu0 }
 0x9b4   : > { %v4066_v7 = vmax.f32 %v4064_v47, %v9533_v22 }
 0x9b5   : > { %v9539_v61 = vpop.f32.mrf.mxu0 }
 0x9b7   : > { %v9543_v14 = vpop.f32.mrf.mxu0 }
 0x9b8   : > { %v4067_v44 = vmax.f32 %v4065_v41, %v9543_v14 }
 0x9b9   : > { %v9547_v3 = vpop.f32.mrf.mxu0 }
 0x9bb   : > { %v9551_v20 = vpop.f32.mrf.mxu0 }
 0x9bc   : > { %v4068_v37 = vmax.f32 %v4066_v7, %v9551_v20 }
 0x9bd   : > { %v9555_v31 = vpop.f32.mrf.mxu0 }
 0x9bf   : > { %v9559_v53 = vpop.f32.mrf.mxu0 }
 0x9c0   : > { %v4069_v9 = vmax.f32 %v4067_v44, %v9559_v53 }
 0x9c1   : > { %v9563_v39 = vpop.f32.mrf.mxu0 }
 0x9c3   : > { %v9567_v13 = vpop.f32.mrf.mxu0 }
 0x9c4   : > { %11295 = vst [vmem:[#allocation80_spill] sm:$0xff] %v9567_v13  ;;  %v4070_v47 = vmax.f32 %v4068_v37, %v9567_v13  ;;  %v4096_v37 = vmax.f32 %v4094_v10, %v9507_v57 }
 0x9c5   : > { %v9571_v18 = vpop.f32.mrf.mxu0 }
 0x9c6   : > { %v4098_v33 = vmax.f32 %v4096_v37, %v9515_v49 }
 0x9c7   : > { %v9577_v2 = vpop.f32.mrf.mxu0 }
 0x9c8   : > { %11296 = vst [vmem:[#allocation20_spill] sm:$0xff] %v9577_v2  ;;  %v4071_v41 = vmax.f32 %v4069_v9, %v9577_v2  ;;  %v4095_v2 = vmax.f32 %v4093_v19, %v9503_v32 }
 0x9c9   : > { %v9584_v48 = vpop.f32.mrf.mxu0 }
 0x9ca   : > { %v4097_v8 = vmax.f32 %v4095_v2, %v9511_v63 }
 0x9cb   : > { %v9590_v17 = vpop.f32.mrf.mxu0 }
 0x9cc   : > { %v4072_v7 = vmax.f32 %v4070_v47, %v9590_v17  ;;  %v4100_v47 = vmax.f32 %v4098_v33, %v9523_v28  ;;  %v4099_v35 = vmax.f32 %v4097_v8, %v9519_v11 }
 0x9cd   : > { %v9596_v12 = vpop.f32.mrf.mxu0 }
 0x9ce   : > { %v4102_v16 = vmax.f32 %v4100_v47, %v9531_v42  ;;  %v4101_v45 = vmax.f32 %v4099_v35, %v9527_v55 }
 0x9cf   : > { %v9602_v30 = vpop.f32.mrf.mxu0 }
 0x9d0   : > { %v4073_v44 = vmax.f32 %v4071_v41, %v9602_v30  ;;  %v4103_v19 = vmax.f32 %v4101_v45, %v9539_v61 }
 0x9d2   : > { %v4074_v27 = vmax.f32 %v4072_v7, %v4073_v44  ;;  %v4104_v44 = vmax.f32 %v4102_v16, %v9547_v3  ;;  %v4105_v2 = vmax.f32 %v4103_v19, %v9555_v31 }
 0x9d4   : > { %v4075_v9 = vrot.slane %v4074_v27, 4  ;;  %v4106_v37 = vmax.f32 %v4104_v44, %v9563_v39  ;;  %v4107_v8 = vmax.f32 %v4105_v2, %v9571_v18 }
 0x9d6   : > { %v4076_v13 = vmax.f32 %v4074_v27, %v4075_v9  ;;  %v9622_v27 = vpop.f32.mrf.mxu0  ;;  %v4108_v9 = vmax.f32 %v4106_v37, %v9584_v48  ;;  %v4109_v47 = vmax.f32 %v4107_v8, %v9596_v12 }
 0x9d8   : > { %v4077_v41 = vrot.slane %v4076_v13, 2 }
 0x9da   : > { %v4078_v7 = vmax.f32 %v4076_v13, %v4077_v41  ;;  %v4110_v13 = vmax.f32 %v4108_v9, %v9622_v27 }
 0x9dc   : > { %v4079_v10 = vrot.slane %v4078_v7, 1  ;;  %v4111_v45 = vmax.f32 %v4109_v47, %v4110_v13 }
 0x9de   : > { %v9626_v33 = vmax.f32 %v4078_v7, %v4079_v10  ;;  %v4112_v2 = vrot.slane %v4111_v45, 4 }
 0x9e0   : > { %v4118_v41 = vsub.f32 %v9435_v52, %v9626_v33  ;;  %v4120_v35 = vsub.f32 %v9441_v1, %v9626_v33  ;;  %v4122_v16 = vsub.f32 %v9445_v34, %v9626_v33  ;;  %v4124_v7 = vsub.f32 %v9449_v43, %v9626_v33 }
 0x9e1   : > { %v4126_v19 = vsub.f32 %v9453_v58, %v9626_v33  ;;  %v4128_v52 = vsub.f32 %v9457_v38, %v9626_v33  ;;  %v4130_v34 = vsub.f32 %v9461_v6, %v9626_v33  ;;  %v4113_v8 = vmax.f32 %v4111_v45, %v4112_v2  ;;  %v11297_v58 = vld [vmem:[#allocation38_spill] sm:$0xff] }
 0x9e2   : > { %v4182_v44 = vmul.f32 1.442695, %v4118_v41  ;;  %v4186_v10 = vmul.f32 1.442695, %v4120_v35  ;;  %v4190_v37 = vmul.f32 1.442695, %v4122_v16  ;;  %v4132_v43 = vsub.f32 %v9465_v54, %v9626_v33 }
 0x9e3   : > { %v4194_v1 = vmul.f32 1.442695, %v4124_v7  ;;  %v4198_v9 = vmul.f32 1.442695, %v4126_v19  ;;  %v4202_v13 = vmul.f32 1.442695, %v4128_v52  ;;  %v4134_v47 = vsub.f32 %v11297_v58, %v9626_v33 }
 0x9e4   : > { %6115 = vpow2.f32 %v4182_v44  ;;  %v4206_v41 = vmul.f32 1.442695, %v4130_v34  ;;  %v4136_v38 = vsub.f32 %v9473_v40, %v9626_v33  ;;  %v4114_v35 = vrot.slane %v4113_v8, 2  ;;  %v11298_v16 = vld [vmem:[#allocation78_spill] sm:$0xff]  ;;  %v11299_v54 = vld [vmem:[#allocation49_spill] sm:$0xff] }
 0x9e5   : > { %6117 = vpow2.f32 %v4186_v10  ;;  %v4138_v6 = vsub.f32 %v11298_v16, %v9626_v33  ;;  %v4210_v7 = vmul.f32 1.442695, %v4132_v43  ;;  %v4140_v45 = vsub.f32 %v9481_v56, %v9626_v33 }
 0x9e6   : > { %6119 = vpow2.f32 %v4190_v37  ;;  %v4142_v44 = vsub.f32 %v11299_v54, %v9626_v33  ;;  %v4214_v10 = vmul.f32 1.442695, %v4134_v47  ;;  %v4144_v19 = vsub.f32 %v9489_v5, %v9626_v33 }
 0x9e7   : > { %6121 = vpow2.f32 %v4194_v1  ;;  %v4218_v37 = vmul.f32 1.442695, %v4136_v38  ;;  %v4115_v2 = vmax.f32 %v4113_v8, %v4114_v35  ;;  %v4146_v52 = vsub.f32 %v9493_v36, %v9626_v33 }
 0x9e8   : > { %6123 = vpow2.f32 %v4198_v9  ;;  %v4222_v1 = vmul.f32 1.442695, %v4138_v6  ;;  %v4162_v56 = vsub.f32 %v9525_v59, %v9626_v33  ;;  %v4226_v9 = vmul.f32 1.442695, %v4140_v45 }
 0x9e9   : > { %6125 = vpow2.f32 %v4202_v13  ;;  %v4164_v43 = vsub.f32 %v9529_v51, %v9626_v33  ;;  %v4230_v5 = vmul.f32 1.442695, %v4142_v44  ;;  %v4166_v36 = vsub.f32 %v9533_v22, %v9626_v33 }
 0x9ea   : > { %6127 = vpow2.f32 %v4206_v41  ;;  %v4234_v58 = vmul.f32 1.442695, %v4144_v19  ;;  %v4116_v47 = vrot.slane %v4115_v2, 1  ;;  %v4168_v59 = vsub.f32 %v9543_v14, %v9626_v33  ;;  %v11301_v14 = vld [vmem:[#allocation52_spill] sm:$0xff] }
 0x9eb   : > { %6129 = vpow2.f32 %v4210_v7  ;;  %v4238_v41 = vmul.f32 1.442695, %v4146_v52  ;;  %v4170_v35 = vsub.f32 %v9551_v20, %v9626_v33  ;;  %v4270_v16 = vmul.f32 1.442695, %v4162_v56  ;;  %v11302_v56 = vld [vmem:[#allocation45_spill] sm:$0xff] }
 0x9ec   : > { %6131 = vpow2.f32 %v4214_v10  ;;  %v4172_v22 = vsub.f32 %v9559_v53, %v9626_v33  ;;  %v4274_v6 = vmul.f32 1.442695, %v4164_v43  ;;  %v4148_v54 = vsub.f32 %v11301_v14, %v9626_v33 }
 0x9ed   : > { %6133 = vpow2.f32 %v4218_v37  ;;  %v4278_v44 = vmul.f32 1.442695, %v4166_v36  ;;  %v9689_v10 = vmax.f32 %v4115_v2, %v4116_v47  ;;  %v4150_v20 = vsub.f32 %v9501_v46, %v9626_v33 }
 0x9ee   : > { %6135 = vpow2.f32 %v4222_v1  ;;  %v4282_v19 = vmul.f32 1.442695, %v4168_v59  ;;  %v4152_v52 = vsub.f32 %v9505_v62, %v9626_v33  ;;  %v4286_v1 = vmul.f32 1.442695, %v4170_v35  ;;  %v11303_v59 = vld [vmem:[#allocation47_spill] sm:$0xff] }
 0x9ef   : > { %6137 = vpow2.f32 %v4226_v9  ;;  %v4154_v9 = vsub.f32 %v11302_v56, %v9626_v33  ;;  %v4290_v2 = vmul.f32 1.442695, %v4172_v22  ;;  %v4242_v46 = vmul.f32 1.442695, %v4148_v54 }
 0x9f0   : > { %6139 = vpow2.f32 %v4230_v5  ;;  %v4246_v36 = vmul.f32 1.442695, %v4150_v20 }
 0x9f1   : > { %v9659_v40 = vpop.eup %6115  ;;  %6141 = vpow2.f32 %v4234_v58  ;;  %v4121_v58 = vsub.f32 %v9443_v4, %v9689_v10  ;;  %v4254_v35 = vmul.f32 1.442695, %v4154_v9 }
 0x9f2   : > { %v9663_v34 = vpop.eup %6117  ;;  %6143 = vpow2.f32 %v4238_v41  ;;  %v4156_v41 = vsub.f32 %v11303_v59, %v9626_v33 }
 0x9f3   : > { %11300 = vst [vmem:[#allocation71_spill] sm:$0xff] %v9663_v34  ;;  %v4310_v8 = vadd.f32 %v9663_v34, %v9659_v40  ;;  %v9671_v13 = vpop.eup %6119  ;;  %6145 = vpow2.f32 %v4270_v16 }
 0x9f4   : > { %v9678_v38 = vpop.eup %6121  ;;  %6147 = vpow2.f32 %v4274_v6  ;;  %v11304_v6 = vld [vmem:[#allocation82_spill] sm:$0xff] }
 0x9f5   : > { %v4311_v51 = vadd.f32 %v9671_v13, %v4310_v8  ;;  %v9685_v45 = vpop.eup %6123  ;;  %6149 = vpow2.f32 %v4278_v44  ;;  %v4119_v8 = vsub.f32 %v9439_v50, %v9689_v10  ;;  %v4123_v50 = vsub.f32 %v9447_v15, %v9689_v10  ;;  %v11305_v44 = vld [vmem:[#allocation35_spill] sm:$0xff]  ;;  %v11306_v15 = vld [vmem:[#allocation18_spill] sm:$0xff] }
 0x9f6   : > { %v9694_v37 = vpop.eup %6125  ;;  %6151 = vpow2.f32 %v4282_v19  ;;  %v4125_v20 = vsub.f32 %v11305_v44, %v9689_v10  ;;  %v4188_v19 = vmul.f32 1.442695, %v4121_v58 }
 0x9f7   : > { %v4312_v7 = vadd.f32 %v9678_v38, %v4311_v51  ;;  %v9701_v5 = vpop.eup %6127  ;;  %v4250_v51 = vmul.f32 1.442695, %v4152_v52  ;;  %6153 = vpow2.f32 %v4286_v1  ;;  %v4184_v4 = vmul.f32 1.442695, %v4119_v8 }
 0x9f8   : > { %v9708_v47 = vpop.eup %6129  ;;  %6155 = vpow2.f32 %v4290_v2  ;;  %v4160_v52 = vsub.f32 %v11306_v15, %v9626_v33  ;;  %v4258_v1 = vmul.f32 1.442695, %v4156_v41  ;;  %v4127_v2 = vsub.f32 %v9455_v24, %v9689_v10 }
 0x9f9   : > { %v4313_v53 = vadd.f32 %v9685_v45, %v4312_v7  ;;  %v9715_v22 = vpop.eup %6131  ;;  %v4158_v7 = vsub.f32 %v11304_v6, %v9626_v33  ;;  %6157 = vpow2.f32 %v4242_v46  ;;  %v4131_v41 = vsub.f32 %v9463_v25, %v9689_v10 }
 0x9fa   : > { %v9719_v14 = vpop.eup %6133  ;;  %6159 = vpow2.f32 %v4246_v36  ;;  %v11307_v36 = vld [vmem:[#allocation7_spill] sm:$0xff]  ;;  %v4266_v24 = vmul.f32 1.442695, %v4160_v52  ;;  %v4200_v44 = vmul.f32 1.442695, %v4127_v2  ;;  %v4143_v25 = vsub.f32 %v9487_v26, %v9689_v10 }
 0x9fb   : > { %v4314_v43 = vadd.f32 %v9694_v37, %v4313_v53  ;;  %v9724_v53 = vpop.eup %6135  ;;  %6161 = vpow2.f32 %v4250_v51  ;;  %v4262_v8 = vmul.f32 1.442695, %v4158_v7  ;;  %v4196_v51 = vmul.f32 1.442695, %v4125_v20 }
 0x9fc   : > { %v9728_v56 = vpop.eup %6137  ;;  %6163 = vpow2.f32 %v4254_v35  ;;  %v4145_v20 = vsub.f32 %v9491_v60, %v9689_v10  ;;  %v4149_v26 = vsub.f32 %v9499_v0, %v9689_v10 }
 0x9fd   : > { %v4315_v62 = vadd.f32 %v9701_v5, %v4314_v43  ;;  %v4192_v43 = vmul.f32 1.442695, %v4123_v50  ;;  %v9733_v46 = vpop.eup %6139  ;;  %6165 = vpow2.f32 %v4184_v4  ;;  %v11309_v4 = vld [vmem:[#allocation41_spill] sm:$0xff] }
 0x9fe   : > { %v9737_v58 = vpop.eup %6141  ;;  %6167 = vpow2.f32 %v4188_v19 }
 0x9ff   : > { %v4316_v16 = vadd.f32 %v9708_v47, %v4315_v62  ;;  %v4129_v62 = vsub.f32 %v11307_v36, %v9689_v10  ;;  %v9742_v35 = vpop.eup %6143  ;;  %6169 = vpow2.f32 %v4258_v1 }
 0xa00   : > { %v9746_v6 = vpop.eup %6145  ;;  %6171 = vpow2.f32 %v4192_v43 }
 0xa01   : > { %v4317_v54 = vadd.f32 %v9715_v22, %v4316_v16  ;;  %v11308_v16 = vld [vmem:[#allocation40_spill] sm:$0xff]  ;;  %v9751_v15 = vpop.eup %6147  ;;  %6173 = vpow2.f32 %v4262_v8  ;;  %v4204_v19 = vmul.f32 1.442695, %v4129_v62  ;;  %v4147_v8 = vsub.f32 %v9495_v23, %v9689_v10 }
 0xa02   : > { %v4133_v50 = vsub.f32 %v11308_v16, %v9689_v10  ;;  %v9757_v52 = vpop.eup %6149  ;;  %6175 = vpow2.f32 %v4196_v51  ;;  %v4232_v23 = vmul.f32 1.442695, %v4143_v25 }
 0xa03   : > { %v4318_v9 = vadd.f32 %v9719_v14, %v4317_v54  ;;  %v4135_v54 = vsub.f32 %v11309_v4, %v9689_v10  ;;  %v9762_v2 = vpop.eup %6151  ;;  %6177 = vpow2.f32 %v4266_v24  ;;  %v11310_v24 = vld [vmem:[#allocation43_spill] sm:$0xff] }
 0xa04   : > { %v4212_v60 = vmul.f32 1.442695, %v4133_v50  ;;  %v9768_v36 = vpop.eup %6153  ;;  %6179 = vpow2.f32 %v4200_v44  ;;  %v4137_v16 = vsub.f32 %v11310_v24, %v9689_v10  ;;  %v4236_v50 = vmul.f32 1.442695, %v4145_v20 }
 0xa05   : > { %v4319_v59 = vadd.f32 %v9724_v53, %v4318_v9  ;;  %v4208_v9 = vmul.f32 1.442695, %v4131_v41  ;;  %v9773_v51 = vpop.eup %6155  ;;  %6181 = vpow2.f32 %v4204_v19  ;;  %v4139_v44 = vsub.f32 %v9479_v29, %v9689_v10 }
 0xa06   : > { %v4141_v19 = vsub.f32 %v9483_v21, %v9689_v10  ;;  %v4220_v41 = vmul.f32 1.442695, %v4137_v16  ;;  %v11316_v16 = vld [vmem:[#allocation20_spill] sm:$0xff] }
 0xa07   : > { %v4320_v7 = vadd.f32 %v9728_v56, %v4319_v59  ;;  %v4216_v59 = vmul.f32 1.442695, %v4135_v54  ;;  %6183 = vpow2.f32 %v4208_v9  ;;  %v4244_v9 = vmul.f32 1.442695, %v4149_v26 }
 0xa08   : > { %6185 = vpow2.f32 %v4212_v60  ;;  %v4228_v26 = vmul.f32 1.442695, %v4141_v19 }
 0xa09   : > { %v4321_v1 = vadd.f32 %v9733_v46, %v4320_v7  ;;  %v9777_v7 = vpop.eup %6157  ;;  %6187 = vpow2.f32 %v4216_v59 }
 0xa0a   : > { %v9782_v54 = vpop.eup %6159  ;;  %6189 = vpow2.f32 %v4232_v23 }
 0xa0b   : > { %v4322_v62 = vadd.f32 %v9737_v58, %v4321_v1  ;;  %11311 = vst [vmem:[#allocation73_spill] sm:$0xff] %v9782_v54  ;;  %v4240_v1 = vmul.f32 1.442695, %v4147_v8  ;;  %v9786_v43 = vpop.eup %6161  ;;  %6191 = vpow2.f32 %v4236_v50  ;;  %v11314_v8 = vld [vmem:[#allocation80_spill] sm:$0xff]  ;;  %v4176_v50 = vsub.f32 %v11316_v16, %v9626_v33 }
 0xa0c   : > { %11312 = vst [vmem:[#allocation17_spill] sm:$0xff] %v9786_v43  ;;  %v9791_v20 = vpop.eup %6163  ;;  %v4174_v60 = vsub.f32 %v11314_v8, %v9626_v33  ;;  %v4171_v8 = vsub.f32 %v9555_v31, %v9689_v10 }
 0xa0d   : > { %v4323_v0 = vadd.f32 %v9742_v35, %v4322_v62  ;;  %11313 = vst [vmem:[#allocation62_spill] sm:$0xff] %v9791_v20  ;;  %v9793_v62 = vpop.eup %6165  ;;  %6193 = vpow2.f32 %v4240_v1 }
 0xa0e   : > { %v9796_v29 = vpop.eup %6167  ;;  %6195 = vpow2.f32 %v4244_v9  ;;  %v4294_v9 = vmul.f32 1.442695, %v4174_v60  ;;  %v4180_v60 = vsub.f32 %v9602_v30, %v9626_v33 }
 0xa0f   : > { %v4324_v25 = vadd.f32 %v9777_v7, %v4323_v0  ;;  %v4224_v0 = vmul.f32 1.442695, %v4139_v44  ;;  %v9800_v4 = vpop.eup %6169  ;;  %v4347_v59 = vadd.f32 %v9796_v29, %v9793_v62  ;;  %v4178_v44 = vsub.f32 %v9590_v17, %v9626_v33 }
 0xa10   : > { %11315 = vst [vmem:[#allocation63_spill] sm:$0xff] %v9800_v4  ;;  %v9805_v23 = vpop.eup %6171  ;;  %6197 = vpow2.f32 %v4220_v41  ;;  %v4153_v33 = vsub.f32 %v9507_v57, %v9689_v10 }
 0xa11   : > { %v4325_v24 = vadd.f32 %v9782_v54, %v4324_v25  ;;  %v9809_v25 = vpop.eup %6173  ;;  %6199 = vpow2.f32 %v4224_v0  ;;  %v4173_v54 = vsub.f32 %v9563_v39, %v9689_v10  ;;  %v4302_v31 = vmul.f32 1.442695, %v4178_v44 }
 0xa12   : > { %v9815_v19 = vpop.eup %6175  ;;  %6201 = vpow2.f32 %v4228_v26  ;;  %v4151_v39 = vsub.f32 %v9503_v32, %v9689_v10  ;;  %v4288_v26 = vmul.f32 1.442695, %v4171_v8 }
 0xa13   : > { %v4326_v21 = vadd.f32 %v9786_v43, %v4325_v24  ;;  %v4348_v24 = vadd.f32 %v9805_v23, %v4347_v59  ;;  %v9819_v43 = vpop.eup %6177  ;;  %6203 = vpow2.f32 %v4294_v9  ;;  %v4155_v9 = vsub.f32 %v9511_v63, %v9689_v10 }
 0xa14   : > { %11317 = vst [vmem:[#allocation19_spill] sm:$0xff] %v9819_v43  ;;  %v9825_v41 = vpop.eup %6179 }
 0xa15   : > { %v4327_v1 = vadd.f32 %v9791_v20, %v4326_v21  ;;  %v4349_v17 = vadd.f32 %v9815_v19, %v4348_v24  ;;  %v4298_v21 = vmul.f32 1.442695, %v4176_v50  ;;  %v9827_v59 = vpop.eup %6181 }
 0xa17   : > { %v4328_v16 = vadd.f32 %v9800_v4, %v4327_v1  ;;  %v4350_v20 = vadd.f32 %v9825_v41, %v4349_v17  ;;  %v9833_v1 = vpop.eup %6183  ;;  %v4292_v4 = vmul.f32 1.442695, %v4173_v54  ;;  %6205 = vpow2.f32 %v4298_v21 }
 0xa18   : > { %v9837_v24 = vpop.eup %6185  ;;  %6207 = vpow2.f32 %v4302_v31  ;;  %v4248_v21 = vmul.f32 1.442695, %v4151_v39  ;;  %v4252_v31 = vmul.f32 1.442695, %v4153_v33  ;;  %v4256_v39 = vmul.f32 1.442695, %v4155_v9 }
 0xa19   : > { %v4329_v0 = vadd.f32 %v9809_v25, %v4328_v16  ;;  %v4351_v34 = vadd.f32 %v9827_v59, %v4350_v20  ;;  %v9841_v30 = vpop.eup %6187  ;;  %v4306_v16 = vmul.f32 1.442695, %v4180_v60  ;;  %6209 = vpow2.f32 %v4288_v26 }
 0xa1a   : > { %v6190_v44 = vpop.eup %6189  ;;  %6211 = vpow2.f32 %v4292_v4  ;;  %v4157_v60 = vsub.f32 %v9515_v49, %v9689_v10  ;;  %v4159_v4 = vsub.f32 %v9519_v11, %v9689_v10 }
 0xa1b   : > { %v4330_v50 = vadd.f32 %v9819_v43, %v4329_v0  ;;  %v4352_v8 = vadd.f32 %v9833_v1, %v4351_v34  ;;  %v6192_v17 = vpop.eup %6191  ;;  %6213 = vpow2.f32 %v4306_v16  ;;  %v4163_v43 = vsub.f32 %v9527_v55, %v9689_v10 }
 0xa1c   : > { %v9849_v54 = vpop.eup %6193  ;;  %6215 = vpow2.f32 %v4248_v21  ;;  %v4397_v16 = vpack.c.bf16 %v6192_v17, %v6190_v44  ;;  %v4260_v9 = vmul.f32 1.442695, %v4157_v60  ;;  %v4181_v21 = vsub.f32 %v9622_v27, %v9689_v10 }
 0xa1d   : > { %v4331_v32 = vadd.f32 %v9746_v6, %v4330_v50  ;;  %v4353_v57 = vadd.f32 %v9837_v24, %v4352_v8  ;;  %v9853_v0 = vpop.eup %6195  ;;  %6217 = vpow2.f32 %v4252_v31  ;;  %v4165_v60 = vsub.f32 %v9531_v42, %v9689_v10 }
 0xa1e   : > { %v4399_v26 = vpack.c.bf16 %v9853_v0, %v9849_v54  ;;  %v6198_v50 = vpop.eup %6197  ;;  %6219 = vpow2.f32 %v4256_v39  ;;  %v4175_v27 = vsub.f32 %v9571_v18, %v9689_v10  ;;  %v4177_v42 = vsub.f32 %v9584_v48, %v9689_v10 }
 0xa1f   : > { %v4332_v20 = vadd.f32 %v9751_v15, %v4331_v32  ;;  %v4354_v63 = vadd.f32 %v9841_v30, %v4353_v57  ;;  %v4398_v32 = vpack.c.bf16 %v9777_v7, %v9742_v35  ;;  %v6200_v8 = vpop.eup %6199  ;;  %v4161_v57 = vsub.f32 %v9523_v28, %v9689_v10 }
 0xa20   : > { %4416 = vmatprep.subr.bf16.mxu1 %v4399_v26  ;;  %v4179_v7 = vsub.f32 %v9596_v12, %v9689_v10  ;;  %v4396_v28 = vpack.c.bf16 %v9737_v58, %v9733_v46  ;;  %v4167_v12 = vsub.f32 %v9539_v61, %v9689_v10  ;;  %6221 = vpow2.f32 %v4260_v9 }
 0xa21   : > { %v4333_v34 = vadd.f32 %v9757_v52, %v4332_v20  ;;  %v4355_v33 = vadd.f32 %v6198_v50, %v4354_v63  ;;  %v6202_v20 = vpop.eup %6201  ;;  %4417 = vmatpush1.bf16.msra.mxu1 %v4398_v32  ;;  %v4268_v31 = vmul.f32 1.442695, %v4161_v57  ;;  %v4272_v58 = vmul.f32 1.442695, %v4163_v43 }
 0xa22   : > { %4418 = vmatprep.subr.bf16.mxu1 %v4397_v16  ;;  %v4395_v26 = vpack.c.bf16 %v6202_v20, %v6200_v8  ;;  %v9878_v32 = vpop.eup %6203  ;;  %v4308_v61 = vmul.f32 1.442695, %v4181_v21  ;;  %v4394_v18 = vpack.c.bf16 %v9728_v56, %v9724_v53  ;;  %v4393_v43 = vpack.c.bf16 %v6198_v50, %v9841_v30 }
 0xa23   : > { %v4334_v49 = vadd.f32 %v9762_v2, %v4333_v34  ;;  %v4356_v35 = vadd.f32 %v6200_v8, %v4355_v33  ;;  %v4264_v34 = vmul.f32 1.442695, %v4159_v4  ;;  %v4169_v57 = vsub.f32 %v9547_v3, %v9689_v10 }
 0xa24   : > { %v9886_v4 = vpop.eup %6205  ;;  %v4276_v48 = vmul.f32 1.442695, %v4165_v60  ;;  %v4296_v30 = vmul.f32 1.442695, %v4175_v27  ;;  %v4300_v50 = vmul.f32 1.442695, %v4177_v42  ;;  %v4392_v3 = vpack.c.bf16 %v9719_v14, %v9715_v22 }
 0xa25   : > { %v4335_v11 = vadd.f32 %v9768_v36, %v4334_v49  ;;  %v4357_v55 = vadd.f32 %v6202_v20, %v4356_v35  ;;  %4419 = vmatpush1.bf16.msra.mxu1 %v4396_v28  ;;  %v9889_v8 = vpop.eup %6207  ;;  %v4304_v49 = vmul.f32 1.442695, %v4179_v7  ;;  %6223 = vpow2.f32 %v4264_v34 }
 0xa26   : > { %4420 = vmatprep.subr.bf16.mxu1 %v4395_v26  ;;  %v9895_v33 = vpop.eup %6209  ;;  %6225 = vpow2.f32 %v4268_v31  ;;  %v4391_v7 = vpack.c.bf16 %v9837_v24, %v9833_v1  ;;  %v4284_v21 = vmul.f32 1.442695, %v4169_v57  ;;  %v4390_v22 = vpack.c.bf16 %v9708_v47, %v9701_v5 }
 0xa27   : > { %v4336_v63 = vadd.f32 %v9773_v51, %v4335_v11  ;;  %v4358_v39 = vadd.f32 %v6190_v44, %v4357_v55  ;;  %v9899_v44 = vpop.eup %6211  ;;  %v4280_v11 = vmul.f32 1.442695, %v4167_v12  ;;  %6227 = vpow2.f32 %v4272_v58 }
 0xa28   : > { %v4411_v56 = vpack.c.bf16 %v9899_v44, %v9895_v33  ;;  %6229 = vpow2.f32 %v4304_v49  ;;  %v4389_v1 = vpack.c.bf16 %v9827_v59, %v9825_v41  ;;  %v4388_v55 = vpack.c.bf16 %v9694_v37, %v9685_v45 }
 0xa29   : > { %v4337_v46 = vadd.f32 %v9878_v32, %v4336_v63  ;;  %v4359_v20 = vadd.f32 %v6192_v17, %v4358_v39  ;;  %4421 = vmatpush1.bf16.msra.mxu1 %v4394_v18  ;;  %v6214_v17 = vpop.eup %6213  ;;  %6231 = vpow2.f32 %v4308_v61  ;;  %v4387_v60 = vpack.c.bf16 %v9815_v19, %v9805_v23  ;;  %v11318_v19 = vld [vmem:[#allocation71_spill] sm:$0xff] }
 0xa2a   : > { %4422 = vmatprep.subr.bf16.mxu1 %v4393_v43  ;;  %6233 = vpow2.f32 %v4276_v48  ;;  %v4386_v41 = vpack.c.bf16 %v9678_v38, %v9671_v13  ;;  %v4384_v39 = vpack.c.bf16 %v11318_v19, %v9659_v40  ;;  %v4412_v43 = vpack.c.bf16 %v9886_v4, %v9878_v32  ;;  %v11350_v19 = vld [vmem:[#allocation92_spill] sm:$0xff] }
 0xa2b   : > { %v4338_v16 = vadd.f32 %v9886_v4, %v4337_v46  ;;  %v4360_v53 = vadd.f32 %v9849_v54, %v4359_v20  ;;  %v9914_v54 = vpop.eup %6215  ;;  %6235 = vpow2.f32 %v4280_v11  ;;  %v4385_v46 = vpack.c.bf16 %v9796_v29, %v9793_v62 }
 0xa2c   : > { %v9917_v28 = vpop.eup %6217  ;;  %6237 = vpow2.f32 %v4296_v30  ;;  %v11320_v32 = vpack.c.bf16 %v9762_v2, %v9757_v52  ;;  %v11324_v30 = vld [vmem:[#allocation63_spill] sm:$0xff]  ;;  %v11325_v2 = vld [vmem:[#allocation73_spill] sm:$0xff] }
 0xa2d   : > { %v4339_v9 = vadd.f32 %v9889_v8, %v4338_v16  ;;  %v4361_v35 = vadd.f32 %v9853_v0, %v4360_v53  ;;  %4423 = vmatpush1.bf16.msra.mxu1 %v4392_v3  ;;  %6239 = vpow2.f32 %v4300_v50  ;;  %v6220_v24 = vpop.eup %6219  ;;  %v4414_v16 = vpack.c.bf16 %v6214_v17, %v9889_v8  ;;  %v11326_v3 = vld [vmem:[#allocation17_spill] sm:$0xff] }
 0xa2e   : > { %4424 = vmatprep.subr.bf16.mxu1 %v4391_v7  ;;  %6241 = vpow2.f32 %v4284_v21  ;;  %v6222_v63 = vpop.eup %6221  ;;  %v11319_v8 = vpack.c.bf16 %v9773_v51, %v9768_v36  ;;  %v4401_v52 = vpack.c.bf16 %v9917_v28, %v9914_v54  ;;  %v11329_v21 = vld [vmem:[#allocation12_spill] sm:$0xff] }
 0xa2f   : > { %v9909_v10 = vadd.f32 %v6214_v17, %v4339_v9  ;;  %v4362_v34 = vadd.f32 %v9914_v54, %v4361_v35  ;;  %v4403_v51 = vpack.c.bf16 %v6222_v63, %v6220_v24  ;;  %v4400_v35 = vpack.c.bf16 %v11326_v3, %v11325_v2 }
 0xa31   : > { %v4363_v14 = vadd.f32 %v9917_v28, %v4362_v34  ;;  %4425 = vmatpush1.bf16.msra.mxu1 %v4390_v22  ;;  %v11331_v22 = vld [vmem:[#allocation10_spill] sm:$0xff] }
 0xa32   : > { %4426 = vmatprep.subr.bf16.mxu1 %v4389_v1  ;;  %v6224_v5 = vpop.eup %6223  ;;  %v11335_v28 = vld [vmem:[#allocation30_spill] sm:$0xff] }
 0xa33   : > { %v4364_v0 = vadd.f32 %v6220_v24, %v4363_v14  ;;  %v6226_v47 = vpop.eup %6225  ;;  %v11332_v14 = vld [vmem:[#allocation25_spill] sm:$0xff] }
 0xa34   : > { %v6228_v27 = vpop.eup %6227  ;;  %v4405_v4 = vpack.c.bf16 %v6226_v47, %v6224_v5  ;;  %v11333_v1 = vpack.c.bf16 %v11331_v22, %v11332_v14  ;;  %v11334_v24 = vld [vmem:[#allocation21_spill] sm:$0xff] }
 0xa35   : > { %v4365_v26 = vadd.f32 %v6222_v63, %v4364_v0  ;;  %4427 = vmatpush1.bf16.msra.mxu1 %v4388_v55  ;;  %v6230_v59 = vpop.eup %6229  ;;  %v11336_v63 = vld [vmem:[#allocation27_spill] sm:$0xff] }
 0xa36   : > { %4428 = vmatprep.subr.bf16.mxu1 %v4387_v60  ;;  %v6232_v58 = vpop.eup %6231  ;;  %v11337_v55 = vpack.c.bf16 %v11335_v28, %v11336_v63 }
 0xa37   : > { %v4366_v12 = vadd.f32 %v6224_v5, %v4365_v26  ;;  %v6234_v45 = vpop.eup %6233  ;;  %v4415_v61 = vpack.c.bf16 %v6232_v58, %v6230_v59  ;;  %v11338_v26 = vld [vmem:[#allocation23_spill] sm:$0xff] }
 0xa38   : > { %v6236_v23 = vpop.eup %6235  ;;  %v4407_v17 = vpack.c.bf16 %v6234_v45, %v6228_v27  ;;  %v2088_v60 = vadd.f32 %v11338_v26, %v11329_v21  ;;  %v11339_v5 = vld [vmem:[#allocation3_spill] sm:$0xff] }
 0xa39   : > { %v4367_v31 = vadd.f32 %v6226_v47, %v4366_v12  ;;  %4429 = vmatpush1.bf16.msra.mxu1 %v4386_v41  ;;  %v6238_v42 = vpop.eup %6237  ;;  %v11340_v47 = vld [vmem:[#allocation6_spill] sm:$0xff]  ;;  %v11343_v41 = vld [vmem:[#allocation28_spill] sm:$0xff] }
 0xa3a   : > { %4430 = vmatprep.subr.bf16.mxu1 %v4385_v46  ;;  %v6240_v18 = vpop.eup %6239  ;;  %v11341_v12 = vpack.c.bf16 %v11339_v5, %v11340_v47  ;;  %v11345_v46 = vld [vmem:[#allocation4_spill] sm:$0xff] }
 0xa3b   : > { %v4368_v37 = vadd.f32 %v6228_v27, %v4367_v31  ;;  %v6242_v38 = vpop.eup %6241  ;;  %v4413_v29 = vpack.c.bf16 %v6240_v18, %v6238_v42  ;;  %v11342_v27 = vld [vmem:[#allocation5_spill] sm:$0xff] }
 0xa3c   : > { %v4409_v11 = vpack.c.bf16 %v6242_v38, %v6236_v23 }
 0xa3d   : > { %v4369_v49 = vadd.f32 %v6234_v45, %v4368_v37  ;;  %4431 = vmatpush1.bf16.msra.mxu1 %v4384_v39  ;;  %v11348_v37 = vmov 0   ;;  %v11351_v39 = vld [vmem:[#allocation100_spill] sm:$0xff] }
 0xa3e   : > { %4432 = vmatprep.subr.bf16.mxu1 %v4415_v61  ;;  %v11354_v61 = vld [vmem:[#allocation69_spill] sm:$0xff] }
 0xa3f   : > { %v4370_v13 = vadd.f32 %v6236_v23, %v4369_v49  ;;  %v11349_v23 = vld [vmem:[#allocation75_spill] sm:$0xff]  ;;  %v11353_v49 = vld [vmem:[#allocation97_spill] sm:$0xff] }
 0xa41   : > { %v4371_v62 = vadd.f32 %v6242_v38, %v4370_v13  ;;  %4433 = vmatpush2.bf16.msra.mxu1 %v4414_v16  ;;  %v11356_v13 = vld [vmem:[#allocation99_spill] sm:$0xff]  ;;  %v11357_v38 = vld [vmem:[#allocation76_spill] sm:$0xff] }
 0xa42   : > { %4434 = vmatprep.subr.bf16.mxu1 %v4413_v29  ;;  %v11358_v16 = vld [vmem:[#allocation95_spill] sm:$0xff]  ;;  %v11360_v29 = vld [vmem:[#allocation102_spill] sm:$0xff] }
 0xa43   : > { %v4372_v20 = vadd.f32 %v9895_v33, %v4371_v62  ;;  %v11321_v33 = vpack.c.bf16 %v9751_v15, %v9746_v6  ;;  %v11327_v6 = vld [vmem:[#allocation26_spill] sm:$0xff] }
 0xa44   : > { %v11328_v15 = vld [vmem:[#allocation22_spill] sm:$0xff]  ;;  %v2084_v0 = vadd.f32 %v11334_v24, %v11327_v6 }
 0xa45   : > { %v4373_v40 = vadd.f32 %v9899_v44, %v4372_v20  ;;  %4435 = vmatpush2.bf16.msra.mxu1 %v4412_v43  ;;  %v11322_v44 = vld [vmem:[#allocation19_spill] sm:$0xff]  ;;  %v2086_v7 = vadd.f32 %v11328_v15, %v11327_v6  ;;  %v11359_v62 = vld [vmem:[#allocation74_spill] sm:$0xff]  ;;  %v11361_v20 = vld [vmem:[#allocation89_spill] sm:$0xff] }
 0xa46   : > { %4436 = vmatprep.subr.bf16.mxu1 %v4411_v56  ;;  %v4404_v36 = vpack.c.bf16 %v11322_v44, %v9809_v25  ;;  %v11323_v56 = vld [vmem:[#allocation62_spill] sm:$0xff]  ;;  %v11330_v25 = vld [vmem:[#allocation24_spill] sm:$0xff]  ;;  %v4507_v31 = vpack.c.bf16 %v2088_v60, %v2084_v0 }
 0xa47   : > { %v4374_v57 = vadd.f32 %v6238_v42, %v4373_v40  ;;  %v4402_v50 = vpack.c.bf16 %v11324_v30, %v11323_v56  ;;  %v2090_v34 = vadd.f32 %v11330_v25, %v11329_v21  ;;  %v11352_v42 = vld [vmem:[#allocation88_spill] sm:$0xff]  ;;  %v11362_v43 = vld [vmem:[#allocation98_spill] sm:$0xff]  ;;  %v11363_v40 = vld [vmem:[#allocation87_spill] sm:$0xff] }
 0xa49   : > { %v4375_v48 = vadd.f32 %v6240_v18, %v4374_v57  ;;  %4437 = vmatpush2.bf16.msra.mxu1 %v11319_v8  ;;  %v4508_v54 = vpack.c.bf16 %v2090_v34, %v2086_v7  ;;  %v11355_v18 = vld [vmem:[#allocation101_spill] sm:$0xff]  ;;  %v11364_v57 = vld [vmem:[#allocation64_spill] sm:$0xff] }
 0xa4a   : > { %4438 = vmatprep.subr.bf16.mxu1 %v4409_v11 }
 0xa4b   : > { %v4376_v9 = vadd.f32 %v6230_v59, %v4375_v48  ;;  %v11344_v59 = vpack.c.bf16 %v11342_v27, %v11343_v41  ;;  %v4341_v48 = vrot.slane %v9909_v10, 4 }
 0xa4d   : > { %v9945_v53 = vadd.f32 %v6232_v58, %v4376_v9  ;;  %4439 = vmatpush2.bf16.msra.mxu1 %v11320_v32  ;;  %v11346_v58 = vld [vmem:[#allocation29_spill] sm:$0xff]  ;;  %v4342_v8 = vadd.f32 %v4341_v48, %v9909_v10 }
 0xa4e   : > { %4440 = vmatprep.subr.bf16.mxu1 %v4407_v17  ;;  %v11347_v45 = vpack.c.bf16 %v11345_v46, %v11346_v58 }
 0xa4f   : > { %v4378_v11 = vrot.slane %v9945_v53, 4  ;;  %v4343_v17 = vrot.slane %v4342_v8, 2 }
 0xa51   : > { %4441 = vmatpush2.bf16.msra.mxu1 %v11321_v33  ;;  %v4379_v9 = vadd.f32 %v4378_v11, %v9945_v53 }
 0xa52   : > { %4442 = vmatprep.subr.bf16.mxu1 %v4405_v4  ;;  %v4344_v4 = vadd.f32 %v4343_v17, %v4342_v8 }
 0xa53   : > { %v4380_v32 = vrot.slane %v4379_v9, 2 }
 0xa54   : > { %v4345_v44 = vrot.slane %v4344_v4, 1 }
 0xa55   : > { %4443 = vmatpush2.bf16.msra.mxu1 %v4404_v36  ;;  %v4381_v33 = vadd.f32 %v4380_v32, %v4379_v9 }
 0xa56   : > { %4444 = vmatprep.subr.bf16.mxu1 %v4403_v51  ;;  %v4346_v51 = vadd.f32 %v4345_v44, %v4344_v4 }
 0xa57   : > { %v4382_v36 = vrot.slane %v4381_v33, 1 }
 0xa58   : > { %6243 = vrcp.f32 %v4346_v51 }
 0xa59   : > { %4445 = vmatpush2.bf16.msra.mxu1 %v4402_v50  ;;  %v4383_v56 = vadd.f32 %v4382_v36, %v4381_v33 }
 0xa5a   : > { %4446 = vmatprep.subr.bf16.mxu1 %v4401_v52 }
 0xa5b   : > { %6245 = vrcp.f32 %v4383_v56 }
 0xa5d   : > { %4447 = vmatpush2.bf16.msra.mxu1 %v4400_v35 }
 0xa5e   : > { %4611 = vmatprep.subr.bf16.mxu1 %v11333_v1 }
 0xa60   : > { %4449 = vmatmul.mubr.bf16.vlgmr.msra.gmra.mxu1 %v11337_v55 }
 0xa61   : > { %4458 = vmatprep.mubr.bf16.mxu1 %v11341_v12  ;;  %4612 = vmatpush1.bf16.msra.mxu1 %v11344_v59 }
 0xa62   : > { %4613 = vmatprep.subr.bf16.mxu1 %v4508_v54 }
 0xa65   : > { %4614 = vmatpush1.bf16.msra.mxu1 %v4507_v31  ;;  %v6244_v30 = vpop.eup %6243 }
 0xa68   : > { %4459 = vmatmul.mubr.bf16.gmra.mxu1 %v11347_v45  ;;  %v6246_v2 = vpop.eup %6245 }
 0xa69   : > { %4631 = vmatprep.mubr.bf16.mxu1 %v11348_v37 }
 0xa70   : > { %5726 = vmatmul.mubr.msk.bf16.vlgmr.msra.gmra.mxu1 %vm2306_vm1, %v11349_v23 }
 0xa71   : > { %4641 = vmatprep.mubr.bf16.mxu1 %v11348_v37 }
 0xa78   : > { %5727 = vmatmul.mubr.msk.bf16.gmra.mxu1 %vm2306_vm1, %v11350_v19 }
 0xa79   : > { %4651 = vmatprep.mubr.bf16.mxu1 %v11348_v37 }
 0xa80   : > { %5728 = vmatmul.mubr.msk.bf16.gmra.mxu1 %vm2306_vm1, %v11351_v39 }
 0xa81   : > { %4661 = vmatprep.mubr.bf16.mxu1 %v11348_v37 }
 0xa88   : > { %5729 = vmatmul.mubr.msk.bf16.gmra.mxu1 %vm2306_vm1, %v11352_v42 }
 0xa89   : > { %4671 = vmatprep.mubr.bf16.mxu1 %v11348_v37 }
 0xa90   : > { %5730 = vmatmul.mubr.msk.bf16.gmra.mxu1 %vm2306_vm1, %v11353_v49 }
 0xa91   : > { %4681 = vmatprep.mubr.bf16.mxu1 %v11348_v37 }
 0xa98   : > { %5731 = vmatmul.mubr.msk.bf16.gmra.mxu1 %vm2306_vm1, %v11354_v61 }
 0xa99   : > { %4691 = vmatprep.mubr.bf16.mxu1 %v11348_v37 }
 0xaa0   : > { %5732 = vmatmul.mubr.msk.bf16.gmra.mxu1 %vm2306_vm1, %v11355_v18 }
 0xaa1   : > { %4701 = vmatprep.mubr.bf16.mxu1 %v11348_v37 }
 0xaa8   : > { %5733 = vmatmul.mubr.msk.bf16.gmra.mxu1 %vm2306_vm1, %v11356_v13 }
 0xaa9   : > { %4711 = vmatprep.mubr.bf16.mxu1 %v11348_v37 }
 0xab0   : > { %5734 = vmatmul.mubr.msk.bf16.gmra.mxu1 %vm2306_vm1, %v11357_v38 }
 0xab1   : > { %4721 = vmatprep.mubr.bf16.mxu1 %v11348_v37 }
 0xab8   : > { %5735 = vmatmul.mubr.msk.bf16.gmra.mxu1 %vm2306_vm1, %v11358_v16 }
 0xab9   : > { %4731 = vmatprep.mubr.bf16.mxu1 %v11348_v37 }
 0xac0   : > { %5736 = vmatmul.mubr.msk.bf16.gmra.mxu1 %vm2306_vm1, %v11359_v62 }
 0xac1   : > { %4741 = vmatprep.mubr.bf16.mxu1 %v11348_v37 }
 0xac8   : > { %5737 = vmatmul.mubr.msk.bf16.gmra.mxu1 %vm2306_vm1, %v11360_v29 }
 0xac9   : > { %4751 = vmatprep.mubr.bf16.mxu1 %v11348_v37 }
 0xad0   : > { %5738 = vmatmul.mubr.msk.bf16.gmra.mxu1 %vm2306_vm1, %v11361_v20 }
 0xad1   : > { %4761 = vmatprep.mubr.bf16.mxu1 %v11348_v37 }
 0xad8   : > { %5739 = vmatmul.mubr.msk.bf16.gmra.mxu1 %vm2306_vm1, %v11362_v43 }
 0xad9   : > { %4771 = vmatprep.mubr.bf16.mxu1 %v11348_v37 }
 0xae0   : > { %5740 = vmatmul.mubr.msk.bf16.gmra.mxu1 %vm2306_vm1, %v11363_v40 }
 0xae1   : > { %4781 = vmatprep.mubr.bf16.mxu1 %v11348_v37 }
 0xae8   : > { %5741 = vmatmul.mubr.msk.bf16.gmra.mxu1 %vm2306_vm1, %v11364_v57 }
 0xb20   : > { %v4450_v50 = vpop.f32.mrf.mxu1 }
 0xb21   : > { %v10036_v52 = vmul.f32 %v6244_v30, %v4450_v50 }
 0xb22   : > { %v4452_v3 = vpop.f32.mrf.mxu1 }
 0xb23   : > { %11365 = vst [vmem:[#allocation66_spill] sm:$0xff] %v10036_v52  ;;  %v10038_v35 = vmul.f32 %v6246_v2, %v4452_v3 }
 0xb24   : > { %v4454_v10 = vpop.f32.mrf.mxu1 }
 0xb25   : > { %11366 = vst [vmem:[#allocation68_spill] sm:$0xff] %v10038_v35  ;;  %v10040_v53 = vmul.f32 %v6244_v30, %v4454_v10 }
 0xb26   : > { %v4456_v6 = vpop.f32.mrf.mxu1 }
 0xb27   : > { %11367 = vst [vmem:[#allocation70_spill] sm:$0xff] %v10040_v53  ;;  %v10044_v7 = vmul.f32 %v6246_v2, %v4456_v6 }
 0xb28   : > { %v4460_v21 = vpop.f32.mrf.mxu1 }
 0xb29   : > { %11368 = vst [vmem:[#allocation72_spill] sm:$0xff] %v10044_v7  ;;  %v10048_v34 = vmul.f32 %v6244_v30, %v4460_v21 }
 0xb2a   : > { %v4462_v22 = vpop.f32.mrf.mxu1 }
 0xb2b   : > { %11369 = vst [vmem:[#allocation65_spill] sm:$0xff] %v10048_v34  ;;  %v10050_v14 = vmul.f32 %v6246_v2, %v4462_v22 }
 0xb2c   : > { %v4464_v1 = vpop.f32.mrf.mxu1 }
 0xb2d   : > { %11370 = vst [vmem:[#allocation67_spill] sm:$0xff] %v10050_v14  ;;  %v10052_v24 = vmul.f32 %v6244_v30, %v4464_v1 }
 0xb2e   : > { %v4466_v0 = vpop.f32.mrf.mxu1 }
 0xb2f   : > { %11371 = vst [vmem:[#allocation83_spill] sm:$0xff] %v10052_v24  ;;  %v10056_v28 = vmul.f32 %v6246_v2, %v4466_v0 }
 0xb30   : > { %v10058_v63 = vpop.f32.mrf.mxu1 }
 0xb31   : > { %11372 = vst [vmem:[#allocation85_spill] sm:$0xff] %v10056_v28 }
 0xb32   : > { %v10062_v26 = vpop.f32.mrf.mxu1 }
 0xb34   : > { %v10064_v60 = vpop.f32.mrf.mxu1 }
 0xb36   : > { %v10066_v5 = vpop.f32.mrf.mxu1 }
 0xb38   : > { %v10068_v47 = vpop.f32.mrf.mxu1 }
 0xb39   : > { %v4792_v1 = vmax.f32 %v10058_v63, %v10068_v47 }
 0xb3a   : > { %v10070_v12 = vpop.f32.mrf.mxu1 }
 0xb3c   : > { %v10072_v27 = vpop.f32.mrf.mxu1 }
 0xb3d   : > { %v4793_v0 = vmax.f32 %v10064_v60, %v10072_v27 }
 0xb3e   : > { %v10074_v41 = vpop.f32.mrf.mxu1 }
 0xb3f   : > { %11373 = vst [vmem:[#allocation61_spill] sm:$0xff] %v10074_v41 }
 0xb40   : > { %v10076_v59 = vpop.f32.mrf.mxu1 }
 0xb41   : > { %v4794_v25 = vmax.f32 %v4792_v1, %v10076_v59 }
 0xb42   : > { %v10078_v31 = vpop.f32.mrf.mxu1 }
 0xb44   : > { %v10080_v46 = vpop.f32.mrf.mxu1 }
 0xb45   : > { %v4795_v54 = vmax.f32 %v4793_v0, %v10080_v46 }
 0xb46   : > { %v10082_v58 = vpop.f32.mrf.mxu1 }
 0xb47   : > { %11374 = vst [vmem:[#allocation90_spill] sm:$0xff] %v10082_v58 }
 0xb48   : > { %v10084_v45 = vpop.f32.mrf.mxu1 }
 0xb49   : > { %v4796_v52 = vmax.f32 %v4794_v25, %v10084_v45 }
 0xb4a   : > { %v10086_v23 = vpop.f32.mrf.mxu1 }
 0xb4c   : > { %v10088_v19 = vpop.f32.mrf.mxu1 }
 0xb4d   : > { %v4797_v53 = vmax.f32 %v4795_v54, %v10088_v19 }
 0xb4e   : > { %v10090_v39 = vpop.f32.mrf.mxu1 }
 0xb4f   : > { %11375 = vst [vmem:[#allocation93_spill] sm:$0xff] %v10090_v39 }
 0xb50   : > { %v10092_v42 = vpop.f32.mrf.mxu1 }
 0xb51   : > { %11376 = vst [vmem:[#allocation77_spill] sm:$0xff] %v10092_v42  ;;  %v4798_v7 = vmax.f32 %v4796_v52, %v10092_v42 }
 0xb52   : > { %v10094_v49 = vpop.f32.mrf.mxu1 }
 0xb53   : > { %11377 = vst [vmem:[#allocation53_spill] sm:$0xff] %v10094_v49 }
 0xb54   : > { %v10096_v61 = vpop.f32.mrf.mxu1 }
 0xb55   : > { %v4799_v34 = vmax.f32 %v4797_v53, %v10096_v61 }
 0xb56   : > { %v10098_v18 = vpop.f32.mrf.mxu1 }
 0xb57   : > { %11378 = vst [vmem:[#allocation79_spill] sm:$0xff] %v10098_v18 }
 0xb58   : > { %v10100_v13 = vpop.f32.mrf.mxu1 }
 0xb59   : > { %11379 = vst [vmem:[#allocation81_spill] sm:$0xff] %v10100_v13  ;;  %v4800_v14 = vmax.f32 %v4798_v7, %v10100_v13 }
 0xb5a   : > { %v10102_v38 = vpop.f32.mrf.mxu1 }
 0xb5c   : > { %v10104_v16 = vpop.f32.mrf.mxu1 }
 0xb5d   : > { %v4801_v1 = vmax.f32 %v4799_v34, %v10104_v16 }
 0xb5e   : > { %v10106_v62 = vpop.f32.mrf.mxu1 }
 0xb60   : > { %v10108_v29 = vpop.f32.mrf.mxu1 }
 0xb61   : > { %11380 = vst [vmem:[#allocation84_spill] sm:$0xff] %v10108_v29  ;;  %v4802_v0 = vmax.f32 %v4800_v14, %v10108_v29 }
 0xb62   : > { %v10110_v20 = vpop.f32.mrf.mxu1 }
 0xb64   : > { %v10112_v43 = vpop.f32.mrf.mxu1 }
 0xb65   : > { %v4803_v25 = vmax.f32 %v4801_v1, %v10112_v43  ;;  %v4830_v1 = vmax.f32 %v10066_v5, %v10074_v41 }
 0xb66   : > { %v10114_v40 = vpop.f32.mrf.mxu1 }
 0xb68   : > { %v10116_v57 = vpop.f32.mrf.mxu1 }
 0xb69   : > { %v4804_v54 = vmax.f32 %v4802_v0, %v10116_v57 }
 0xb6a   : > { %v10118_v48 = vpop.f32.mrf.mxu1 }
 0xb6c   : > { %v10120_v11 = vpop.f32.mrf.mxu1 }
 0xb6d   : > { %11381 = vst [vmem:[#allocation58_spill] sm:$0xff] %v10120_v11  ;;  %v4805_v52 = vmax.f32 %v4803_v25, %v10120_v11 }
 0xb6e   : > { %v10122_v8 = vpop.f32.mrf.mxu1 }
 0xb70   : > { %v10124_v9 = vpop.f32.mrf.mxu1 }
 0xb71   : > { %v4806_v53 = vmax.f32 %v4804_v54, %v10124_v9  ;;  %v4829_v54 = vmax.f32 %v10062_v26, %v10070_v12 }
 0xb72   : > { %v10126_v17 = vpop.f32.mrf.mxu1 }
 0xb74   : > { %v10128_v32 = vpop.f32.mrf.mxu1 }
 0xb75   : > { %v4807_v7 = vmax.f32 %v4805_v52, %v10128_v32  ;;  %v4832_v52 = vmax.f32 %v4830_v1, %v10082_v58 }
 0xb76   : > { %v10130_v4 = vpop.f32.mrf.mxu1 }
 0xb77   : > { %v4834_v41 = vmax.f32 %v4832_v52, %v10090_v39 }
 0xb78   : > { %v10132_v33 = vpop.f32.mrf.mxu1 }
 0xb79   : > { %11382 = vst [vmem:[#allocation86_spill] sm:$0xff] %v10132_v33  ;;  %v4808_v34 = vmax.f32 %v4806_v53, %v10132_v33  ;;  %v4831_v33 = vmax.f32 %v4829_v54, %v10078_v31  ;;  %v4836_v1 = vmax.f32 %v4834_v41, %v10098_v18 }
 0xb7a   : > { %v10134_v44 = vpop.f32.mrf.mxu1 }
 0xb7b   : > { %v4838_v52 = vmax.f32 %v4836_v1, %v10106_v62 }
 0xb7c   : > { %v10136_v36 = vpop.f32.mrf.mxu1 }
 0xb7d   : > { %11383 = vst [vmem:[#allocation91_spill] sm:$0xff] %v10136_v36  ;;  %v4809_v14 = vmax.f32 %v4807_v7, %v10136_v36  ;;  %v4840_v41 = vmax.f32 %v4838_v52, %v10114_v40 }
 0xb7e   : > { %v10138_v51 = vpop.f32.mrf.mxu1 }
 0xb80   : > { %v10140_v56 = vpop.f32.mrf.mxu1 }
 0xb81   : > { %11384 = vst [vmem:[#allocation94_spill] sm:$0xff] %v10140_v56  ;;  %v4810_v0 = vmax.f32 %v4808_v34, %v10140_v56  ;;  %v4833_v56 = vmax.f32 %v4831_v33, %v10086_v23 }
 0xb82   : > { %v10142_v30 = vpop.f32.mrf.mxu1 }
 0xb83   : > { %v4835_v54 = vmax.f32 %v4833_v56, %v10094_v49  ;;  %v4842_v56 = vmax.f32 %v4840_v41, %v10122_v8 }
 0xb84   : > { %v10144_v50 = vpop.f32.mrf.mxu1 }
 0xb85   : > { %11385 = vst [vmem:[#allocation50_spill] sm:$0xff] %v10144_v50  ;;  %v4811_v25 = vmax.f32 %v4809_v14, %v10144_v50  ;;  %v4837_v33 = vmax.f32 %v4835_v54, %v10102_v38 }
 0xb86   : > { %v10146_v2 = vpop.f32.mrf.mxu1 }
 0xb87   : > { %v4839_v18 = vmax.f32 %v4837_v33, %v10110_v20 }
 0xb88   : > { %v10148_v3 = vpop.f32.mrf.mxu1 }
 0xb89   : > { %v4812_v53 = vmax.f32 %v4810_v0, %v10148_v3  ;;  %v4841_v1 = vmax.f32 %v4839_v18, %v10118_v48 }
 0xb8a   : > { %v10150_v10 = vpop.f32.mrf.mxu1 }
 0xb8c   : > { %v10152_v6 = vpop.f32.mrf.mxu1 }
 0xb8d   : > { %v4813_v7 = vmax.f32 %v4811_v25, %v10152_v6 }
 0xb8e   : > { %v10154_v21 = vpop.f32.mrf.mxu1 }
 0xb90   : > { %v10156_v22 = vpop.f32.mrf.mxu1 }
 0xb91   : > { %v4814_v34 = vmax.f32 %v4812_v53, %v10156_v22 }
 0xb92   : > { %v10162_v15 = vpop.f32.mrf.mxu1 }
 0xb94   : > { %v10166_v55 = vpop.f32.mrf.mxu1 }
 0xb95   : > { %v4815_v14 = vmax.f32 %v4813_v7, %v10166_v55 }
 0xb96   : > { %v10170_v35 = vpop.f32.mrf.mxu1 }
 0xb98   : > { %v10174_v24 = vpop.f32.mrf.mxu1 }
 0xb99   : > { %v4816_v0 = vmax.f32 %v4814_v34, %v10174_v24 }
 0xb9a   : > { %v10178_v28 = vpop.f32.mrf.mxu1 }
 0xb9c   : > { %v10182_v37 = vpop.f32.mrf.mxu1 }
 0xb9d   : > { %v4817_v25 = vmax.f32 %v4815_v14, %v10182_v37 }
 0xb9e   : > { %v10186_v42 = vpop.f32.mrf.mxu1 }
 0xba0   : > { %v10190_v13 = vpop.f32.mrf.mxu1 }
 0xba1   : > { %11386 = vst [vmem:[#allocation39_spill] sm:$0xff] %v10190_v13  ;;  %v4818_v53 = vmax.f32 %v4816_v0, %v10190_v13  ;;  %v4844_v0 = vmax.f32 %v4842_v56, %v10130_v4 }
 0xba2   : > { %v10194_v29 = vpop.f32.mrf.mxu1 }
 0xba3   : > { %v4846_v54 = vmax.f32 %v4844_v0, %v10138_v51 }
 0xba4   : > { %v10200_v11 = vpop.f32.mrf.mxu1 }
 0xba5   : > { %11387 = vst [vmem:[#allocation60_spill] sm:$0xff] %v10200_v11  ;;  %v4819_v7 = vmax.f32 %v4817_v25, %v10200_v11  ;;  %v4843_v11 = vmax.f32 %v4841_v1, %v10126_v17 }
 0xba6   : > { %v10207_v36 = vpop.f32.mrf.mxu1 }
 0xba7   : > { %v4845_v52 = vmax.f32 %v4843_v11, %v10134_v44 }
 0xba8   : > { %v10213_v50 = vpop.f32.mrf.mxu1 }
 0xba9   : > { %v4820_v34 = vmax.f32 %v4818_v53, %v10213_v50  ;;  %v4848_v53 = vmax.f32 %v4846_v54, %v10146_v2  ;;  %v4847_v33 = vmax.f32 %v4845_v52, %v10142_v30 }
 0xbaa   : > { %v10219_v58 = vpop.f32.mrf.mxu1 }
 0xbab   : > { %v4850_v41 = vmax.f32 %v4848_v53, %v10154_v21  ;;  %v4849_v18 = vmax.f32 %v4847_v33, %v10150_v10 }
 0xbac   : > { %v10225_v39 = vpop.f32.mrf.mxu1 }
 0xbad   : > { %v4821_v14 = vmax.f32 %v4819_v7, %v10225_v39  ;;  %v4851_v1 = vmax.f32 %v4849_v18, %v10162_v15 }
 0xbaf   : > { %v4822_v49 = vmax.f32 %v4820_v34, %v4821_v14  ;;  %v4852_v14 = vmax.f32 %v4850_v41, %v10170_v35  ;;  %v4853_v11 = vmax.f32 %v4851_v1, %v10178_v28 }
 0xbb1   : > { %v4823_v25 = vrot.slane %v4822_v49, 4  ;;  %v4854_v0 = vmax.f32 %v4852_v14, %v10186_v42  ;;  %v4855_v52 = vmax.f32 %v4853_v11, %v10194_v29 }
 0xbb3   : > { %v4824_v13 = vmax.f32 %v4822_v49, %v4823_v25  ;;  %v10245_v49 = vpop.f32.mrf.mxu1  ;;  %v4856_v25 = vmax.f32 %v4854_v0, %v10207_v36  ;;  %v4857_v53 = vmax.f32 %v4855_v52, %v10219_v58 }
 0xbb5   : > { %v4825_v7 = vrot.slane %v4824_v13, 2 }
 0xbb7   : > { %v4826_v34 = vmax.f32 %v4824_v13, %v4825_v7  ;;  %v4858_v13 = vmax.f32 %v4856_v25, %v10245_v49 }
 0xbb9   : > { %v4827_v56 = vrot.slane %v4826_v34, 1  ;;  %v4859_v18 = vmax.f32 %v4857_v53, %v4858_v13 }
 0xbbb   : > { %v10249_v54 = vmax.f32 %v4826_v34, %v4827_v56  ;;  %v4860_v11 = vrot.slane %v4859_v18, 4 }
 0xbbd   : > { %v4866_v7 = vsub.f32 %v10058_v63, %v10249_v54  ;;  %v4868_v33 = vsub.f32 %v10064_v60, %v10249_v54  ;;  %v4870_v41 = vsub.f32 %v10068_v47, %v10249_v54  ;;  %v4872_v34 = vsub.f32 %v10072_v27, %v10249_v54 }
 0xbbe   : > { %v4874_v1 = vsub.f32 %v10076_v59, %v10249_v54  ;;  %v4876_v63 = vsub.f32 %v10080_v46, %v10249_v54  ;;  %v4878_v47 = vsub.f32 %v10084_v45, %v10249_v54  ;;  %v4861_v52 = vmax.f32 %v4859_v18, %v4860_v11  ;;  %v11388_v59 = vld [vmem:[#allocation77_spill] sm:$0xff] }
 0xbbf   : > { %v4930_v14 = vmul.f32 1.442695, %v4866_v7  ;;  %v4934_v56 = vmul.f32 1.442695, %v4868_v33  ;;  %v4938_v0 = vmul.f32 1.442695, %v4870_v41  ;;  %v4880_v27 = vsub.f32 %v10088_v19, %v10249_v54 }
 0xbc0   : > { %v4942_v60 = vmul.f32 1.442695, %v4872_v34  ;;  %v4946_v25 = vmul.f32 1.442695, %v4874_v1  ;;  %v4950_v13 = vmul.f32 1.442695, %v4876_v63  ;;  %v4882_v53 = vsub.f32 %v11388_v59, %v10249_v54 }
 0xbc1   : > { %6247 = vpow2.f32 %v4930_v14  ;;  %v4954_v7 = vmul.f32 1.442695, %v4878_v47  ;;  %v4884_v46 = vsub.f32 %v10096_v61, %v10249_v54  ;;  %v4862_v33 = vrot.slane %v4861_v52, 2  ;;  %v11389_v41 = vld [vmem:[#allocation81_spill] sm:$0xff]  ;;  %v11390_v19 = vld [vmem:[#allocation84_spill] sm:$0xff] }
 0xbc2   : > { %6249 = vpow2.f32 %v4934_v56  ;;  %v4886_v45 = vsub.f32 %v11389_v41, %v10249_v54  ;;  %v4958_v34 = vmul.f32 1.442695, %v4880_v27  ;;  %v4888_v18 = vsub.f32 %v10104_v16, %v10249_v54 }
 0xbc3   : > { %6251 = vpow2.f32 %v4938_v0  ;;  %v4890_v14 = vsub.f32 %v11390_v19, %v10249_v54  ;;  %v4962_v56 = vmul.f32 1.442695, %v4882_v53  ;;  %v4892_v1 = vsub.f32 %v10112_v43, %v10249_v54 }
 0xbc4   : > { %6253 = vpow2.f32 %v4942_v60  ;;  %v4966_v0 = vmul.f32 1.442695, %v4884_v46  ;;  %v4863_v11 = vmax.f32 %v4861_v52, %v4862_v33  ;;  %v4894_v63 = vsub.f32 %v10116_v57, %v10249_v54 }
 0xbc5   : > { %6255 = vpow2.f32 %v4946_v25  ;;  %v4970_v60 = vmul.f32 1.442695, %v4886_v45  ;;  %v4910_v16 = vsub.f32 %v10148_v3, %v10249_v54  ;;  %v4974_v25 = vmul.f32 1.442695, %v4888_v18 }
 0xbc6   : > { %6257 = vpow2.f32 %v4950_v13  ;;  %v4912_v27 = vsub.f32 %v10152_v6, %v10249_v54  ;;  %v4978_v43 = vmul.f32 1.442695, %v4890_v14  ;;  %v4914_v57 = vsub.f32 %v10156_v22, %v10249_v54 }
 0xbc7   : > { %6259 = vpow2.f32 %v4954_v7  ;;  %v4982_v59 = vmul.f32 1.442695, %v4892_v1  ;;  %v4864_v53 = vrot.slane %v4863_v11, 1  ;;  %v4916_v3 = vsub.f32 %v10166_v55, %v10249_v54  ;;  %v11392_v55 = vld [vmem:[#allocation58_spill] sm:$0xff] }
 0xbc8   : > { %6261 = vpow2.f32 %v4958_v34  ;;  %v4986_v7 = vmul.f32 1.442695, %v4894_v63  ;;  %v4918_v33 = vsub.f32 %v10174_v24, %v10249_v54  ;;  %v5018_v41 = vmul.f32 1.442695, %v4910_v16  ;;  %v11393_v16 = vld [vmem:[#allocation86_spill] sm:$0xff] }
 0xbc9   : > { %6263 = vpow2.f32 %v4962_v56  ;;  %v4920_v22 = vsub.f32 %v10182_v37, %v10249_v54  ;;  %v5022_v45 = vmul.f32 1.442695, %v4912_v27  ;;  %v4896_v19 = vsub.f32 %v11392_v55, %v10249_v54 }
 0xbca   : > { %6265 = vpow2.f32 %v4966_v0  ;;  %v5026_v14 = vmul.f32 1.442695, %v4914_v57  ;;  %v10312_v56 = vmax.f32 %v4863_v11, %v4864_v53  ;;  %v4898_v24 = vsub.f32 %v10124_v9, %v10249_v54 }
 0xbcb   : > { %6267 = vpow2.f32 %v4970_v60  ;;  %v5030_v1 = vmul.f32 1.442695, %v4916_v3  ;;  %v4900_v63 = vsub.f32 %v10128_v32, %v10249_v54  ;;  %v5034_v60 = vmul.f32 1.442695, %v4918_v33  ;;  %v11394_v3 = vld [vmem:[#allocation91_spill] sm:$0xff] }
 0xbcc   : > { %6269 = vpow2.f32 %v4974_v25  ;;  %v4902_v25 = vsub.f32 %v11393_v16, %v10249_v54  ;;  %v5038_v11 = vmul.f32 1.442695, %v4920_v22  ;;  %v4990_v9 = vmul.f32 1.442695, %v4896_v19 }
 0xbcd   : > { %6271 = vpow2.f32 %v4978_v43  ;;  %v4994_v57 = vmul.f32 1.442695, %v4898_v24 }
 0xbce   : > { %v10282_v61 = vpop.eup %6247  ;;  %6273 = vpow2.f32 %v4982_v59  ;;  %v4869_v59 = vsub.f32 %v10066_v5, %v10312_v56  ;;  %v5002_v33 = vmul.f32 1.442695, %v4902_v25 }
 0xbcf   : > { %v10286_v47 = vpop.eup %6249  ;;  %6275 = vpow2.f32 %v4986_v7  ;;  %v4904_v7 = vsub.f32 %v11394_v3, %v10249_v54 }
 0xbd0   : > { %11391 = vst [vmem:[#allocation96_spill] sm:$0xff] %v10286_v47  ;;  %v5058_v52 = vadd.f32 %v10286_v47, %v10282_v61  ;;  %v10294_v13 = vpop.eup %6251  ;;  %6277 = vpow2.f32 %v5018_v41 }
 0xbd1   : > { %v10301_v46 = vpop.eup %6253  ;;  %6279 = vpow2.f32 %v5022_v45  ;;  %v11395_v45 = vld [vmem:[#allocation94_spill] sm:$0xff] }
 0xbd2   : > { %v5059_v6 = vadd.f32 %v10294_v13, %v5058_v52  ;;  %v10308_v18 = vpop.eup %6255  ;;  %6281 = vpow2.f32 %v5026_v14  ;;  %v4867_v52 = vsub.f32 %v10062_v26, %v10312_v56  ;;  %v4871_v26 = vsub.f32 %v10070_v12, %v10312_v56  ;;  %v11396_v14 = vld [vmem:[#allocation61_spill] sm:$0xff]  ;;  %v11397_v12 = vld [vmem:[#allocation50_spill] sm:$0xff] }
 0xbd3   : > { %v10317_v0 = vpop.eup %6257  ;;  %6283 = vpow2.f32 %v5030_v1  ;;  %v4873_v24 = vsub.f32 %v11396_v14, %v10312_v56  ;;  %v4936_v1 = vmul.f32 1.442695, %v4869_v59 }
 0xbd4   : > { %v5060_v34 = vadd.f32 %v10301_v46, %v5059_v6  ;;  %v10324_v43 = vpop.eup %6259  ;;  %v4998_v6 = vmul.f32 1.442695, %v4900_v63  ;;  %6285 = vpow2.f32 %v5034_v60  ;;  %v4932_v5 = vmul.f32 1.442695, %v4867_v52 }
 0xbd5   : > { %v10331_v53 = vpop.eup %6261  ;;  %6287 = vpow2.f32 %v5038_v11  ;;  %v4908_v63 = vsub.f32 %v11397_v12, %v10249_v54  ;;  %v5006_v60 = vmul.f32 1.442695, %v4904_v7  ;;  %v4875_v11 = vsub.f32 %v10078_v31, %v10312_v56 }
 0xbd6   : > { %v5061_v37 = vadd.f32 %v10308_v18, %v5060_v34  ;;  %v10338_v22 = vpop.eup %6263  ;;  %v4906_v34 = vsub.f32 %v11395_v45, %v10249_v54  ;;  %6289 = vpow2.f32 %v4990_v9  ;;  %v4879_v7 = vsub.f32 %v10086_v23, %v10312_v56 }
 0xbd7   : > { %v10342_v55 = vpop.eup %6265  ;;  %6291 = vpow2.f32 %v4994_v57  ;;  %v11398_v57 = vld [vmem:[#allocation90_spill] sm:$0xff]  ;;  %v5014_v31 = vmul.f32 1.442695, %v4908_v63  ;;  %v4948_v14 = vmul.f32 1.442695, %v4875_v11  ;;  %v4891_v23 = vsub.f32 %v10110_v20, %v10312_v56 }
 0xbd8   : > { %v5062_v27 = vadd.f32 %v10317_v0, %v5061_v37  ;;  %v10347_v37 = vpop.eup %6267  ;;  %6293 = vpow2.f32 %v4998_v6  ;;  %v5010_v52 = vmul.f32 1.442695, %v4906_v34  ;;  %v4944_v6 = vmul.f32 1.442695, %v4873_v24 }
 0xbd9   : > { %v10351_v16 = vpop.eup %6269  ;;  %6295 = vpow2.f32 %v5002_v33  ;;  %v4893_v24 = vsub.f32 %v10114_v40, %v10312_v56  ;;  %v4897_v20 = vsub.f32 %v10122_v8, %v10312_v56 }
 0xbda   : > { %v5063_v32 = vadd.f32 %v10324_v43, %v5062_v27  ;;  %v4940_v27 = vmul.f32 1.442695, %v4871_v26  ;;  %v10356_v9 = vpop.eup %6271  ;;  %6297 = vpow2.f32 %v4932_v5  ;;  %v11400_v5 = vld [vmem:[#allocation53_spill] sm:$0xff] }
 0xbdb   : > { %v10360_v59 = vpop.eup %6273  ;;  %6299 = vpow2.f32 %v4936_v1 }
 0xbdc   : > { %v5064_v41 = vadd.f32 %v10331_v53, %v5063_v32  ;;  %v4877_v32 = vsub.f32 %v11398_v57, %v10312_v56  ;;  %v10365_v33 = vpop.eup %6275  ;;  %6301 = vpow2.f32 %v5006_v60 }
 0xbdd   : > { %v10369_v45 = vpop.eup %6277  ;;  %6303 = vpow2.f32 %v4940_v27 }
 0xbde   : > { %v5065_v19 = vadd.f32 %v10338_v22, %v5064_v41  ;;  %v11399_v41 = vld [vmem:[#allocation93_spill] sm:$0xff]  ;;  %v10374_v12 = vpop.eup %6279  ;;  %6305 = vpow2.f32 %v5010_v52  ;;  %v4952_v1 = vmul.f32 1.442695, %v4877_v32  ;;  %v4895_v52 = vsub.f32 %v10118_v48, %v10312_v56 }
 0xbdf   : > { %v4881_v26 = vsub.f32 %v11399_v41, %v10312_v56  ;;  %v10380_v63 = vpop.eup %6281  ;;  %6307 = vpow2.f32 %v4944_v6  ;;  %v4980_v48 = vmul.f32 1.442695, %v4891_v23 }
 0xbe0   : > { %v5066_v25 = vadd.f32 %v10342_v55, %v5065_v19  ;;  %v4883_v19 = vsub.f32 %v11400_v5, %v10312_v56  ;;  %v10385_v11 = vpop.eup %6283  ;;  %6309 = vpow2.f32 %v5014_v31  ;;  %v11401_v31 = vld [vmem:[#allocation79_spill] sm:$0xff] }
 0xbe1   : > { %v4960_v40 = vmul.f32 1.442695, %v4881_v26  ;;  %v10391_v57 = vpop.eup %6285  ;;  %6311 = vpow2.f32 %v4948_v14  ;;  %v4885_v41 = vsub.f32 %v11401_v31, %v10312_v56  ;;  %v4984_v26 = vmul.f32 1.442695, %v4893_v24 }
 0xbe2   : > { %v5067_v3 = vadd.f32 %v10347_v37, %v5066_v25  ;;  %v4956_v25 = vmul.f32 1.442695, %v4879_v7  ;;  %v10396_v6 = vpop.eup %6287  ;;  %6313 = vpow2.f32 %v4952_v1  ;;  %v4887_v14 = vsub.f32 %v10102_v38, %v10312_v56 }
 0xbe3   : > { %v4889_v1 = vsub.f32 %v10106_v62, %v10312_v56  ;;  %v4968_v7 = vmul.f32 1.442695, %v4885_v41  ;;  %v11407_v41 = vld [vmem:[#allocation60_spill] sm:$0xff] }
 0xbe4   : > { %v5068_v34 = vadd.f32 %v10351_v16, %v5067_v3  ;;  %v4964_v3 = vmul.f32 1.442695, %v4883_v19  ;;  %6315 = vpow2.f32 %v4956_v25  ;;  %v4992_v25 = vmul.f32 1.442695, %v4897_v20 }
 0xbe5   : > { %6317 = vpow2.f32 %v4960_v40  ;;  %v4976_v20 = vmul.f32 1.442695, %v4889_v1 }
 0xbe6   : > { %v5069_v60 = vadd.f32 %v10356_v9, %v5068_v34  ;;  %v10400_v34 = vpop.eup %6289  ;;  %6319 = vpow2.f32 %v4964_v3 }
 0xbe7   : > { %v10405_v19 = vpop.eup %6291  ;;  %6321 = vpow2.f32 %v4980_v48 }
 0xbe8   : > { %v5070_v32 = vadd.f32 %v10360_v59, %v5069_v60  ;;  %11402 = vst [vmem:[#allocation57_spill] sm:$0xff] %v10405_v19  ;;  %v4988_v60 = vmul.f32 1.442695, %v4895_v52  ;;  %v10409_v27 = vpop.eup %6293  ;;  %6323 = vpow2.f32 %v4984_v26  ;;  %v11405_v52 = vld [vmem:[#allocation39_spill] sm:$0xff]  ;;  %v4924_v26 = vsub.f32 %v11407_v41, %v10249_v54 }
 0xbe9   : > { %11403 = vst [vmem:[#allocation38_spill] sm:$0xff] %v10409_v27  ;;  %v10414_v24 = vpop.eup %6295  ;;  %v4922_v40 = vsub.f32 %v11405_v52, %v10249_v54  ;;  %v4919_v52 = vsub.f32 %v10178_v28, %v10312_v56 }
 0xbea   : > { %v5071_v8 = vadd.f32 %v10365_v33, %v5070_v32  ;;  %11404 = vst [vmem:[#allocation78_spill] sm:$0xff] %v10414_v24  ;;  %v10416_v32 = vpop.eup %6297  ;;  %6325 = vpow2.f32 %v4988_v60 }
 0xbeb   : > { %v10419_v38 = vpop.eup %6299  ;;  %6327 = vpow2.f32 %v4992_v25  ;;  %v5042_v25 = vmul.f32 1.442695, %v4922_v40  ;;  %v4928_v40 = vsub.f32 %v10225_v39, %v10249_v54 }
 0xbec   : > { %v5072_v23 = vadd.f32 %v10400_v34, %v5071_v8  ;;  %v4972_v8 = vmul.f32 1.442695, %v4887_v14  ;;  %v10423_v5 = vpop.eup %6301  ;;  %v5095_v3 = vadd.f32 %v10419_v38, %v10416_v32  ;;  %v4926_v14 = vsub.f32 %v10213_v50, %v10249_v54 }
 0xbed   : > { %11406 = vst [vmem:[#allocation49_spill] sm:$0xff] %v10423_v5  ;;  %v10428_v48 = vpop.eup %6303  ;;  %6329 = vpow2.f32 %v4968_v7  ;;  %v4901_v54 = vsub.f32 %v10130_v4, %v10312_v56 }
 0xbee   : > { %v5073_v31 = vadd.f32 %v10405_v19, %v5072_v23  ;;  %v10432_v23 = vpop.eup %6305  ;;  %6331 = vpow2.f32 %v4972_v8  ;;  %v4921_v19 = vsub.f32 %v10186_v42, %v10312_v56  ;;  %v5050_v28 = vmul.f32 1.442695, %v4926_v14 }
 0xbef   : > { %v10438_v1 = vpop.eup %6307  ;;  %6333 = vpow2.f32 %v4976_v20  ;;  %v4899_v42 = vsub.f32 %v10126_v17, %v10312_v56  ;;  %v5036_v20 = vmul.f32 1.442695, %v4919_v52 }
 0xbf0   : > { %v5074_v62 = vadd.f32 %v10409_v27, %v5073_v31  ;;  %v5096_v31 = vadd.f32 %v10428_v48, %v5095_v3  ;;  %v10442_v27 = vpop.eup %6309  ;;  %6335 = vpow2.f32 %v5042_v25  ;;  %v4903_v25 = vsub.f32 %v10134_v44, %v10312_v56 }
 0xbf1   : > { %11408 = vst [vmem:[#allocation52_spill] sm:$0xff] %v10442_v27  ;;  %v10448_v7 = vpop.eup %6311 }
 0xbf2   : > { %v5075_v60 = vadd.f32 %v10414_v24, %v5074_v62  ;;  %v5097_v50 = vadd.f32 %v10438_v1, %v5096_v31  ;;  %v5046_v62 = vmul.f32 1.442695, %v4924_v26  ;;  %v10450_v3 = vpop.eup %6313 }
 0xbf4   : > { %v5076_v41 = vadd.f32 %v10423_v5, %v5075_v60  ;;  %v5098_v24 = vadd.f32 %v10448_v7, %v5097_v50  ;;  %v10456_v60 = vpop.eup %6315  ;;  %v5040_v5 = vmul.f32 1.442695, %v4921_v19  ;;  %6337 = vpow2.f32 %v5046_v62 }
 0xbf5   : > { %v10460_v31 = vpop.eup %6317  ;;  %6339 = vpow2.f32 %v5050_v28  ;;  %v4996_v62 = vmul.f32 1.442695, %v4899_v42  ;;  %v5000_v28 = vmul.f32 1.442695, %v4901_v54  ;;  %v5004_v42 = vmul.f32 1.442695, %v4903_v25 }
 0xbf6   : > { %v5077_v8 = vadd.f32 %v10432_v23, %v5076_v41  ;;  %v5099_v47 = vadd.f32 %v10450_v3, %v5098_v24  ;;  %v10464_v39 = vpop.eup %6319  ;;  %v5054_v41 = vmul.f32 1.442695, %v4928_v40  ;;  %6341 = vpow2.f32 %v5036_v20 }
 0xbf7   : > { %v6322_v14 = vpop.eup %6321  ;;  %6343 = vpow2.f32 %v5040_v5  ;;  %v4905_v40 = vsub.f32 %v10138_v51, %v10312_v56  ;;  %v4907_v5 = vsub.f32 %v10142_v30, %v10312_v56 }
 0xbf8   : > { %v5078_v26 = vadd.f32 %v10442_v27, %v5077_v8  ;;  %v5100_v52 = vadd.f32 %v10456_v60, %v5099_v47  ;;  %v6324_v50 = vpop.eup %6323  ;;  %6345 = vpow2.f32 %v5054_v41  ;;  %v4911_v27 = vsub.f32 %v10150_v10, %v10312_v56 }
 0xbf9   : > { %v10472_v19 = vpop.eup %6325  ;;  %6347 = vpow2.f32 %v4996_v62  ;;  %v5145_v41 = vpack.c.bf16 %v6324_v50, %v6322_v14  ;;  %v5008_v25 = vmul.f32 1.442695, %v4905_v40  ;;  %v4929_v62 = vsub.f32 %v10245_v49, %v10312_v56 }
 0xbfa   : > { %v5079_v17 = vadd.f32 %v10369_v45, %v5078_v26  ;;  %v5101_v4 = vadd.f32 %v10460_v31, %v5100_v52  ;;  %v10476_v8 = vpop.eup %6327  ;;  %6349 = vpow2.f32 %v5000_v28  ;;  %v4913_v40 = vsub.f32 %v10154_v21, %v10312_v56 }
 0xbfb   : > { %v5147_v20 = vpack.c.bf16 %v10476_v8, %v10472_v19  ;;  %v6330_v26 = vpop.eup %6329  ;;  %6351 = vpow2.f32 %v5004_v42  ;;  %v4923_v49 = vsub.f32 %v10194_v29, %v10312_v56  ;;  %v4925_v21 = vsub.f32 %v10207_v36, %v10312_v56 }
 0xbfc   : > { %v5080_v24 = vadd.f32 %v10374_v12, %v5079_v17  ;;  %v5102_v44 = vadd.f32 %v10464_v39, %v5101_v4  ;;  %v5146_v17 = vpack.c.bf16 %v10400_v34, %v10365_v33  ;;  %v6332_v52 = vpop.eup %6331  ;;  %v4909_v4 = vsub.f32 %v10146_v2, %v10312_v56 }
 0xbfd   : > { %5164 = vmatprep.subr.bf16.mxu0 %v5147_v20  ;;  %v4927_v34 = vsub.f32 %v10219_v58, %v10312_v56  ;;  %v5144_v2 = vpack.c.bf16 %v10360_v59, %v10356_v9  ;;  %v4915_v58 = vsub.f32 %v10162_v15, %v10312_v56  ;;  %6353 = vpow2.f32 %v5008_v25 }
 0xbfe   : > { %v5081_v47 = vadd.f32 %v10380_v63, %v5080_v24  ;;  %v5103_v54 = vadd.f32 %v6330_v26, %v5102_v44  ;;  %v6334_v24 = vpop.eup %6333  ;;  %5165 = vmatpush1.bf16.msra.mxu0 %v5146_v17  ;;  %v5016_v28 = vmul.f32 1.442695, %v4909_v4  ;;  %v5020_v59 = vmul.f32 1.442695, %v4911_v27 }
 0xbff   : > { %5166 = vmatprep.subr.bf16.mxu0 %v5145_v41  ;;  %v5143_v20 = vpack.c.bf16 %v6334_v24, %v6332_v52  ;;  %v10501_v17 = vpop.eup %6335  ;;  %v5056_v15 = vmul.f32 1.442695, %v4929_v62  ;;  %v5142_v29 = vpack.c.bf16 %v10351_v16, %v10347_v37  ;;  %v5141_v27 = vpack.c.bf16 %v6330_v26, %v10464_v39 }
 0xc00   : > { %v5082_v51 = vadd.f32 %v10385_v11, %v5081_v47  ;;  %v5104_v33 = vadd.f32 %v6332_v52, %v5103_v54  ;;  %v5012_v47 = vmul.f32 1.442695, %v4907_v5  ;;  %v4917_v4 = vsub.f32 %v10170_v35, %v10312_v56 }
 0xc01   : > { %v10509_v5 = vpop.eup %6337  ;;  %v5024_v36 = vmul.f32 1.442695, %v4913_v40  ;;  %v5044_v39 = vmul.f32 1.442695, %v4923_v49  ;;  %v5048_v26 = vmul.f32 1.442695, %v4925_v21  ;;  %v5140_v35 = vpack.c.bf16 %v10342_v55, %v10338_v22 }
 0xc02   : > { %v5083_v30 = vadd.f32 %v10391_v57, %v5082_v51  ;;  %v5105_v10 = vadd.f32 %v6334_v24, %v5104_v33  ;;  %5167 = vmatpush1.bf16.msra.mxu0 %v5144_v2  ;;  %v10512_v52 = vpop.eup %6339  ;;  %v5052_v51 = vmul.f32 1.442695, %v4927_v34  ;;  %6355 = vpow2.f32 %v5012_v47 }
 0xc03   : > { %5168 = vmatprep.subr.bf16.mxu0 %v5143_v20  ;;  %v10518_v54 = vpop.eup %6341  ;;  %6357 = vpow2.f32 %v5016_v28  ;;  %v5139_v34 = vpack.c.bf16 %v10460_v31, %v10456_v60  ;;  %v5032_v62 = vmul.f32 1.442695, %v4917_v4  ;;  %v5138_v22 = vpack.c.bf16 %v10331_v53, %v10324_v43 }
 0xc04   : > { %v5084_v44 = vadd.f32 %v10396_v6, %v5083_v30  ;;  %v5106_v42 = vadd.f32 %v6322_v14, %v5105_v10  ;;  %v10522_v14 = vpop.eup %6343  ;;  %v5028_v30 = vmul.f32 1.442695, %v4915_v58  ;;  %6359 = vpow2.f32 %v5020_v59 }
 0xc05   : > { %v5159_v16 = vpack.c.bf16 %v10522_v14, %v10518_v54  ;;  %6361 = vpow2.f32 %v5052_v51  ;;  %v5137_v60 = vpack.c.bf16 %v10450_v3, %v10448_v7  ;;  %v5136_v10 = vpack.c.bf16 %v10317_v0, %v10308_v18 }
 0xc06   : > { %v5085_v9 = vadd.f32 %v10501_v17, %v5084_v44  ;;  %v5107_v24 = vadd.f32 %v6324_v50, %v5106_v42  ;;  %5169 = vmatpush1.bf16.msra.mxu0 %v5142_v29  ;;  %v6346_v50 = vpop.eup %6345  ;;  %6363 = vpow2.f32 %v5056_v15  ;;  %v5135_v40 = vpack.c.bf16 %v10438_v1, %v10428_v48  ;;  %v11409_v1 = vld [vmem:[#allocation96_spill] sm:$0xff] }
 0xc07   : > { %5170 = vmatprep.subr.bf16.mxu0 %v5141_v27  ;;  %6365 = vpow2.f32 %v5024_v36  ;;  %v5134_v7 = vpack.c.bf16 %v10301_v46, %v10294_v13  ;;  %v5132_v42 = vpack.c.bf16 %v11409_v1, %v10282_v61  ;;  %v5160_v27 = vpack.c.bf16 %v10509_v5, %v10501_v17 }
 0xc08   : > { %v5086_v41 = vadd.f32 %v10509_v5, %v5085_v9  ;;  %v5108_v37 = vadd.f32 %v10472_v19, %v5107_v24  ;;  %v10537_v19 = vpop.eup %6347  ;;  %6367 = vpow2.f32 %v5028_v30  ;;  %v5133_v9 = vpack.c.bf16 %v10419_v38, %v10416_v32 }
 0xc09   : > { %v10540_v2 = vpop.eup %6349  ;;  %6369 = vpow2.f32 %v5044_v39  ;;  %v11411_v17 = vpack.c.bf16 %v10385_v11, %v10380_v63  ;;  %v11415_v39 = vld [vmem:[#allocation49_spill] sm:$0xff]  ;;  %v1795_v11 = vpop.permute.xlu1 %1794 }
 0xc0a   : > { %v5087_v25 = vadd.f32 %v10512_v52, %v5086_v41  ;;  %v5109_v33 = vadd.f32 %v10476_v8, %v5108_v37  ;;  %5171 = vmatpush1.bf16.msra.mxu0 %v5140_v35  ;;  %6371 = vpow2.f32 %v5048_v26  ;;  %v6352_v31 = vpop.eup %6351  ;;  %v5162_v41 = vpack.c.bf16 %v6346_v50, %v10512_v52  ;;  %v1790_v35 = vpop.permute.xlu0 %1789 }
 0xc0b   : > { %5172 = vmatprep.subr.bf16.mxu0 %v5139_v34  ;;  %6373 = vpow2.f32 %v5032_v62  ;;  %v6354_v44 = vpop.eup %6353  ;;  %v11410_v52 = vpack.c.bf16 %v10396_v6, %v10391_v57  ;;  %v11414_v6 = vld [vmem:[#allocation78_spill] sm:$0xff]  ;;  %v5149_v63 = vpack.c.bf16 %v10540_v2, %v10537_v19 }
 0xc0c   : > { %v10532_v56 = vadd.f32 %v6346_v50, %v5087_v25  ;;  %v5110_v47 = vadd.f32 %v10537_v19, %v5109_v33  ;;  %v5151_v57 = vpack.c.bf16 %v6354_v44, %v6352_v31  ;;  %v5150_v26 = vpack.c.bf16 %v11415_v39, %v11414_v6  ;;  %v11416_v33 = vld [vmem:[#allocation55_spill] sm:$0xff]  ;;  %v11418_v34 = vld [vmem:[#allocation38_spill] sm:$0xff]  ;;  %v11433_v6 = vld [vmem:[#allocation68_spill] sm:$0xff] }
 0xc0d   : > { %v11424_v19 = vld [vmem:[#allocation31_spill] sm:$0xff] }
 0xc0e   : > { %v5111_v55 = vadd.f32 %v10540_v2, %v5110_v47  ;;  %5173 = vmatpush1.bf16.msra.mxu0 %v5138_v22  ;;  %v11419_v47 = vld [vmem:[#allocation42_spill] sm:$0xff]  ;;  %v2258_v2 = vadd.f32 %v11424_v19, %v1795_v11 }
 0xc0f   : > { %5174 = vmatprep.subr.bf16.mxu0 %v5137_v60  ;;  %v6356_v43 = vpop.eup %6355  ;;  %v11421_v60 = vld [vmem:[#allocation37_spill] sm:$0xff] }
 0xc10   : > { %v5112_v8 = vadd.f32 %v6352_v31, %v5111_v55  ;;  %v6358_v53 = vpop.eup %6357  ;;  %v11420_v55 = vld [vmem:[#allocation11_spill] sm:$0xff] }
 0xc11   : > { %v6360_v49 = vpop.eup %6359  ;;  %v5153_v5 = vpack.c.bf16 %v6358_v53, %v6356_v43  ;;  %v11422_v31 = vpack.c.bf16 %v11420_v55, %v11421_v60  ;;  %v11447_v55 = vld [vmem:[#allocation48_spill] sm:$0xff] }
 0xc12   : > { %v5113_v20 = vadd.f32 %v6354_v44, %v5112_v8  ;;  %5175 = vmatpush1.bf16.msra.mxu0 %v5136_v10  ;;  %v6362_v3 = vpop.eup %6361  ;;  %v11423_v8 = vld [vmem:[#allocation59_spill] sm:$0xff]  ;;  %v11448_v60 = vld [vmem:[#allocation44_spill] sm:$0xff] }
 0xc13   : > { %5176 = vmatprep.subr.bf16.mxu0 %v5135_v40  ;;  %v6364_v59 = vpop.eup %6363  ;;  %v2254_v44 = vadd.f32 %v11423_v8, %v1790_v35  ;;  %v5089_v40 = vrot.slane %v10532_v56, 4  ;;  %v11450_v8 = vld [vmem:[#allocation33_spill] sm:$0xff] }
 0xc14   : > { %v5114_v58 = vadd.f32 %v6356_v43, %v5113_v20  ;;  %v6366_v18 = vpop.eup %6365  ;;  %v5163_v15 = vpack.c.bf16 %v6364_v59, %v6362_v3  ;;  %v11425_v20 = vmov 0  }
 0xc15   : > { %v6368_v48 = vpop.eup %6367  ;;  %v5155_v50 = vpack.c.bf16 %v6366_v18, %v6360_v49  ;;  %v4517_v10 = vpack.c.bf16 %v2258_v2, %v2254_v44  ;;  %v11451_v44 = vld [vmem:[#allocation8_spill] sm:$0xff]  ;;  %v11453_v2 = vld [vmem:[#allocation15_spill] sm:$0xff] }
 0xc16   : > { %v5115_v28 = vadd.f32 %v6358_v53, %v5114_v58  ;;  %5177 = vmatpush1.bf16.msra.mxu0 %v5134_v7  ;;  %v6370_v21 = vpop.eup %6369  ;;  %v5090_v53 = vadd.f32 %v5089_v40, %v10532_v56  ;;  %v11452_v19 = vpack.c.bf16 %v11450_v8, %v11451_v44 }
 0xc17   : > { %5178 = vmatprep.subr.bf16.mxu0 %v5133_v9  ;;  %v6372_v29 = vpop.eup %6371 }
 0xc18   : > { %v5116_v0 = vadd.f32 %v6360_v49, %v5115_v28  ;;  %v6374_v46 = vpop.eup %6373  ;;  %v5161_v38 = vpack.c.bf16 %v6372_v29, %v6370_v21  ;;  %v5091_v49 = vrot.slane %v5090_v53, 2 }
 0xc19   : > { %v5157_v30 = vpack.c.bf16 %v6374_v46, %v6368_v48 }
 0xc1a   : > { %v5117_v51 = vadd.f32 %v6366_v18, %v5116_v0  ;;  %5179 = vmatpush1.bf16.msra.mxu0 %v5132_v42 }
 0xc1b   : > { %5180 = vmatprep.subr.bf16.mxu0 %v5163_v15 }
 0xc1c   : > { %v5118_v13 = vadd.f32 %v6368_v48, %v5117_v51 }
 0xc1e   : > { %v5119_v32 = vadd.f32 %v6374_v46, %v5118_v13  ;;  %5181 = vmatpush2.bf16.msra.mxu0 %v5162_v41 }
 0xc1f   : > { %5182 = vmatprep.subr.bf16.mxu0 %v5161_v38 }
 0xc20   : > { %v5120_v24 = vadd.f32 %v10518_v54, %v5119_v32  ;;  %v11412_v54 = vpack.c.bf16 %v10374_v12, %v10369_v45  ;;  %v2256_v45 = vadd.f32 %v11416_v33, %v1790_v35  ;;  %v11417_v12 = vld [vmem:[#allocation57_spill] sm:$0xff]  ;;  %v11436_v35 = vld [vmem:[#allocation66_spill] sm:$0xff] }
 0xc21   : > { %v5148_v62 = vpack.c.bf16 %v11418_v34, %v11417_v12  ;;  %v11439_v33 = vld [vmem:[#allocation13_spill] sm:$0xff]  ;;  %v11441_v12 = vld [vmem:[#allocation56_spill] sm:$0xff]  ;;  %v11442_v34 = vld [vmem:[#allocation54_spill] sm:$0xff] }
 0xc22   : > { %v5121_v61 = vadd.f32 %v10522_v14, %v5120_v24  ;;  %5183 = vmatpush2.bf16.msra.mxu0 %v5160_v27  ;;  %v11413_v14 = vld [vmem:[#allocation52_spill] sm:$0xff] }
 0xc23   : > { %5184 = vmatprep.subr.bf16.mxu0 %v5159_v16  ;;  %v5152_v16 = vpack.c.bf16 %v11413_v14, %v10432_v23  ;;  %v2260_v23 = vadd.f32 %v11419_v47, %v1795_v11  ;;  %v11430_v14 = vld [vmem:[#allocation65_spill] sm:$0xff]  ;;  %v11438_v11 = vld [vmem:[#allocation14_spill] sm:$0xff]  ;;  %v11444_v47 = vld [vmem:[#allocation51_spill] sm:$0xff] }
 0xc24   : > { %v5122_v4 = vadd.f32 %v6370_v21, %v5121_v61 }
 0xc25   : > { %v4518_v22 = vpack.c.bf16 %v2260_v23, %v2256_v45  ;;  %v11440_v45 = vpack.c.bf16 %v11438_v11, %v11439_v33  ;;  %v11445_v23 = vld [vmem:[#allocation46_spill] sm:$0xff]  ;;  %v6403_v11 = vld [vmem:[%s6494_s14 + $0x40] sm:$0xff] }
 0xc26   : > { %v5123_v36 = vadd.f32 %v6372_v29, %v5122_v4  ;;  %5185 = vmatpush2.bf16.msra.mxu0 %v11410_v52 }
 0xc27   : > { %5186 = vmatprep.subr.bf16.mxu0 %v5157_v30 }
 0xc28   : > { %v5124_v25 = vadd.f32 %v6362_v3, %v5123_v36  ;;  %v5092_v3 = vadd.f32 %v5091_v49, %v5090_v53  ;;  %v11457_v53 = vld [vmem:[#allocation34_spill] sm:$0xff]  ;;  %v5845_v49 = vld [vmem:[%s10692_s7] sm:$0xff]  }
 0xc2a   : > { %v5125_v37 = vadd.f32 %v6364_v59, %v5124_v25  ;;  %5187 = vmatpush2.bf16.msra.mxu0 %v11411_v17  ;;  %v5093_v9 = vrot.slane %v5092_v3, 1  ;;  %v11427_v17 = vld [vmem:[#allocation67_spill] sm:$0xff] }
 0xc2b   : > { %5188 = vmatprep.subr.bf16.mxu0 %v5155_v50  ;;  %v11426_v50 = vld [vmem:[#allocation85_spill] sm:$0xff] }
 0xc2c   : > { %v5126_v43 = vrot.slane %v5125_v37, 4  ;;  %v5094_v18 = vadd.f32 %v5093_v9, %v5092_v3  ;;  %v11460_v3 = vld [vmem:[#allocation16_spill] sm:$0xff] }
 0xc2d   : > { %v5846_v9 = vld [vmem:[%s10692_s7 + $0x8] sm:$0xff]  }
 0xc2e   : > { %5189 = vmatpush2.bf16.msra.mxu0 %v11412_v54  ;;  %v5127_v58 = vadd.f32 %v5126_v43, %v5125_v37  ;;  %6375 = vrcp.f32 %v5094_v18  ;;  %v11429_v54 = vld [vmem:[#allocation83_spill] sm:$0xff]  ;;  %v11456_v43 = vld [vmem:[#allocation9_spill] sm:$0xff]  ;;  %v5848_v18 = vld [vmem:[%s10692_s7 + $0x18] sm:$0xff]  }
 0xc2f   : > { %5190 = vmatprep.subr.bf16.mxu0 %v5153_v5  ;;  %v11428_v5 = vpack.c.bf16 %v11426_v50, %v11427_v17 }
 0xc30   : > { %v5128_v7 = vrot.slane %v5127_v58, 2 }
 0xc32   : > { %5191 = vmatpush2.bf16.msra.mxu0 %v5152_v16  ;;  %v5129_v28 = vadd.f32 %v5128_v7, %v5127_v58  ;;  %v11431_v16 = vpack.c.bf16 %v11429_v54, %v11430_v14  ;;  %v11458_v58 = vpack.c.bf16 %v11456_v43, %v11457_v53  ;;  %v11459_v7 = vld [vmem:[#allocation36_spill] sm:$0xff]  ;;  %v6401_v54 = vld [vmem:[%s6494_s14 + $0x30] sm:$0xff]  ;;  %v6407_v43 = vld [vmem:[%s6494_s14 + $0x60] sm:$0xff] }
 0xc33   : > { %5192 = vmatprep.subr.bf16.mxu0 %v5151_v57  ;;  %v11432_v57 = vld [vmem:[#allocation72_spill] sm:$0xff] }
 0xc34   : > { %v5130_v59 = vrot.slane %v5129_v28, 1  ;;  %v11434_v39 = vpack.c.bf16 %v11432_v57, %v11433_v6 }
 0xc36   : > { %5193 = vmatpush2.bf16.msra.mxu0 %v5150_v26  ;;  %v5131_v0 = vadd.f32 %v5130_v59, %v5129_v28  ;;  %v11435_v26 = vld [vmem:[#allocation70_spill] sm:$0xff]  ;;  %v11461_v28 = vpack.c.bf16 %v11459_v7, %v11460_v3  ;;  %v5847_v59 = vld [vmem:[%s10692_s7 + $0x10] sm:$0xff]   ;;  %v6408_v3 = vld [vmem:[%s6494_s14 + $0x68] sm:$0xff] }
 0xc37   : > { %5194 = vmatprep.subr.bf16.mxu0 %v5149_v63  ;;  %v11437_v63 = vpack.c.bf16 %v11435_v26, %v11436_v35 }
 0xc38   : > { %6377 = vrcp.f32 %v5131_v0  ;;  %v5467_v0 = vpop.permute.xlu0 %5466 }
 0xc3a   : > { %5195 = vmatpush2.bf16.msra.mxu0 %v5148_v62  ;;  %v11443_v62 = vpack.c.bf16 %v11441_v12, %v11442_v34 }
 0xc3b   : > { %v6376_v13 = vpop.eup %6375 }
 0xc3d   : > { %5197 = vmatmul.mubr.bf16.vlgmr.msra.gmra.mxu0 %v11422_v31  ;;  %v11449_v31 = vpack.c.bf16 %v11447_v55, %v11448_v60  ;;  %v6405_v55 = vld [vmem:[%s6494_s14 + $0x50] sm:$0xff] }
 0xc3e   : > { %5206 = vmatprep.mubr.bf16.mxu0 %v4518_v22  ;;  %v11446_v22 = vpack.c.bf16 %v11444_v47, %v11445_v23 }
 0xc45   : > { %5207 = vmatmul.mubr.bf16.gmra.mxu0 %v4517_v10  ;;  %v6378_v56 = vpop.eup %6377  ;;  %v11454_v10 = vld [vmem:[#allocation32_spill] sm:$0xff] }
 0xc46   : > { %5415 = vmatprep.mubr.bf16.mxu0 %v11425_v20  ;;  %v11455_v40 = vpack.c.bf16 %v11453_v2, %v11454_v10 }
 0xcfd   : > { %v5198_v48 = vpop.f32.mrf.mxu0 }
 0xcfe   : > { %v5219_v25 = vmul.f32 %v6376_v13, %v5198_v48  ;;  %v6395_v48 = vld [vmem:[%s6494_s14] sm:$0xff] }
 0xcff   : > { %v5200_v1 = vpop.f32.mrf.mxu0 }
 0xd00   : > { %v5220_v61 = vmul.f32 %v6378_v56, %v5200_v1  ;;  %v5504_v1 = vadd.f32 %v6395_v48, %v5467_v0 }
 0xd01   : > { %v5202_v42 = vpop.f32.mrf.mxu0 }
 0xd02   : > { %v5221_v36 = vmul.f32 %v6376_v13, %v5202_v42  ;;  %v5472_v42 = vpop.permute.xlu1 %5471 }
 0xd03   : > { %v5204_v21 = vpop.f32.mrf.mxu0 }
 0xd04   : > { %v5222_v32 = vmul.f32 %v6378_v56, %v5204_v21  ;;  %v5798_v37 = vpack.c.bf16 %v5221_v36, %v5219_v25 }
 0xd05   : > { %v5208_v51 = vpop.f32.mrf.mxu0 }
 0xd06   : > { %v5223_v27 = vmul.f32 %v6376_v13, %v5208_v51  ;;  %v5799_v52 = vpack.c.bf16 %v5222_v32, %v5220_v61 }
 0xd07   : > { %v5210_v15 = vpop.f32.mrf.mxu0 }
 0xd08   : > { %v5224_v38 = vmul.f32 %v6378_v56, %v5210_v15 }
 0xd09   : > { %v5212_v29 = vpop.f32.mrf.mxu0 }
 0xd0a   : > { %v5225_v46 = vmul.f32 %v6376_v13, %v5212_v29  ;;  %v6397_v13 = vld [vmem:[%s6494_s14 + $0x10] sm:$0xff] }
 0xd0b   : > { %v5214_v41 = vpop.f32.mrf.mxu0 }
 0xd0c   : > { %v5226_v24 = vmul.f32 %v6378_v56, %v5214_v41  ;;  %v5800_v30 = vpack.c.bf16 %v5225_v46, %v5223_v27  ;;  %v5506_v56 = vadd.f32 %v6397_v13, %v5472_v42  ;;  %v5477_v41 = vpop.permute.xlu0 %5476 }
 0xd0e   : > { %v5801_v4 = vpack.c.bf16 %v5226_v24, %v5224_v38  ;;  %v6398_v38 = vld [vmem:[%s6494_s14 + $0x18] sm:$0xff] }
 0xd0f   : > { %v5507_v24 = vadd.f32 %v6398_v38, %v5472_v42  ;;  %v6410_v42 = vld [vmem:[%s6494_s14 + $0x78] sm:$0xff] }
 0xd10   : > { %5383 = vmatprep.subr.bf16.mxu0 %v5801_v4  ;;  %v6399_v4 = vld [vmem:[%s6494_s14 + $0x20] sm:$0xff]  ;;  %v5487_v57 = vpop.permute.xlu0 %5486 }
 0xd11   : > { %5384 = vmatpush1.bf16.msra.mxu0 %v5800_v30  ;;  %v5508_v36 = vadd.f32 %v6399_v4, %v5477_v41  ;;  %v5512_v33 = vadd.f32 %v6403_v11, %v5487_v57 }
 0xd12   : > { %5385 = vmatprep.subr.bf16.mxu0 %v5799_v52  ;;  %v5482_v52 = vpop.permute.xlu1 %5481 }
 0xd13   : > { %v5510_v14 = vadd.f32 %v6401_v54, %v5482_v52 }
 0xd14   : > { %v5497_v8 = vpop.permute.xlu0 %5496 }
 0xd15   : > { %5386 = vmatpush1.bf16.msra.mxu0 %v5798_v37  ;;  %v6400_v37 = vld [vmem:[%s6494_s14 + $0x28] sm:$0xff]  ;;  %v5516_v53 = vadd.f32 %v6407_v43, %v5497_v8 }
 0xd16   : > { %5387 = vmatprep.subr.bf16.mxu0 %v11428_v5  ;;  %v5509_v50 = vadd.f32 %v6400_v37, %v5477_v41  ;;  %v5492_v12 = vpop.permute.xlu1 %5491 }
 0xd17   : > { %v5514_v60 = vadd.f32 %v6405_v55, %v5492_v12 }
 0xd19   : > { %5388 = vmatpush1.bf16.msra.mxu0 %v11431_v16 }
 0xd1a   : > { %5389 = vmatprep.subr.bf16.mxu0 %v11434_v39  ;;  %v6402_v39 = vld [vmem:[%s6494_s14 + $0x38] sm:$0xff] }
 0xd1b   : > { %v5511_v26 = vadd.f32 %v6402_v39, %v5482_v52 }
 0xd1d   : > { %5390 = vmatpush1.bf16.msra.mxu0 %v11437_v63 }
 0xd1e   : > { %5391 = vmatprep.subr.bf16.mxu0 %v11440_v45 }
 0xd21   : > { %5392 = vmatpush1.bf16.msra.mxu0 %v11443_v62  ;;  %v6404_v62 = vld [vmem:[%s6494_s14 + $0x48] sm:$0xff] }
 0xd22   : > { %5393 = vmatprep.subr.bf16.mxu0 %v11446_v22  ;;  %v5513_v47 = vadd.f32 %v6404_v62, %v5487_v57 }
 0xd25   : > { %5394 = vmatpush1.bf16.msra.mxu0 %v11449_v31 }
 0xd26   : > { %5395 = vmatprep.subr.bf16.mxu0 %v11452_v19  ;;  %v6406_v19 = vld [vmem:[%s6494_s14 + $0x58] sm:$0xff] }
 0xd27   : > { %v5515_v2 = vadd.f32 %v6406_v19, %v5492_v12 }
 0xd29   : > { %5396 = vmatpush1.bf16.msra.mxu0 %v11455_v40 }
 0xd2a   : > { %5397 = vmatprep.subr.bf16.mxu0 %v11458_v58 }
 0xd2d   : > { %5398 = vmatpush1.bf16.msra.mxu0 %v11461_v28  ;;  %v5517_v28 = vadd.f32 %v6408_v3, %v5497_v8 }
 0xd30   : > { %5416 = vmatmul.mubr.bf16.vlgmr.msra.gmra.mxu0 %v5845_v49  ;;  %v5502_v49 = vpop.permute.xlu1 %5501 }
 0xd31   : > { %5425 = vmatprep.mubr.bf16.mxu0 %v11425_v20 }
 0xd38   : > { %5426 = vmatmul.mubr.bf16.gmra.mxu0 %v5846_v9 }
 0xd39   : > { %5435 = vmatprep.mubr.bf16.mxu0 %v11425_v20 }
 0xd40   : > { %5436 = vmatmul.mubr.bf16.gmra.mxu0 %v5847_v59 }
 0xd41   : > { %5445 = vmatprep.mubr.bf16.mxu0 %v11425_v20  ;;  %v6396_v20 = vld [vmem:[%s6494_s14 + $0x8] sm:$0xff] }
 0xd42   : > { %v5505_v51 = vadd.f32 %v6396_v20, %v5467_v0 }
 0xd48   : > { %5446 = vmatmul.mubr.bf16.gmra.mxu0 %v5848_v18  ;;  %v6409_v18 = vld [vmem:[%s6494_s14 + $0x70] sm:$0xff] }
 0xd49   : > { %v5518_v0 = vadd.f32 %v6409_v18, %v5502_v49 }
 0xdf0   : > { %v5417_v21 = vpop.f32.mrf.mxu0 }
 0xdf1   : > { %v5520_v15 = vadd.f32 %v5504_v1, %v5417_v21  ;;  %v5519_v21 = vadd.f32 %v6410_v42, %v5502_v49 }
 0xdf2   : > { %v5419_v29 = vpop.f32.mrf.mxu0 }
 0xdf3   : > { %5536 = vst [vmem:[%s10649_s21] sm:$0xff] %v5520_v15  ;;  %v5521_v46 = vadd.f32 %v5505_v51, %v5419_v29 }
 0xdf4   : > { %v5421_v32 = vpop.f32.mrf.mxu0 }
 0xdf5   : > { %5537 = vst [vmem:[%s10649_s21 + $0x8] sm:$0xff] %v5521_v46  ;;  %v5522_v27 = vadd.f32 %v5506_v56, %v5421_v32 }
 0xdf6   : > { %v5423_v61 = vpop.f32.mrf.mxu0 }
 0xdf7   : > { %5538 = vst [vmem:[%s10649_s21 + $0x10] sm:$0xff] %v5522_v27  ;;  %v5523_v30 = vadd.f32 %v5507_v24, %v5423_v61 }
 0xdf8   : > { %v5427_v25 = vpop.f32.mrf.mxu0 }
 0xdf9   : > { %5539 = vst [vmem:[%s10649_s21 + $0x18] sm:$0xff] %v5523_v30  ;;  %v5524_v17 = vadd.f32 %v5508_v36, %v5427_v25 }
 0xdfa   : > { %v5429_v5 = vpop.f32.mrf.mxu0 }
 0xdfb   : > { %5540 = vst [vmem:[%s10649_s21 + $0x20] sm:$0xff] %v5524_v17  ;;  %v5525_v16 = vadd.f32 %v5509_v50, %v5429_v5 }
 0xdfc   : > { %v5431_v6 = vpop.f32.mrf.mxu0 }
 0xdfd   : > { %5541 = vst [vmem:[%s10649_s21 + $0x28] sm:$0xff] %v5525_v16  ;;  %v5526_v35 = vadd.f32 %v5510_v14, %v5431_v6 }
 0xdfe   : > { %v5433_v63 = vpop.f32.mrf.mxu0 }
 0xdff   : > { %5542 = vst [vmem:[%s10649_s21 + $0x30] sm:$0xff] %v5526_v35  ;;  %v5527_v45 = vadd.f32 %v5511_v26, %v5433_v63 }
 0xe00   : > { %v5437_v34 = vpop.f32.mrf.mxu0 }
 0xe01   : > { %5543 = vst [vmem:[%s10649_s21 + $0x38] sm:$0xff] %v5527_v45  ;;  %v5528_v23 = vadd.f32 %v5512_v33, %v5437_v34 }
 0xe02   : > { %v5439_v22 = vpop.f32.mrf.mxu0 }
 0xe03   : > { %5544 = vst [vmem:[%s10649_s21 + $0x40] sm:$0xff] %v5528_v23  ;;  %v5529_v31 = vadd.f32 %v5513_v47, %v5439_v22 }
 0xe04   : > { %v5441_v44 = vpop.f32.mrf.mxu0 }
 0xe05   : > { %5545 = vst [vmem:[%s10649_s21 + $0x48] sm:$0xff] %v5529_v31  ;;  %v5530_v10 = vadd.f32 %v5514_v60, %v5441_v44 }
 0xe06   : > { %v5443_v40 = vpop.f32.mrf.mxu0 }
 0xe07   : > { %5546 = vst [vmem:[%s10649_s21 + $0x50] sm:$0xff] %v5530_v10  ;;  %v5531_v58 = vadd.f32 %v5515_v2, %v5443_v40 }
 0xe08   : > { %v5447_v7 = vpop.f32.mrf.mxu0 }
 0xe09   : > { %5547 = vst [vmem:[%s10649_s21 + $0x58] sm:$0xff] %v5531_v58  ;;  %v5532_v9 = vadd.f32 %v5516_v53, %v5447_v7 }
 0xe0a   : > { %v5449_v59 = vpop.f32.mrf.mxu0 }
 0xe0b   : > { %5548 = vst [vmem:[%s10649_s21 + $0x60] sm:$0xff] %v5532_v9  ;;  %v5533_v48 = vadd.f32 %v5517_v28, %v5449_v59 }
 0xe0c   : > { %v5451_v1 = vpop.f32.mrf.mxu0 }
 0xe0d   : > { %5549 = vst [vmem:[%s10649_s21 + $0x68] sm:$0xff] %v5533_v48  ;;  %v5534_v20 = vadd.f32 %v5518_v0, %v5451_v1 }
 0xe0e   : > { %v5453_v51 = vpop.f32.mrf.mxu0 }
 0xe0f   : > { %5550 = vst [vmem:[%s10649_s21 + $0x70] sm:$0xff] %v5534_v20  ;;  %v5535_v15 = vadd.f32 %v5519_v21, %v5453_v51 }
 0xe11   : > { %5551 = vst [vmem:[%s10649_s21 + $0x78] sm:$0xff] %v5535_v15 }
 0xe12 PF: > { %s19_s30 = sadd.s32 1, %s6417_s30  }
 0xe13   : > { %p16_p4 = scmp.ge.s32.totalorder %s19_s30, 4  }
 0xe15   :  { %18 = sbr.rel (!%p16_p4) target bundleno = 1 (0x1), region = 86 }

</bundles_post_ra>
